<compile_context>
chip_gen: v6e
topology: v6e:2x2x1
jax: 0.10.0
libtpu: 0.0.40
codegen_flags: <defaults>
</compile_context>

<pallas_src>
import math
from functools import partial

import jax
import jax.numpy as jnp
from jax.experimental import pallas as pl
from jax.experimental.pallas import tpu as pltpu

# ----------------------------- model config (small) -----------------------------
VOL = 16          # volume_size
PATCH = 4         # patch_size
IN_CHANS = 3
EMBED_DIM = 32
DEPTH = 2
NUM_HEADS = 4
DEC_DIM = 16
DEC_DEPTH = 1
DEC_HEADS = 4
MLP_RATIO = 4.0
NUM_PATCHES = (VOL // PATCH) ** 3          # 64
PATCH_DIM = PATCH ** 3 * IN_CHANS          # 192
PD_PAD = 256                               # decoder_pred lane-padded width (2 full lane tiles)
LN_EPS = 1e-5                              # torch.nn.LayerNorm default

_VMEM = pl.BlockSpec(memory_space=pltpu.MemorySpace.VMEM)
_SMEM = pl.BlockSpec(memory_space=pltpu.MemorySpace.SMEM)


def _ceil_mult(n, m):
    return ((n + m - 1) // m) * m


def _pad_axis(x, axis, target):
    pad = target - x.shape[axis]
    if pad == 0:
        return x
    cfg = [(0, 0)] * x.ndim
    cfg[axis] = (0, pad)
    return jnp.pad(x, cfg)


# ============================== in-kernel helpers ================================
def _mm(a, b):
    """A @ B with bf16 operands, f32 accumulation (native MXU path)."""
    return jax.lax.dot_general(
        a.astype(jnp.bfloat16), b.astype(jnp.bfloat16),
        (((1,), (0,)), ((), ())), preferred_element_type=jnp.float32)


def _mm_nt(a, b):
    """A @ B.T with bf16 operands, f32 accumulation."""
    return jax.lax.dot_general(
        a.astype(jnp.bfloat16), b.astype(jnp.bfloat16),
        (((1,), (1,)), ((), ())), preferred_element_type=jnp.float32)


def _ln(x, g, b, eps):
    """Row-wise LayerNorm (biased variance), matches torch.nn.LayerNorm."""
    mu = jnp.mean(x, axis=-1, keepdims=True)
    xc = x - mu
    var = jnp.mean(xc * xc, axis=-1, keepdims=True)
    return xc * jax.lax.rsqrt(var + eps) * g + b


def _erf(x):
    # Abramowitz & Stegun 7.1.26 polynomial; exp + reciprocal ride the EUP slot.
    p = 0.3275911
    a1, a2, a3, a4, a5 = 0.254829592, -0.284496736, 1.421413741, -1.453152027, 1.061405429
    ax = jnp.abs(x)
    t = pl.reciprocal(1.0 + p * ax, approx=True)
    poly = ((((a5 * t + a4) * t + a3) * t + a2) * t + a1) * t
    y = 1.0 - poly * jnp.exp(-(ax * ax))
    return jnp.where(x >= 0, y, -y)


def _gelu_exact(x):
    return 0.5 * x * (1.0 + _erf(x * 0.7071067811865476))


# ================================ Pallas kernels =================================
def _patch_embed_kernel(x_ref, w_ref, b_ref, pos_ref, o_ref):
    # fused: patch linear projection + bias + positional-embedding add
    y = _mm(x_ref[...], w_ref[...]) + b_ref[...] + pos_ref[...]
    o_ref[...] = y.astype(o_ref.dtype)


def pallas_patch_embed(patches, w, b, pos):
    """patches: (M, Pd), w: (Pd, E) bf16, b: (E,), pos: (M, E) -> (M, E)."""
    M = patches.shape[0]
    E = w.shape[1]
    return pl.pallas_call(
        _patch_embed_kernel,
        out_shape=jax.ShapeDtypeStruct((M, E), jnp.float32),
        in_specs=[_VMEM] * 4,
        out_specs=_VMEM,
    )(patches, w, b.reshape(1, E), pos)


def _block_stack_kernel(x_ref, g1_ref, b1_ref, wqkv_ref, bqkv_ref, wo_ref, bo_ref,
                        g2_ref, b2_ref, w1_ref, b1m_ref, w2_ref, b2m_ref,
                        o_ref, xs_ref, *, num_heads, eps, s_valid):
    """grid = (batch, layer).  One full timm Block per grid step; the activation
    lives in the VMEM scratch xs_ref across the (arbitrary) layer axis."""
    layer = pl.program_id(1)

    @pl.when(layer == 0)
    def _():
        xs_ref[...] = x_ref[0]

    x = xs_ref[...]                                  # (S, D) f32, layer-resident
    S, D = x.shape
    dh = wqkv_ref.shape[-1]
    scale = dh ** -0.5

    # static key-padding bias (additive -inf on padded key columns), hoisted
    if s_valid < S:
        col = jax.lax.broadcasted_iota(jnp.int32, (S, S), 1)
        key_bias = jnp.where(col < s_valid, 0.0, -1e30).astype(jnp.float32)
    else:
        key_bias = None

    # ------------------------------ attention ------------------------------
    h = _ln(x, g1_ref[0], b1_ref[0], eps)
    h16 = h.astype(jnp.bfloat16)                     # cast once, reused by all heads
    attn = None
    for hd in range(num_heads):                      # per-head weights: free ref offsets
        q = _mm(h16, wqkv_ref[0, 0, hd]) + bqkv_ref[0, 0, hd]   # (S, dh)
        k = _mm(h16, wqkv_ref[0, 1, hd]) + bqkv_ref[0, 1, hd]
        v = _mm(h16, wqkv_ref[0, 2, hd]) + bqkv_ref[0, 2, hd]
        s = _mm_nt(q * scale, k)                                # (S, S)
        if key_bias is not None:
            s = s + key_bias
        s = s - jnp.max(s, axis=-1, keepdims=True)
        p = jnp.exp(s)                                          # un-normalized
        inv_l = pl.reciprocal(jnp.sum(p, axis=-1, keepdims=True), approx=True)
        o_h = _mm(p, v) * inv_l                                 # normalize after PV
        contrib = _mm(o_h, wo_ref[0, hd])                       # (S, D)
        attn = contrib if attn is None else attn + contrib
    x1 = x + attn + bo_ref[0]

    # -------------------------------- MLP ----------------------------------
    h2 = _ln(x1, g2_ref[0], b2_ref[0], eps)
    h2 = _mm(h2, w1_ref[0]) + b1m_ref[0]
    h2 = _gelu_exact(h2)
    h2 = _mm(h2, w2_ref[0]) + b2m_ref[0]
    xn = x1 + h2
    xs_ref[...] = xn

    @pl.when(layer == pl.num_programs(1) - 1)
    def _():
        o_ref[0] = xn.astype(o_ref.dtype)


def pallas_block_stack(x, blk, num_heads, s_valid, eps=LN_EPS):
    """x: (B, S, D) padded; blk: per-layer-stacked weight dict."""
    B, S, D = x.shape
    depth = blk["wqkv"].shape[0]

    def wspec(arr):
        nd = arr.ndim
        return pl.BlockSpec((1,) + arr.shape[1:],
                            lambda b, l, _nd=nd: (l,) + (0,) * (_nd - 1))

    order = ("ln1_g", "ln1_b", "wqkv", "bqkv", "wo", "bo",
             "ln2_g", "ln2_b", "fc1_w", "fc1_b", "fc2_w", "fc2_b")
    return pl.pallas_call(
        partial(_block_stack_kernel, num_heads=num_heads, eps=eps, s_valid=s_valid),
        out_shape=jax.ShapeDtypeStruct((B, S, D), jnp.float32),
        grid=(B, depth),
        in_specs=[pl.BlockSpec((1, S, D), lambda b, l: (b, 0, 0))]
                 + [wspec(blk[k]) for k in order],
        out_specs=pl.BlockSpec((1, S, D), lambda b, l: (b, 0, 0)),
        scratch_shapes=[pltpu.VMEM((S, D), jnp.float32)],
        compiler_params=pltpu.CompilerParams(
            dimension_semantics=("parallel", "arbitrary")),
    )(x, *[blk[k] for k in order])


def _ln_linear_kernel(x_ref, g_ref, bln_ref, w_ref, b_ref, o_ref, *, eps):
    h = _ln(x_ref[...], g_ref[...], bln_ref[...], eps)
    o_ref[...] = (_mm(h, w_ref[...]) + b_ref[...]).astype(o_ref.dtype)


def pallas_ln_linear(x, g, bln, w, b, eps=LN_EPS):
    """LayerNorm(x) @ w + b, x: (M, K) -> (M, N).  w is bf16."""
    M, K = x.shape
    N = w.shape[1]
    return pl.pallas_call(
        partial(_ln_linear_kernel, eps=eps),
        out_shape=jax.ShapeDtypeStruct((M, N), jnp.float32),
        in_specs=[_VMEM] * 5,
        out_specs=_VMEM,
    )(x, g.reshape(1, K), bln.reshape(1, K), w, b.reshape(1, N))


def _dec_head_loss_kernel(x_ref, g_ref, bln_ref, w_ref, b_ref, tgt_ref, mask_ref,
                          pred_ref, num_ref, *, eps, inv_pd):
    """decoder_norm -> decoder_pred (lane-padded to 256) -> masked MSE numerator."""
    h = _ln(x_ref[...], g_ref[...], bln_ref[...], eps)
    y = _mm(h, w_ref[...]) + b_ref[...]                     # (M, 256) lane-dense
    pred_ref[...] = y.astype(pred_ref.dtype)
    d = y - tgt_ref[...]                                    # padded cols/rows diff == 0
    mse = jnp.sum(d * d, axis=-1, keepdims=True) * inv_pd   # mean over true 192 cols
    num_ref[0, 0] = jnp.sum(mse * mask_ref[...])


def pallas_dec_head_loss(x2d, g, bln, w_pad, b_pad, tgt2d, mask2d, eps=LN_EPS):
    """x2d: (M, Dm); w_pad: (Dm, 256) bf16; tgt2d: (M, 256); mask2d: (M, 1)."""
    M, Dm = x2d.shape
    Pp = w_pad.shape[1]
    pred, num = pl.pallas_call(
        partial(_dec_head_loss_kernel, eps=eps, inv_pd=1.0 / PATCH_DIM),
        out_shape=(jax.ShapeDtypeStruct((M, Pp), jnp.float32),
                   jax.ShapeDtypeStruct((1, 1), jnp.float32)),
        in_specs=[_VMEM] * 7,
        out_specs=(_VMEM, _SMEM),
    )(x2d, g.reshape(1, Dm), bln.reshape(1, Dm), w_pad, b_pad.reshape(1, Pp),
      tgt2d, mask2d)
    return pred, num[0, 0]


# ================================== model glue ===================================
def extract_patches(vol, p, channel_last):
    """vol: (N, C, D, H, W) -> (N, L, p^3*C).
    channel_last=True  -> ordering (r,p,q,c)  == MaskedAutoencoderViT.patchify
    channel_last=False -> ordering (c,r,p,q)  == Conv3d(kernel=stride=p) flattening
    """
    N, C, D, H, W = vol.shape
    l, h, w = D // p, H // p, W // p
    x = vol.reshape(N, C, l, p, h, p, w, p)
    if channel_last:
        x = x.transpose(0, 2, 4, 6, 3, 5, 7, 1)   # n l h w r p q c
    else:
        x = x.transpose(0, 2, 4, 6, 1, 3, 5, 7)   # n l h w c r p q
    return x.reshape(N, l * h * w, -1)


def random_masking(x, mask_ratio, key):
    N, L, D = x.shape
    len_keep = int(L * (1 - mask_ratio))
    noise = jax.random.uniform(key, (N, L))
    ids_shuffle = jnp.argsort(noise, axis=1)
    ids_restore = jnp.argsort(ids_shuffle, axis=1)
    ids_keep = ids_shuffle[:, :len_keep]
    gather_idx = jnp.broadcast_to(ids_keep[:, :, None], (N, len_keep, D))
    x_masked = jnp.take_along_axis(x, gather_idx, axis=1)
    mask = jnp.ones((N, L), jnp.float32).at[:, :len_keep].set(0.0)
    mask = jnp.take_along_axis(mask, ids_restore, axis=1)
    return x_masked, mask, ids_restore


def _prep_blocks(blocks, dim, num_heads):
    """Stack per-layer weights along a leading layer axis and pre-split q/k/v and
    proj weights per head (avoids all in-kernel lane slicing).  Matmul weights bf16."""
    depth = len(blocks)
    dh = dim // num_heads
    st = lambda name: jnp.stack([b[name] for b in blocks], axis=0)
    wqkv = (st("qkv_w").reshape(depth, dim, 3, num_heads, dh)
            .transpose(0, 2, 3, 1, 4).astype(jnp.bfloat16))          # (L, 3, H, D, Dh)
    bqkv = st("qkv_b").reshape(depth, 3, num_heads, 1, dh)            # (L, 3, H, 1, Dh)
    wo = st("proj_w").reshape(depth, num_heads, dh, dim).astype(jnp.bfloat16)
    bo = st("proj_b").reshape(depth, 1, dim)
    return dict(
        ln1_g=st("ln1_g").reshape(depth, 1, dim),
        ln1_b=st("ln1_b").reshape(depth, 1, dim),
        wqkv=wqkv, bqkv=bqkv, wo=wo, bo=bo,
        ln2_g=st("ln2_g").reshape(depth, 1, dim),
        ln2_b=st("ln2_b").reshape(depth, 1, dim),
        fc1_w=st("fc1_w").astype(jnp.bfloat16),
        fc1_b=st("fc1_b").reshape(depth, 1, -1),
        fc2_w=st("fc2_w").astype(jnp.bfloat16),
        fc2_b=st("fc2_b").reshape(depth, 1, dim),
    )


def forward(params, sample, mask_key, mask_ratio=0.75, edge_map_weight=0):
    N = sample.shape[0]
    # ---------------------------------- encoder ----------------------------------
    # PatchEmbed3D == Conv3d(kernel=stride=PATCH) == patch extraction + linear.
    patches = extract_patches(sample, PATCH, channel_last=False)        # (N, L, Pd)
    L = patches.shape[1]
    pos_tok = jnp.broadcast_to(params["pos_embed"][:, 1:, :], (N, L, EMBED_DIM))
    x = pallas_patch_embed(patches.reshape(N * L, PATCH_DIM),
                           params["pe_w"].astype(jnp.bfloat16), params["pe_b"],
                           pos_tok.reshape(N * L, EMBED_DIM)).reshape(N, L, EMBED_DIM)
    x, mask, ids_restore = random_masking(x, mask_ratio, mask_key)
    len_keep = int(L * (1 - mask_ratio))
    cls = params["cls_token"] + params["pos_embed"][:, :1, :]
    x = jnp.concatenate([jnp.broadcast_to(cls, (N, 1, EMBED_DIM)), x], axis=1)
    S = x.shape[1]                                                      # 17
    S_pad = _ceil_mult(S, 8)                                            # 24
    x = _pad_axis(x, 1, S_pad)
    enc_blk = _prep_blocks(params["blocks"], EMBED_DIM, NUM_HEADS)
    x = pallas_block_stack(x, enc_blk, NUM_HEADS, s_valid=S)            # one launch, all layers
    # fused: final encoder LayerNorm + decoder_embed linear (on padded flat rows).
    x = pallas_ln_linear(x.reshape(N * S_pad, EMBED_DIM),
                         params["norm_g"], params["norm_b"],
                         params["de_w"].astype(jnp.bfloat16),
                         params["de_b"]).reshape(N, S_pad, DEC_DIM)[:, :S, :]
    # ---------------------------------- decoder ----------------------------------
    n_mask = L + 1 - S
    mask_tokens = jnp.broadcast_to(params["mask_token"], (N, n_mask, DEC_DIM))
    x_ = jnp.concatenate([x[:, 1:, :], mask_tokens], axis=1)            # (N, L, DEC_DIM)
    gather_idx = jnp.broadcast_to(ids_restore[:, :, None], (N, L, DEC_DIM))
    x_ = jnp.take_along_axis(x_, gather_idx, axis=1)
    x = jnp.concatenate([x[:, :1, :], x_], axis=1) + params["decoder_pos_embed"]
    S2 = L + 1                                                          # 65
    S2_pad = _ceil_mult(S2, 8)                                          # 72
    x = _pad_axis(x, 1, S2_pad)
    dec_blk = _prep_blocks(params["dec_blocks"], DEC_DIM, DEC_HEADS)
    x = pallas_block_stack(x, dec_blk, DEC_HEADS, s_valid=S2)
    # fused: decoder LayerNorm + decoder_pred (lane-padded) + masked MSE numerator.
    target = extract_patches(sample, PATCH, channel_last=True)          # patchify (norm_pix_loss=False)
    target_full = jnp.concatenate(
        [jnp.zeros((N, 1, PATCH_DIM), jnp.float32), target], axis=1)    # dummy cls row (masked out)
    target_full = _pad_axis(_pad_axis(target_full, 1, S2_pad), 2, PD_PAD)
    mask_full = _pad_axis(
        jnp.concatenate([jnp.zeros((N, 1), jnp.float32), mask], axis=1), 1, S2_pad)
    dp_w = jnp.pad(params["dp_w"], ((0, 0), (0, PD_PAD - PATCH_DIM))).astype(jnp.bfloat16)
    dp_b = jnp.pad(params["dp_b"], (0, PD_PAD - PATCH_DIM))
    pred_flat, num = pallas_dec_head_loss(
        x.reshape(N * S2_pad, DEC_DIM), params["dnorm_g"], params["dnorm_b"],
        dp_w, dp_b, target_full.reshape(N * S2_pad, PD_PAD),
        mask_full.reshape(N * S2_pad, 1))
    pred = pred_flat.reshape(N, S2_pad, PD_PAD)[:, 1:1 + L, :PATCH_DIM]  # drop cls & padding
    den = float(N * (L - len_keep))                                      # sum(mask) is static
    reconstruction_loss = num / den
    # TODO(synk): SobelFilter3d / perform_3d_gaussian_blur edge-map loss and the frozen
    # VGG perceptual loss are external undefined modules; returned as zeros here.
    raw_edge_map_loss = jnp.float32(0.0)
    edge_map_loss = jnp.float32(edge_map_weight) * raw_edge_map_loss
    percep_loss = jnp.float32(0.0)
    loss = edge_map_loss + reconstruction_loss + percep_loss
    return [loss, raw_edge_map_loss, reconstruction_loss, percep_loss], pred, mask


# ============================== deterministic init ===============================
def xavier(key, shape):
    fan_in, fan_out = shape
    a = math.sqrt(6.0 / (fan_in + fan_out))
    return jax.random.uniform(key, shape, jnp.float32, -a, a)


def init_block(key, dim):
    k = jax.random.split(key, 4)
    hidden = int(dim * MLP_RATIO)
    return dict(
        ln1_g=jnp.ones((dim,), jnp.float32), ln1_b=jnp.zeros((dim,), jnp.float32),
        qkv_w=xavier(k[0], (dim, 3 * dim)), qkv_b=jnp.zeros((3 * dim,), jnp.float32),
        proj_w=xavier(k[1], (dim, dim)), proj_b=jnp.zeros((dim,), jnp.float32),
        ln2_g=jnp.ones((dim,), jnp.float32), ln2_b=jnp.zeros((dim,), jnp.float32),
        fc1_w=xavier(k[2], (dim, hidden)), fc1_b=jnp.zeros((hidden,), jnp.float32),
        fc2_w=xavier(k[3], (hidden, dim)), fc2_b=jnp.zeros((dim,), jnp.float32),
    )


def init_params(key):
    keys = list(jax.random.split(key, 8 + DEPTH + DEC_DEPTH))
    kit = iter(keys)
    p = {}
    p["pe_w"] = xavier(next(kit), (PATCH_DIM, EMBED_DIM))
    p["pe_b"] = jnp.zeros((EMBED_DIM,), jnp.float32)
    p["cls_token"] = 0.02 * jax.random.normal(next(kit), (1, 1, EMBED_DIM), jnp.float32)
    # TODO(synk): get_3d_sincos_pos_embed not provided; fixed deterministic random pos-embeds instead.
    p["pos_embed"] = 0.02 * jax.random.normal(next(kit), (1, NUM_PATCHES + 1, EMBED_DIM), jnp.float32)
    p["blocks"] = [init_block(next(kit), EMBED_DIM) for _ in range(DEPTH)]
    p["norm_g"] = jnp.ones((EMBED_DIM,), jnp.float32)
    p["norm_b"] = jnp.zeros((EMBED_DIM,), jnp.float32)
    p["de_w"] = xavier(next(kit), (EMBED_DIM, DEC_DIM))
    p["de_b"] = jnp.zeros((DEC_DIM,), jnp.float32)
    p["mask_token"] = 0.02 * jax.random.normal(next(kit), (1, 1, DEC_DIM), jnp.float32)
    p["decoder_pos_embed"] = 0.02 * jax.random.normal(next(kit), (1, NUM_PATCHES + 1, DEC_DIM), jnp.float32)
    p["dec_blocks"] = [init_block(next(kit), DEC_DIM) for _ in range(DEC_DEPTH)]
    p["dnorm_g"] = jnp.ones((DEC_DIM,), jnp.float32)
    p["dnorm_b"] = jnp.zeros((DEC_DIM,), jnp.float32)
    p["dp_w"] = xavier(next(kit), (DEC_DIM, PATCH_DIM))
    p["dp_b"] = jnp.zeros((PATCH_DIM,), jnp.float32)
    return p


# ===================================== main ======================================
if __name__ == "__main__":
    key = jax.random.PRNGKey(0)
    pkey, dkey, mkey = jax.random.split(key, 3)
    params = init_params(pkey)
    sample = jax.random.normal(dkey, (2, IN_CHANS, VOL, VOL, VOL), jnp.float32)  # NCDHW

    fwd = jax.jit(partial(forward, mask_ratio=0.75, edge_map_weight=0))
    loss, pred, mask = fwd(params, sample, mkey)
    jax.block_until_ready((loss, pred, mask))

    assert pred.shape == (2, NUM_PATCHES, PATCH_DIM)
    assert mask.shape == (2, NUM_PATCHES)
    assert all(jnp.isfinite(l) for l in loss)
    print("KERNEL_OK")
</pallas_src>

<mosaic_0001>
module attributes {stable_mosaic.version = 11 : i64} {
  func.func @_patch_embed_kernel(%arg0: memref<128x192xf32, #tpu.memory_space<vmem>>, %arg1: memref<192x32xbf16, #tpu.memory_space<vmem>>, %arg2: memref<1x32xf32, #tpu.memory_space<vmem>>, %arg3: memref<128x32xf32, #tpu.memory_space<vmem>>, %arg4: memref<128x32xf32, #tpu.memory_space<vmem>>) attributes {dimension_semantics = [], scalar_prefetch = 0 : i64, scratch_operands = 0 : i64, tpu.core_type = #tpu.core_type<tc>} {
    %c0 = arith.constant 0 : index
    %c0_0 = arith.constant 0 : index
    %0 = vector.load %arg0[%c0, %c0_0] : memref<128x192xf32, #tpu.memory_space<vmem>>, vector<128x192xf32>
    %c0_1 = arith.constant 0 : index
    %c0_2 = arith.constant 0 : index
    %1 = vector.load %arg1[%c0_1, %c0_2] : memref<192x32xbf16, #tpu.memory_space<vmem>>, vector<192x32xbf16>
    %2 = arith.truncf %0 : vector<128x192xf32> to vector<128x192xbf16>
    %cst = arith.constant dense<0.000000e+00> : vector<128x32xf32>
    %3 = tpu.matmul %2, %1, %cst {dimension_numbers = #tpu.dot_dimension_numbers<[1], [0], [0], [1], [0, 0, 1, 1], [], []>} : vector<128x192xbf16>, vector<192x32xbf16>, vector<128x32xf32> -> vector<128x32xf32>
    %c0_3 = arith.constant 0 : index
    %c0_4 = arith.constant 0 : index
    %4 = vector.load %arg2[%c0_3, %c0_4] : memref<1x32xf32, #tpu.memory_space<vmem>>, vector<1x32xf32>
    %5 = vector.broadcast %4 : vector<1x32xf32> to vector<128x32xf32>
    %6 = arith.addf %3, %5 : vector<128x32xf32>
    %c0_5 = arith.constant 0 : index
    %c0_6 = arith.constant 0 : index
    %7 = vector.load %arg3[%c0_5, %c0_6] : memref<128x32xf32, #tpu.memory_space<vmem>>, vector<128x32xf32>
    %8 = arith.addf %6, %7 : vector<128x32xf32>
    %c0_7 = arith.constant 0 : index
    %c0_8 = arith.constant 0 : index
    %9 = vector.load %arg4[%c0_7, %c0_8] : memref<128x32xf32, #tpu.memory_space<vmem>>, vector<128x32xf32>
    tpu.vector_store %arg4[%c0_7, %c0_8], %8 {strides = array<i32>} : memref<128x32xf32, #tpu.memory_space<vmem>>, vector<128x32xf32>,
    return
  }
}

module attributes {stable_mosaic.version = 11 : i64} {
  func.func @_block_stack_kernel(%arg0: i32, %arg1: i32, %arg2: memref<1x24x32xf32, #tpu.memory_space<vmem>>, %arg3: memref<1x1x32xf32, #tpu.memory_space<vmem>>, %arg4: memref<1x1x32xf32, #tpu.memory_space<vmem>>, %arg5: memref<1x3x4x32x8xbf16, #tpu.memory_space<vmem>>, %arg6: memref<1x3x4x1x8xf32, #tpu.memory_space<vmem>>, %arg7: memref<1x4x8x32xbf16, #tpu.memory_space<vmem>>, %arg8: memref<1x1x32xf32, #tpu.memory_space<vmem>>, %arg9: memref<1x1x32xf32, #tpu.memory_space<vmem>>, %arg10: memref<1x1x32xf32, #tpu.memory_space<vmem>>, %arg11: memref<1x32x128xbf16, #tpu.memory_space<vmem>>, %arg12: memref<1x1x128xf32, #tpu.memory_space<vmem>>, %arg13: memref<1x128x32xbf16, #tpu.memory_space<vmem>>, %arg14: memref<1x1x32xf32, #tpu.memory_space<vmem>>, %arg15: memref<1x24x32xf32, #tpu.memory_space<vmem>>, %arg16: memref<24x32xf32, #tpu.memory_space<vmem>>) attributes {dimension_semantics = [#tpu.dimension_semantics<parallel>, #tpu.dimension_semantics<arbitrary>], iteration_bounds = array<i64: 2, 2>, scalar_prefetch = 0 : i64, scratch_operands = 1 : i64, tpu.core_type = #tpu.core_type<tc>, window_params = [{transform_indices = @transform_0, window_bounds = array<i64: 1, 24, 32>}, {transform_indices = @transform_1, window_bounds = array<i64: 1, 1, 32>}, {transform_indices = @transform_2, window_bounds = array<i64: 1, 1, 32>}, {transform_indices = @transform_3, window_bounds = array<i64: 1, 3, 4, 32, 8>}, {transform_indices = @transform_4, window_bounds = array<i64: 1, 3, 4, 1, 8>}, {transform_indices = @transform_5, window_bounds = array<i64: 1, 4, 8, 32>}, {transform_indices = @transform_6, window_bounds = array<i64: 1, 1, 32>}, {transform_indices = @transform_7, window_bounds = array<i64: 1, 1, 32>}, {transform_indices = @transform_8, window_bounds = array<i64: 1, 1, 32>}, {transform_indices = @transform_9, window_bounds = array<i64: 1, 32, 128>}, {transform_indices = @transform_10, window_bounds = array<i64: 1, 1, 128>}, {transform_indices = @transform_11, window_bounds = array<i64: 1, 128, 32>}, {transform_indices = @transform_12, window_bounds = array<i64: 1, 1, 32>}, {transform_indices = @transform_13, window_bounds = array<i64: 1, 24, 32>}]} {
    %c0_i32 = arith.constant 0 : i32
    %0 = arith.cmpi eq, %arg1, %c0_i32 : i32
    %1 = arith.extui %0 : i1 to i32
    %c0_i32_0 = arith.constant 0 : i32
    %2 = arith.cmpi ne, %1, %c0_i32_0 : i32
    scf.if %2 {
      %c0_228 = arith.constant 0 : index
      %c0_229 = arith.constant 0 : index
      %c0_230 = arith.constant 0 : index
      %303 = vector.load %arg2[%c0_228, %c0_229, %c0_230] : memref<1x24x32xf32, #tpu.memory_space<vmem>>, vector<1x24x32xf32>
      %304 = vector.shape_cast %303 : vector<1x24x32xf32> to vector<24x32xf32>
      %c0_231 = arith.constant 0 : index
      %c0_232 = arith.constant 0 : index
      %305 = vector.load %arg16[%c0_231, %c0_232] : memref<24x32xf32, #tpu.memory_space<vmem>>, vector<24x32xf32>
      tpu.vector_store %arg16[%c0_231, %c0_232], %304 {strides = array<i32>} : memref<24x32xf32, #tpu.memory_space<vmem>>, vector<24x32xf32>,
    } else {
    }
    %c0 = arith.constant 0 : index
    %c0_1 = arith.constant 0 : index
    %3 = vector.load %arg16[%c0, %c0_1] : memref<24x32xf32, #tpu.memory_space<vmem>>, vector<24x32xf32>
    %4 = tpu.iota {dimensions = array<i32: 1>} : vector<24x24xi32>
    %c17_i32 = arith.constant 17 : i32
    %5 = vector.broadcast %c17_i32 : i32 to vector<24x24xi32>
    %6 = arith.cmpi slt, %4, %5 : vector<24x24xi32>
    %cst = arith.constant 0.000000e+00 : f32
    %cst_2 = arith.constant -1.000000e+30 : f32
    %7 = vector.broadcast %cst : f32 to vector<24x24xf32>
    %8 = vector.broadcast %cst_2 : f32 to vector<24x24xf32>
    %9 = arith.select %6, %7, %8 : vector<24x24xi1>, vector<24x24xf32>
    %c0_3 = arith.constant 0 : index
    %c0_4 = arith.constant 0 : index
    %c0_5 = arith.constant 0 : index
    %10 = vector.load %arg3[%c0_3, %c0_4, %c0_5] : memref<1x1x32xf32, #tpu.memory_space<vmem>>, vector<1x1x32xf32>
    %11 = vector.shape_cast %10 : vector<1x1x32xf32> to vector<1x32xf32>
    %c0_6 = arith.constant 0 : index
    %c0_7 = arith.constant 0 : index
    %c0_8 = arith.constant 0 : index
    %12 = vector.load %arg4[%c0_6, %c0_7, %c0_8] : memref<1x1x32xf32, #tpu.memory_space<vmem>>, vector<1x1x32xf32>
    %13 = vector.shape_cast %12 : vector<1x1x32xf32> to vector<1x32xf32>
    %cst_9 = arith.constant dense<0.000000e+00> : vector<24xf32>
    %14 = vector.multi_reduction <add>, %3, %cst_9 [1] : vector<24x32xf32> to vector<24xf32>
    %15 = vector.shape_cast %14 : vector<24xf32> to vector<24x1xf32>
    %cst_10 = arith.constant 3.200000e+01 : f32
    %16 = vector.broadcast %cst_10 : f32 to vector<24x1xf32>
    %17 = arith.divf %15, %16 : vector<24x1xf32>
    %18 = vector.broadcast %17 : vector<24x1xf32> to vector<24x32xf32>
    %19 = arith.subf %3, %18 : vector<24x32xf32>
    %20 = arith.mulf %19, %19 : vector<24x32xf32>
    %cst_11 = arith.constant dense<0.000000e+00> : vector<24xf32>
    %21 = vector.multi_reduction <add>, %20, %cst_11 [1] : vector<24x32xf32> to vector<24xf32>
    %22 = vector.shape_cast %21 : vector<24xf32> to vector<24x1xf32>
    %cst_12 = arith.constant 3.200000e+01 : f32
    %23 = vector.broadcast %cst_12 : f32 to vector<24x1xf32>
    %24 = arith.divf %22, %23 : vector<24x1xf32>
    %cst_13 = arith.constant 9.99999974E-6 : f32
    %25 = vector.broadcast %cst_13 : f32 to vector<24x1xf32>
    %26 = arith.addf %24, %25 : vector<24x1xf32>
    %27 = math.rsqrt %26 : vector<24x1xf32>
    %28 = vector.broadcast %27 : vector<24x1xf32> to vector<24x32xf32>
    %29 = arith.mulf %19, %28 : vector<24x32xf32>
    %30 = vector.broadcast %11 : vector<1x32xf32> to vector<24x32xf32>
    %31 = arith.mulf %29, %30 : vector<24x32xf32>
    %32 = vector.broadcast %13 : vector<1x32xf32> to vector<24x32xf32>
    %33 = arith.addf %31, %32 : vector<24x32xf32>
    %34 = arith.truncf %33 : vector<24x32xf32> to vector<24x32xbf16>
    %c0_14 = arith.constant 0 : index
    %c0_15 = arith.constant 0 : index
    %c0_16 = arith.constant 0 : index
    %c0_17 = arith.constant 0 : index
    %c0_18 = arith.constant 0 : index
    %35 = vector.load %arg5[%c0_14, %c0_15, %c0_16, %c0_17, %c0_18] : memref<1x3x4x32x8xbf16, #tpu.memory_space<vmem>>, vector<1x1x1x32x8xbf16>
    %36 = vector.shape_cast %35 : vector<1x1x1x32x8xbf16> to vector<32x8xbf16>
    %cst_19 = arith.constant dense<0.000000e+00> : vector<24x8xf32>
    %37 = tpu.matmul %34, %36, %cst_19 {dimension_numbers = #tpu.dot_dimension_numbers<[1], [0], [0], [1], [0, 0, 1, 1], [], []>} : vector<24x32xbf16>, vector<32x8xbf16>, vector<24x8xf32> -> vector<24x8xf32>
    %c0_20 = arith.constant 0 : index
    %c0_21 = arith.constant 0 : index
    %c0_22 = arith.constant 0 : index
    %c0_23 = arith.constant 0 : index
    %c0_24 = arith.constant 0 : index
    %38 = vector.load %arg6[%c0_20, %c0_21, %c0_22, %c0_23, %c0_24] : memref<1x3x4x1x8xf32, #tpu.memory_space<vmem>>, vector<1x1x1x1x8xf32>
    %39 = vector.shape_cast %38 : vector<1x1x1x1x8xf32> to vector<1x8xf32>
    %40 = vector.broadcast %39 : vector<1x8xf32> to vector<24x8xf32>
    %41 = arith.addf %37, %40 : vector<24x8xf32>
    %c0_25 = arith.constant 0 : index
    %c1 = arith.constant 1 : index
    %c0_26 = arith.constant 0 : index
    %c0_27 = arith.constant 0 : index
    %c0_28 = arith.constant 0 : index
    %42 = vector.load %arg5[%c0_25, %c1, %c0_26, %c0_27, %c0_28] : memref<1x3x4x32x8xbf16, #tpu.memory_space<vmem>>, vector<1x1x1x32x8xbf16>
    %43 = vector.shape_cast %42 : vector<1x1x1x32x8xbf16> to vector<32x8xbf16>
    %cst_29 = arith.constant dense<0.000000e+00> : vector<24x8xf32>
    %44 = tpu.matmul %34, %43, %cst_29 {dimension_numbers = #tpu.dot_dimension_numbers<[1], [0], [0], [1], [0, 0, 1, 1], [], []>} : vector<24x32xbf16>, vector<32x8xbf16>, vector<24x8xf32> -> vector<24x8xf32>
    %c0_30 = arith.constant 0 : index
    %c1_31 = arith.constant 1 : index
    %c0_32 = arith.constant 0 : index
    %c0_33 = arith.constant 0 : index
    %c0_34 = arith.constant 0 : index
    %45 = vector.load %arg6[%c0_30, %c1_31, %c0_32, %c0_33, %c0_34] : memref<1x3x4x1x8xf32, #tpu.memory_space<vmem>>, vector<1x1x1x1x8xf32>
    %46 = vector.shape_cast %45 : vector<1x1x1x1x8xf32> to vector<1x8xf32>
    %47 = vector.broadcast %46 : vector<1x8xf32> to vector<24x8xf32>
    %48 = arith.addf %44, %47 : vector<24x8xf32>
    %c0_35 = arith.constant 0 : index
    %c2 = arith.constant 2 : index
    %c0_36 = arith.constant 0 : index
    %c0_37 = arith.constant 0 : index
    %c0_38 = arith.constant 0 : index
    %49 = vector.load %arg5[%c0_35, %c2, %c0_36, %c0_37, %c0_38] : memref<1x3x4x32x8xbf16, #tpu.memory_space<vmem>>, vector<1x1x1x32x8xbf16>
    %50 = vector.shape_cast %49 : vector<1x1x1x32x8xbf16> to vector<32x8xbf16>
    %cst_39 = arith.constant dense<0.000000e+00> : vector<24x8xf32>
    %51 = tpu.matmul %34, %50, %cst_39 {dimension_numbers = #tpu.dot_dimension_numbers<[1], [0], [0], [1], [0, 0, 1, 1], [], []>} : vector<24x32xbf16>, vector<32x8xbf16>, vector<24x8xf32> -> vector<24x8xf32>
    %c0_40 = arith.constant 0 : index
    %c2_41 = arith.constant 2 : index
    %c0_42 = arith.constant 0 : index
    %c0_43 = arith.constant 0 : index
    %c0_44 = arith.constant 0 : index
    %52 = vector.load %arg6[%c0_40, %c2_41, %c0_42, %c0_43, %c0_44] : memref<1x3x4x1x8xf32, #tpu.memory_space<vmem>>, vector<1x1x1x1x8xf32>
    %53 = vector.shape_cast %52 : vector<1x1x1x1x8xf32> to vector<1x8xf32>
    %54 = vector.broadcast %53 : vector<1x8xf32> to vector<24x8xf32>
    %55 = arith.addf %51, %54 : vector<24x8xf32>
    %cst_45 = arith.constant 0.353553385 : f32
    %56 = vector.broadcast %cst_45 : f32 to vector<24x8xf32>
    %57 = arith.mulf %41, %56 : vector<24x8xf32>
    %58 = arith.truncf %57 : vector<24x8xf32> to vector<24x8xbf16>
    %59 = arith.truncf %48 : vector<24x8xf32> to vector<24x8xbf16>
    %cst_46 = arith.constant dense<0.000000e+00> : vector<24x24xf32>
    %60 = tpu.matmul %58, %59, %cst_46 {dimension_numbers = #tpu.dot_dimension_numbers<[1], [1], [0], [0], [0, 0, 1, 0], [], []>} : vector<24x8xbf16>, vector<24x8xbf16>, vector<24x24xf32> -> vector<24x24xf32>
    %61 = arith.addf %60, %9 : vector<24x24xf32>
    %cst_47 = arith.constant dense<0xFF800000> : vector<24xf32>
    %62 = vector.multi_reduction <maximumf>, %61, %cst_47 [1] : vector<24x24xf32> to vector<24xf32>
    %63 = vector.shape_cast %62 : vector<24xf32> to vector<24x1xf32>
    %64 = vector.broadcast %63 : vector<24x1xf32> to vector<24x24xf32>
    %65 = arith.subf %61, %64 : vector<24x24xf32>
    %66 = math.exp %65 : vector<24x24xf32>
    %cst_48 = arith.constant dense<0.000000e+00> : vector<24xf32>
    %67 = vector.multi_reduction <add>, %66, %cst_48 [1] : vector<24x24xf32> to vector<24xf32>
    %68 = vector.shape_cast %67 : vector<24xf32> to vector<24x1xf32>
    %69 = tpu.reciprocal %68 {approx = true} : vector<24x1xf32> -> vector<24x1xf32>
    %70 = arith.truncf %66 : vector<24x24xf32> to vector<24x24xbf16>
    %71 = arith.truncf %55 : vector<24x8xf32> to vector<24x8xbf16>
    %cst_49 = arith.constant dense<0.000000e+00> : vector<24x8xf32>
    %72 = tpu.matmul %70, %71, %cst_49 {dimension_numbers = #tpu.dot_dimension_numbers<[1], [0], [0], [1], [0, 0, 1, 1], [], []>} : vector<24x24xbf16>, vector<24x8xbf16>, vector<24x8xf32> -> vector<24x8xf32>
    %73 = vector.broadcast %69 : vector<24x1xf32> to vector<24x8xf32>
    %74 = arith.mulf %72, %73 : vector<24x8xf32>
    %c0_50 = arith.constant 0 : index
    %c0_51 = arith.constant 0 : index
    %c0_52 = arith.constant 0 : index
    %c0_53 = arith.constant 0 : index
    %75 = vector.load %arg7[%c0_50, %c0_51, %c0_52, %c0_53] : memref<1x4x8x32xbf16, #tpu.memory_space<vmem>>, vector<1x1x8x32xbf16>
    %76 = vector.shape_cast %75 : vector<1x1x8x32xbf16> to vector<8x32xbf16>
    %77 = arith.truncf %74 : vector<24x8xf32> to vector<24x8xbf16>
    %cst_54 = arith.constant dense<0.000000e+00> : vector<24x32xf32>
    %78 = tpu.matmul %77, %76, %cst_54 {dimension_numbers = #tpu.dot_dimension_numbers<[1], [0], [0], [1], [0, 0, 1, 1], [], []>} : vector<24x8xbf16>, vector<8x32xbf16>, vector<24x32xf32> -> vector<24x32xf32>
    %c0_55 = arith.constant 0 : index
    %c0_56 = arith.constant 0 : index
    %c1_57 = arith.constant 1 : index
    %c0_58 = arith.constant 0 : index
    %c0_59 = arith.constant 0 : index
    %79 = vector.load %arg5[%c0_55, %c0_56, %c1_57, %c0_58, %c0_59] : memref<1x3x4x32x8xbf16, #tpu.memory_space<vmem>>, vector<1x1x1x32x8xbf16>
    %80 = vector.shape_cast %79 : vector<1x1x1x32x8xbf16> to vector<32x8xbf16>
    %cst_60 = arith.constant dense<0.000000e+00> : vector<24x8xf32>
    %81 = tpu.matmul %34, %80, %cst_60 {dimension_numbers = #tpu.dot_dimension_numbers<[1], [0], [0], [1], [0, 0, 1, 1], [], []>} : vector<24x32xbf16>, vector<32x8xbf16>, vector<24x8xf32> -> vector<24x8xf32>
    %c0_61 = arith.constant 0 : index
    %c0_62 = arith.constant 0 : index
    %c1_63 = arith.constant 1 : index
    %c0_64 = arith.constant 0 : index
    %c0_65 = arith.constant 0 : index
    %82 = vector.load %arg6[%c0_61, %c0_62, %c1_63, %c0_64, %c0_65] : memref<1x3x4x1x8xf32, #tpu.memory_space<vmem>>, vector<1x1x1x1x8xf32>
    %83 = vector.shape_cast %82 : vector<1x1x1x1x8xf32> to vector<1x8xf32>
    %84 = vector.broadcast %83 : vector<1x8xf32> to vector<24x8xf32>
    %85 = arith.addf %81, %84 : vector<24x8xf32>
    %c0_66 = arith.constant 0 : index
    %c1_67 = arith.constant 1 : index
    %c1_68 = arith.constant 1 : index
    %c0_69 = arith.constant 0 : index
    %c0_70 = arith.constant 0 : index
    %86 = vector.load %arg5[%c0_66, %c1_67, %c1_68, %c0_69, %c0_70] : memref<1x3x4x32x8xbf16, #tpu.memory_space<vmem>>, vector<1x1x1x32x8xbf16>
    %87 = vector.shape_cast %86 : vector<1x1x1x32x8xbf16> to vector<32x8xbf16>
    %cst_71 = arith.constant dense<0.000000e+00> : vector<24x8xf32>
    %88 = tpu.matmul %34, %87, %cst_71 {dimension_numbers = #tpu.dot_dimension_numbers<[1], [0], [0], [1], [0, 0, 1, 1], [], []>} : vector<24x32xbf16>, vector<32x8xbf16>, vector<24x8xf32> -> vector<24x8xf32>
    %c0_72 = arith.constant 0 : index
    %c1_73 = arith.constant 1 : index
    %c1_74 = arith.constant 1 : index
    %c0_75 = arith.constant 0 : index
    %c0_76 = arith.constant 0 : index
    %89 = vector.load %arg6[%c0_72, %c1_73, %c1_74, %c0_75, %c0_76] : memref<1x3x4x1x8xf32, #tpu.memory_space<vmem>>, vector<1x1x1x1x8xf32>
    %90 = vector.shape_cast %89 : vector<1x1x1x1x8xf32> to vector<1x8xf32>
    %91 = vector.broadcast %90 : vector<1x8xf32> to vector<24x8xf32>
    %92 = arith.addf %88, %91 : vector<24x8xf32>
    %c0_77 = arith.constant 0 : index
    %c2_78 = arith.constant 2 : index
    %c1_79 = arith.constant 1 : index
    %c0_80 = arith.constant 0 : index
    %c0_81 = arith.constant 0 : index
    %93 = vector.load %arg5[%c0_77, %c2_78, %c1_79, %c0_80, %c0_81] : memref<1x3x4x32x8xbf16, #tpu.memory_space<vmem>>, vector<1x1x1x32x8xbf16>
    %94 = vector.shape_cast %93 : vector<1x1x1x32x8xbf16> to vector<32x8xbf16>
    %cst_82 = arith.constant dense<0.000000e+00> : vector<24x8xf32>
    %95 = tpu.matmul %34, %94, %cst_82 {dimension_numbers = #tpu.dot_dimension_numbers<[1], [0], [0], [1], [0, 0, 1, 1], [], []>} : vector<24x32xbf16>, vector<32x8xbf16>, vector<24x8xf32> -> vector<24x8xf32>
    %c0_83 = arith.constant 0 : index
    %c2_84 = arith.constant 2 : index
    %c1_85 = arith.constant 1 : index
    %c0_86 = arith.constant 0 : index
    %c0_87 = arith.constant 0 : index
    %96 = vector.load %arg6[%c0_83, %c2_84, %c1_85, %c0_86, %c0_87] : memref<1x3x4x1x8xf32, #tpu.memory_space<vmem>>, vector<1x1x1x1x8xf32>
    %97 = vector.shape_cast %96 : vector<1x1x1x1x8xf32> to vector<1x8xf32>
    %98 = vector.broadcast %97 : vector<1x8xf32> to vector<24x8xf32>
    %99 = arith.addf %95, %98 : vector<24x8xf32>
    %cst_88 = arith.constant 0.353553385 : f32
    %100 = vector.broadcast %cst_88 : f32 to vector<24x8xf32>
    %101 = arith.mulf %85, %100 : vector<24x8xf32>
    %102 = arith.truncf %101 : vector<24x8xf32> to vector<24x8xbf16>
    %103 = arith.truncf %92 : vector<24x8xf32> to vector<24x8xbf16>
    %cst_89 = arith.constant dense<0.000000e+00> : vector<24x24xf32>
    %104 = tpu.matmul %102, %103, %cst_89 {dimension_numbers = #tpu.dot_dimension_numbers<[1], [1], [0], [0], [0, 0, 1, 0], [], []>} : vector<24x8xbf16>, vector<24x8xbf16>, vector<24x24xf32> -> vector<24x24xf32>
    %105 = arith.addf %104, %9 : vector<24x24xf32>
    %cst_90 = arith.constant dense<0xFF800000> : vector<24xf32>
    %106 = vector.multi_reduction <maximumf>, %105, %cst_90 [1] : vector<24x24xf32> to vector<24xf32>
    %107 = vector.shape_cast %106 : vector<24xf32> to vector<24x1xf32>
    %108 = vector.broadcast %107 : vector<24x1xf32> to vector<24x24xf32>
    %109 = arith.subf %105, %108 : vector<24x24xf32>
    %110 = math.exp %109 : vector<24x24xf32>
    %cst_91 = arith.constant dense<0.000000e+00> : vector<24xf32>
    %111 = vector.multi_reduction <add>, %110, %cst_91 [1] : vector<24x24xf32> to vector<24xf32>
    %112 = vector.shape_cast %111 : vector<24xf32> to vector<24x1xf32>
    %113 = tpu.reciprocal %112 {approx = true} : vector<24x1xf32> -> vector<24x1xf32>
    %114 = arith.truncf %110 : vector<24x24xf32> to vector<24x24xbf16>
    %115 = arith.truncf %99 : vector<24x8xf32> to vector<24x8xbf16>
    %cst_92 = arith.constant dense<0.000000e+00> : vector<24x8xf32>
    %116 = tpu.matmul %114, %115, %cst_92 {dimension_numbers = #tpu.dot_dimension_numbers<[1], [0], [0], [1], [0, 0, 1, 1], [], []>} : vector<24x24xbf16>, vector<24x8xbf16>, vector<24x8xf32> -> vector<24x8xf32>
    %117 = vector.broadcast %113 : vector<24x1xf32> to vector<24x8xf32>
    %118 = arith.mulf %116, %117 : vector<24x8xf32>
    %c0_93 = arith.constant 0 : index
    %c1_94 = arith.constant 1 : index
    %c0_95 = arith.constant 0 : index
    %c0_96 = arith.constant 0 : index
    %119 = vector.load %arg7[%c0_93, %c1_94, %c0_95, %c0_96] : memref<1x4x8x32xbf16, #tpu.memory_space<vmem>>, vector<1x1x8x32xbf16>
    %120 = vector.shape_cast %119 : vector<1x1x8x32xbf16> to vector<8x32xbf16>
    %121 = arith.truncf %118 : vector<24x8xf32> to vector<24x8xbf16>
    %cst_97 = arith.constant dense<0.000000e+00> : vector<24x32xf32>
    %122 = tpu.matmul %121, %120, %cst_97 {dimension_numbers = #tpu.dot_dimension_numbers<[1], [0], [0], [1], [0, 0, 1, 1], [], []>} : vector<24x8xbf16>, vector<8x32xbf16>, vector<24x32xf32> -> vector<24x32xf32>
    %123 = arith.addf %78, %122 : vector<24x32xf32>
    %c0_98 = arith.constant 0 : index
    %c0_99 = arith.constant 0 : index
    %c2_100 = arith.constant 2 : index
    %c0_101 = arith.constant 0 : index
    %c0_102 = arith.constant 0 : index
    %124 = vector.load %arg5[%c0_98, %c0_99, %c2_100, %c0_101, %c0_102] : memref<1x3x4x32x8xbf16, #tpu.memory_space<vmem>>, vector<1x1x1x32x8xbf16>
    %125 = vector.shape_cast %124 : vector<1x1x1x32x8xbf16> to vector<32x8xbf16>
    %cst_103 = arith.constant dense<0.000000e+00> : vector<24x8xf32>
    %126 = tpu.matmul %34, %125, %cst_103 {dimension_numbers = #tpu.dot_dimension_numbers<[1], [0], [0], [1], [0, 0, 1, 1], [], []>} : vector<24x32xbf16>, vector<32x8xbf16>, vector<24x8xf32> -> vector<24x8xf32>
    %c0_104 = arith.constant 0 : index
    %c0_105 = arith.constant 0 : index
    %c2_106 = arith.constant 2 : index
    %c0_107 = arith.constant 0 : index
    %c0_108 = arith.constant 0 : index
    %127 = vector.load %arg6[%c0_104, %c0_105, %c2_106, %c0_107, %c0_108] : memref<1x3x4x1x8xf32, #tpu.memory_space<vmem>>, vector<1x1x1x1x8xf32>
    %128 = vector.shape_cast %127 : vector<1x1x1x1x8xf32> to vector<1x8xf32>
    %129 = vector.broadcast %128 : vector<1x8xf32> to vector<24x8xf32>
    %130 = arith.addf %126, %129 : vector<24x8xf32>
    %c0_109 = arith.constant 0 : index
    %c1_110 = arith.constant 1 : index
    %c2_111 = arith.constant 2 : index
    %c0_112 = arith.constant 0 : index
    %c0_113 = arith.constant 0 : index
    %131 = vector.load %arg5[%c0_109, %c1_110, %c2_111, %c0_112, %c0_113] : memref<1x3x4x32x8xbf16, #tpu.memory_space<vmem>>, vector<1x1x1x32x8xbf16>
    %132 = vector.shape_cast %131 : vector<1x1x1x32x8xbf16> to vector<32x8xbf16>
    %cst_114 = arith.constant dense<0.000000e+00> : vector<24x8xf32>
    %133 = tpu.matmul %34, %132, %cst_114 {dimension_numbers = #tpu.dot_dimension_numbers<[1], [0], [0], [1], [0, 0, 1, 1], [], []>} : vector<24x32xbf16>, vector<32x8xbf16>, vector<24x8xf32> -> vector<24x8xf32>
    %c0_115 = arith.constant 0 : index
    %c1_116 = arith.constant 1 : index
    %c2_117 = arith.constant 2 : index
    %c0_118 = arith.constant 0 : index
    %c0_119 = arith.constant 0 : index
    %134 = vector.load %arg6[%c0_115, %c1_116, %c2_117, %c0_118, %c0_119] : memref<1x3x4x1x8xf32, #tpu.memory_space<vmem>>, vector<1x1x1x1x8xf32>
    %135 = vector.shape_cast %134 : vector<1x1x1x1x8xf32> to vector<1x8xf32>
    %136 = vector.broadcast %135 : vector<1x8xf32> to vector<24x8xf32>
    %137 = arith.addf %133, %136 : vector<24x8xf32>
    %c0_120 = arith.constant 0 : index
    %c2_121 = arith.constant 2 : index
    %c2_122 = arith.constant 2 : index
    %c0_123 = arith.constant 0 : index
    %c0_124 = arith.constant 0 : index
    %138 = vector.load %arg5[%c0_120, %c2_121, %c2_122, %c0_123, %c0_124] : memref<1x3x4x32x8xbf16, #tpu.memory_space<vmem>>, vector<1x1x1x32x8xbf16>
    %139 = vector.shape_cast %138 : vector<1x1x1x32x8xbf16> to vector<32x8xbf16>
    %cst_125 = arith.constant dense<0.000000e+00> : vector<24x8xf32>
    %140 = tpu.matmul %34, %139, %cst_125 {dimension_numbers = #tpu.dot_dimension_numbers<[1], [0], [0], [1], [0, 0, 1, 1], [], []>} : vector<24x32xbf16>, vector<32x8xbf16>, vector<24x8xf32> -> vector<24x8xf32>
    %c0_126 = arith.constant 0 : index
    %c2_127 = arith.constant 2 : index
    %c2_128 = arith.constant 2 : index
    %c0_129 = arith.constant 0 : index
    %c0_130 = arith.constant 0 : index
    %141 = vector.load %arg6[%c0_126, %c2_127, %c2_128, %c0_129, %c0_130] : memref<1x3x4x1x8xf32, #tpu.memory_space<vmem>>, vector<1x1x1x1x8xf32>
    %142 = vector.shape_cast %141 : vector<1x1x1x1x8xf32> to vector<1x8xf32>
    %143 = vector.broadcast %142 : vector<1x8xf32> to vector<24x8xf32>
    %144 = arith.addf %140, %143 : vector<24x8xf32>
    %cst_131 = arith.constant 0.353553385 : f32
    %145 = vector.broadcast %cst_131 : f32 to vector<24x8xf32>
    %146 = arith.mulf %130, %145 : vector<24x8xf32>
    %147 = arith.truncf %146 : vector<24x8xf32> to vector<24x8xbf16>
    %148 = arith.truncf %137 : vector<24x8xf32> to vector<24x8xbf16>
    %cst_132 = arith.constant dense<0.000000e+00> : vector<24x24xf32>
    %149 = tpu.matmul %147, %148, %cst_132 {dimension_numbers = #tpu.dot_dimension_numbers<[1], [1], [0], [0], [0, 0, 1, 0], [], []>} : vector<24x8xbf16>, vector<24x8xbf16>, vector<24x24xf32> -> vector<24x24xf32>
    %150 = arith.addf %149, %9 : vector<24x24xf32>
    %cst_133 = arith.constant dense<0xFF800000> : vector<24xf32>
    %151 = vector.multi_reduction <maximumf>, %150, %cst_133 [1] : vector<24x24xf32> to vector<24xf32>
    %152 = vector.shape_cast %151 : vector<24xf32> to vector<24x1xf32>
    %153 = vector.broadcast %152 : vector<24x1xf32> to vector<24x24xf32>
    %154 = arith.subf %150, %153 : vector<24x24xf32>
    %155 = math.exp %154 : vector<24x24xf32>
    %cst_134 = arith.constant dense<0.000000e+00> : vector<24xf32>
    %156 = vector.multi_reduction <add>, %155, %cst_134 [1] : vector<24x24xf32> to vector<24xf32>
    %157 = vector.shape_cast %156 : vector<24xf32> to vector<24x1xf32>
    %158 = tpu.reciprocal %157 {approx = true} : vector<24x1xf32> -> vector<24x1xf32>
    %159 = arith.truncf %155 : vector<24x24xf32> to vector<24x24xbf16>
    %160 = arith.truncf %144 : vector<24x8xf32> to vector<24x8xbf16>
    %cst_135 = arith.constant dense<0.000000e+00> : vector<24x8xf32>
    %161 = tpu.matmul %159, %160, %cst_135 {dimension_numbers = #tpu.dot_dimension_numbers<[1], [0], [0], [1], [0, 0, 1, 1], [], []>} : vector<24x24xbf16>, vector<24x8xbf16>, vector<24x8xf32> -> vector<24x8xf32>
    %162 = vector.broadcast %158 : vector<24x1xf32> to vector<24x8xf32>
    %163 = arith.mulf %161, %162 : vector<24x8xf32>
    %c0_136 = arith.constant 0 : index
    %c2_137 = arith.constant 2 : index
    %c0_138 = arith.constant 0 : index
    %c0_139 = arith.constant 0 : index
    %164 = vector.load %arg7[%c0_136, %c2_137, %c0_138, %c0_139] : memref<1x4x8x32xbf16, #tpu.memory_space<vmem>>, vector<1x1x8x32xbf16>
    %165 = vector.shape_cast %164 : vector<1x1x8x32xbf16> to vector<8x32xbf16>
    %166 = arith.truncf %163 : vector<24x8xf32> to vector<24x8xbf16>
    %cst_140 = arith.constant dense<0.000000e+00> : vector<24x32xf32>
    %167 = tpu.matmul %166, %165, %cst_140 {dimension_numbers = #tpu.dot_dimension_numbers<[1], [0], [0], [1], [0, 0, 1, 1], [], []>} : vector<24x8xbf16>, vector<8x32xbf16>, vector<24x32xf32> -> vector<24x32xf32>
    %168 = arith.addf %123, %167 : vector<24x32xf32>
    %c0_141 = arith.constant 0 : index
    %c0_142 = arith.constant 0 : index
    %c3 = arith.constant 3 : index
    %c0_143 = arith.constant 0 : index
    %c0_144 = arith.constant 0 : index
    %169 = vector.load %arg5[%c0_141, %c0_142, %c3, %c0_143, %c0_144] : memref<1x3x4x32x8xbf16, #tpu.memory_space<vmem>>, vector<1x1x1x32x8xbf16>
    %170 = vector.shape_cast %169 : vector<1x1x1x32x8xbf16> to vector<32x8xbf16>
    %cst_145 = arith.constant dense<0.000000e+00> : vector<24x8xf32>
    %171 = tpu.matmul %34, %170, %cst_145 {dimension_numbers = #tpu.dot_dimension_numbers<[1], [0], [0], [1], [0, 0, 1, 1], [], []>} : vector<24x32xbf16>, vector<32x8xbf16>, vector<24x8xf32> -> vector<24x8xf32>
    %c0_146 = arith.constant 0 : index
    %c0_147 = arith.constant 0 : index
    %c3_148 = arith.constant 3 : index
    %c0_149 = arith.constant 0 : index
    %c0_150 = arith.constant 0 : index
    %172 = vector.load %arg6[%c0_146, %c0_147, %c3_148, %c0_149, %c0_150] : memref<1x3x4x1x8xf32, #tpu.memory_space<vmem>>, vector<1x1x1x1x8xf32>
    %173 = vector.shape_cast %172 : vector<1x1x1x1x8xf32> to vector<1x8xf32>
    %174 = vector.broadcast %173 : vector<1x8xf32> to vector<24x8xf32>
    %175 = arith.addf %171, %174 : vector<24x8xf32>
    %c0_151 = arith.constant 0 : index
    %c1_152 = arith.constant 1 : index
    %c3_153 = arith.constant 3 : index
    %c0_154 = arith.constant 0 : index
    %c0_155 = arith.constant 0 : index
    %176 = vector.load %arg5[%c0_151, %c1_152, %c3_153, %c0_154, %c0_155] : memref<1x3x4x32x8xbf16, #tpu.memory_space<vmem>>, vector<1x1x1x32x8xbf16>
    %177 = vector.shape_cast %176 : vector<1x1x1x32x8xbf16> to vector<32x8xbf16>
    %cst_156 = arith.constant dense<0.000000e+00> : vector<24x8xf32>
    %178 = tpu.matmul %34, %177, %cst_156 {dimension_numbers = #tpu.dot_dimension_numbers<[1], [0], [0], [1], [0, 0, 1, 1], [], []>} : vector<24x32xbf16>, vector<32x8xbf16>, vector<24x8xf32> -> vector<24x8xf32>
    %c0_157 = arith.constant 0 : index
    %c1_158 = arith.constant 1 : index
    %c3_159 = arith.constant 3 : index
    %c0_160 = arith.constant 0 : index
    %c0_161 = arith.constant 0 : index
    %179 = vector.load %arg6[%c0_157, %c1_158, %c3_159, %c0_160, %c0_161] : memref<1x3x4x1x8xf32, #tpu.memory_space<vmem>>, vector<1x1x1x1x8xf32>
    %180 = vector.shape_cast %179 : vector<1x1x1x1x8xf32> to vector<1x8xf32>
    %181 = vector.broadcast %180 : vector<1x8xf32> to vector<24x8xf32>
    %182 = arith.addf %178, %181 : vector<24x8xf32>
    %c0_162 = arith.constant 0 : index
    %c2_163 = arith.constant 2 : index
    %c3_164 = arith.constant 3 : index
    %c0_165 = arith.constant 0 : index
    %c0_166 = arith.constant 0 : index
    %183 = vector.load %arg5[%c0_162, %c2_163, %c3_164, %c0_165, %c0_166] : memref<1x3x4x32x8xbf16, #tpu.memory_space<vmem>>, vector<1x1x1x32x8xbf16>
    %184 = vector.shape_cast %183 : vector<1x1x1x32x8xbf16> to vector<32x8xbf16>
    %cst_167 = arith.constant dense<0.000000e+00> : vector<24x8xf32>
    %185 = tpu.matmul %34, %184, %cst_167 {dimension_numbers = #tpu.dot_dimension_numbers<[1], [0], [0], [1], [0, 0, 1, 1], [], []>} : vector<24x32xbf16>, vector<32x8xbf16>, vector<24x8xf32> -> vector<24x8xf32>
    %c0_168 = arith.constant 0 : index
    %c2_169 = arith.constant 2 : index
    %c3_170 = arith.constant 3 : index
    %c0_171 = arith.constant 0 : index
    %c0_172 = arith.constant 0 : index
    %186 = vector.load %arg6[%c0_168, %c2_169, %c3_170, %c0_171, %c0_172] : memref<1x3x4x1x8xf32, #tpu.memory_space<vmem>>, vector<1x1x1x1x8xf32>
    %187 = vector.shape_cast %186 : vector<1x1x1x1x8xf32> to vector<1x8xf32>
    %188 = vector.broadcast %187 : vector<1x8xf32> to vector<24x8xf32>
    %189 = arith.addf %185, %188 : vector<24x8xf32>
    %cst_173 = arith.constant 0.353553385 : f32
    %190 = vector.broadcast %cst_173 : f32 to vector<24x8xf32>
    %191 = arith.mulf %175, %190 : vector<24x8xf32>
    %192 = arith.truncf %191 : vector<24x8xf32> to vector<24x8xbf16>
    %193 = arith.truncf %182 : vector<24x8xf32> to vector<24x8xbf16>
    %cst_174 = arith.constant dense<0.000000e+00> : vector<24x24xf32>
    %194 = tpu.matmul %192, %193, %cst_174 {dimension_numbers = #tpu.dot_dimension_numbers<[1], [1], [0], [0], [0, 0, 1, 0], [], []>} : vector<24x8xbf16>, vector<24x8xbf16>, vector<24x24xf32> -> vector<24x24xf32>
    %195 = arith.addf %194, %9 : vector<24x24xf32>
    %cst_175 = arith.constant dense<0xFF800000> : vector<24xf32>
    %196 = vector.multi_reduction <maximumf>, %195, %cst_175 [1] : vector<24x24xf32> to vector<24xf32>
    %197 = vector.shape_cast %196 : vector<24xf32> to vector<24x1xf32>
    %198 = vector.broadcast %197 : vector<24x1xf32> to vector<24x24xf32>
    %199 = arith.subf %195, %198 : vector<24x24xf32>
    %200 = math.exp %199 : vector<24x24xf32>
    %cst_176 = arith.constant dense<0.000000e+00> : vector<24xf32>
    %201 = vector.multi_reduction <add>, %200, %cst_176 [1] : vector<24x24xf32> to vector<24xf32>
    %202 = vector.shape_cast %201 : vector<24xf32> to vector<24x1xf32>
    %203 = tpu.reciprocal %202 {approx = true} : vector<24x1xf32> -> vector<24x1xf32>
    %204 = arith.truncf %200 : vector<24x24xf32> to vector<24x24xbf16>
    %205 = arith.truncf %189 : vector<24x8xf32> to vector<24x8xbf16>
    %cst_177 = arith.constant dense<0.000000e+00> : vector<24x8xf32>
    %206 = tpu.matmul %204, %205, %cst_177 {dimension_numbers = #tpu.dot_dimension_numbers<[1], [0], [0], [1], [0, 0, 1, 1], [], []>} : vector<24x24xbf16>, vector<24x8xbf16>, vector<24x8xf32> -> vector<24x8xf32>
    %207 = vector.broadcast %203 : vector<24x1xf32> to vector<24x8xf32>
    %208 = arith.mulf %206, %207 : vector<24x8xf32>
    %c0_178 = arith.constant 0 : index
    %c3_179 = arith.constant 3 : index
    %c0_180 = arith.constant 0 : index
    %c0_181 = arith.constant 0 : index
    %209 = vector.load %arg7[%c0_178, %c3_179, %c0_180, %c0_181] : memref<1x4x8x32xbf16, #tpu.memory_space<vmem>>, vector<1x1x8x32xbf16>
    %210 = vector.shape_cast %209 : vector<1x1x8x32xbf16> to vector<8x32xbf16>
    %211 = arith.truncf %208 : vector<24x8xf32> to vector<24x8xbf16>
    %cst_182 = arith.constant dense<0.000000e+00> : vector<24x32xf32>
    %212 = tpu.matmul %211, %210, %cst_182 {dimension_numbers = #tpu.dot_dimension_numbers<[1], [0], [0], [1], [0, 0, 1, 1], [], []>} : vector<24x8xbf16>, vector<8x32xbf16>, vector<24x32xf32> -> vector<24x32xf32>
    %213 = arith.addf %168, %212 : vector<24x32xf32>
    %214 = arith.addf %3, %213 : vector<24x32xf32>
    %c0_183 = arith.constant 0 : index
    %c0_184 = arith.constant 0 : index
    %c0_185 = arith.constant 0 : index
    %215 = vector.load %arg8[%c0_183, %c0_184, %c0_185] : memref<1x1x32xf32, #tpu.memory_space<vmem>>, vector<1x1x32xf32>
    %216 = vector.shape_cast %215 : vector<1x1x32xf32> to vector<1x32xf32>
    %217 = vector.broadcast %216 : vector<1x32xf32> to vector<24x32xf32>
    %218 = arith.addf %214, %217 : vector<24x32xf32>
    %c0_186 = arith.constant 0 : index
    %c0_187 = arith.constant 0 : index
    %c0_188 = arith.constant 0 : index
    %219 = vector.load %arg9[%c0_186, %c0_187, %c0_188] : memref<1x1x32xf32, #tpu.memory_space<vmem>>, vector<1x1x32xf32>
    %220 = vector.shape_cast %219 : vector<1x1x32xf32> to vector<1x32xf32>
    %c0_189 = arith.constant 0 : index
    %c0_190 = arith.constant 0 : index
    %c0_191 = arith.constant 0 : index
    %221 = vector.load %arg10[%c0_189, %c0_190, %c0_191] : memref<1x1x32xf32, #tpu.memory_space<vmem>>, vector<1x1x32xf32>
    %222 = vector.shape_cast %221 : vector<1x1x32xf32> to vector<1x32xf32>
    %cst_192 = arith.constant dense<0.000000e+00> : vector<24xf32>
    %223 = vector.multi_reduction <add>, %218, %cst_192 [1] : vector<24x32xf32> to vector<24xf32>
    %224 = vector.shape_cast %223 : vector<24xf32> to vector<24x1xf32>
    %cst_193 = arith.constant 3.200000e+01 : f32
    %225 = vector.broadcast %cst_193 : f32 to vector<24x1xf32>
    %226 = arith.divf %224, %225 : vector<24x1xf32>
    %227 = vector.broadcast %226 : vector<24x1xf32> to vector<24x32xf32>
    %228 = arith.subf %218, %227 : vector<24x32xf32>
    %229 = arith.mulf %228, %228 : vector<24x32xf32>
    %cst_194 = arith.constant dense<0.000000e+00> : vector<24xf32>
    %230 = vector.multi_reduction <add>, %229, %cst_194 [1] : vector<24x32xf32> to vector<24xf32>
    %231 = vector.shape_cast %230 : vector<24xf32> to vector<24x1xf32>
    %cst_195 = arith.constant 3.200000e+01 : f32
    %232 = vector.broadcast %cst_195 : f32 to vector<24x1xf32>
    %233 = arith.divf %231, %232 : vector<24x1xf32>
    %cst_196 = arith.constant 9.99999974E-6 : f32
    %234 = vector.broadcast %cst_196 : f32 to vector<24x1xf32>
    %235 = arith.addf %233, %234 : vector<24x1xf32>
    %236 = math.rsqrt %235 : vector<24x1xf32>
    %237 = vector.broadcast %236 : vector<24x1xf32> to vector<24x32xf32>
    %238 = arith.mulf %228, %237 : vector<24x32xf32>
    %239 = vector.broadcast %220 : vector<1x32xf32> to vector<24x32xf32>
    %240 = arith.mulf %238, %239 : vector<24x32xf32>
    %241 = vector.broadcast %222 : vector<1x32xf32> to vector<24x32xf32>
    %242 = arith.addf %240, %241 : vector<24x32xf32>
    %c0_197 = arith.constant 0 : index
    %c0_198 = arith.constant 0 : index
    %c0_199 = arith.constant 0 : index
    %243 = vector.load %arg11[%c0_197, %c0_198, %c0_199] : memref<1x32x128xbf16, #tpu.memory_space<vmem>>, vector<1x32x128xbf16>
    %244 = vector.shape_cast %243 : vector<1x32x128xbf16> to vector<32x128xbf16>
    %245 = arith.truncf %242 : vector<24x32xf32> to vector<24x32xbf16>
    %cst_200 = arith.constant dense<0.000000e+00> : vector<24x128xf32>
    %246 = tpu.matmul %245, %244, %cst_200 {dimension_numbers = #tpu.dot_dimension_numbers<[1], [0], [0], [1], [0, 0, 1, 1], [], []>} : vector<24x32xbf16>, vector<32x128xbf16>, vector<24x128xf32> -> vector<24x128xf32>
    %c0_201 = arith.constant 0 : index
    %c0_202 = arith.constant 0 : index
    %c0_203 = arith.constant 0 : index
    %247 = vector.load %arg12[%c0_201, %c0_202, %c0_203] : memref<1x1x128xf32, #tpu.memory_space<vmem>>, vector<1x1x128xf32>
    %248 = vector.shape_cast %247 : vector<1x1x128xf32> to vector<1x128xf32>
    %249 = vector.broadcast %248 : vector<1x128xf32> to vector<24x128xf32>
    %250 = arith.addf %246, %249 : vector<24x128xf32>
    %cst_204 = arith.constant 5.000000e-01 : f32
    %251 = vector.broadcast %cst_204 : f32 to vector<24x128xf32>
    %252 = arith.mulf %251, %250 : vector<24x128xf32>
    %cst_205 = arith.constant 0.707106769 : f32
    %253 = vector.broadcast %cst_205 : f32 to vector<24x128xf32>
    %254 = arith.mulf %250, %253 : vector<24x128xf32>
    %255 = math.absf %254 : vector<24x128xf32>
    %cst_206 = arith.constant 0.327591091 : f32
    %256 = vector.broadcast %cst_206 : f32 to vector<24x128xf32>
    %257 = arith.mulf %256, %255 : vector<24x128xf32>
    %cst_207 = arith.constant 1.000000e+00 : f32
    %258 = vector.broadcast %cst_207 : f32 to vector<24x128xf32>
    %259 = arith.addf %258, %257 : vector<24x128xf32>
    %260 = tpu.reciprocal %259 {approx = true} : vector<24x128xf32> -> vector<24x128xf32>
    %cst_208 = arith.constant 1.06140542 : f32
    %261 = vector.broadcast %cst_208 : f32 to vector<24x128xf32>
    %262 = arith.mulf %261, %260 : vector<24x128xf32>
    %cst_209 = arith.constant -1.45315206 : f32
    %263 = vector.broadcast %cst_209 : f32 to vector<24x128xf32>
    %264 = arith.addf %262, %263 : vector<24x128xf32>
    %265 = arith.mulf %264, %260 : vector<24x128xf32>
    %cst_210 = arith.constant 1.42141378 : f32
    %266 = vector.broadcast %cst_210 : f32 to vector<24x128xf32>
    %267 = arith.addf %265, %266 : vector<24x128xf32>
    %268 = arith.mulf %267, %260 : vector<24x128xf32>
    %cst_211 = arith.constant -0.284496725 : f32
    %269 = vector.broadcast %cst_211 : f32 to vector<24x128xf32>
    %270 = arith.addf %268, %269 : vector<24x128xf32>
    %271 = arith.mulf %270, %260 : vector<24x128xf32>
    %cst_212 = arith.constant 0.254829586 : f32
    %272 = vector.broadcast %cst_212 : f32 to vector<24x128xf32>
    %273 = arith.addf %271, %272 : vector<24x128xf32>
    %274 = arith.mulf %273, %260 : vector<24x128xf32>
    %275 = arith.mulf %255, %255 : vector<24x128xf32>
    %cst_213 = arith.constant 0.000000e+00 : f32
    %276 = vector.broadcast %cst_213 : f32 to vector<24x128xf32>
    %277 = arith.subf %276, %275 : vector<24x128xf32>
    %278 = math.exp %277 : vector<24x128xf32>
    %279 = arith.mulf %274, %278 : vector<24x128xf32>
    %cst_214 = arith.constant 1.000000e+00 : f32
    %280 = vector.broadcast %cst_214 : f32 to vector<24x128xf32>
    %281 = arith.subf %280, %279 : vector<24x128xf32>
    %cst_215 = arith.constant 0.000000e+00 : f32
    %282 = vector.broadcast %cst_215 : f32 to vector<24x128xf32>
    %283 = arith.cmpf oge, %254, %282 : vector<24x128xf32>
    %cst_216 = arith.constant 0.000000e+00 : f32
    %284 = vector.broadcast %cst_216 : f32 to vector<24x128xf32>
    %285 = arith.subf %284, %281 : vector<24x128xf32>
    %286 = arith.select %283, %281, %285 : vector<24x128xi1>, vector<24x128xf32>
    %cst_217 = arith.constant 1.000000e+00 : f32
    %287 = vector.broadcast %cst_217 : f32 to vector<24x128xf32>
    %288 = arith.addf %287, %286 : vector<24x128xf32>
    %289 = arith.mulf %252, %288 : vector<24x128xf32>
    %c0_218 = arith.constant 0 : index
    %c0_219 = arith.constant 0 : index
    %c0_220 = arith.constant 0 : index
    %290 = vector.load %arg13[%c0_218, %c0_219, %c0_220] : memref<1x128x32xbf16, #tpu.memory_space<vmem>>, vector<1x128x32xbf16>
    %291 = vector.shape_cast %290 : vector<1x128x32xbf16> to vector<128x32xbf16>
    %292 = arith.truncf %289 : vector<24x128xf32> to vector<24x128xbf16>
    %cst_221 = arith.constant dense<0.000000e+00> : vector<24x32xf32>
    %293 = tpu.matmul %292, %291, %cst_221 {dimension_numbers = #tpu.dot_dimension_numbers<[1], [0], [0], [1], [0, 0, 1, 1], [], []>} : vector<24x128xbf16>, vector<128x32xbf16>, vector<24x32xf32> -> vector<24x32xf32>
    %c0_222 = arith.constant 0 : index
    %c0_223 = arith.constant 0 : index
    %c0_224 = arith.constant 0 : index
    %294 = vector.load %arg14[%c0_222, %c0_223, %c0_224] : memref<1x1x32xf32, #tpu.memory_space<vmem>>, vector<1x1x32xf32>
    %295 = vector.shape_cast %294 : vector<1x1x32xf32> to vector<1x32xf32>
    %296 = vector.broadcast %295 : vector<1x32xf32> to vector<24x32xf32>
    %297 = arith.addf %293, %296 : vector<24x32xf32>
    %298 = arith.addf %218, %297 : vector<24x32xf32>
    %c0_225 = arith.constant 0 : index
    %c0_226 = arith.constant 0 : index
    %299 = vector.load %arg16[%c0_225, %c0_226] : memref<24x32xf32, #tpu.memory_space<vmem>>, vector<24x32xf32>
    tpu.vector_store %arg16[%c0_225, %c0_226], %298 {strides = array<i32>} : memref<24x32xf32, #tpu.memory_space<vmem>>, vector<24x32xf32>,
    %c1_i32 = arith.constant 1 : i32
    %300 = arith.cmpi eq, %arg1, %c1_i32 : i32
    %301 = arith.extui %300 : i1 to i32
    %c0_i32_227 = arith.constant 0 : i32
    %302 = arith.cmpi ne, %301, %c0_i32_227 : i32
    scf.if %302 {
      %c0_228 = arith.constant 0 : index
      %c0_229 = arith.constant 0 : index
      %c0_230 = arith.constant 0 : index
      %303 = vector.load %arg15[%c0_228, %c0_229, %c0_230] : memref<1x24x32xf32, #tpu.memory_space<vmem>>, vector<1x24x32xf32>
      %304 = vector.shape_cast %303 : vector<1x24x32xf32> to vector<24x32xf32>
      %305 = vector.shape_cast %298 : vector<24x32xf32> to vector<1x24x32xf32>
      tpu.vector_store %arg15[%c0_228, %c0_229, %c0_230], %305 {strides = array<i32>} : memref<1x24x32xf32, #tpu.memory_space<vmem>>, vector<1x24x32xf32>,
    } else {
    }
    return
  }
  func.func @transform_0(%arg0: i32, %arg1: i32) -> (i32, i32, i32) {
    %c0_i32 = arith.constant 0 : i32
    %c0_i32_0 = arith.constant 0 : i32
    %c0_i32_1 = arith.constant 0 : i32
    return %arg0, %c0_i32, %c0_i32_0 : i32, i32, i32
  }
  func.func @transform_1(%arg0: i32, %arg1: i32) -> (i32, i32, i32) {
    %c0_i32 = arith.constant 0 : i32
    %c0_i32_0 = arith.constant 0 : i32
    %c0_i32_1 = arith.constant 0 : i32
    return %arg1, %c0_i32, %c0_i32_0 : i32, i32, i32
  }
  func.func @transform_2(%arg0: i32, %arg1: i32) -> (i32, i32, i32) {
    %c0_i32 = arith.constant 0 : i32
    %c0_i32_0 = arith.constant 0 : i32
    %c0_i32_1 = arith.constant 0 : i32
    return %arg1, %c0_i32, %c0_i32_0 : i32, i32, i32
  }
  func.func @transform_3(%arg0: i32, %arg1: i32) -> (i32, i32, i32, i32, i32) {
    %c0_i32 = arith.constant 0 : i32
    %c0_i32_0 = arith.constant 0 : i32
    %c0_i32_1 = arith.constant 0 : i32
    %c0_i32_2 = arith.constant 0 : i32
    %c0_i32_3 = arith.constant 0 : i32
    return %arg1, %c0_i32, %c0_i32_0, %c0_i32_1, %c0_i32_2 : i32, i32, i32, i32, i32
  }
  func.func @transform_4(%arg0: i32, %arg1: i32) -> (i32, i32, i32, i32, i32) {
    %c0_i32 = arith.constant 0 : i32
    %c0_i32_0 = arith.constant 0 : i32
    %c0_i32_1 = arith.constant 0 : i32
    %c0_i32_2 = arith.constant 0 : i32
    %c0_i32_3 = arith.constant 0 : i32
    return %arg1, %c0_i32, %c0_i32_0, %c0_i32_1, %c0_i32_2 : i32, i32, i32, i32, i32
  }
  func.func @transform_5(%arg0: i32, %arg1: i32) -> (i32, i32, i32, i32) {
    %c0_i32 = arith.constant 0 : i32
    %c0_i32_0 = arith.constant 0 : i32
    %c0_i32_1 = arith.constant 0 : i32
    %c0_i32_2 = arith.constant 0 : i32
    return %arg1, %c0_i32, %c0_i32_0, %c0_i32_1 : i32, i32, i32, i32
  }
  func.func @transform_6(%arg0: i32, %arg1: i32) -> (i32, i32, i32) {
    %c0_i32 = arith.constant 0 : i32
    %c0_i32_0 = arith.constant 0 : i32
    %c0_i32_1 = arith.constant 0 : i32
    return %arg1, %c0_i32, %c0_i32_0 : i32, i32, i32
  }
  func.func @transform_7(%arg0: i32, %arg1: i32) -> (i32, i32, i32) {
    %c0_i32 = arith.constant 0 : i32
    %c0_i32_0 = arith.constant 0 : i32
    %c0_i32_1 = arith.constant 0 : i32
    return %arg1, %c0_i32, %c0_i32_0 : i32, i32, i32
  }
  func.func @transform_8(%arg0: i32, %arg1: i32) -> (i32, i32, i32) {
    %c0_i32 = arith.constant 0 : i32
    %c0_i32_0 = arith.constant 0 : i32
    %c0_i32_1 = arith.constant 0 : i32
    return %arg1, %c0_i32, %c0_i32_0 : i32, i32, i32
  }
  func.func @transform_9(%arg0: i32, %arg1: i32) -> (i32, i32, i32) {
    %c0_i32 = arith.constant 0 : i32
    %c0_i32_0 = arith.constant 0 : i32
    %c0_i32_1 = arith.constant 0 : i32
    return %arg1, %c0_i32, %c0_i32_0 : i32, i32, i32
  }
  func.func @transform_10(%arg0: i32, %arg1: i32) -> (i32, i32, i32) {
    %c0_i32 = arith.constant 0 : i32
    %c0_i32_0 = arith.constant 0 : i32
    %c0_i32_1 = arith.constant 0 : i32
    return %arg1, %c0_i32, %c0_i32_0 : i32, i32, i32
  }
  func.func @transform_11(%arg0: i32, %arg1: i32) -> (i32, i32, i32) {
    %c0_i32 = arith.constant 0 : i32
    %c0_i32_0 = arith.constant 0 : i32
    %c0_i32_1 = arith.constant 0 : i32
    return %arg1, %c0_i32, %c0_i32_0 : i32, i32, i32
  }
  func.func @transform_12(%arg0: i32, %arg1: i32) -> (i32, i32, i32) {
    %c0_i32 = arith.constant 0 : i32
    %c0_i32_0 = arith.constant 0 : i32
    %c0_i32_1 = arith.constant 0 : i32
    return %arg1, %c0_i32, %c0_i32_0 : i32, i32, i32
  }
  func.func @transform_13(%arg0: i32, %arg1: i32) -> (i32, i32, i32) {
    %c0_i32 = arith.constant 0 : i32
    %c0_i32_0 = arith.constant 0 : i32
    %c0_i32_1 = arith.constant 0 : i32
    return %arg0, %c0_i32, %c0_i32_0 : i32, i32, i32
  }
}

module attributes {stable_mosaic.version = 11 : i64} {
  func.func @_ln_linear_kernel(%arg0: memref<48x32xf32, #tpu.memory_space<vmem>>, %arg1: memref<1x32xf32, #tpu.memory_space<vmem>>, %arg2: memref<1x32xf32, #tpu.memory_space<vmem>>, %arg3: memref<32x16xbf16, #tpu.memory_space<vmem>>, %arg4: memref<1x16xf32, #tpu.memory_space<vmem>>, %arg5: memref<48x16xf32, #tpu.memory_space<vmem>>) attributes {dimension_semantics = [], scalar_prefetch = 0 : i64, scratch_operands = 0 : i64, tpu.core_type = #tpu.core_type<tc>} {
    %c0 = arith.constant 0 : index
    %c0_0 = arith.constant 0 : index
    %0 = vector.load %arg0[%c0, %c0_0] : memref<48x32xf32, #tpu.memory_space<vmem>>, vector<48x32xf32>
    %c0_1 = arith.constant 0 : index
    %c0_2 = arith.constant 0 : index
    %1 = vector.load %arg1[%c0_1, %c0_2] : memref<1x32xf32, #tpu.memory_space<vmem>>, vector<1x32xf32>
    %c0_3 = arith.constant 0 : index
    %c0_4 = arith.constant 0 : index
    %2 = vector.load %arg2[%c0_3, %c0_4] : memref<1x32xf32, #tpu.memory_space<vmem>>, vector<1x32xf32>
    %cst = arith.constant dense<0.000000e+00> : vector<48xf32>
    %3 = vector.multi_reduction <add>, %0, %cst [1] : vector<48x32xf32> to vector<48xf32>
    %4 = vector.shape_cast %3 : vector<48xf32> to vector<48x1xf32>
    %cst_5 = arith.constant 3.200000e+01 : f32
    %5 = vector.broadcast %cst_5 : f32 to vector<48x1xf32>
    %6 = arith.divf %4, %5 : vector<48x1xf32>
    %7 = vector.broadcast %6 : vector<48x1xf32> to vector<48x32xf32>
    %8 = arith.subf %0, %7 : vector<48x32xf32>
    %9 = arith.mulf %8, %8 : vector<48x32xf32>
    %cst_6 = arith.constant dense<0.000000e+00> : vector<48xf32>
    %10 = vector.multi_reduction <add>, %9, %cst_6 [1] : vector<48x32xf32> to vector<48xf32>
    %11 = vector.shape_cast %10 : vector<48xf32> to vector<48x1xf32>
    %cst_7 = arith.constant 3.200000e+01 : f32
    %12 = vector.broadcast %cst_7 : f32 to vector<48x1xf32>
    %13 = arith.divf %11, %12 : vector<48x1xf32>
    %cst_8 = arith.constant 9.99999974E-6 : f32
    %14 = vector.broadcast %cst_8 : f32 to vector<48x1xf32>
    %15 = arith.addf %13, %14 : vector<48x1xf32>
    %16 = math.rsqrt %15 : vector<48x1xf32>
    %17 = vector.broadcast %16 : vector<48x1xf32> to vector<48x32xf32>
    %18 = arith.mulf %8, %17 : vector<48x32xf32>
    %19 = vector.broadcast %1 : vector<1x32xf32> to vector<48x32xf32>
    %20 = arith.mulf %18, %19 : vector<48x32xf32>
    %21 = vector.broadcast %2 : vector<1x32xf32> to vector<48x32xf32>
    %22 = arith.addf %20, %21 : vector<48x32xf32>
    %c0_9 = arith.constant 0 : index
    %c0_10 = arith.constant 0 : index
    %23 = vector.load %arg3[%c0_9, %c0_10] : memref<32x16xbf16, #tpu.memory_space<vmem>>, vector<32x16xbf16>
    %24 = arith.truncf %22 : vector<48x32xf32> to vector<48x32xbf16>
    %cst_11 = arith.constant dense<0.000000e+00> : vector<48x16xf32>
    %25 = tpu.matmul %24, %23, %cst_11 {dimension_numbers = #tpu.dot_dimension_numbers<[1], [0], [0], [1], [0, 0, 1, 1], [], []>} : vector<48x32xbf16>, vector<32x16xbf16>, vector<48x16xf32> -> vector<48x16xf32>
    %c0_12 = arith.constant 0 : index
    %c0_13 = arith.constant 0 : index
    %26 = vector.load %arg4[%c0_12, %c0_13] : memref<1x16xf32, #tpu.memory_space<vmem>>, vector<1x16xf32>
    %27 = vector.broadcast %26 : vector<1x16xf32> to vector<48x16xf32>
    %28 = arith.addf %25, %27 : vector<48x16xf32>
    %c0_14 = arith.constant 0 : index
    %c0_15 = arith.constant 0 : index
    %29 = vector.load %arg5[%c0_14, %c0_15] : memref<48x16xf32, #tpu.memory_space<vmem>>, vector<48x16xf32>
    tpu.vector_store %arg5[%c0_14, %c0_15], %28 {strides = array<i32>} : memref<48x16xf32, #tpu.memory_space<vmem>>, vector<48x16xf32>,
    return
  }
}

module attributes {stable_mosaic.version = 11 : i64} {
  func.func @_block_stack_kernel(%arg0: i32, %arg1: i32, %arg2: memref<1x72x16xf32, #tpu.memory_space<vmem>>, %arg3: memref<1x1x16xf32, #tpu.memory_space<vmem>>, %arg4: memref<1x1x16xf32, #tpu.memory_space<vmem>>, %arg5: memref<1x3x4x16x4xbf16, #tpu.memory_space<vmem>>, %arg6: memref<1x3x4x1x4xf32, #tpu.memory_space<vmem>>, %arg7: memref<1x4x4x16xbf16, #tpu.memory_space<vmem>>, %arg8: memref<1x1x16xf32, #tpu.memory_space<vmem>>, %arg9: memref<1x1x16xf32, #tpu.memory_space<vmem>>, %arg10: memref<1x1x16xf32, #tpu.memory_space<vmem>>, %arg11: memref<1x16x64xbf16, #tpu.memory_space<vmem>>, %arg12: memref<1x1x64xf32, #tpu.memory_space<vmem>>, %arg13: memref<1x64x16xbf16, #tpu.memory_space<vmem>>, %arg14: memref<1x1x16xf32, #tpu.memory_space<vmem>>, %arg15: memref<1x72x16xf32, #tpu.memory_space<vmem>>, %arg16: memref<72x16xf32, #tpu.memory_space<vmem>>) attributes {dimension_semantics = [#tpu.dimension_semantics<parallel>, #tpu.dimension_semantics<arbitrary>], iteration_bounds = array<i64: 2, 1>, scalar_prefetch = 0 : i64, scratch_operands = 1 : i64, tpu.core_type = #tpu.core_type<tc>, window_params = [{transform_indices = @transform_0, window_bounds = array<i64: 1, 72, 16>}, {transform_indices = @transform_1, window_bounds = array<i64: 1, 1, 16>}, {transform_indices = @transform_2, window_bounds = array<i64: 1, 1, 16>}, {transform_indices = @transform_3, window_bounds = array<i64: 1, 3, 4, 16, 4>}, {transform_indices = @transform_4, window_bounds = array<i64: 1, 3, 4, 1, 4>}, {transform_indices = @transform_5, window_bounds = array<i64: 1, 4, 4, 16>}, {transform_indices = @transform_6, window_bounds = array<i64: 1, 1, 16>}, {transform_indices = @transform_7, window_bounds = array<i64: 1, 1, 16>}, {transform_indices = @transform_8, window_bounds = array<i64: 1, 1, 16>}, {transform_indices = @transform_9, window_bounds = array<i64: 1, 16, 64>}, {transform_indices = @transform_10, window_bounds = array<i64: 1, 1, 64>}, {transform_indices = @transform_11, window_bounds = array<i64: 1, 64, 16>}, {transform_indices = @transform_12, window_bounds = array<i64: 1, 1, 16>}, {transform_indices = @transform_13, window_bounds = array<i64: 1, 72, 16>}]} {
    %c0_i32 = arith.constant 0 : i32
    %0 = arith.cmpi eq, %arg1, %c0_i32 : i32
    %1 = arith.extui %0 : i1 to i32
    %c0_i32_0 = arith.constant 0 : i32
    %2 = arith.cmpi ne, %1, %c0_i32_0 : i32
    scf.if %2 {
      %c0_229 = arith.constant 0 : index
      %c0_230 = arith.constant 0 : index
      %c0_231 = arith.constant 0 : index
      %303 = vector.load %arg2[%c0_229, %c0_230, %c0_231] : memref<1x72x16xf32, #tpu.memory_space<vmem>>, vector<1x72x16xf32>
      %304 = vector.shape_cast %303 : vector<1x72x16xf32> to vector<72x16xf32>
      %c0_232 = arith.constant 0 : index
      %c0_233 = arith.constant 0 : index
      %305 = vector.load %arg16[%c0_232, %c0_233] : memref<72x16xf32, #tpu.memory_space<vmem>>, vector<72x16xf32>
      tpu.vector_store %arg16[%c0_232, %c0_233], %304 {strides = array<i32>} : memref<72x16xf32, #tpu.memory_space<vmem>>, vector<72x16xf32>,
    } else {
    }
    %c0 = arith.constant 0 : index
    %c0_1 = arith.constant 0 : index
    %3 = vector.load %arg16[%c0, %c0_1] : memref<72x16xf32, #tpu.memory_space<vmem>>, vector<72x16xf32>
    %4 = tpu.iota {dimensions = array<i32: 1>} : vector<72x72xi32>
    %c65_i32 = arith.constant 65 : i32
    %5 = vector.broadcast %c65_i32 : i32 to vector<72x72xi32>
    %6 = arith.cmpi slt, %4, %5 : vector<72x72xi32>
    %cst = arith.constant 0.000000e+00 : f32
    %cst_2 = arith.constant -1.000000e+30 : f32
    %7 = vector.broadcast %cst : f32 to vector<72x72xf32>
    %8 = vector.broadcast %cst_2 : f32 to vector<72x72xf32>
    %9 = arith.select %6, %7, %8 : vector<72x72xi1>, vector<72x72xf32>
    %c0_3 = arith.constant 0 : index
    %c0_4 = arith.constant 0 : index
    %c0_5 = arith.constant 0 : index
    %10 = vector.load %arg3[%c0_3, %c0_4, %c0_5] : memref<1x1x16xf32, #tpu.memory_space<vmem>>, vector<1x1x16xf32>
    %11 = vector.shape_cast %10 : vector<1x1x16xf32> to vector<1x16xf32>
    %c0_6 = arith.constant 0 : index
    %c0_7 = arith.constant 0 : index
    %c0_8 = arith.constant 0 : index
    %12 = vector.load %arg4[%c0_6, %c0_7, %c0_8] : memref<1x1x16xf32, #tpu.memory_space<vmem>>, vector<1x1x16xf32>
    %13 = vector.shape_cast %12 : vector<1x1x16xf32> to vector<1x16xf32>
    %cst_9 = arith.constant dense<0.000000e+00> : vector<72xf32>
    %14 = vector.multi_reduction <add>, %3, %cst_9 [1] : vector<72x16xf32> to vector<72xf32>
    %15 = vector.shape_cast %14 : vector<72xf32> to vector<72x1xf32>
    %cst_10 = arith.constant 1.600000e+01 : f32
    %16 = vector.broadcast %cst_10 : f32 to vector<72x1xf32>
    %17 = arith.divf %15, %16 : vector<72x1xf32>
    %18 = vector.broadcast %17 : vector<72x1xf32> to vector<72x16xf32>
    %19 = arith.subf %3, %18 : vector<72x16xf32>
    %20 = arith.mulf %19, %19 : vector<72x16xf32>
    %cst_11 = arith.constant dense<0.000000e+00> : vector<72xf32>
    %21 = vector.multi_reduction <add>, %20, %cst_11 [1] : vector<72x16xf32> to vector<72xf32>
    %22 = vector.shape_cast %21 : vector<72xf32> to vector<72x1xf32>
    %cst_12 = arith.constant 1.600000e+01 : f32
    %23 = vector.broadcast %cst_12 : f32 to vector<72x1xf32>
    %24 = arith.divf %22, %23 : vector<72x1xf32>
    %cst_13 = arith.constant 9.99999974E-6 : f32
    %25 = vector.broadcast %cst_13 : f32 to vector<72x1xf32>
    %26 = arith.addf %24, %25 : vector<72x1xf32>
    %27 = math.rsqrt %26 : vector<72x1xf32>
    %28 = vector.broadcast %27 : vector<72x1xf32> to vector<72x16xf32>
    %29 = arith.mulf %19, %28 : vector<72x16xf32>
    %30 = vector.broadcast %11 : vector<1x16xf32> to vector<72x16xf32>
    %31 = arith.mulf %29, %30 : vector<72x16xf32>
    %32 = vector.broadcast %13 : vector<1x16xf32> to vector<72x16xf32>
    %33 = arith.addf %31, %32 : vector<72x16xf32>
    %34 = arith.truncf %33 : vector<72x16xf32> to vector<72x16xbf16>
    %c0_14 = arith.constant 0 : index
    %c0_15 = arith.constant 0 : index
    %c0_16 = arith.constant 0 : index
    %c0_17 = arith.constant 0 : index
    %c0_18 = arith.constant 0 : index
    %35 = vector.load %arg5[%c0_14, %c0_15, %c0_16, %c0_17, %c0_18] : memref<1x3x4x16x4xbf16, #tpu.memory_space<vmem>>, vector<1x1x1x16x4xbf16>
    %36 = vector.shape_cast %35 : vector<1x1x1x16x4xbf16> to vector<16x4xbf16>
    %cst_19 = arith.constant dense<0.000000e+00> : vector<72x4xf32>
    %37 = tpu.matmul %34, %36, %cst_19 {dimension_numbers = #tpu.dot_dimension_numbers<[1], [0], [0], [1], [0, 0, 1, 1], [], []>} : vector<72x16xbf16>, vector<16x4xbf16>, vector<72x4xf32> -> vector<72x4xf32>
    %c0_20 = arith.constant 0 : index
    %c0_21 = arith.constant 0 : index
    %c0_22 = arith.constant 0 : index
    %c0_23 = arith.constant 0 : index
    %c0_24 = arith.constant 0 : index
    %38 = vector.load %arg6[%c0_20, %c0_21, %c0_22, %c0_23, %c0_24] : memref<1x3x4x1x4xf32, #tpu.memory_space<vmem>>, vector<1x1x1x1x4xf32>
    %39 = vector.shape_cast %38 : vector<1x1x1x1x4xf32> to vector<1x4xf32>
    %40 = vector.broadcast %39 : vector<1x4xf32> to vector<72x4xf32>
    %41 = arith.addf %37, %40 : vector<72x4xf32>
    %c0_25 = arith.constant 0 : index
    %c1 = arith.constant 1 : index
    %c0_26 = arith.constant 0 : index
    %c0_27 = arith.constant 0 : index
    %c0_28 = arith.constant 0 : index
    %42 = vector.load %arg5[%c0_25, %c1, %c0_26, %c0_27, %c0_28] : memref<1x3x4x16x4xbf16, #tpu.memory_space<vmem>>, vector<1x1x1x16x4xbf16>
    %43 = vector.shape_cast %42 : vector<1x1x1x16x4xbf16> to vector<16x4xbf16>
    %cst_29 = arith.constant dense<0.000000e+00> : vector<72x4xf32>
    %44 = tpu.matmul %34, %43, %cst_29 {dimension_numbers = #tpu.dot_dimension_numbers<[1], [0], [0], [1], [0, 0, 1, 1], [], []>} : vector<72x16xbf16>, vector<16x4xbf16>, vector<72x4xf32> -> vector<72x4xf32>
    %c0_30 = arith.constant 0 : index
    %c1_31 = arith.constant 1 : index
    %c0_32 = arith.constant 0 : index
    %c0_33 = arith.constant 0 : index
    %c0_34 = arith.constant 0 : index
    %45 = vector.load %arg6[%c0_30, %c1_31, %c0_32, %c0_33, %c0_34] : memref<1x3x4x1x4xf32, #tpu.memory_space<vmem>>, vector<1x1x1x1x4xf32>
    %46 = vector.shape_cast %45 : vector<1x1x1x1x4xf32> to vector<1x4xf32>
    %47 = vector.broadcast %46 : vector<1x4xf32> to vector<72x4xf32>
    %48 = arith.addf %44, %47 : vector<72x4xf32>
    %c0_35 = arith.constant 0 : index
    %c2 = arith.constant 2 : index
    %c0_36 = arith.constant 0 : index
    %c0_37 = arith.constant 0 : index
    %c0_38 = arith.constant 0 : index
    %49 = vector.load %arg5[%c0_35, %c2, %c0_36, %c0_37, %c0_38] : memref<1x3x4x16x4xbf16, #tpu.memory_space<vmem>>, vector<1x1x1x16x4xbf16>
    %50 = vector.shape_cast %49 : vector<1x1x1x16x4xbf16> to vector<16x4xbf16>
    %cst_39 = arith.constant dense<0.000000e+00> : vector<72x4xf32>
    %51 = tpu.matmul %34, %50, %cst_39 {dimension_numbers = #tpu.dot_dimension_numbers<[1], [0], [0], [1], [0, 0, 1, 1], [], []>} : vector<72x16xbf16>, vector<16x4xbf16>, vector<72x4xf32> -> vector<72x4xf32>
    %c0_40 = arith.constant 0 : index
    %c2_41 = arith.constant 2 : index
    %c0_42 = arith.constant 0 : index
    %c0_43 = arith.constant 0 : index
    %c0_44 = arith.constant 0 : index
    %52 = vector.load %arg6[%c0_40, %c2_41, %c0_42, %c0_43, %c0_44] : memref<1x3x4x1x4xf32, #tpu.memory_space<vmem>>, vector<1x1x1x1x4xf32>
    %53 = vector.shape_cast %52 : vector<1x1x1x1x4xf32> to vector<1x4xf32>
    %54 = vector.broadcast %53 : vector<1x4xf32> to vector<72x4xf32>
    %55 = arith.addf %51, %54 : vector<72x4xf32>
    %cst_45 = arith.constant 5.000000e-01 : f32
    %56 = vector.broadcast %cst_45 : f32 to vector<72x4xf32>
    %57 = arith.mulf %41, %56 : vector<72x4xf32>
    %58 = arith.truncf %57 : vector<72x4xf32> to vector<72x4xbf16>
    %59 = arith.truncf %48 : vector<72x4xf32> to vector<72x4xbf16>
    %cst_46 = arith.constant dense<0.000000e+00> : vector<72x72xf32>
    %60 = tpu.matmul %58, %59, %cst_46 {dimension_numbers = #tpu.dot_dimension_numbers<[1], [1], [0], [0], [0, 0, 1, 0], [], []>} : vector<72x4xbf16>, vector<72x4xbf16>, vector<72x72xf32> -> vector<72x72xf32>
    %61 = arith.addf %60, %9 : vector<72x72xf32>
    %cst_47 = arith.constant dense<0xFF800000> : vector<72xf32>
    %62 = vector.multi_reduction <maximumf>, %61, %cst_47 [1] : vector<72x72xf32> to vector<72xf32>
    %63 = vector.shape_cast %62 : vector<72xf32> to vector<72x1xf32>
    %64 = vector.broadcast %63 : vector<72x1xf32> to vector<72x72xf32>
    %65 = arith.subf %61, %64 : vector<72x72xf32>
    %66 = math.exp %65 : vector<72x72xf32>
    %cst_48 = arith.constant dense<0.000000e+00> : vector<72xf32>
    %67 = vector.multi_reduction <add>, %66, %cst_48 [1] : vector<72x72xf32> to vector<72xf32>
    %68 = vector.shape_cast %67 : vector<72xf32> to vector<72x1xf32>
    %69 = tpu.reciprocal %68 {approx = true} : vector<72x1xf32> -> vector<72x1xf32>
    %70 = arith.truncf %66 : vector<72x72xf32> to vector<72x72xbf16>
    %71 = arith.truncf %55 : vector<72x4xf32> to vector<72x4xbf16>
    %cst_49 = arith.constant dense<0.000000e+00> : vector<72x4xf32>
    %72 = tpu.matmul %70, %71, %cst_49 {dimension_numbers = #tpu.dot_dimension_numbers<[1], [0], [0], [1], [0, 0, 1, 1], [], []>} : vector<72x72xbf16>, vector<72x4xbf16>, vector<72x4xf32> -> vector<72x4xf32>
    %73 = vector.broadcast %69 : vector<72x1xf32> to vector<72x4xf32>
    %74 = arith.mulf %72, %73 : vector<72x4xf32>
    %c0_50 = arith.constant 0 : index
    %c0_51 = arith.constant 0 : index
    %c0_52 = arith.constant 0 : index
    %c0_53 = arith.constant 0 : index
    %75 = vector.load %arg7[%c0_50, %c0_51, %c0_52, %c0_53] : memref<1x4x4x16xbf16, #tpu.memory_space<vmem>>, vector<1x1x4x16xbf16>
    %76 = vector.shape_cast %75 : vector<1x1x4x16xbf16> to vector<4x16xbf16>
    %77 = arith.truncf %74 : vector<72x4xf32> to vector<72x4xbf16>
    %cst_54 = arith.constant dense<0.000000e+00> : vector<72x16xf32>
    %78 = tpu.matmul %77, %76, %cst_54 {dimension_numbers = #tpu.dot_dimension_numbers<[1], [0], [0], [1], [0, 0, 1, 1], [], []>} : vector<72x4xbf16>, vector<4x16xbf16>, vector<72x16xf32> -> vector<72x16xf32>
    %c0_55 = arith.constant 0 : index
    %c0_56 = arith.constant 0 : index
    %c1_57 = arith.constant 1 : index
    %c0_58 = arith.constant 0 : index
    %c0_59 = arith.constant 0 : index
    %79 = vector.load %arg5[%c0_55, %c0_56, %c1_57, %c0_58, %c0_59] : memref<1x3x4x16x4xbf16, #tpu.memory_space<vmem>>, vector<1x1x1x16x4xbf16>
    %80 = vector.shape_cast %79 : vector<1x1x1x16x4xbf16> to vector<16x4xbf16>
    %cst_60 = arith.constant dense<0.000000e+00> : vector<72x4xf32>
    %81 = tpu.matmul %34, %80, %cst_60 {dimension_numbers = #tpu.dot_dimension_numbers<[1], [0], [0], [1], [0, 0, 1, 1], [], []>} : vector<72x16xbf16>, vector<16x4xbf16>, vector<72x4xf32> -> vector<72x4xf32>
    %c0_61 = arith.constant 0 : index
    %c0_62 = arith.constant 0 : index
    %c1_63 = arith.constant 1 : index
    %c0_64 = arith.constant 0 : index
    %c0_65 = arith.constant 0 : index
    %82 = vector.load %arg6[%c0_61, %c0_62, %c1_63, %c0_64, %c0_65] : memref<1x3x4x1x4xf32, #tpu.memory_space<vmem>>, vector<1x1x1x1x4xf32>
    %83 = vector.shape_cast %82 : vector<1x1x1x1x4xf32> to vector<1x4xf32>
    %84 = vector.broadcast %83 : vector<1x4xf32> to vector<72x4xf32>
    %85 = arith.addf %81, %84 : vector<72x4xf32>
    %c0_66 = arith.constant 0 : index
    %c1_67 = arith.constant 1 : index
    %c1_68 = arith.constant 1 : index
    %c0_69 = arith.constant 0 : index
    %c0_70 = arith.constant 0 : index
    %86 = vector.load %arg5[%c0_66, %c1_67, %c1_68, %c0_69, %c0_70] : memref<1x3x4x16x4xbf16, #tpu.memory_space<vmem>>, vector<1x1x1x16x4xbf16>
    %87 = vector.shape_cast %86 : vector<1x1x1x16x4xbf16> to vector<16x4xbf16>
    %cst_71 = arith.constant dense<0.000000e+00> : vector<72x4xf32>
    %88 = tpu.matmul %34, %87, %cst_71 {dimension_numbers = #tpu.dot_dimension_numbers<[1], [0], [0], [1], [0, 0, 1, 1], [], []>} : vector<72x16xbf16>, vector<16x4xbf16>, vector<72x4xf32> -> vector<72x4xf32>
    %c0_72 = arith.constant 0 : index
    %c1_73 = arith.constant 1 : index
    %c1_74 = arith.constant 1 : index
    %c0_75 = arith.constant 0 : index
    %c0_76 = arith.constant 0 : index
    %89 = vector.load %arg6[%c0_72, %c1_73, %c1_74, %c0_75, %c0_76] : memref<1x3x4x1x4xf32, #tpu.memory_space<vmem>>, vector<1x1x1x1x4xf32>
    %90 = vector.shape_cast %89 : vector<1x1x1x1x4xf32> to vector<1x4xf32>
    %91 = vector.broadcast %90 : vector<1x4xf32> to vector<72x4xf32>
    %92 = arith.addf %88, %91 : vector<72x4xf32>
    %c0_77 = arith.constant 0 : index
    %c2_78 = arith.constant 2 : index
    %c1_79 = arith.constant 1 : index
    %c0_80 = arith.constant 0 : index
    %c0_81 = arith.constant 0 : index
    %93 = vector.load %arg5[%c0_77, %c2_78, %c1_79, %c0_80, %c0_81] : memref<1x3x4x16x4xbf16, #tpu.memory_space<vmem>>, vector<1x1x1x16x4xbf16>
    %94 = vector.shape_cast %93 : vector<1x1x1x16x4xbf16> to vector<16x4xbf16>
    %cst_82 = arith.constant dense<0.000000e+00> : vector<72x4xf32>
    %95 = tpu.matmul %34, %94, %cst_82 {dimension_numbers = #tpu.dot_dimension_numbers<[1], [0], [0], [1], [0, 0, 1, 1], [], []>} : vector<72x16xbf16>, vector<16x4xbf16>, vector<72x4xf32> -> vector<72x4xf32>
    %c0_83 = arith.constant 0 : index
    %c2_84 = arith.constant 2 : index
    %c1_85 = arith.constant 1 : index
    %c0_86 = arith.constant 0 : index
    %c0_87 = arith.constant 0 : index
    %96 = vector.load %arg6[%c0_83, %c2_84, %c1_85, %c0_86, %c0_87] : memref<1x3x4x1x4xf32, #tpu.memory_space<vmem>>, vector<1x1x1x1x4xf32>
    %97 = vector.shape_cast %96 : vector<1x1x1x1x4xf32> to vector<1x4xf32>
    %98 = vector.broadcast %97 : vector<1x4xf32> to vector<72x4xf32>
    %99 = arith.addf %95, %98 : vector<72x4xf32>
    %cst_88 = arith.constant 5.000000e-01 : f32
    %100 = vector.broadcast %cst_88 : f32 to vector<72x4xf32>
    %101 = arith.mulf %85, %100 : vector<72x4xf32>
    %102 = arith.truncf %101 : vector<72x4xf32> to vector<72x4xbf16>
    %103 = arith.truncf %92 : vector<72x4xf32> to vector<72x4xbf16>
    %cst_89 = arith.constant dense<0.000000e+00> : vector<72x72xf32>
    %104 = tpu.matmul %102, %103, %cst_89 {dimension_numbers = #tpu.dot_dimension_numbers<[1], [1], [0], [0], [0, 0, 1, 0], [], []>} : vector<72x4xbf16>, vector<72x4xbf16>, vector<72x72xf32> -> vector<72x72xf32>
    %105 = arith.addf %104, %9 : vector<72x72xf32>
    %cst_90 = arith.constant dense<0xFF800000> : vector<72xf32>
    %106 = vector.multi_reduction <maximumf>, %105, %cst_90 [1] : vector<72x72xf32> to vector<72xf32>
    %107 = vector.shape_cast %106 : vector<72xf32> to vector<72x1xf32>
    %108 = vector.broadcast %107 : vector<72x1xf32> to vector<72x72xf32>
    %109 = arith.subf %105, %108 : vector<72x72xf32>
    %110 = math.exp %109 : vector<72x72xf32>
    %cst_91 = arith.constant dense<0.000000e+00> : vector<72xf32>
    %111 = vector.multi_reduction <add>, %110, %cst_91 [1] : vector<72x72xf32> to vector<72xf32>
    %112 = vector.shape_cast %111 : vector<72xf32> to vector<72x1xf32>
    %113 = tpu.reciprocal %112 {approx = true} : vector<72x1xf32> -> vector<72x1xf32>
    %114 = arith.truncf %110 : vector<72x72xf32> to vector<72x72xbf16>
    %115 = arith.truncf %99 : vector<72x4xf32> to vector<72x4xbf16>
    %cst_92 = arith.constant dense<0.000000e+00> : vector<72x4xf32>
    %116 = tpu.matmul %114, %115, %cst_92 {dimension_numbers = #tpu.dot_dimension_numbers<[1], [0], [0], [1], [0, 0, 1, 1], [], []>} : vector<72x72xbf16>, vector<72x4xbf16>, vector<72x4xf32> -> vector<72x4xf32>
    %117 = vector.broadcast %113 : vector<72x1xf32> to vector<72x4xf32>
    %118 = arith.mulf %116, %117 : vector<72x4xf32>
    %c0_93 = arith.constant 0 : index
    %c1_94 = arith.constant 1 : index
    %c0_95 = arith.constant 0 : index
    %c0_96 = arith.constant 0 : index
    %119 = vector.load %arg7[%c0_93, %c1_94, %c0_95, %c0_96] : memref<1x4x4x16xbf16, #tpu.memory_space<vmem>>, vector<1x1x4x16xbf16>
    %120 = vector.shape_cast %119 : vector<1x1x4x16xbf16> to vector<4x16xbf16>
    %121 = arith.truncf %118 : vector<72x4xf32> to vector<72x4xbf16>
    %cst_97 = arith.constant dense<0.000000e+00> : vector<72x16xf32>
    %122 = tpu.matmul %121, %120, %cst_97 {dimension_numbers = #tpu.dot_dimension_numbers<[1], [0], [0], [1], [0, 0, 1, 1], [], []>} : vector<72x4xbf16>, vector<4x16xbf16>, vector<72x16xf32> -> vector<72x16xf32>
    %123 = arith.addf %78, %122 : vector<72x16xf32>
    %c0_98 = arith.constant 0 : index
    %c0_99 = arith.constant 0 : index
    %c2_100 = arith.constant 2 : index
    %c0_101 = arith.constant 0 : index
    %c0_102 = arith.constant 0 : index
    %124 = vector.load %arg5[%c0_98, %c0_99, %c2_100, %c0_101, %c0_102] : memref<1x3x4x16x4xbf16, #tpu.memory_space<vmem>>, vector<1x1x1x16x4xbf16>
    %125 = vector.shape_cast %124 : vector<1x1x1x16x4xbf16> to vector<16x4xbf16>
    %cst_103 = arith.constant dense<0.000000e+00> : vector<72x4xf32>
    %126 = tpu.matmul %34, %125, %cst_103 {dimension_numbers = #tpu.dot_dimension_numbers<[1], [0], [0], [1], [0, 0, 1, 1], [], []>} : vector<72x16xbf16>, vector<16x4xbf16>, vector<72x4xf32> -> vector<72x4xf32>
    %c0_104 = arith.constant 0 : index
    %c0_105 = arith.constant 0 : index
    %c2_106 = arith.constant 2 : index
    %c0_107 = arith.constant 0 : index
    %c0_108 = arith.constant 0 : index
    %127 = vector.load %arg6[%c0_104, %c0_105, %c2_106, %c0_107, %c0_108] : memref<1x3x4x1x4xf32, #tpu.memory_space<vmem>>, vector<1x1x1x1x4xf32>
    %128 = vector.shape_cast %127 : vector<1x1x1x1x4xf32> to vector<1x4xf32>
    %129 = vector.broadcast %128 : vector<1x4xf32> to vector<72x4xf32>
    %130 = arith.addf %126, %129 : vector<72x4xf32>
    %c0_109 = arith.constant 0 : index
    %c1_110 = arith.constant 1 : index
    %c2_111 = arith.constant 2 : index
    %c0_112 = arith.constant 0 : index
    %c0_113 = arith.constant 0 : index
    %131 = vector.load %arg5[%c0_109, %c1_110, %c2_111, %c0_112, %c0_113] : memref<1x3x4x16x4xbf16, #tpu.memory_space<vmem>>, vector<1x1x1x16x4xbf16>
    %132 = vector.shape_cast %131 : vector<1x1x1x16x4xbf16> to vector<16x4xbf16>
    %cst_114 = arith.constant dense<0.000000e+00> : vector<72x4xf32>
    %133 = tpu.matmul %34, %132, %cst_114 {dimension_numbers = #tpu.dot_dimension_numbers<[1], [0], [0], [1], [0, 0, 1, 1], [], []>} : vector<72x16xbf16>, vector<16x4xbf16>, vector<72x4xf32> -> vector<72x4xf32>
    %c0_115 = arith.constant 0 : index
    %c1_116 = arith.constant 1 : index
    %c2_117 = arith.constant 2 : index
    %c0_118 = arith.constant 0 : index
    %c0_119 = arith.constant 0 : index
    %134 = vector.load %arg6[%c0_115, %c1_116, %c2_117, %c0_118, %c0_119] : memref<1x3x4x1x4xf32, #tpu.memory_space<vmem>>, vector<1x1x1x1x4xf32>
    %135 = vector.shape_cast %134 : vector<1x1x1x1x4xf32> to vector<1x4xf32>
    %136 = vector.broadcast %135 : vector<1x4xf32> to vector<72x4xf32>
    %137 = arith.addf %133, %136 : vector<72x4xf32>
    %c0_120 = arith.constant 0 : index
    %c2_121 = arith.constant 2 : index
    %c2_122 = arith.constant 2 : index
    %c0_123 = arith.constant 0 : index
    %c0_124 = arith.constant 0 : index
    %138 = vector.load %arg5[%c0_120, %c2_121, %c2_122, %c0_123, %c0_124] : memref<1x3x4x16x4xbf16, #tpu.memory_space<vmem>>, vector<1x1x1x16x4xbf16>
    %139 = vector.shape_cast %138 : vector<1x1x1x16x4xbf16> to vector<16x4xbf16>
    %cst_125 = arith.constant dense<0.000000e+00> : vector<72x4xf32>
    %140 = tpu.matmul %34, %139, %cst_125 {dimension_numbers = #tpu.dot_dimension_numbers<[1], [0], [0], [1], [0, 0, 1, 1], [], []>} : vector<72x16xbf16>, vector<16x4xbf16>, vector<72x4xf32> -> vector<72x4xf32>
    %c0_126 = arith.constant 0 : index
    %c2_127 = arith.constant 2 : index
    %c2_128 = arith.constant 2 : index
    %c0_129 = arith.constant 0 : index
    %c0_130 = arith.constant 0 : index
    %141 = vector.load %arg6[%c0_126, %c2_127, %c2_128, %c0_129, %c0_130] : memref<1x3x4x1x4xf32, #tpu.memory_space<vmem>>, vector<1x1x1x1x4xf32>
    %142 = vector.shape_cast %141 : vector<1x1x1x1x4xf32> to vector<1x4xf32>
    %143 = vector.broadcast %142 : vector<1x4xf32> to vector<72x4xf32>
    %144 = arith.addf %140, %143 : vector<72x4xf32>
    %cst_131 = arith.constant 5.000000e-01 : f32
    %145 = vector.broadcast %cst_131 : f32 to vector<72x4xf32>
    %146 = arith.mulf %130, %145 : vector<72x4xf32>
    %147 = arith.truncf %146 : vector<72x4xf32> to vector<72x4xbf16>
    %148 = arith.truncf %137 : vector<72x4xf32> to vector<72x4xbf16>
    %cst_132 = arith.constant dense<0.000000e+00> : vector<72x72xf32>
    %149 = tpu.matmul %147, %148, %cst_132 {dimension_numbers = #tpu.dot_dimension_numbers<[1], [1], [0], [0], [0, 0, 1, 0], [], []>} : vector<72x4xbf16>, vector<72x4xbf16>, vector<72x72xf32> -> vector<72x72xf32>
    %150 = arith.addf %149, %9 : vector<72x72xf32>
    %cst_133 = arith.constant dense<0xFF800000> : vector<72xf32>
    %151 = vector.multi_reduction <maximumf>, %150, %cst_133 [1] : vector<72x72xf32> to vector<72xf32>
    %152 = vector.shape_cast %151 : vector<72xf32> to vector<72x1xf32>
    %153 = vector.broadcast %152 : vector<72x1xf32> to vector<72x72xf32>
    %154 = arith.subf %150, %153 : vector<72x72xf32>
    %155 = math.exp %154 : vector<72x72xf32>
    %cst_134 = arith.constant dense<0.000000e+00> : vector<72xf32>
    %156 = vector.multi_reduction <add>, %155, %cst_134 [1] : vector<72x72xf32> to vector<72xf32>
    %157 = vector.shape_cast %156 : vector<72xf32> to vector<72x1xf32>
    %158 = tpu.reciprocal %157 {approx = true} : vector<72x1xf32> -> vector<72x1xf32>
    %159 = arith.truncf %155 : vector<72x72xf32> to vector<72x72xbf16>
    %160 = arith.truncf %144 : vector<72x4xf32> to vector<72x4xbf16>
    %cst_135 = arith.constant dense<0.000000e+00> : vector<72x4xf32>
    %161 = tpu.matmul %159, %160, %cst_135 {dimension_numbers = #tpu.dot_dimension_numbers<[1], [0], [0], [1], [0, 0, 1, 1], [], []>} : vector<72x72xbf16>, vector<72x4xbf16>, vector<72x4xf32> -> vector<72x4xf32>
    %162 = vector.broadcast %158 : vector<72x1xf32> to vector<72x4xf32>
    %163 = arith.mulf %161, %162 : vector<72x4xf32>
    %c0_136 = arith.constant 0 : index
    %c2_137 = arith.constant 2 : index
    %c0_138 = arith.constant 0 : index
    %c0_139 = arith.constant 0 : index
    %164 = vector.load %arg7[%c0_136, %c2_137, %c0_138, %c0_139] : memref<1x4x4x16xbf16, #tpu.memory_space<vmem>>, vector<1x1x4x16xbf16>
    %165 = vector.shape_cast %164 : vector<1x1x4x16xbf16> to vector<4x16xbf16>
    %166 = arith.truncf %163 : vector<72x4xf32> to vector<72x4xbf16>
    %cst_140 = arith.constant dense<0.000000e+00> : vector<72x16xf32>
    %167 = tpu.matmul %166, %165, %cst_140 {dimension_numbers = #tpu.dot_dimension_numbers<[1], [0], [0], [1], [0, 0, 1, 1], [], []>} : vector<72x4xbf16>, vector<4x16xbf16>, vector<72x16xf32> -> vector<72x16xf32>
    %168 = arith.addf %123, %167 : vector<72x16xf32>
    %c0_141 = arith.constant 0 : index
    %c0_142 = arith.constant 0 : index
    %c3 = arith.constant 3 : index
    %c0_143 = arith.constant 0 : index
    %c0_144 = arith.constant 0 : index
    %169 = vector.load %arg5[%c0_141, %c0_142, %c3, %c0_143, %c0_144] : memref<1x3x4x16x4xbf16, #tpu.memory_space<vmem>>, vector<1x1x1x16x4xbf16>
    %170 = vector.shape_cast %169 : vector<1x1x1x16x4xbf16> to vector<16x4xbf16>
    %cst_145 = arith.constant dense<0.000000e+00> : vector<72x4xf32>
    %171 = tpu.matmul %34, %170, %cst_145 {dimension_numbers = #tpu.dot_dimension_numbers<[1], [0], [0], [1], [0, 0, 1, 1], [], []>} : vector<72x16xbf16>, vector<16x4xbf16>, vector<72x4xf32> -> vector<72x4xf32>
    %c0_146 = arith.constant 0 : index
    %c0_147 = arith.constant 0 : index
    %c3_148 = arith.constant 3 : index
    %c0_149 = arith.constant 0 : index
    %c0_150 = arith.constant 0 : index
    %172 = vector.load %arg6[%c0_146, %c0_147, %c3_148, %c0_149, %c0_150] : memref<1x3x4x1x4xf32, #tpu.memory_space<vmem>>, vector<1x1x1x1x4xf32>
    %173 = vector.shape_cast %172 : vector<1x1x1x1x4xf32> to vector<1x4xf32>
    %174 = vector.broadcast %173 : vector<1x4xf32> to vector<72x4xf32>
    %175 = arith.addf %171, %174 : vector<72x4xf32>
    %c0_151 = arith.constant 0 : index
    %c1_152 = arith.constant 1 : index
    %c3_153 = arith.constant 3 : index
    %c0_154 = arith.constant 0 : index
    %c0_155 = arith.constant 0 : index
    %176 = vector.load %arg5[%c0_151, %c1_152, %c3_153, %c0_154, %c0_155] : memref<1x3x4x16x4xbf16, #tpu.memory_space<vmem>>, vector<1x1x1x16x4xbf16>
    %177 = vector.shape_cast %176 : vector<1x1x1x16x4xbf16> to vector<16x4xbf16>
    %cst_156 = arith.constant dense<0.000000e+00> : vector<72x4xf32>
    %178 = tpu.matmul %34, %177, %cst_156 {dimension_numbers = #tpu.dot_dimension_numbers<[1], [0], [0], [1], [0, 0, 1, 1], [], []>} : vector<72x16xbf16>, vector<16x4xbf16>, vector<72x4xf32> -> vector<72x4xf32>
    %c0_157 = arith.constant 0 : index
    %c1_158 = arith.constant 1 : index
    %c3_159 = arith.constant 3 : index
    %c0_160 = arith.constant 0 : index
    %c0_161 = arith.constant 0 : index
    %179 = vector.load %arg6[%c0_157, %c1_158, %c3_159, %c0_160, %c0_161] : memref<1x3x4x1x4xf32, #tpu.memory_space<vmem>>, vector<1x1x1x1x4xf32>
    %180 = vector.shape_cast %179 : vector<1x1x1x1x4xf32> to vector<1x4xf32>
    %181 = vector.broadcast %180 : vector<1x4xf32> to vector<72x4xf32>
    %182 = arith.addf %178, %181 : vector<72x4xf32>
    %c0_162 = arith.constant 0 : index
    %c2_163 = arith.constant 2 : index
    %c3_164 = arith.constant 3 : index
    %c0_165 = arith.constant 0 : index
    %c0_166 = arith.constant 0 : index
    %183 = vector.load %arg5[%c0_162, %c2_163, %c3_164, %c0_165, %c0_166] : memref<1x3x4x16x4xbf16, #tpu.memory_space<vmem>>, vector<1x1x1x16x4xbf16>
    %184 = vector.shape_cast %183 : vector<1x1x1x16x4xbf16> to vector<16x4xbf16>
    %cst_167 = arith.constant dense<0.000000e+00> : vector<72x4xf32>
    %185 = tpu.matmul %34, %184, %cst_167 {dimension_numbers = #tpu.dot_dimension_numbers<[1], [0], [0], [1], [0, 0, 1, 1], [], []>} : vector<72x16xbf16>, vector<16x4xbf16>, vector<72x4xf32> -> vector<72x4xf32>
    %c0_168 = arith.constant 0 : index
    %c2_169 = arith.constant 2 : index
    %c3_170 = arith.constant 3 : index
    %c0_171 = arith.constant 0 : index
    %c0_172 = arith.constant 0 : index
    %186 = vector.load %arg6[%c0_168, %c2_169, %c3_170, %c0_171, %c0_172] : memref<1x3x4x1x4xf32, #tpu.memory_space<vmem>>, vector<1x1x1x1x4xf32>
    %187 = vector.shape_cast %186 : vector<1x1x1x1x4xf32> to vector<1x4xf32>
    %188 = vector.broadcast %187 : vector<1x4xf32> to vector<72x4xf32>
    %189 = arith.addf %185, %188 : vector<72x4xf32>
    %cst_173 = arith.constant 5.000000e-01 : f32
    %190 = vector.broadcast %cst_173 : f32 to vector<72x4xf32>
    %191 = arith.mulf %175, %190 : vector<72x4xf32>
    %192 = arith.truncf %191 : vector<72x4xf32> to vector<72x4xbf16>
    %193 = arith.truncf %182 : vector<72x4xf32> to vector<72x4xbf16>
    %cst_174 = arith.constant dense<0.000000e+00> : vector<72x72xf32>
    %194 = tpu.matmul %192, %193, %cst_174 {dimension_numbers = #tpu.dot_dimension_numbers<[1], [1], [0], [0], [0, 0, 1, 0], [], []>} : vector<72x4xbf16>, vector<72x4xbf16>, vector<72x72xf32> -> vector<72x72xf32>
    %195 = arith.addf %194, %9 : vector<72x72xf32>
    %cst_175 = arith.constant dense<0xFF800000> : vector<72xf32>
    %196 = vector.multi_reduction <maximumf>, %195, %cst_175 [1] : vector<72x72xf32> to vector<72xf32>
    %197 = vector.shape_cast %196 : vector<72xf32> to vector<72x1xf32>
    %198 = vector.broadcast %197 : vector<72x1xf32> to vector<72x72xf32>
    %199 = arith.subf %195, %198 : vector<72x72xf32>
    %200 = math.exp %199 : vector<72x72xf32>
    %cst_176 = arith.constant dense<0.000000e+00> : vector<72xf32>
    %201 = vector.multi_reduction <add>, %200, %cst_176 [1] : vector<72x72xf32> to vector<72xf32>
    %202 = vector.shape_cast %201 : vector<72xf32> to vector<72x1xf32>
    %203 = tpu.reciprocal %202 {approx = true} : vector<72x1xf32> -> vector<72x1xf32>
    %204 = arith.truncf %200 : vector<72x72xf32> to vector<72x72xbf16>
    %205 = arith.truncf %189 : vector<72x4xf32> to vector<72x4xbf16>
    %cst_177 = arith.constant dense<0.000000e+00> : vector<72x4xf32>
    %206 = tpu.matmul %204, %205, %cst_177 {dimension_numbers = #tpu.dot_dimension_numbers<[1], [0], [0], [1], [0, 0, 1, 1], [], []>} : vector<72x72xbf16>, vector<72x4xbf16>, vector<72x4xf32> -> vector<72x4xf32>
    %207 = vector.broadcast %203 : vector<72x1xf32> to vector<72x4xf32>
    %208 = arith.mulf %206, %207 : vector<72x4xf32>
    %c0_178 = arith.constant 0 : index
    %c3_179 = arith.constant 3 : index
    %c0_180 = arith.constant 0 : index
    %c0_181 = arith.constant 0 : index
    %209 = vector.load %arg7[%c0_178, %c3_179, %c0_180, %c0_181] : memref<1x4x4x16xbf16, #tpu.memory_space<vmem>>, vector<1x1x4x16xbf16>
    %210 = vector.shape_cast %209 : vector<1x1x4x16xbf16> to vector<4x16xbf16>
    %211 = arith.truncf %208 : vector<72x4xf32> to vector<72x4xbf16>
    %cst_182 = arith.constant dense<0.000000e+00> : vector<72x16xf32>
    %212 = tpu.matmul %211, %210, %cst_182 {dimension_numbers = #tpu.dot_dimension_numbers<[1], [0], [0], [1], [0, 0, 1, 1], [], []>} : vector<72x4xbf16>, vector<4x16xbf16>, vector<72x16xf32> -> vector<72x16xf32>
    %213 = arith.addf %168, %212 : vector<72x16xf32>
    %214 = arith.addf %3, %213 : vector<72x16xf32>
    %c0_183 = arith.constant 0 : index
    %c0_184 = arith.constant 0 : index
    %c0_185 = arith.constant 0 : index
    %215 = vector.load %arg8[%c0_183, %c0_184, %c0_185] : memref<1x1x16xf32, #tpu.memory_space<vmem>>, vector<1x1x16xf32>
    %216 = vector.shape_cast %215 : vector<1x1x16xf32> to vector<1x16xf32>
    %217 = vector.broadcast %216 : vector<1x16xf32> to vector<72x16xf32>
    %218 = arith.addf %214, %217 : vector<72x16xf32>
    %c0_186 = arith.constant 0 : index
    %c0_187 = arith.constant 0 : index
    %c0_188 = arith.constant 0 : index
    %219 = vector.load %arg9[%c0_186, %c0_187, %c0_188] : memref<1x1x16xf32, #tpu.memory_space<vmem>>, vector<1x1x16xf32>
    %220 = vector.shape_cast %219 : vector<1x1x16xf32> to vector<1x16xf32>
    %c0_189 = arith.constant 0 : index
    %c0_190 = arith.constant 0 : index
    %c0_191 = arith.constant 0 : index
    %221 = vector.load %arg10[%c0_189, %c0_190, %c0_191] : memref<1x1x16xf32, #tpu.memory_space<vmem>>, vector<1x1x16xf32>
    %222 = vector.shape_cast %221 : vector<1x1x16xf32> to vector<1x16xf32>
    %cst_192 = arith.constant dense<0.000000e+00> : vector<72xf32>
    %223 = vector.multi_reduction <add>, %218, %cst_192 [1] : vector<72x16xf32> to vector<72xf32>
    %224 = vector.shape_cast %223 : vector<72xf32> to vector<72x1xf32>
    %cst_193 = arith.constant 1.600000e+01 : f32
    %225 = vector.broadcast %cst_193 : f32 to vector<72x1xf32>
    %226 = arith.divf %224, %225 : vector<72x1xf32>
    %227 = vector.broadcast %226 : vector<72x1xf32> to vector<72x16xf32>
    %228 = arith.subf %218, %227 : vector<72x16xf32>
    %229 = arith.mulf %228, %228 : vector<72x16xf32>
    %cst_194 = arith.constant dense<0.000000e+00> : vector<72xf32>
    %230 = vector.multi_reduction <add>, %229, %cst_194 [1] : vector<72x16xf32> to vector<72xf32>
    %231 = vector.shape_cast %230 : vector<72xf32> to vector<72x1xf32>
    %cst_195 = arith.constant 1.600000e+01 : f32
    %232 = vector.broadcast %cst_195 : f32 to vector<72x1xf32>
    %233 = arith.divf %231, %232 : vector<72x1xf32>
    %cst_196 = arith.constant 9.99999974E-6 : f32
    %234 = vector.broadcast %cst_196 : f32 to vector<72x1xf32>
    %235 = arith.addf %233, %234 : vector<72x1xf32>
    %236 = math.rsqrt %235 : vector<72x1xf32>
    %237 = vector.broadcast %236 : vector<72x1xf32> to vector<72x16xf32>
    %238 = arith.mulf %228, %237 : vector<72x16xf32>
    %239 = vector.broadcast %220 : vector<1x16xf32> to vector<72x16xf32>
    %240 = arith.mulf %238, %239 : vector<72x16xf32>
    %241 = vector.broadcast %222 : vector<1x16xf32> to vector<72x16xf32>
    %242 = arith.addf %240, %241 : vector<72x16xf32>
    %c0_197 = arith.constant 0 : index
    %c0_198 = arith.constant 0 : index
    %c0_199 = arith.constant 0 : index
    %243 = vector.load %arg11[%c0_197, %c0_198, %c0_199] : memref<1x16x64xbf16, #tpu.memory_space<vmem>>, vector<1x16x64xbf16>
    %244 = vector.shape_cast %243 : vector<1x16x64xbf16> to vector<16x64xbf16>
    %245 = arith.truncf %242 : vector<72x16xf32> to vector<72x16xbf16>
    %cst_200 = arith.constant dense<0.000000e+00> : vector<72x64xf32>
    %246 = tpu.matmul %245, %244, %cst_200 {dimension_numbers = #tpu.dot_dimension_numbers<[1], [0], [0], [1], [0, 0, 1, 1], [], []>} : vector<72x16xbf16>, vector<16x64xbf16>, vector<72x64xf32> -> vector<72x64xf32>
    %c0_201 = arith.constant 0 : index
    %c0_202 = arith.constant 0 : index
    %c0_203 = arith.constant 0 : index
    %247 = vector.load %arg12[%c0_201, %c0_202, %c0_203] : memref<1x1x64xf32, #tpu.memory_space<vmem>>, vector<1x1x64xf32>
    %248 = vector.shape_cast %247 : vector<1x1x64xf32> to vector<1x64xf32>
    %249 = vector.broadcast %248 : vector<1x64xf32> to vector<72x64xf32>
    %250 = arith.addf %246, %249 : vector<72x64xf32>
    %cst_204 = arith.constant 5.000000e-01 : f32
    %251 = vector.broadcast %cst_204 : f32 to vector<72x64xf32>
    %252 = arith.mulf %251, %250 : vector<72x64xf32>
    %cst_205 = arith.constant 0.707106769 : f32
    %253 = vector.broadcast %cst_205 : f32 to vector<72x64xf32>
    %254 = arith.mulf %250, %253 : vector<72x64xf32>
    %255 = math.absf %254 : vector<72x64xf32>
    %cst_206 = arith.constant 0.327591091 : f32
    %256 = vector.broadcast %cst_206 : f32 to vector<72x64xf32>
    %257 = arith.mulf %256, %255 : vector<72x64xf32>
    %cst_207 = arith.constant 1.000000e+00 : f32
    %258 = vector.broadcast %cst_207 : f32 to vector<72x64xf32>
    %259 = arith.addf %258, %257 : vector<72x64xf32>
    %260 = tpu.reciprocal %259 {approx = true} : vector<72x64xf32> -> vector<72x64xf32>
    %cst_208 = arith.constant 1.06140542 : f32
    %261 = vector.broadcast %cst_208 : f32 to vector<72x64xf32>
    %262 = arith.mulf %261, %260 : vector<72x64xf32>
    %cst_209 = arith.constant -1.45315206 : f32
    %263 = vector.broadcast %cst_209 : f32 to vector<72x64xf32>
    %264 = arith.addf %262, %263 : vector<72x64xf32>
    %265 = arith.mulf %264, %260 : vector<72x64xf32>
    %cst_210 = arith.constant 1.42141378 : f32
    %266 = vector.broadcast %cst_210 : f32 to vector<72x64xf32>
    %267 = arith.addf %265, %266 : vector<72x64xf32>
    %268 = arith.mulf %267, %260 : vector<72x64xf32>
    %cst_211 = arith.constant -0.284496725 : f32
    %269 = vector.broadcast %cst_211 : f32 to vector<72x64xf32>
    %270 = arith.addf %268, %269 : vector<72x64xf32>
    %271 = arith.mulf %270, %260 : vector<72x64xf32>
    %cst_212 = arith.constant 0.254829586 : f32
    %272 = vector.broadcast %cst_212 : f32 to vector<72x64xf32>
    %273 = arith.addf %271, %272 : vector<72x64xf32>
    %274 = arith.mulf %273, %260 : vector<72x64xf32>
    %275 = arith.mulf %255, %255 : vector<72x64xf32>
    %cst_213 = arith.constant 0.000000e+00 : f32
    %276 = vector.broadcast %cst_213 : f32 to vector<72x64xf32>
    %277 = arith.subf %276, %275 : vector<72x64xf32>
    %278 = math.exp %277 : vector<72x64xf32>
    %279 = arith.mulf %274, %278 : vector<72x64xf32>
    %cst_214 = arith.constant 1.000000e+00 : f32
    %280 = vector.broadcast %cst_214 : f32 to vector<72x64xf32>
    %281 = arith.subf %280, %279 : vector<72x64xf32>
    %cst_215 = arith.constant 0.000000e+00 : f32
    %282 = vector.broadcast %cst_215 : f32 to vector<72x64xf32>
    %283 = arith.cmpf oge, %254, %282 : vector<72x64xf32>
    %cst_216 = arith.constant 0.000000e+00 : f32
    %284 = vector.broadcast %cst_216 : f32 to vector<72x64xf32>
    %285 = arith.subf %284, %281 : vector<72x64xf32>
    %286 = arith.select %283, %281, %285 : vector<72x64xi1>, vector<72x64xf32>
    %cst_217 = arith.constant 1.000000e+00 : f32
    %287 = vector.broadcast %cst_217 : f32 to vector<72x64xf32>
    %288 = arith.addf %287, %286 : vector<72x64xf32>
    %289 = arith.mulf %252, %288 : vector<72x64xf32>
    %c0_218 = arith.constant 0 : index
    %c0_219 = arith.constant 0 : index
    %c0_220 = arith.constant 0 : index
    %290 = vector.load %arg13[%c0_218, %c0_219, %c0_220] : memref<1x64x16xbf16, #tpu.memory_space<vmem>>, vector<1x64x16xbf16>
    %291 = vector.shape_cast %290 : vector<1x64x16xbf16> to vector<64x16xbf16>
    %292 = arith.truncf %289 : vector<72x64xf32> to vector<72x64xbf16>
    %cst_221 = arith.constant dense<0.000000e+00> : vector<72x16xf32>
    %293 = tpu.matmul %292, %291, %cst_221 {dimension_numbers = #tpu.dot_dimension_numbers<[1], [0], [0], [1], [0, 0, 1, 1], [], []>} : vector<72x64xbf16>, vector<64x16xbf16>, vector<72x16xf32> -> vector<72x16xf32>
    %c0_222 = arith.constant 0 : index
    %c0_223 = arith.constant 0 : index
    %c0_224 = arith.constant 0 : index
    %294 = vector.load %arg14[%c0_222, %c0_223, %c0_224] : memref<1x1x16xf32, #tpu.memory_space<vmem>>, vector<1x1x16xf32>
    %295 = vector.shape_cast %294 : vector<1x1x16xf32> to vector<1x16xf32>
    %296 = vector.broadcast %295 : vector<1x16xf32> to vector<72x16xf32>
    %297 = arith.addf %293, %296 : vector<72x16xf32>
    %298 = arith.addf %218, %297 : vector<72x16xf32>
    %c0_225 = arith.constant 0 : index
    %c0_226 = arith.constant 0 : index
    %299 = vector.load %arg16[%c0_225, %c0_226] : memref<72x16xf32, #tpu.memory_space<vmem>>, vector<72x16xf32>
    tpu.vector_store %arg16[%c0_225, %c0_226], %298 {strides = array<i32>} : memref<72x16xf32, #tpu.memory_space<vmem>>, vector<72x16xf32>,
    %c0_i32_227 = arith.constant 0 : i32
    %300 = arith.cmpi eq, %arg1, %c0_i32_227 : i32
    %301 = arith.extui %300 : i1 to i32
    %c0_i32_228 = arith.constant 0 : i32
    %302 = arith.cmpi ne, %301, %c0_i32_228 : i32
    scf.if %302 {
      %c0_229 = arith.constant 0 : index
      %c0_230 = arith.constant 0 : index
      %c0_231 = arith.constant 0 : index
      %303 = vector.load %arg15[%c0_229, %c0_230, %c0_231] : memref<1x72x16xf32, #tpu.memory_space<vmem>>, vector<1x72x16xf32>
      %304 = vector.shape_cast %303 : vector<1x72x16xf32> to vector<72x16xf32>
      %305 = vector.shape_cast %298 : vector<72x16xf32> to vector<1x72x16xf32>
      tpu.vector_store %arg15[%c0_229, %c0_230, %c0_231], %305 {strides = array<i32>} : memref<1x72x16xf32, #tpu.memory_space<vmem>>, vector<1x72x16xf32>,
    } else {
    }
    return
  }
  func.func @transform_0(%arg0: i32, %arg1: i32) -> (i32, i32, i32) {
    %c0_i32 = arith.constant 0 : i32
    %c0_i32_0 = arith.constant 0 : i32
    %c0_i32_1 = arith.constant 0 : i32
    return %arg0, %c0_i32, %c0_i32_0 : i32, i32, i32
  }
  func.func @transform_1(%arg0: i32, %arg1: i32) -> (i32, i32, i32) {
    %c0_i32 = arith.constant 0 : i32
    %c0_i32_0 = arith.constant 0 : i32
    %c0_i32_1 = arith.constant 0 : i32
    return %arg1, %c0_i32, %c0_i32_0 : i32, i32, i32
  }
  func.func @transform_2(%arg0: i32, %arg1: i32) -> (i32, i32, i32) {
    %c0_i32 = arith.constant 0 : i32
    %c0_i32_0 = arith.constant 0 : i32
    %c0_i32_1 = arith.constant 0 : i32
    return %arg1, %c0_i32, %c0_i32_0 : i32, i32, i32
  }
  func.func @transform_3(%arg0: i32, %arg1: i32) -> (i32, i32, i32, i32, i32) {
    %c0_i32 = arith.constant 0 : i32
    %c0_i32_0 = arith.constant 0 : i32
    %c0_i32_1 = arith.constant 0 : i32
    %c0_i32_2 = arith.constant 0 : i32
    %c0_i32_3 = arith.constant 0 : i32
    return %arg1, %c0_i32, %c0_i32_0, %c0_i32_1, %c0_i32_2 : i32, i32, i32, i32, i32
  }
  func.func @transform_4(%arg0: i32, %arg1: i32) -> (i32, i32, i32, i32, i32) {
    %c0_i32 = arith.constant 0 : i32
    %c0_i32_0 = arith.constant 0 : i32
    %c0_i32_1 = arith.constant 0 : i32
    %c0_i32_2 = arith.constant 0 : i32
    %c0_i32_3 = arith.constant 0 : i32
    return %arg1, %c0_i32, %c0_i32_0, %c0_i32_1, %c0_i32_2 : i32, i32, i32, i32, i32
  }
  func.func @transform_5(%arg0: i32, %arg1: i32) -> (i32, i32, i32, i32) {
    %c0_i32 = arith.constant 0 : i32
    %c0_i32_0 = arith.constant 0 : i32
    %c0_i32_1 = arith.constant 0 : i32
    %c0_i32_2 = arith.constant 0 : i32
    return %arg1, %c0_i32, %c0_i32_0, %c0_i32_1 : i32, i32, i32, i32
  }
  func.func @transform_6(%arg0: i32, %arg1: i32) -> (i32, i32, i32) {
    %c0_i32 = arith.constant 0 : i32
    %c0_i32_0 = arith.constant 0 : i32
    %c0_i32_1 = arith.constant 0 : i32
    return %arg1, %c0_i32, %c0_i32_0 : i32, i32, i32
  }
  func.func @transform_7(%arg0: i32, %arg1: i32) -> (i32, i32, i32) {
    %c0_i32 = arith.constant 0 : i32
    %c0_i32_0 = arith.constant 0 : i32
    %c0_i32_1 = arith.constant 0 : i32
    return %arg1, %c0_i32, %c0_i32_0 : i32, i32, i32
  }
  func.func @transform_8(%arg0: i32, %arg1: i32) -> (i32, i32, i32) {
    %c0_i32 = arith.constant 0 : i32
    %c0_i32_0 = arith.constant 0 : i32
    %c0_i32_1 = arith.constant 0 : i32
    return %arg1, %c0_i32, %c0_i32_0 : i32, i32, i32
  }
  func.func @transform_9(%arg0: i32, %arg1: i32) -> (i32, i32, i32) {
    %c0_i32 = arith.constant 0 : i32
    %c0_i32_0 = arith.constant 0 : i32
    %c0_i32_1 = arith.constant 0 : i32
    return %arg1, %c0_i32, %c0_i32_0 : i32, i32, i32
  }
  func.func @transform_10(%arg0: i32, %arg1: i32) -> (i32, i32, i32) {
    %c0_i32 = arith.constant 0 : i32
    %c0_i32_0 = arith.constant 0 : i32
    %c0_i32_1 = arith.constant 0 : i32
    return %arg1, %c0_i32, %c0_i32_0 : i32, i32, i32
  }
  func.func @transform_11(%arg0: i32, %arg1: i32) -> (i32, i32, i32) {
    %c0_i32 = arith.constant 0 : i32
    %c0_i32_0 = arith.constant 0 : i32
    %c0_i32_1 = arith.constant 0 : i32
    return %arg1, %c0_i32, %c0_i32_0 : i32, i32, i32
  }
  func.func @transform_12(%arg0: i32, %arg1: i32) -> (i32, i32, i32) {
    %c0_i32 = arith.constant 0 : i32
    %c0_i32_0 = arith.constant 0 : i32
    %c0_i32_1 = arith.constant 0 : i32
    return %arg1, %c0_i32, %c0_i32_0 : i32, i32, i32
  }
  func.func @transform_13(%arg0: i32, %arg1: i32) -> (i32, i32, i32) {
    %c0_i32 = arith.constant 0 : i32
    %c0_i32_0 = arith.constant 0 : i32
    %c0_i32_1 = arith.constant 0 : i32
    return %arg0, %c0_i32, %c0_i32_0 : i32, i32, i32
  }
}

module attributes {stable_mosaic.version = 11 : i64} {
  func.func @_dec_head_loss_kernel(%arg0: memref<144x16xf32, #tpu.memory_space<vmem>>, %arg1: memref<1x16xf32, #tpu.memory_space<vmem>>, %arg2: memref<1x16xf32, #tpu.memory_space<vmem>>, %arg3: memref<16x256xbf16, #tpu.memory_space<vmem>>, %arg4: memref<1x256xf32, #tpu.memory_space<vmem>>, %arg5: memref<144x256xf32, #tpu.memory_space<vmem>>, %arg6: memref<144x1xf32, #tpu.memory_space<vmem>>, %arg7: memref<144x256xf32, #tpu.memory_space<vmem>>, %arg8: memref<1x1xf32, #tpu.memory_space<smem>>) attributes {dimension_semantics = [], scalar_prefetch = 0 : i64, scratch_operands = 0 : i64, tpu.core_type = #tpu.core_type<tc>} {
    %c0 = arith.constant 0 : index
    %c0_0 = arith.constant 0 : index
    %0 = vector.load %arg0[%c0, %c0_0] : memref<144x16xf32, #tpu.memory_space<vmem>>, vector<144x16xf32>
    %c0_1 = arith.constant 0 : index
    %c0_2 = arith.constant 0 : index
    %1 = vector.load %arg1[%c0_1, %c0_2] : memref<1x16xf32, #tpu.memory_space<vmem>>, vector<1x16xf32>
    %c0_3 = arith.constant 0 : index
    %c0_4 = arith.constant 0 : index
    %2 = vector.load %arg2[%c0_3, %c0_4] : memref<1x16xf32, #tpu.memory_space<vmem>>, vector<1x16xf32>
    %cst = arith.constant dense<0.000000e+00> : vector<144xf32>
    %3 = vector.multi_reduction <add>, %0, %cst [1] : vector<144x16xf32> to vector<144xf32>
    %4 = vector.shape_cast %3 : vector<144xf32> to vector<144x1xf32>
    %cst_5 = arith.constant 1.600000e+01 : f32
    %5 = vector.broadcast %cst_5 : f32 to vector<144x1xf32>
    %6 = arith.divf %4, %5 : vector<144x1xf32>
    %7 = vector.broadcast %6 : vector<144x1xf32> to vector<144x16xf32>
    %8 = arith.subf %0, %7 : vector<144x16xf32>
    %9 = arith.mulf %8, %8 : vector<144x16xf32>
    %cst_6 = arith.constant dense<0.000000e+00> : vector<144xf32>
    %10 = vector.multi_reduction <add>, %9, %cst_6 [1] : vector<144x16xf32> to vector<144xf32>
    %11 = vector.shape_cast %10 : vector<144xf32> to vector<144x1xf32>
    %cst_7 = arith.constant 1.600000e+01 : f32
    %12 = vector.broadcast %cst_7 : f32 to vector<144x1xf32>
    %13 = arith.divf %11, %12 : vector<144x1xf32>
    %cst_8 = arith.constant 9.99999974E-6 : f32
    %14 = vector.broadcast %cst_8 : f32 to vector<144x1xf32>
    %15 = arith.addf %13, %14 : vector<144x1xf32>
    %16 = math.rsqrt %15 : vector<144x1xf32>
    %17 = vector.broadcast %16 : vector<144x1xf32> to vector<144x16xf32>
    %18 = arith.mulf %8, %17 : vector<144x16xf32>
    %19 = vector.broadcast %1 : vector<1x16xf32> to vector<144x16xf32>
    %20 = arith.mulf %18, %19 : vector<144x16xf32>
    %21 = vector.broadcast %2 : vector<1x16xf32> to vector<144x16xf32>
    %22 = arith.addf %20, %21 : vector<144x16xf32>
    %c0_9 = arith.constant 0 : index
    %c0_10 = arith.constant 0 : index
    %23 = vector.load %arg3[%c0_9, %c0_10] : memref<16x256xbf16, #tpu.memory_space<vmem>>, vector<16x256xbf16>
    %24 = arith.truncf %22 : vector<144x16xf32> to vector<144x16xbf16>
    %cst_11 = arith.constant dense<0.000000e+00> : vector<144x256xf32>
    %25 = tpu.matmul %24, %23, %cst_11 {dimension_numbers = #tpu.dot_dimension_numbers<[1], [0], [0], [1], [0, 0, 1, 1], [], []>} : vector<144x16xbf16>, vector<16x256xbf16>, vector<144x256xf32> -> vector<144x256xf32>
    %c0_12 = arith.constant 0 : index
    %c0_13 = arith.constant 0 : index
    %26 = vector.load %arg4[%c0_12, %c0_13] : memref<1x256xf32, #tpu.memory_space<vmem>>, vector<1x256xf32>
    %27 = vector.broadcast %26 : vector<1x256xf32> to vector<144x256xf32>
    %28 = arith.addf %25, %27 : vector<144x256xf32>
    %c0_14 = arith.constant 0 : index
    %c0_15 = arith.constant 0 : index
    %29 = vector.load %arg7[%c0_14, %c0_15] : memref<144x256xf32, #tpu.memory_space<vmem>>, vector<144x256xf32>
    tpu.vector_store %arg7[%c0_14, %c0_15], %28 {strides = array<i32>} : memref<144x256xf32, #tpu.memory_space<vmem>>, vector<144x256xf32>,
    %c0_16 = arith.constant 0 : index
    %c0_17 = arith.constant 0 : index
    %30 = vector.load %arg5[%c0_16, %c0_17] : memref<144x256xf32, #tpu.memory_space<vmem>>, vector<144x256xf32>
    %31 = arith.subf %28, %30 : vector<144x256xf32>
    %32 = arith.mulf %31, %31 : vector<144x256xf32>
    %cst_18 = arith.constant dense<0.000000e+00> : vector<144xf32>
    %33 = vector.multi_reduction <add>, %32, %cst_18 [1] : vector<144x256xf32> to vector<144xf32>
    %34 = vector.shape_cast %33 : vector<144xf32> to vector<144x1xf32>
    %cst_19 = arith.constant 0.00520833349 : f32
    %35 = vector.broadcast %cst_19 : f32 to vector<144x1xf32>
    %36 = arith.mulf %34, %35 : vector<144x1xf32>
    %c0_20 = arith.constant 0 : index
    %c0_21 = arith.constant 0 : index
    %37 = vector.load %arg6[%c0_20, %c0_21] : memref<144x1xf32, #tpu.memory_space<vmem>>, vector<144x1xf32>
    %38 = arith.mulf %36, %37 : vector<144x1xf32>
    %39 = vector.shape_cast %38 : vector<144x1xf32> to vector<1x144x1xf32>
    %cst_22 = arith.constant dense<0.000000e+00> : vector<1xf32>
    %40 = vector.multi_reduction <add>, %39, %cst_22 [1, 2] : vector<1x144x1xf32> to vector<1xf32>
    %41 = vector.shape_cast %40 : vector<1xf32> to vector<1x1x1xf32>
    %42 = vector.extract %41[0, 0, 0] : f32 from vector<1x1x1xf32>
    %c0_23 = arith.constant 0 : index
    %c0_24 = arith.constant 0 : index
    %43 = memref.load %arg8[%c0_23, %c0_24] : memref<1x1xf32, #tpu.memory_space<smem>>
    memref.store %42, %arg8[%c0_23, %c0_24] : memref<1x1xf32, #tpu.memory_space<smem>>
    return
  }
}

</mosaic_0001>

<bundles_post_ra>
// kernel: forward.5
= control target key start
LH: loop header
LB: loop body
LE: loop exit
PB: predicated region body
PF: predicated region fallthrough
CT: control target
= control target key end

     0   :  { %v402_v0 = vmov 0   ;;  %vm169_vm0 = vcmask 523264   ;;  %vm323_vm1 = vcmask 261120   ;;  %s725_s1 = inlined_call_operand.vmem [shape: bf16[192,32], index: 1, kind: input, shape index: {}]   ;;  %s726_s0 = inlined_call_operand.vmem [shape: f32[128,192], index: 0, kind: input, shape index: {}]   ;;  %s727_s2 = inlined_call_operand.vmem [shape: f32[1,32], index: 2, kind: input, shape index: {}]   ;;  %s728_s3 = inlined_call_operand.vmem [shape: f32[128,32], index: 3, kind: input, shape index: {}]   ;;  %s729_s4 = inlined_call_operand.vmem [shape: f32[128,32], index: 4, kind: output, shape index: {}]  }
   0x1   :  { %194 = vmatprep.subr.bf16.mxu0 %v402_v0  ;;  %365 = vmatprep.subr.bf16.mxu1 %v402_v0  ;;  %v390_v1 = vld [vmem:[%s725_s1 + $0x38] sm:$0xff]   ;;  %v391_v2 = vld [vmem:[%s725_s1 + $0x30] sm:$0xff]   ;;  %v392_v3 = vld [vmem:[%s725_s1 + $0x28] sm:$0xff]  }
   0x2   :  { %195 = vmatpush1.bf16.msra.mxu0 %v390_v1  ;;  %377 = vmatpush1.bf16.msra.mxu1 %v390_v1  ;;  %v393_v4 = vld [vmem:[%s725_s1 + $0x20] sm:$0xff]   ;;  %v19_v5 = vld [vmem:[%s726_s0 + $0x8] sm:$0xff]  ;;  %v21_v6 = vld [vmem:[%s726_s0 + $0x18] sm:$0xff] }
   0x3   :  { %196 = vmatprep.subr.bf16.mxu0 %v402_v0  ;;  %366 = vmatprep.subr.bf16.mxu1 %v402_v0  ;;  %v35_v7 = vld [vmem:[%s726_s0 + $0x88] sm:$0xff]  ;;  %v75_v8 = vpack.c.bf16 %v21_v6, %v19_v5  ;;  %v37_v9 = vld [vmem:[%s726_s0 + $0x98] sm:$0xff]  ;;  %v395_v12 = vld [vmem:[%s725_s1 + $0x10] sm:$0xff]  }
   0x4   :  { %v394_v10 = vld [vmem:[%s725_s1 + $0x18] sm:$0xff]   ;;  %v83_v11 = vpack.c.bf16 %v37_v9, %v35_v7  ;;  %v396_v13 = vld [vmem:[%s725_s1 + $0x8] sm:$0xff]   ;;  %v397_v14 = vld [vmem:[%s725_s1] sm:$0xff]  }
   0x5   :  { %357 = vmatprep.mubr.msk.bf16.mxu0 %vm169_vm0, %v75_v8  ;;  %v398_v15 = vld [vmem:[%s725_s1 + $0x58] sm:$0xff]   ;;  %v399_v16 = vld [vmem:[%s725_s1 + $0x50] sm:$0xff]   ;;  %v400_v17 = vld [vmem:[%s725_s1 + $0x48] sm:$0xff]  }
   0x6   :  { %197 = vmatpush1.bf16.msra.mxu0 %v391_v2  ;;  %378 = vmatpush1.bf16.msra.mxu1 %v391_v2  ;;  %v401_v18 = vld [vmem:[%s725_s1 + $0x40] sm:$0xff]   ;;  %v20_v20 = vld [vmem:[%s726_s0 + $0x10] sm:$0xff]  ;;  %v23_v23 = vld [vmem:[%s726_s0 + $0x28] sm:$0xff] }
   0x7   :  { %198 = vmatprep.subr.bf16.mxu0 %v402_v0  ;;  %367 = vmatprep.subr.bf16.mxu1 %v402_v0  ;;  %v18_v19 = vld [vmem:[%s726_s0] sm:$0xff]  ;;  %v36_v22 = vld [vmem:[%s726_s0 + $0x90] sm:$0xff]  ;;  %v25_v24 = vld [vmem:[%s726_s0 + $0x38] sm:$0xff] }
   0x8   :  { %361 = vmatprep.mubr.msk.bf16.mxu1 %vm169_vm0, %v83_v11  ;;  %v34_v21 = vld [vmem:[%s726_s0 + $0x80] sm:$0xff]  ;;  %v39_v25 = vld [vmem:[%s726_s0 + $0xa8] sm:$0xff]  ;;  %v41_v26 = vld [vmem:[%s726_s0 + $0xb8] sm:$0xff]  ;;  %v74_v27 = vpack.c.bf16 %v20_v20, %v18_v19  ;;  %v77_v29 = vpack.c.bf16 %v25_v24, %v23_v23 }
   0x9   :  { %v82_v28 = vpack.c.bf16 %v36_v22, %v34_v21  ;;  %v85_v30 = vpack.c.bf16 %v41_v26, %v39_v25  ;;  %v22_v31 = vld [vmem:[%s726_s0 + $0x20] sm:$0xff]  ;;  %v24_v32 = vld [vmem:[%s726_s0 + $0x30] sm:$0xff]  ;;  %v27_v35 = vld [vmem:[%s726_s0 + $0x48] sm:$0xff] }
   0xa   :  { %199 = vmatpush1.bf16.msra.mxu0 %v392_v3  ;;  %379 = vmatpush1.bf16.msra.mxu1 %v392_v3  ;;  %v38_v33 = vld [vmem:[%s726_s0 + $0xa0] sm:$0xff]  ;;  %v40_v34 = vld [vmem:[%s726_s0 + $0xb0] sm:$0xff]  ;;  %v29_v36 = vld [vmem:[%s726_s0 + $0x58] sm:$0xff]  ;;  %v76_v39 = vpack.c.bf16 %v24_v32, %v22_v31 }
   0xb   :  { %200 = vmatprep.subr.bf16.mxu0 %v402_v0  ;;  %368 = vmatprep.subr.bf16.mxu1 %v402_v0  ;;  %v43_v37 = vld [vmem:[%s726_s0 + $0xc8] sm:$0xff]  ;;  %v45_v38 = vld [vmem:[%s726_s0 + $0xd8] sm:$0xff]  ;;  %v84_v40 = vpack.c.bf16 %v40_v34, %v38_v33  ;;  %v79_v41 = vpack.c.bf16 %v29_v36, %v27_v35  ;;  %v26_v43 = vld [vmem:[%s726_s0 + $0x40] sm:$0xff] }
   0xc   :  { %v87_v42 = vpack.c.bf16 %v45_v38, %v43_v37  ;;  %v28_v44 = vld [vmem:[%s726_s0 + $0x50] sm:$0xff]  ;;  %v42_v45 = vld [vmem:[%s726_s0 + $0xc0] sm:$0xff]  ;;  %v31_v47 = vld [vmem:[%s726_s0 + $0x68] sm:$0xff] }
   0xd   :  { %v44_v46 = vld [vmem:[%s726_s0 + $0xd0] sm:$0xff]  ;;  %v33_v48 = vld [vmem:[%s726_s0 + $0x78] sm:$0xff]  ;;  %v47_v49 = vld [vmem:[%s726_s0 + $0xe8] sm:$0xff]  ;;  %v78_v51 = vpack.c.bf16 %v28_v44, %v26_v43 }
   0xe   :  { %201 = vmatpush1.bf16.msra.mxu0 %v393_v4  ;;  %380 = vmatpush1.bf16.msra.mxu1 %v393_v4  ;;  %v49_v50 = vld [vmem:[%s726_s0 + $0xf8] sm:$0xff]  ;;  %v86_v52 = vpack.c.bf16 %v44_v46, %v42_v45  ;;  %v81_v53 = vpack.c.bf16 %v33_v48, %v31_v47  ;;  %v30_v55 = vld [vmem:[%s726_s0 + $0x60] sm:$0xff]  ;;  %v32_v56 = vld [vmem:[%s726_s0 + $0x70] sm:$0xff] }
   0xf   :  { %202 = vmatprep.subr.bf16.mxu0 %v402_v0  ;;  %369 = vmatprep.subr.bf16.mxu1 %v402_v0  ;;  %v89_v54 = vpack.c.bf16 %v49_v50, %v47_v49  ;;  %v46_v57 = vld [vmem:[%s726_s0 + $0xe0] sm:$0xff]  ;;  %v48_v58 = vld [vmem:[%s726_s0 + $0xf0] sm:$0xff]  ;;  %v80_v59 = vpack.c.bf16 %v32_v56, %v30_v55  ;;  %v292_v9 = vld [vmem:[%s728_s3 + $0x8] sm:$0xff] }
  0x10   :  { %v88_v60 = vpack.c.bf16 %v48_v58, %v46_v57  ;;  %v595_v61 = vld [vmem:[%s727_s2] ss:$0 sm:$0xff]  ;;  %v300_v11 = vld [vmem:[%s728_s3 + $0x48] sm:$0xff]  ;;  %v293_v19 = vld [vmem:[%s728_s3 + $0x10] sm:$0xff] }
  0x11   :  { %v291_v63 = vld [vmem:[%s728_s3] sm:$0xff]  ;;  %v301_v21 = vld [vmem:[%s728_s3 + $0x50] sm:$0xff]  ;;  %v302_v31 = vld [vmem:[%s728_s3 + $0x58] sm:$0xff] }
  0x12   :  { %203 = vmatpush1.bf16.msra.mxu0 %v394_v10  ;;  %381 = vmatpush1.bf16.msra.mxu1 %v394_v10  ;;  %v299_v1 = vld [vmem:[%s728_s3 + $0x40] sm:$0xff]  ;;  %v296_v49 = vld [vmem:[%s728_s3 + $0x28] sm:$0xff] }
  0x13   :  { %204 = vmatprep.subr.bf16.mxu0 %v402_v0  ;;  %370 = vmatprep.subr.bf16.mxu1 %v402_v0 }
  0x16   :  { %205 = vmatpush1.bf16.msra.mxu0 %v395_v12  ;;  %382 = vmatpush1.bf16.msra.mxu1 %v395_v12 }
  0x17   :  { %206 = vmatprep.subr.bf16.mxu0 %v402_v0  ;;  %371 = vmatprep.subr.bf16.mxu1 %v402_v0 }
  0x1a   :  { %207 = vmatpush1.bf16.msra.mxu0 %v396_v13  ;;  %383 = vmatpush1.bf16.msra.mxu1 %v396_v13 }
  0x1b   :  { %208 = vmatprep.subr.bf16.mxu0 %v402_v0  ;;  %372 = vmatprep.subr.bf16.mxu1 %v402_v0 }
  0x1e   :  { %209 = vmatpush1.bf16.msra.mxu0 %v397_v14  ;;  %384 = vmatpush1.bf16.msra.mxu1 %v397_v14 }
  0x1f   :  { %218 = vmatprep.subr.bf16.mxu0 %v402_v0  ;;  %373 = vmatprep.subr.bf16.mxu1 %v402_v0 }
  0x22   :  { %219 = vmatpush2.bf16.msra.mxu0 %v398_v15  ;;  %385 = vmatpush2.bf16.msra.mxu1 %v398_v15 }
  0x23   :  { %220 = vmatprep.subr.bf16.mxu0 %v402_v0  ;;  %374 = vmatprep.subr.bf16.mxu1 %v402_v0 }
  0x26   :  { %221 = vmatpush2.bf16.msra.mxu0 %v399_v16  ;;  %386 = vmatpush2.bf16.msra.mxu1 %v399_v16 }
  0x27   :  { %222 = vmatprep.subr.bf16.mxu0 %v402_v0  ;;  %375 = vmatprep.subr.bf16.mxu1 %v402_v0 }
  0x2a   :  { %223 = vmatpush2.bf16.msra.mxu0 %v400_v17  ;;  %387 = vmatpush2.bf16.msra.mxu1 %v400_v17 }
  0x2b   :  { %224 = vmatprep.subr.bf16.mxu0 %v402_v0  ;;  %376 = vmatprep.subr.bf16.mxu1 %v402_v0 }
  0x2e   :  { %225 = vmatpush2.bf16.msra.mxu0 %v401_v18  ;;  %388 = vmatpush2.bf16.msra.mxu1 %v401_v18 }
  0x31   :  { %227 = vmatmul.mubr.bf16.vlgmr.msra.gmra.mxu0 %v74_v27  ;;  %259 = vmatmul.mubr.bf16.vlgmr.msra.gmra.mxu1 %v82_v28 }
  0x32   :  { %358 = vmatprep.mubr.msk.bf16.mxu0 %vm169_vm0, %v77_v29  ;;  %362 = vmatprep.mubr.msk.bf16.mxu1 %vm169_vm0, %v85_v30  ;;  %v294_v29 = vld [vmem:[%s728_s3 + $0x18] sm:$0xff] }
  0x39   :  { %235 = vmatmul.mubr.bf16.gmra.mxu0 %v76_v39  ;;  %267 = vmatmul.mubr.bf16.gmra.mxu1 %v84_v40  ;;  %v295_v39 = vld [vmem:[%s728_s3 + $0x20] sm:$0xff] }
  0x3a   :  { %359 = vmatprep.mubr.msk.bf16.mxu0 %vm169_vm0, %v79_v41  ;;  %363 = vmatprep.mubr.msk.bf16.mxu1 %vm169_vm0, %v87_v42  ;;  %v303_v41 = vld [vmem:[%s728_s3 + $0x60] sm:$0xff] }
  0x41   :  { %243 = vmatmul.mubr.bf16.gmra.mxu0 %v78_v51  ;;  %275 = vmatmul.mubr.bf16.gmra.mxu1 %v86_v52  ;;  %v304_v51 = vld [vmem:[%s728_s3 + $0x68] sm:$0xff] }
  0x42   :  { %360 = vmatprep.mubr.msk.bf16.mxu0 %vm169_vm0, %v81_v53  ;;  %364 = vmatprep.mubr.msk.bf16.mxu1 %vm169_vm0, %v89_v54 }
  0x49   :  { %251 = vmatmul.mubr.bf16.gmra.mxu0 %v80_v59  ;;  %283 = vmatmul.mubr.bf16.gmra.mxu1 %v88_v60  ;;  %v297_v59 = vld [vmem:[%s728_s3 + $0x30] sm:$0xff] }
  0xf1   :  { %v228_v62 = vpop.f32.mrf.mxu0  ;;  %v260_v0 = vpop.f32.mrf.mxu1 }
  0xf2   :  { %v229_v2 = vadd.f32 %v595_v61, %v228_v62  ;;  %v261_v3 = vadd.f32 %v595_v61, %v260_v0  ;;  %v305_v62 = vld [vmem:[%s728_s3 + $0x70] sm:$0xff] }
  0xf3   :  { %v230_v4 = vpop.f32.mrf.mxu0  ;;  %v262_v5 = vpop.f32.mrf.mxu1 }
  0xf4   :  { %v307_v6 = vadd.f32 %v291_v63, %v229_v2  ;;  %v315_v7 = vadd.f32 %v299_v1, %v261_v3 }
  0xf5   :  { %v231_v8 = vpop.f32.mrf.mxu0  ;;  %v263_v10 = vpop.f32.mrf.mxu1 }
  0xf6   :  { %324 = vst.msk [vmem:[%s729_s4] sm:$0xff] %vm323_vm1, %v307_v6  ;;  %332 = vst.msk [vmem:[%s729_s4 + $0x40] sm:$0xff] %vm323_vm1, %v315_v7  ;;  %v232_v12 = vadd.f32 %v595_v61, %v231_v8  ;;  %v264_v13 = vadd.f32 %v595_v61, %v263_v10  ;;  %v298_v6 = vld [vmem:[%s728_s3 + $0x38] sm:$0xff] }
  0xf7   :  { %v233_v14 = vpop.f32.mrf.mxu0  ;;  %v265_v15 = vpop.f32.mrf.mxu1  ;;  %v306_v8 = vld [vmem:[%s728_s3 + $0x78] sm:$0xff] }
  0xf8   :  { %v308_v16 = vadd.f32 %v292_v9, %v232_v12  ;;  %v316_v17 = vadd.f32 %v300_v11, %v264_v13 }
  0xf9   :  { %v236_v18 = vpop.f32.mrf.mxu0  ;;  %v268_v20 = vpop.f32.mrf.mxu1 }
  0xfa   :  { %325 = vst.msk [vmem:[%s729_s4 + $0x8] sm:$0xff] %vm323_vm1, %v308_v16  ;;  %333 = vst.msk [vmem:[%s729_s4 + $0x48] sm:$0xff] %vm323_vm1, %v316_v17  ;;  %v237_v22 = vadd.f32 %v595_v61, %v236_v18  ;;  %v269_v23 = vadd.f32 %v595_v61, %v268_v20 }
  0xfb   :  { %v238_v24 = vpop.f32.mrf.mxu0  ;;  %v270_v25 = vpop.f32.mrf.mxu1 }
  0xfc   :  { %v309_v26 = vadd.f32 %v293_v19, %v237_v22  ;;  %v317_v27 = vadd.f32 %v301_v21, %v269_v23 }
  0xfd   :  { %v239_v28 = vpop.f32.mrf.mxu0  ;;  %v271_v30 = vpop.f32.mrf.mxu1 }
  0xfe   :  { %326 = vst.msk [vmem:[%s729_s4 + $0x10] sm:$0xff] %vm323_vm1, %v309_v26  ;;  %334 = vst.msk [vmem:[%s729_s4 + $0x50] sm:$0xff] %vm323_vm1, %v317_v27  ;;  %v240_v32 = vadd.f32 %v595_v61, %v239_v28  ;;  %v272_v33 = vadd.f32 %v595_v61, %v271_v30 }
  0xff   :  { %v241_v34 = vpop.f32.mrf.mxu0  ;;  %v273_v35 = vpop.f32.mrf.mxu1 }
 0x100   :  { %v310_v36 = vadd.f32 %v294_v29, %v240_v32  ;;  %v318_v37 = vadd.f32 %v302_v31, %v272_v33 }
 0x101   :  { %v244_v38 = vpop.f32.mrf.mxu0  ;;  %v276_v40 = vpop.f32.mrf.mxu1 }
 0x102   :  { %327 = vst.msk [vmem:[%s729_s4 + $0x18] sm:$0xff] %vm323_vm1, %v310_v36  ;;  %335 = vst.msk [vmem:[%s729_s4 + $0x58] sm:$0xff] %vm323_vm1, %v318_v37  ;;  %v245_v42 = vadd.f32 %v595_v61, %v244_v38  ;;  %v277_v43 = vadd.f32 %v595_v61, %v276_v40 }
 0x103   :  { %v246_v44 = vpop.f32.mrf.mxu0  ;;  %v278_v45 = vpop.f32.mrf.mxu1 }
 0x104   :  { %v311_v46 = vadd.f32 %v295_v39, %v245_v42  ;;  %v319_v47 = vadd.f32 %v303_v41, %v277_v43 }
 0x105   :  { %v247_v48 = vpop.f32.mrf.mxu0  ;;  %v279_v50 = vpop.f32.mrf.mxu1 }
 0x106   :  { %328 = vst.msk [vmem:[%s729_s4 + $0x20] sm:$0xff] %vm323_vm1, %v311_v46  ;;  %336 = vst.msk [vmem:[%s729_s4 + $0x60] sm:$0xff] %vm323_vm1, %v319_v47  ;;  %v248_v52 = vadd.f32 %v595_v61, %v247_v48  ;;  %v280_v53 = vadd.f32 %v595_v61, %v279_v50 }
 0x107   :  { %v249_v54 = vpop.f32.mrf.mxu0  ;;  %v281_v55 = vpop.f32.mrf.mxu1 }
 0x108   :  { %v312_v56 = vadd.f32 %v296_v49, %v248_v52  ;;  %v320_v57 = vadd.f32 %v304_v51, %v280_v53 }
 0x109   :  { %v252_v58 = vpop.f32.mrf.mxu0  ;;  %v284_v60 = vpop.f32.mrf.mxu1 }
 0x10a   :  { %329 = vst.msk [vmem:[%s729_s4 + $0x28] sm:$0xff] %vm323_vm1, %v312_v56  ;;  %337 = vst.msk [vmem:[%s729_s4 + $0x68] sm:$0xff] %vm323_vm1, %v320_v57  ;;  %v253_v63 = vadd.f32 %v595_v61, %v252_v58  ;;  %v285_v0 = vadd.f32 %v595_v61, %v284_v60 }
 0x10b   :  { %v254_v1 = vpop.f32.mrf.mxu0  ;;  %v286_v2 = vpop.f32.mrf.mxu1 }
 0x10c   :  { %v313_v3 = vadd.f32 %v297_v59, %v253_v63  ;;  %v321_v4 = vadd.f32 %v305_v62, %v285_v0 }
 0x10d   :  { %v255_v5 = vpop.f32.mrf.mxu0  ;;  %v287_v7 = vpop.f32.mrf.mxu1 }
 0x10e   :  { %330 = vst.msk [vmem:[%s729_s4 + $0x30] sm:$0xff] %vm323_vm1, %v313_v3  ;;  %338 = vst.msk [vmem:[%s729_s4 + $0x70] sm:$0xff] %vm323_vm1, %v321_v4  ;;  %v256_v9 = vadd.f32 %v595_v61, %v255_v5  ;;  %v288_v10 = vadd.f32 %v595_v61, %v287_v7 }
 0x10f   :  { %v257_v11 = vpop.f32.mrf.mxu0  ;;  %v289_v12 = vpop.f32.mrf.mxu1 }
 0x110   :  { %v314_v13 = vadd.f32 %v298_v6, %v256_v9  ;;  %v322_v14 = vadd.f32 %v306_v8, %v288_v10 }
 0x112   :  { %331 = vst.msk [vmem:[%s729_s4 + $0x38] sm:$0xff] %vm323_vm1, %v314_v13  ;;  %339 = vst.msk [vmem:[%s729_s4 + $0x78] sm:$0xff] %vm323_vm1, %v322_v14 }

// kernel: forward.7
= control target key start
LH: loop header
LB: loop body
LE: loop exit
PB: predicated region body
PF: predicated region fallthrough
CT: control target
= control target key end

     0   :  { %vm29_vm0 = vcmask 261120   ;;  %v285_v42 = vmov 0.0   ;;  %vm286_vm1 = vmmov 0   ;;  %vm225_vm2 = vcmask 130048   ;;  %s429_s0 = inlined_call_operand.vmem [shape: f32[48,32], index: 0, kind: input, shape index: {}]   ;;  %s430_s3 = inlined_call_operand.vmem [shape: bf16[32,16], index: 3, kind: input, shape index: {}]   ;;  %s431_s1 = inlined_call_operand.vmem [shape: f32[1,32], index: 1, kind: input, shape index: {}]   ;;  %s432_s2 = inlined_call_operand.vmem [shape: f32[1,32], index: 2, kind: input, shape index: {}]   ;;  %s433_s4 = inlined_call_operand.vmem [shape: f32[1,16], index: 4, kind: input, shape index: {}]   ;;  %s434_s5 = inlined_call_operand.vmem [shape: f32[48,16], index: 5, kind: output, shape index: {}]  }
   0x1   :  { %v23_v0 = vld [vmem:[%s429_s0 + $0x10] sm:$0xff]  ;;  %v24_v1 = vld [vmem:[%s429_s0 + $0x18] sm:$0xff]  ;;  %v21_v2 = vld [vmem:[%s429_s0] sm:$0xff]  ;;  %265 = vmatprep.subr.bf16.mxu1 %v285_v42  ;;  %249 = vmatprep.subr.bf16.mxu0 %v285_v42 }
   0x2   :  { %v36_v3 = vsel %vm29_vm0, %v23_v0, 0.0  ;;  %v30_v4 = vsel %vm29_vm0, %v21_v2, 0.0  ;;  %v22_v5 = vld [vmem:[%s429_s0 + $0x8] sm:$0xff]  ;;  %v39_v6 = vsel %vm29_vm0, %v24_v1, 0.0  ;;  %v25_v8 = vld [vmem:[%s429_s0 + $0x20] sm:$0xff]  ;;  %257 = vmatprep.mubr.msk.bf16.mxu1 %vm286_vm1, %v285_v42  ;;  %253 = vmatprep.mubr.msk.bf16.mxu0 %vm286_vm1, %v285_v42 }
   0x3   :  { %37 = vadd.xlane.f32.xlu0 %v36_v3  ;;  %31 = vadd.xlane.f32.xlu1 %v30_v4  ;;  %v33_v7 = vsel %vm29_vm0, %v22_v5, 0.0  ;;  %v26_v9 = vld [vmem:[%s429_s0 + $0x28] sm:$0xff]  ;;  %v42_v10 = vsel %vm29_vm0, %v25_v8, 0.0  ;;  %v272_v44 = vld [vmem:[%s430_s3] sm:$0xff]  }
   0x4   :  { %v45_v11 = vsel %vm29_vm0, %v26_v9, 0.0  ;;  %v271_v43 = vld [vmem:[%s430_s3 + $0x8] sm:$0xff]  }
   0x5   :  { %267 = vmatpush3.bf16.msra.mxu1 %v271_v43  ;;  %250 = vmatpush3.bf16.msra.mxu0 %v271_v43 }
   0x6   :  { %266 = vmatprep.subr.bf16.mxu1 %v285_v42  ;;  %251 = vmatprep.subr.bf16.mxu0 %v285_v42 }
   0x7   :  { %40 = vadd.xlane.f32.xlu0 %v39_v6  ;;  %34 = vadd.xlane.f32.xlu1 %v33_v7  ;;  %v237_v7 = vld [vmem:[%s432_s2] ss:$0 sm:$0xff] }
   0x9   :  { %268 = vmatpush3.bf16.msra.mxu1 %v272_v44  ;;  %252 = vmatpush3.bf16.msra.mxu0 %v272_v44 }
   0xb   :  { %43 = vadd.xlane.f32.xlu0 %v42_v10  ;;  %46 = vadd.xlane.f32.xlu1 %v45_v11 }
  0x8c   :  { %v38_v12 = vpop.xlane.xlu0 %37  ;;  %v32_v13 = vpop.xlane.xlu1 %31 }
  0x8d   :  { %v51_v14 = vmul.f32 0.03125, %v38_v12  ;;  %v49_v15 = vmul.f32 0.03125, %v32_v13 }
  0x8f   :  { %v341_v16 = vsub.f32 %v23_v0, %v51_v14  ;;  %v343_v17 = vsub.f32 %v21_v2, %v49_v15 }
  0x90   :  { %v41_v18 = vpop.xlane.xlu0 %40  ;;  %v35_v19 = vpop.xlane.xlu1 %34 }
  0x91   :  { %v52_v20 = vmul.f32 0.03125, %v41_v18  ;;  %v63_v21 = vmul.f32 %v341_v16, %v341_v16  ;;  %v50_v22 = vmul.f32 0.03125, %v35_v19  ;;  %v61_v23 = vmul.f32 %v343_v17, %v343_v17 }
  0x93   :  { %v349_v24 = vsub.f32 %v24_v1, %v52_v20  ;;  %v73_v25 = vsel %vm29_vm0, %v63_v21, 0.0  ;;  %v352_v26 = vsub.f32 %v22_v5, %v50_v22  ;;  %v67_v28 = vsel %vm29_vm0, %v61_v23, 0.0  ;;  %v236_v1 = vld [vmem:[%s431_s1] ss:$0 sm:$0xff] }
  0x94   :  { %74 = vadd.xlane.f32.xlu0 %v73_v25  ;;  %v44_v27 = vpop.xlane.xlu0 %43  ;;  %v47_v29 = vpop.xlane.xlu1 %46 }
  0x95   :  { %v53_v30 = vmul.f32 0.03125, %v44_v27  ;;  %v64_v31 = vmul.f32 %v349_v24, %v349_v24  ;;  %v54_v32 = vmul.f32 0.03125, %v47_v29  ;;  %v62_v33 = vmul.f32 %v352_v26, %v352_v26 }
  0x97   :  { %v359_v34 = vsub.f32 %v25_v8, %v53_v30  ;;  %v76_v35 = vsel %vm29_vm0, %v64_v31, 0.0  ;;  %v362_v36 = vsub.f32 %v26_v9, %v54_v32  ;;  %v70_v38 = vsel %vm29_vm0, %v62_v33, 0.0 }
  0x98   :  { %77 = vadd.xlane.f32.xlu1 %v76_v35  ;;  %68 = vadd.xlane.f32.xlu0 %v67_v28  ;;  %v238_v28 = vld [vmem:[%s433_s4] ss:$0 sm:$0xff] }
  0x99   :  { %v65_v37 = vmul.f32 %v359_v34, %v359_v34  ;;  %v66_v39 = vmul.f32 %v362_v36, %v362_v36 }
  0x9b   :  { %v79_v40 = vsel %vm29_vm0, %v65_v37, 0.0  ;;  %v82_v41 = vsel %vm29_vm0, %v66_v39, 0.0 }
  0x9c   :  { %80 = vadd.xlane.f32.xlu0 %v79_v40  ;;  %71 = vadd.xlane.f32.xlu1 %v70_v38 }
  0xa0   :  { %83 = vadd.xlane.f32.xlu1 %v82_v41 }
 0x11d   :  { %v75_v45 = vpop.xlane.xlu0 %74 }
 0x11e   :  { %v87_v46 = vmul.f32 0.03125, %v75_v45 }
 0x120   :  { %v93_v47 = vadd.f32 1e-05, %v87_v46 }
 0x121   :  { %v69_v48 = vpop.xlane.xlu0 %68  ;;  %v78_v49 = vpop.xlane.xlu1 %77 }
 0x122   :  { %273 = vrsqrt.f32 %v93_v47  ;;  %v85_v50 = vmul.f32 0.03125, %v69_v48  ;;  %v88_v51 = vmul.f32 0.03125, %v78_v49 }
 0x124   :  { %v91_v52 = vadd.f32 1e-05, %v85_v50  ;;  %v94_v53 = vadd.f32 1e-05, %v88_v51 }
 0x125   :  { %v81_v54 = vpop.xlane.xlu0 %80  ;;  %v72_v55 = vpop.xlane.xlu1 %71 }
 0x126   :  { %275 = vrsqrt.f32 %v91_v52  ;;  %v89_v56 = vmul.f32 0.03125, %v81_v54  ;;  %v86_v57 = vmul.f32 0.03125, %v72_v55 }
 0x127   :  { %277 = vrsqrt.f32 %v94_v53 }
 0x128   :  { %v95_v58 = vadd.f32 1e-05, %v89_v56  ;;  %v92_v59 = vadd.f32 1e-05, %v86_v57 }
 0x129   :  { %v84_v60 = vpop.xlane.xlu1 %83 }
 0x12a   :  { %279 = vrsqrt.f32 %v95_v58  ;;  %v90_v61 = vmul.f32 0.03125, %v84_v60 }
 0x12b   :  { %281 = vrsqrt.f32 %v92_v59 }
 0x12c   :  { %v96_v62 = vadd.f32 1e-05, %v90_v61 }
 0x12e   :  { %283 = vrsqrt.f32 %v96_v62 }
 0x12f   :  { %v274_v63 = vpop.eup %273 }
 0x130   :  { %v105_v0 = vmul.f32 %v274_v63, %v341_v16 }
 0x132   :  { %v117_v5 = vmul.f32 %v236_v1, %v105_v0 }
 0x133   :  { %v276_v2 = vpop.eup %275 }
 0x134   :  { %v278_v3 = vpop.eup %277  ;;  %v103_v6 = vmul.f32 %v276_v2, %v343_v17  ;;  %v129_v12 = vadd.f32 %v237_v7, %v117_v5 }
 0x135   :  { %v106_v4 = vmul.f32 %v278_v3, %v349_v24 }
 0x136   :  { %v115_v15 = vmul.f32 %v236_v1, %v103_v6 }
 0x137   :  { %v280_v8 = vpop.eup %279  ;;  %v118_v9 = vmul.f32 %v236_v1, %v106_v4 }
 0x138   :  { %v282_v10 = vpop.eup %281  ;;  %v107_v11 = vmul.f32 %v280_v8, %v359_v34  ;;  %v127_v21 = vadd.f32 %v237_v7, %v115_v15 }
 0x139   :  { %v130_v13 = vadd.f32 %v237_v7, %v118_v9  ;;  %v104_v14 = vmul.f32 %v282_v10, %v352_v26 }
 0x13a   :  { %v119_v17 = vmul.f32 %v236_v1, %v107_v11 }
 0x13b   :  { %v284_v16 = vpop.eup %283  ;;  %v138_v18 = vpack.c.bf16 %v130_v13, %v129_v12  ;;  %v116_v19 = vmul.f32 %v236_v1, %v104_v14 }
 0x13c   :  { %v108_v20 = vmul.f32 %v284_v16, %v362_v36  ;;  %v131_v25 = vadd.f32 %v237_v7, %v119_v17 }
 0x13d   :  { %258 = vmatmul.mubr.msk.bf16.vlgmr.msra.gmra.mxu1 %vm29_vm0, %v138_v18  ;;  %v128_v22 = vadd.f32 %v237_v7, %v116_v19 }
 0x13e   :  { %261 = vmatprep.mubr.msk.bf16.mxu1 %vm286_vm1, %v285_v42  ;;  %v120_v23 = vmul.f32 %v236_v1, %v108_v20 }
 0x13f   :  { %v137_v24 = vpack.c.bf16 %v128_v22, %v127_v21 }
 0x140   :  { %v132_v27 = vadd.f32 %v237_v7, %v120_v23 }
 0x141   :  { %254 = vmatmul.mubr.msk.bf16.vlgmr.msra.gmra.mxu0 %vm29_vm0, %v137_v24 }
 0x142   :  { %v139_v26 = vpack.c.bf16 %v132_v27, %v131_v25 }
 0x145   :  { %262 = vmatmul.mubr.msk.bf16.gmra.mxu1 %vm29_vm0, %v139_v26 }
 0x1fd   :  { %v210_v29 = vpop.f32.mrf.mxu1 }
 0x1fe   :  { %v211_v30 = vadd.f32 %v238_v28, %v210_v29 }
 0x1ff   :  { %v259_v31 = vpop.f32.mrf.mxu1 }
 0x200   :  { %228 = vst.msk [vmem:[%s434_s5 + $0x10] sm:$0xff] %vm225_vm2, %v211_v30 }
 0x201   :  { %v202_v32 = vpop.f32.mrf.mxu0  ;;  %v213_v33 = vpop.f32.mrf.mxu1 }
 0x202   :  { %v203_v34 = vadd.f32 %v238_v28, %v202_v32  ;;  %v214_v35 = vadd.f32 %v238_v28, %v213_v33 }
 0x203   :  { %v255_v36 = vpop.f32.mrf.mxu0  ;;  %v260_v37 = vpop.f32.mrf.mxu1 }
 0x204   :  { %226 = vst.msk [vmem:[%s434_s5] sm:$0xff] %vm225_vm2, %v203_v34  ;;  %229 = vst.msk [vmem:[%s434_s5 + $0x18] sm:$0xff] %vm225_vm2, %v214_v35 }
 0x205   :  { %v205_v38 = vpop.f32.mrf.mxu0  ;;  %v218_v39 = vpop.f32.mrf.mxu1 }
 0x206   :  { %v206_v40 = vadd.f32 %v238_v28, %v205_v38  ;;  %v219_v41 = vadd.f32 %v238_v28, %v218_v39 }
 0x207   :  { %v256_v42 = vpop.f32.mrf.mxu0  ;;  %v263_v43 = vpop.f32.mrf.mxu1 }
 0x208   :  { %227 = vst.msk [vmem:[%s434_s5 + $0x8] sm:$0xff] %vm225_vm2, %v206_v40  ;;  %230 = vst.msk [vmem:[%s434_s5 + $0x20] sm:$0xff] %vm225_vm2, %v219_v41 }
 0x209   :  { %v221_v44 = vpop.f32.mrf.mxu1 }
 0x20a   :  { %v222_v45 = vadd.f32 %v238_v28, %v221_v44 }
 0x20b   :  { %v264_v46 = vpop.f32.mrf.mxu1 }
 0x20c   :  { %231 = vst.msk [vmem:[%s434_s5 + $0x28] sm:$0xff] %vm225_vm2, %v222_v45 }

// kernel: forward.6
= control target key start
LH: loop header
LB: loop body
LE: loop exit
PB: predicated region body
PF: predicated region fallthrough
CT: control target
= control target key end

     0   :  { %s3838_s25 = smov 0   ;;  %s3840_s26 = smov 0   ;;  %s4310_s0 = inlined_call_operand.vmem [shape: f32[2,24,32], index: 0, kind: input, shape index: {}]   ;;  %s4311_s1 = inlined_call_operand.vmem [shape: f32[2,1,32], index: 1, kind: input, shape index: {}]   ;;  %s4312_s2 = inlined_call_operand.vmem [shape: f32[2,1,32], index: 2, kind: input, shape index: {}]   ;;  %s4313_s3 = inlined_call_operand.vmem [shape: bf16[2,3,4,32,8], index: 3, kind: input, shape index: {}]   ;;  %s4314_s4 = inlined_call_operand.vmem [shape: f32[2,3,4,1,8], index: 4, kind: input, shape index: {}]   ;;  %s4315_s5 = inlined_call_operand.vmem [shape: bf16[2,4,8,32], index: 5, kind: input, shape index: {}]   ;;  %s4316_s6 = inlined_call_operand.vmem [shape: f32[2,1,32], index: 6, kind: input, shape index: {}]   ;;  %s4317_s7 = inlined_call_operand.vmem [shape: f32[2,1,32], index: 7, kind: input, shape index: {}]   ;;  %s4318_s8 = inlined_call_operand.vmem [shape: f32[2,1,32], index: 8, kind: input, shape index: {}]   ;;  %s4319_s9 = inlined_call_operand.vmem [shape: bf16[2,32,128], index: 9, kind: input, shape index: {}]   ;;  %s4320_s10 = inlined_call_operand.vmem [shape: f32[2,1,128], index: 10, kind: input, shape index: {}]   ;;  %s4321_s11 = inlined_call_operand.vmem [shape: bf16[2,128,32], index: 11, kind: input, shape index: {}]   ;;  %s4322_s12 = inlined_call_operand.vmem [shape: f32[2,1,32], index: 12, kind: input, shape index: {}]   ;;  %s4323_s13 = inlined_call_operand.vmem [shape: f32[2,24,32], index: 13, kind: output, shape index: {}]  }
   0x1   :  { %4328 = sst [smem:[#allocation9_spill]] %s4310_s0  ;;  %s3842_s27 = smov 0  }
   0x2   :  { %4329 = sst [smem:[#allocation10_spill]] %s4312_s2  ;;  %s3844_s28 = smov 0  }
   0x3   :  { %4330 = sst [smem:[#allocation11_spill]] %s4313_s3  ;;  %s3846_s29 = smov 0  }
   0x4   :  { %4331 = sst [smem:[#allocation12_spill]] %s4314_s4 }
   0x5   :  { %4332 = sst [smem:[#allocation13_spill]] %s4315_s5 }
   0x6   :  { %4333 = sst [smem:[#allocation14_spill]] %s4323_s13 }
   0x7 LB: > { %4334 = sst [smem:[#allocation3_spill]] %s3749_s25  ;;  %s32_s30 = sadd.s32 1, %s3757_s27  ;;  %s3765_s29 = sphi %s3846_s29, %s23_s29   ;;  %s3761_s28 = sphi %s3844_s28, %s4358_s28   ;;  %s3757_s27 = sphi %s3842_s27, %s4357_s27   ;;  %s3753_s26 = sphi %s3840_s26, %s4356_s26   ;;  %s3749_s25 = sphi %s3838_s25, %s4355_s25  }
   0x8   : > { %4335 = sst [smem:[#allocation4_spill]] %s3757_s27  ;;  %s35_s14 = sadd.s32 1, %s3761_s28 }
   0x9   : > { %4336 = sst [smem:[#allocation5_spill]] %s3761_s28  ;;  %p33_p0 = scmp.ge.s32.totalorder %s32_s30, 2 }
   0xa   : > { %4337 = sst [smem:[#allocation6_spill]] %s3765_s29  ;;  %p3062_p1 = scmp.ge.s32.totalorder %s3765_s29, 1 }
   0xb   : > { %p504_p2 = scmp.lt.s32.totalorder %s3765_s29, 5  ;;  %s4360_s30 = smov (%p33_p0, %s32_s30), 0 }
   0xc   : > { %4338 = sst [smem:[#allocation7_spill]] %s4360_s30  ;;  %s4362_s14 = smov (!%p33_p0, %s35_s14), %s3761_s28 }
   0xd   : > { %p505_p3 = pnand %p3062_p1, %p504_p2  ;;  %p37_p4 = scmp.ge.s32.totalorder %s4362_s14, 2 }
   0xe   : > { %p593_p5 = scmp.lt.s32.totalorder (!%p505_p3), %s3753_s26, 1  ;;  %p598_p6 = scmp.lt.s32.totalorder (!%p505_p3), %s3749_s25, 1 }
   0xf   : > { %s4364_s14 = smov (%p37_p4, %s4362_s14), 0  ;;  %508 = sbr.rel (%p505_p3) target bundleno = 4271 (0x10af), region = 72 }
  0x10   : > { %4339 = sst [smem:[#allocation8_spill]] %s4364_s14 }
  0x11   : > { %s4341_s0 = sld [smem:[#allocation9_spill]] (!%p505_p3) }
  0x12   : > { %s4342_s3 = sld [smem:[#allocation11_spill]] (!%p505_p3) }
  0x13   : > { %s4343_s5 = sld [smem:[#allocation13_spill]] (!%p505_p3) }
  0x14   : > { %s4366_s26 = smov (!%p593_p5, %s3753_s26), 1  ;;  %s4344_s4 = sld [smem:[#allocation12_spill]] }
  0x15   : > { %s3872_s15 = scalar_select %p598_p6, %s3749_s25, 1 }
  0x16   : > { %s3574_s16 = smul.u32 24, %s4366_s26 }
  0x17   : > { %s3575_s30 = smul.u32 192, %s3872_s15  ;;  %s3237_s27 = sshll.u32 %s3872_s15, 4 }
  0x18   : > { %s597_s14 = scalar_lea.vmem %s4341_s0, %s3574_s16  ;;  %s3576_s28 = smul.u32 12, %s3872_s15 }
  0x19   : > { %s3891_s26 = scalar_lea.vmem %s4342_s3, %s3575_s30  ;;  %s3896_s18 = scalar_lea.vmem %s4343_s5, %s3237_s27 }
  0x1a   : > { %s3901_s21 = scalar_lea.vmem %s4344_s4, %s3576_s28  ;;  %s3918_s5 = scalar_lea.vmem %s4319_s9, %s3237_s27 }
  0x1b   : > { %s634_s20 = scalar_lea.vmem %s4320_s10, %s3872_s15  ;;  %s3239_s4 = sshll.u32 %s3872_s15, 6 }
  0x1c   : > { %s642_s22 = scalar_lea.vmem %s4322_s12, %s3872_s15  ;;  %s3932_s25 = scalar_lea.vmem %s4321_s11, %s3239_s4 }
  0x1d   : > { %s4345_s3 = sld [smem:[#allocation14_spill]] }
  0x1e   : > { %s4346_s27 = sld [smem:[#allocation3_spill]] }
  0x23   : > { %s3937_s13 = scalar_lea.vmem %s4345_s3, %s3574_s16 }
  0x24   : > { %p3072_p7 = scmp.ne.s32.totalorder %s4346_s27, 0 }
  0x26   : > { %652 = sbr.rel (%p3072_p7) target bundleno = 46 (0x2e), region = 76 }
  0x2b   : > { %v653_v0 = vld [vmem:[%s597_s14] sm:$0xff]  ;;  %vm656_vm0 = vcmask 261120   ;;  %v654_v1 = vld [vmem:[%s597_s14 + $0x8] sm:$0xff]  ;;  %v655_v2 = vld [vmem:[%s597_s14 + $0x10] sm:$0xff] }
  0x2c   : > { %657 = vst.msk [vmem:[#allocation2] sm:$0xff] %vm656_vm0, %v653_v0  ;;  %658 = vst.msk [vmem:[#allocation2 + $0x8] sm:$0xff] %vm656_vm0, %v654_v1 }
  0x2d   : > { %659 = vst.msk [vmem:[#allocation2 + $0x10] sm:$0xff] %vm656_vm0, %v655_v2 }
  0x2e PF: > { %vm669_vm1 = vcmask 261120   ;;  %v3618_v24 = vld [vmem:[%s3891_s26 + $0x8] sm:$0xff]   ;;  %v3619_v25 = vld [vmem:[%s3891_s26] sm:$0xff]   ;;  %s4347_s14 = scalar_lea.vmem %s4311_s1, %s3872_s15  ;;  %s4348_s19 = sld [smem:[#allocation10_spill]]  ;;  %vm960_vm2 = vcmask 64512   ;;  %vm1062_vm3 = vcmask 1043456  }
  0x2f   : > { %3346 = vmatprep.subr.bf16.mxu0 %v3618_v24  ;;  %v3620_v26 = vld [vmem:[%s3891_s26 + $0x48] sm:$0xff]   ;;  %v3073_v38 = vld [vmem:[%s4347_s14] ss:$0 sm:$0xff]  ;;  %v3085_v61 = vld [vmem:[%s3901_s21 + $0x4] ss:$0 sm:$0xff]  ;;  %vm1021_vm5 = vcmask 195584   ;;  %s4351_s24 = scalar_lea.vmem %s4317_s7, %s3872_s15  ;;  %s4352_s29 = scalar_lea.vmem %s4318_s8, %s3872_s15 }
  0x30   : > { %3347 = vmatpush3.bf16.msra.mxu0 %v3618_v24  ;;  %v3621_v52 = vld [vmem:[%s3891_s26 + $0x40] sm:$0xff]   ;;  %v3622_v53 = vld [vmem:[%s3891_s26 + $0x88] sm:$0xff]  }
  0x31   : > { %3348 = vmatprep.subr.bf16.mxu0 %v3619_v25  ;;  %v3623_v54 = vld [vmem:[%s3891_s26 + $0x80] sm:$0xff]  }
  0x32   : > { %v3075_v57 = vld [vmem:[%s3901_s21] ss:$0 sm:$0xff] }
  0x33   : > { %v660_v3 = vld [vmem:[#allocation2] sm:$0xff]  ;;  %v661_v5 = vld [vmem:[#allocation2 + $0x8] sm:$0xff] }
  0x34   : > { %v662_v4 = vld [vmem:[#allocation2 + $0x10] sm:$0xff]  ;;  %v670_v6 = vsel %vm669_vm1, %v660_v3, 0.0  ;;  %v673_v8 = vsel %vm669_vm1, %v661_v5, 0.0  ;;  %3349 = vmatpush3.bf16.msra.mxu0 %v3619_v25  ;;  %s4349_s28 = scalar_lea.vmem %s4348_s19, %s3872_s15 }
  0x35   : > { %v676_v7 = vsel %vm669_vm1, %v662_v4, 0.0  ;;  %671 = vadd.xlane.f32.xlu0 %v670_v6  ;;  %3354 = vmatprep.subr.bf16.mxu0 %v3620_v26  ;;  %v3074_v44 = vld [vmem:[%s4349_s28] ss:$0 sm:$0xff] }
  0x36   : > { %677 = vadd.xlane.f32.xlu1 %v676_v7 }
  0x39   : > { %674 = vadd.xlane.f32.xlu0 %v673_v8 }
  0xbe   : > { %v672_v9 = vpop.xlane.xlu0 %671 }
  0xbf   : > { %v678_v10 = vpop.xlane.xlu1 %677  ;;  %v680_v11 = vmul.f32 0.03125, %v672_v9  ;;  %v3095_v9 = vld [vmem:[%s3901_s21 + $0x8] ss:$0 sm:$0xff] }
  0xc0   : > { %v682_v12 = vmul.f32 0.03125, %v678_v10 }
  0xc1   : > { %v683_v13 = vsub.f32 %v660_v3, %v680_v11 }
  0xc2   : > { %v685_v14 = vsub.f32 %v662_v4, %v682_v12  ;;  %v675_v15 = vpop.xlane.xlu0 %674 }
  0xc3   : > { %v681_v16 = vmul.f32 0.03125, %v675_v15  ;;  %v686_v17 = vmul.f32 %v683_v13, %v683_v13 }
  0xc4   : > { %v688_v18 = vmul.f32 %v685_v14, %v685_v14 }
  0xc5   : > { %v684_v19 = vsub.f32 %v661_v5, %v681_v16  ;;  %v689_v20 = vsel %vm669_vm1, %v686_v17, 0.0 }
  0xc6   : > { %690 = vadd.xlane.f32.xlu1 %v689_v20  ;;  %v695_v21 = vsel %vm669_vm1, %v688_v18, 0.0  ;;  %v3624_v18 = vld [vmem:[%s3891_s26 + $0x58] sm:$0xff]  }
  0xc7   : > { %v687_v22 = vmul.f32 %v684_v19, %v684_v19 }
  0xc9   : > { %v692_v23 = vsel %vm669_vm1, %v687_v22, 0.0 }
  0xca   : > { %696 = vadd.xlane.f32.xlu1 %v695_v21  ;;  %693 = vadd.xlane.f32.xlu0 %v692_v23 }
 0x14f   : > { %v691_v27 = vpop.xlane.xlu1 %690 }
 0x150   : > { %v698_v28 = vmul.f32 0.03125, %v691_v27 }
 0x152   : > { %v701_v29 = vadd.f32 1e-05, %v698_v28  ;;  %v3625_v28 = vld [vmem:[%s3891_s26 + $0x50] sm:$0xff]  }
 0x153   : > { %v697_v30 = vpop.xlane.xlu1 %696  ;;  %v694_v31 = vpop.xlane.xlu0 %693 }
 0x154   : > { %3652 = vrsqrt.f32 %v701_v29  ;;  %v700_v32 = vmul.f32 0.03125, %v697_v30  ;;  %v699_v33 = vmul.f32 0.03125, %v694_v31  ;;  %v663_v29 = vlaneseq }
 0x156   : > { %v703_v34 = vadd.f32 1e-05, %v700_v32  ;;  %v702_v35 = vadd.f32 1e-05, %v699_v33  ;;  %v664_v30 = vand.u32 127, %v663_v29 }
 0x157   : > { %v3767_v32 = vmov -1e+30  }
 0x158   : > { %3654 = vrsqrt.f32 %v703_v34  ;;  %vm665_vm4 = vcmp.lt.s32.totalorder %v664_v30, 17 }
 0x159   : > { %3656 = vrsqrt.f32 %v702_v35  ;;  %v3995_v33 = vsel %vm665_vm4, 0.0, %v3767_v32 }
 0x161   : > { %v3653_v36 = vpop.eup %3652 }
 0x162   : > { %v707_v37 = vmul.f32 %v3653_v36, %v683_v13 }
 0x164   : > { %v716_v42 = vmul.f32 %v3073_v38, %v707_v37 }
 0x165   : > { %v3655_v39 = vpop.eup %3654 }
 0x166   : > { %v3657_v40 = vpop.eup %3656  ;;  %v709_v41 = vmul.f32 %v3655_v39, %v685_v14  ;;  %v725_v48 = vadd.f32 %v3074_v44, %v716_v42 }
 0x167   : > { %v708_v43 = vmul.f32 %v3657_v40, %v684_v19  ;;  %v3119_v40 = vld [vmem:[%s3901_s21 + $0x5] ss:$0 sm:$0xff] }
 0x168   : > { %v718_v45 = vmul.f32 %v3073_v38, %v709_v41 }
 0x169   : > { %v717_v46 = vmul.f32 %v3073_v38, %v708_v43 }
 0x16a   : > { %v727_v47 = vadd.f32 %v3074_v44, %v718_v45 }
 0x16b   : > { %v726_v49 = vadd.f32 %v3074_v44, %v717_v46 }
 0x16c   : > { %v3959_v50 = vpack.c.bf16 %v727_v47, %v727_v47 }
 0x16d   : > { %v3961_v51 = vpack.c.bf16 %v726_v49, %v725_v48 }
 0x16f   : > { %3350 = vmatprep.mubr.msk.bf16.mxu0 %vm669_vm1, %v3961_v51 }
 0x170   : > { %3351 = vmatmul.mubr.msk.bf16.vlgmr.msra.gmra.mxu0 %vm669_vm1, %v3959_v50 }
 0x171   : > { %3355 = vmatpush3.bf16.msra.mxu0 %v3620_v26  ;;  %3358 = vmatprep.mubr.msk.bf16.mxu0 %vm669_vm1, %v3961_v51 }
 0x172   : > { %3356 = vmatprep.subr.bf16.mxu0 %v3621_v52 }
 0x175   : > { %3357 = vmatpush3.bf16.msra.mxu0 %v3621_v52 }
 0x176   : > { %3362 = vmatprep.subr.bf16.mxu0 %v3622_v53 }
 0x178   : > { %3359 = vmatmul.mubr.msk.bf16.vlgmr.msra.gmra.mxu0 %vm669_vm1, %v3959_v50 }
 0x179   : > { %3363 = vmatpush3.bf16.msra.mxu0 %v3622_v53  ;;  %3366 = vmatprep.mubr.msk.bf16.mxu0 %vm669_vm1, %v3961_v51 }
 0x17a   : > { %3364 = vmatprep.subr.bf16.mxu0 %v3623_v54 }
 0x17d   : > { %3365 = vmatpush3.bf16.msra.mxu0 %v3623_v54 }
 0x180   : > { %3367 = vmatmul.mubr.msk.bf16.vlgmr.msra.gmra.mxu0 %vm669_vm1, %v3959_v50 }
 0x230   : > { %v3352_v55 = vpop.f32.mrf.mxu0 }
 0x231   : > { %v802_v16 = vadd.f32 %v3352_v55, %v3075_v57 }
 0x232   : > { %v793_v56 = vpop.f32.mrf.mxu0 }
 0x233   : > { %v794_v59 = vadd.f32 %v3075_v57, %v793_v56  ;;  %v955_v23 = vmul.f32 0.35355338, %v802_v16  ;;  %v3109_v16 = vld [vmem:[%s3901_s21 + $0x1] ss:$0 sm:$0xff] }
 0x234   : > { %v3353_v58 = vpop.f32.mrf.mxu0 }
 0x235   : > { %v953_v0 = vmul.f32 0.35355338, %v794_v59  ;;  %v957_v27 = vpack.c.bf16 %v955_v23, %v955_v23 }
 0x236   : > { %v796_v60 = vpop.f32.mrf.mxu0 }
 0x237   : > { %v797_v62 = vadd.f32 %v3075_v57, %v796_v60  ;;  %v3626_v57 = vld [vmem:[%s3891_s26 + $0x18] sm:$0xff]  }
 0x238   : > { %v3360_v63 = vpop.f32.mrf.mxu0 }
 0x239   : > { %v954_v1 = vmul.f32 0.35355338, %v797_v62  ;;  %v875_v2 = vadd.f32 %v3360_v63, %v3085_v61 }
 0x23a   : > { %v866_v3 = vpop.f32.mrf.mxu0 }
 0x23b   : > { %v959_v4 = vpack.c.bf16 %v875_v2, %v875_v2  ;;  %v956_v5 = vpack.c.bf16 %v954_v1, %v953_v0  ;;  %v867_v10 = vadd.f32 %v3085_v61, %v866_v3 }
 0x23c   : > { %v3361_v6 = vpop.f32.mrf.mxu0 }
 0x23d   : > { %3558 = vmatprep.subr.msk.bf16.mxu1 %vm960_vm2, %v959_v4  ;;  %3374 = vmatprep.mubr.msk.bf16.mxu1 %vm960_vm2, %v956_v5  ;;  %v971_v7 = vsel %vm960_vm2, %v959_v4, 0 }
 0x23e   : > { %v869_v8 = vpop.f32.mrf.mxu0  ;;  %3371 = vmatpush3.bf16.xpose.msra.mxu1 %v971_v7 }
 0x23f   : > { %v870_v11 = vadd.f32 %v3085_v61, %v869_v8  ;;  %v3627_v8 = vld [vmem:[%s3891_s26 + $0x10] sm:$0xff]  }
 0x240   : > { %v3368_v12 = vpop.f32.mrf.mxu0 }
 0x241   : > { %v958_v13 = vpack.c.bf16 %v870_v11, %v867_v10  ;;  %v948_v14 = vadd.f32 %v3368_v12, %v3095_v9  ;;  %v3629_v10 = vld [vmem:[%s3891_s26 + $0x90] sm:$0xff]  }
 0x242   : > { %v939_v15 = vpop.f32.mrf.mxu0 }
 0x243   : > { %v1055_v17 = vpack.c.bf16 %v948_v14, %v948_v14  ;;  %3559 = vmatprep.subr.msk.bf16.mxu1 %vm960_vm2, %v958_v13  ;;  %v968_v21 = vsel %vm960_vm2, %v958_v13, 0  ;;  %v940_v24 = vadd.f32 %v3095_v9, %v939_v15 }
 0x244   : > { %v3369_v19 = vpop.f32.mrf.mxu0 }
 0x245   : > { %v1064_v20 = vsel %vm1062_vm3, %v1055_v17, 0  ;;  %3560 = vmatprep.subr.msk.bf16.mxu0 %vm1062_vm3, %v1055_v17 }
 0x246   : > { %v942_v22 = vpop.f32.mrf.mxu0  ;;  %3373 = vmatpush3.bf16.xpose.msra.mxu1 %v968_v21  ;;  %3379 = vmatpush3.bf16.msra.mxu0 %v1064_v20 }
 0x247   : > { %v943_v25 = vadd.f32 %v3095_v9, %v942_v22  ;;  %3394 = vmatprep.subr.bf16.mxu1 %v3624_v18  ;;  %v3628_v9 = vld [vmem:[%s3891_s26 + $0x98] sm:$0xff]   ;;  %v3129_v22 = vld [vmem:[%s3901_s21 + $0x9] ss:$0 sm:$0xff] }
 0x249   : > { %v1054_v26 = vpack.c.bf16 %v943_v25, %v940_v24 }
 0x24b   : > { %3380 = vmatprep.subr.bf16.mxu0 %v1054_v26 }
 0x24c   : > { %3381 = vmatpush3.bf16.msra.mxu0 %v1054_v26 }
 0x24d   : > { %3375 = vmatmul.mubr.msk.bf16.vlgmr.msra.gmra.mxu1 %vm960_vm2, %v957_v27  ;;  %3386 = vmatprep.subr.bf16.mxu0 %v3626_v57 }
 0x24e   : > { %3395 = vmatpush3.bf16.msra.mxu1 %v3624_v18  ;;  %3398 = vmatprep.mubr.msk.bf16.mxu1 %vm669_vm1, %v3961_v51 }
 0x24f   : > { %3396 = vmatprep.subr.bf16.mxu1 %v3625_v28 }
 0x252   : > { %3397 = vmatpush3.bf16.msra.mxu1 %v3625_v28 }
 0x255   : > { %3399 = vmatmul.mubr.msk.bf16.vlgmr.msra.gmra.mxu1 %vm669_vm1, %v3959_v50 }
 0x30d   : > { %v3376_v31 = vpop.f32.mrf.mxu1 }
 0x30e   : > { %v1016_v37 = vadd.f32 %v3376_v31, %v3995_v33 }
 0x30f   : > { %v1007_v34 = vpop.f32.mrf.mxu1 }
 0x310   : > { %v1008_v35 = vadd.f32 %v1007_v34, %v3995_v33  ;;  %v1028_v45 = vsel %vm1021_vm5, %v1016_v37, -inf }
 0x311   : > { %v3377_v36 = vpop.f32.mrf.mxu1 }
 0x312   : > { %v1022_v38 = vsel %vm1021_vm5, %v1008_v35, -inf }
 0x313   : > { %v1010_v39 = vpop.f32.mrf.mxu1  ;;  %1023 = vmax.xlane.f32.xlu0 %v1022_v38 }
 0x314   : > { %v1011_v41 = vadd.f32 %v1010_v39, %v3995_v33 }
 0x315   : > { %v3400_v42 = vpop.f32.mrf.mxu1 }
 0x316   : > { %v1261_v43 = vadd.f32 %v3400_v42, %v3119_v40  ;;  %v1025_v44 = vsel %vm1021_vm5, %v1011_v41, -inf }
 0x317   : > { %v1252_v46 = vpop.f32.mrf.mxu1  ;;  %1026 = vmax.xlane.f32.xlu1 %v1025_v44  ;;  %1029 = vmax.xlane.f32.xlu0 %v1028_v45 }
 0x318   : > { %v1345_v47 = vpack.c.bf16 %v1261_v43, %v1261_v43  ;;  %v1253_v53 = vadd.f32 %v3119_v40, %v1252_v46 }
 0x319   : > { %v3401_v48 = vpop.f32.mrf.mxu1 }
 0x31a   : > { %v1356_v49 = vsel %vm960_vm2, %v1345_v47, 0  ;;  %3561 = vmatprep.subr.msk.bf16.mxu1 %vm960_vm2, %v1345_v47 }
 0x31b   : > { %v1255_v52 = vpop.f32.mrf.mxu1  ;;  %3411 = vmatpush3.bf16.xpose.msra.mxu1 %v1356_v49 }
 0x31c   : > { %v1256_v54 = vadd.f32 %v3119_v40, %v1255_v52 }
 0x31e   : > { %v1344_v55 = vpack.c.bf16 %v1256_v54, %v1253_v53 }
 0x320   : > { %3562 = vmatprep.subr.msk.bf16.mxu1 %vm960_vm2, %v1344_v55  ;;  %v1353_v56 = vsel %vm960_vm2, %v1344_v55, 0  ;;  %v1117_v55 = vld [vmem:[%s3896_s18] sm:$0xf] }
 0x323   : > { %3413 = vmatpush3.bf16.xpose.msra.mxu1 %v1353_v56  ;;  %v1568_v56 = vsel %vm1062_vm3, %v1117_v55, 0 }
 0x324   : > { %3565 = vmatprep.subr.msk.bf16.mxu1 %vm1062_vm3, %v1117_v55 }
 0x39c   : > { %v1024_v58 = vpop.xlane.xlu0 %1023 }
 0x39d   : > { %v1031_v59 = vsub.f32 %v1008_v35, %v1024_v58 }
 0x39f   : > { %v1034_v60 = vmul.f32 1.442695, %v1031_v59 }
 0x3a0   : > { %v1027_v61 = vpop.xlane.xlu1 %1026  ;;  %v1030_v62 = vpop.xlane.xlu0 %1029 }
 0x3a1   : > { %v1032_v63 = vsub.f32 %v1011_v41, %v1027_v61  ;;  %v1033_v0 = vsub.f32 %v1016_v37, %v1030_v62  ;;  %3658 = vpow2.f32 %v1034_v60 }
 0x3a3   : > { %v1036_v1 = vmul.f32 1.442695, %v1032_v63  ;;  %v1038_v2 = vmul.f32 1.442695, %v1033_v0 }
 0x3a5   : > { %3660 = vpow2.f32 %v1036_v1 }
 0x3a6   : > { %3662 = vpow2.f32 %v1038_v2 }
 0x3ae   : > { %v4009_v3 = vpop.eup %3658 }
 0x3af   : > { %v1040_v52 = vsel %vm1021_vm5, %v4009_v3, 0.0 }
 0x3b2   : > { %v4011_v4 = vpop.eup %3660 }
 0x3b3   : > { %v4013_v5 = vpop.eup %3662  ;;  %v1052_v6 = vpack.c.bf16 %v4011_v4, %v4009_v3  ;;  %v1043_v53 = vsel %vm1021_vm5, %v4011_v4, 0.0 }
 0x3b4   : > { %v1053_v7 = vpack.c.bf16 %v4013_v5, %v4013_v5  ;;  %v1046_v54 = vsel %vm1021_vm5, %v4013_v5, 0.0 }
 0x3b5   : > { %3382 = vmatprep.mubr.msk.bf16.mxu0 %vm1021_vm5, %v1052_v6 }
 0x3b6   : > { %3383 = vmatmul.mubr.msk.bf16.vlgmr.msra.gmra.mxu0 %vm1021_vm5, %v1053_v7 }
 0x3b7   : > { %3387 = vmatpush3.bf16.msra.mxu0 %v3626_v57  ;;  %3390 = vmatprep.mubr.msk.bf16.mxu0 %vm669_vm1, %v3961_v51  ;;  %v3630_v57 = vld [vmem:[%s3891_s26 + $0x68] sm:$0xff]  }
 0x3b8   : > { %3388 = vmatprep.subr.bf16.mxu0 %v3627_v8 }
 0x3bb   : > { %3389 = vmatpush3.bf16.msra.mxu0 %v3627_v8 }
 0x3bc   : > { %3402 = vmatprep.subr.bf16.mxu0 %v3628_v9 }
 0x3be   : > { %3391 = vmatmul.mubr.msk.bf16.vlgmr.msra.gmra.mxu0 %vm669_vm1, %v3959_v50 }
 0x3bf   : > { %3403 = vmatpush3.bf16.msra.mxu0 %v3628_v9  ;;  %3406 = vmatprep.mubr.msk.bf16.mxu0 %vm669_vm1, %v3961_v51 }
 0x3c0   : > { %3404 = vmatprep.subr.bf16.mxu0 %v3629_v10 }
 0x3c3   : > { %3405 = vmatpush3.bf16.msra.mxu0 %v3629_v10 }
 0x3c6   : > { %3407 = vmatmul.mubr.msk.bf16.vlgmr.msra.gmra.mxu0 %vm669_vm1, %v3959_v50 }
 0x476   : > { %v4032_v11 = vpop.f32.mrf.mxu0 }
 0x478   : > { %v4034_v12 = vpop.f32.mrf.mxu0 }
 0x47a   : > { %v3385_v13 = vpop.f32.mrf.mxu0 }
 0x47c   : > { %v4036_v14 = vpop.f32.mrf.mxu0 }
 0x47e   : > { %v3392_v15 = vpop.f32.mrf.mxu0 }
 0x47f   : > { %v1188_v18 = vadd.f32 %v3392_v15, %v3109_v16 }
 0x480   : > { %v1179_v17 = vpop.f32.mrf.mxu0 }
 0x481   : > { %v1180_v20 = vadd.f32 %v3109_v16, %v1179_v17  ;;  %v1341_v24 = vmul.f32 0.35355338, %v1188_v18 }
 0x482   : > { %v3393_v19 = vpop.f32.mrf.mxu0 }
 0x483   : > { %v1339_v26 = vmul.f32 0.35355338, %v1180_v20  ;;  %v1343_v32 = vpack.c.bf16 %v1341_v24, %v1341_v24 }
 0x484   : > { %v1182_v21 = vpop.f32.mrf.mxu0 }
 0x485   : > { %v1183_v23 = vadd.f32 %v3109_v16, %v1182_v21 }
 0x486   : > { %v3408_v25 = vpop.f32.mrf.mxu0 }
 0x487   : > { %v1340_v27 = vmul.f32 0.35355338, %v1183_v23  ;;  %v1334_v28 = vadd.f32 %v3408_v25, %v3129_v22  ;;  %v3631_v25 = vld [vmem:[%s3891_s26 + $0x60] sm:$0xff]  }
 0x488   : > { %v1325_v29 = vpop.f32.mrf.mxu0 }
 0x489   : > { %v1342_v30 = vpack.c.bf16 %v1340_v27, %v1339_v26  ;;  %v1439_v31 = vpack.c.bf16 %v1334_v28, %v1334_v28  ;;  %v1326_v37 = vadd.f32 %v3129_v22, %v1325_v29 }
 0x48a   : > { %v3409_v34 = vpop.f32.mrf.mxu0 }
 0x48b   : > { %v1447_v35 = vsel %vm1062_vm3, %v1439_v31, 0  ;;  %3414 = vmatprep.mubr.msk.bf16.mxu1 %vm960_vm2, %v1342_v30  ;;  %3563 = vmatprep.subr.msk.bf16.mxu0 %vm1062_vm3, %v1439_v31 }
 0x48c   : > { %v1328_v36 = vpop.f32.mrf.mxu0  ;;  %3415 = vmatmul.mubr.msk.bf16.vlgmr.msra.gmra.mxu1 %vm960_vm2, %v1343_v32  ;;  %3419 = vmatpush3.bf16.msra.mxu0 %v1447_v35 }
 0x48d   : > { %v1329_v38 = vadd.f32 %v3129_v22, %v1328_v36  ;;  %3433 = vmatpush3.bf16.msra.mxu1 %v1568_v56 }
 0x48e   : > { %3446 = vmatprep.subr.bf16.mxu1 %v3630_v57 }
 0x48f   : > { %v1438_v39 = vpack.c.bf16 %v1329_v38, %v1326_v37 }
 0x491   : > { %3420 = vmatprep.subr.bf16.mxu0 %v1438_v39 }
 0x492   : > { %3421 = vmatpush3.bf16.msra.mxu0 %v1438_v39 }
 0x54c   : > { %v3416_v40 = vpop.f32.mrf.mxu1 }
 0x54d   : > { %v1401_v44 = vadd.f32 %v3416_v40, %v3995_v33 }
 0x54e   : > { %v1392_v41 = vpop.f32.mrf.mxu1 }
 0x54f   : > { %v1393_v42 = vadd.f32 %v1392_v41, %v3995_v33  ;;  %v1412_v49 = vsel %vm1021_vm5, %v1401_v44, -inf }
 0x550   : > { %v3417_v43 = vpop.f32.mrf.mxu1 }
 0x551   : > { %v1406_v45 = vsel %vm1021_vm5, %v1393_v42, -inf }
 0x552   : > { %v1395_v46 = vpop.f32.mrf.mxu1  ;;  %1407 = vmax.xlane.f32.xlu1 %v1406_v45  ;;  %v3633_v45 = vld [vmem:[%s3891_s26 + $0x20] sm:$0xff]  }
 0x553   : > { %v1396_v47 = vadd.f32 %v1395_v46, %v3995_v33 }
 0x555   : > { %v1409_v48 = vsel %vm1021_vm5, %v1396_v47, -inf }
 0x556   : > { %1410 = vmax.xlane.f32.xlu0 %v1409_v48  ;;  %1413 = vmax.xlane.f32.xlu1 %v1412_v49 }
 0x55a   : > { %1041 = vadd.xlane.f32.xlu0 %v1040_v52  ;;  %1044 = vadd.xlane.f32.xlu1 %v1043_v53  ;;  %v3634_v52 = vld [vmem:[%s3891_s26 + $0xa8] sm:$0xff]  }
 0x55e   : > { %1047 = vadd.xlane.f32.xlu0 %v1046_v54 }
 0x5db   : > { %v1408_v58 = vpop.xlane.xlu1 %1407 }
 0x5dc   : > { %v1415_v59 = vsub.f32 %v1393_v42, %v1408_v58 }
 0x5de   : > { %v1418_v60 = vmul.f32 1.442695, %v1415_v59 }
 0x5df   : > { %v1411_v61 = vpop.xlane.xlu0 %1410  ;;  %v1414_v62 = vpop.xlane.xlu1 %1413 }
 0x5e0   : > { %3664 = vpow2.f32 %v1418_v60  ;;  %v1416_v63 = vsub.f32 %v1396_v47, %v1411_v61  ;;  %v1417_v0 = vsub.f32 %v1401_v44, %v1414_v62  ;;  %v3158_v47 = vld [vmem:[%s3901_s21 + $0x6] ss:$0 sm:$0xff] }
 0x5e2   : > { %v1420_v1 = vmul.f32 1.442695, %v1416_v63  ;;  %v1422_v2 = vmul.f32 1.442695, %v1417_v0  ;;  %v3636_v63 = vld [vmem:[%s3891_s26 + $0x38] sm:$0xff]  }
 0x5e3   : > { %v1042_v3 = vpop.xlane.xlu0 %1041  ;;  %v1045_v4 = vpop.xlane.xlu1 %1044 }
 0x5e4   : > { %3666 = vpow2.f32 %v1420_v1 }
 0x5e5   : > { %3668 = vpow2.f32 %v1422_v2 }
 0x5e6   : > { %3670 = vrcp.f32 %v1042_v3 }
 0x5e7   : > { %3672 = vrcp.f32 %v1045_v4  ;;  %v1048_v5 = vpop.xlane.xlu0 %1047 }
 0x5e8   : > { %3674 = vrcp.f32 %v1048_v5  ;;  %v3148_v5 = vld [vmem:[%s3901_s21 + $0x2] ss:$0 sm:$0xff] }
 0x5ed   : > { %v3665_v6 = vpop.eup %3664 }
 0x5ee   : > { %v1424_v7 = vsel %vm1021_vm5, %v3665_v6, 0.0 }
 0x5ef   : > { %1425 = vadd.xlane.f32.xlu1 %v1424_v7 }
 0x5f1   : > { %v3667_v8 = vpop.eup %3666 }
 0x5f2   : > { %v3669_v9 = vpop.eup %3668  ;;  %v1427_v10 = vsel %vm1021_vm5, %v3667_v8, 0.0  ;;  %v1436_v13 = vpack.c.bf16 %v3667_v8, %v3665_v6 }
 0x5f3   : > { %v3671_v15 = vpop.eup %3670  ;;  %v1430_v16 = vsel %vm1021_vm5, %v3669_v9, 0.0  ;;  %1428 = vadd.xlane.f32.xlu0 %v1427_v10  ;;  %v1437_v17 = vpack.c.bf16 %v3669_v9, %v3669_v9 }
 0x5f4   : > { %v3673_v18 = vpop.eup %3672  ;;  %1431 = vadd.xlane.f32.xlu1 %v1430_v16  ;;  %3422 = vmatprep.mubr.msk.bf16.mxu0 %vm1021_vm5, %v1436_v13  ;;  %v1114_v19 = vmul.f32 %v3671_v15, %v4034_v12  ;;  %v3138_v12 = vld [vmem:[%s3896_s18 + $0x4] sm:$0xf]  ;;  %v3168_v13 = vld [vmem:[%s3901_s21 + $0xa] ss:$0 sm:$0xff] }
 0x5f5   : > { %v3675_v20 = vpop.eup %3674  ;;  %3423 = vmatmul.mubr.msk.bf16.vlgmr.msra.gmra.mxu0 %vm1021_vm5, %v1437_v17  ;;  %v1115_v21 = vmul.f32 %v3673_v18, %v4036_v14  ;;  %3564 = vmatprep.subr.msk.bf16.mxu0 %vm1062_vm3, %v3138_v12  ;;  %v3632_v14 = vld [vmem:[%s3891_s26 + $0x28] sm:$0xff]  }
 0x5f6   : > { %v1116_v22 = vmul.f32 %v3675_v20, %v4032_v11  ;;  %v1511_v11 = vsel %vm1062_vm3, %v3138_v12, 0  ;;  %v3637_v12 = vld [vmem:[%s3891_s26 + $0x30] sm:$0xff]  }
 0x5f7   : > { %v1118_v23 = vpack.c.bf16 %v1115_v21, %v1114_v19  ;;  %3427 = vmatpush3.bf16.msra.mxu0 %v1511_v11 }
 0x5f8   : > { %v1119_v24 = vpack.c.bf16 %v1116_v22, %v1116_v22  ;;  %3438 = vmatprep.subr.bf16.mxu0 %v3632_v14 }
 0x5f9   : > { %3434 = vmatprep.mubr.msk.bf16.mxu1 %vm960_vm2, %v1118_v23 }
 0x5fa   : > { %3435 = vmatmul.mubr.msk.bf16.vlgmr.msra.gmra.mxu1 %vm960_vm2, %v1119_v24 }
 0x5fb   : > { %3447 = vmatpush3.bf16.msra.mxu1 %v3630_v57  ;;  %3450 = vmatprep.mubr.msk.bf16.mxu1 %vm669_vm1, %v3961_v51  ;;  %v3635_v57 = vld [vmem:[%s3891_s26 + $0xa0] sm:$0xff]  }
 0x5fc   : > { %3448 = vmatprep.subr.bf16.mxu1 %v3631_v25 }
 0x5ff   : > { %3449 = vmatpush3.bf16.msra.mxu1 %v3631_v25 }
 0x602   : > { %3451 = vmatmul.mubr.msk.bf16.vlgmr.msra.gmra.mxu1 %vm669_vm1, %v3959_v50 }
 0x678   : > { %v1426_v26 = vpop.xlane.xlu1 %1425 }
 0x679   : > { %3676 = vrcp.f32 %v1426_v26 }
 0x67c   : > { %v1429_v28 = vpop.xlane.xlu0 %1428 }
 0x67d   : > { %v1432_v27 = vpop.xlane.xlu1 %1431 }
 0x67e   : > { %3678 = vrcp.f32 %v1432_v27 }
 0x67f   : > { %3680 = vrcp.f32 %v1429_v28  ;;  %v3638_v28 = vld [vmem:[%s3891_s26 + $0xb8] sm:$0xff]  }
 0x686   : > { %v3677_v31 = vpop.eup %3676 }
 0x68b   : > { %v3679_v34 = vpop.eup %3678 }
 0x68c   : > { %v3681_v36 = vpop.eup %3680 }
 0x6b5   : > { %v3424_v29 = vpop.f32.mrf.mxu0 }
 0x6b6   : > { %v1499_v37 = vmul.f32 %v3679_v34, %v3424_v29 }
 0x6b7   : > { %v1483_v30 = vpop.f32.mrf.mxu0 }
 0x6b8   : > { %v1497_v39 = vmul.f32 %v3677_v31, %v1483_v30  ;;  %v1503_v44 = vpack.c.bf16 %v1499_v37, %v1499_v37  ;;  %v3639_v30 = vld [vmem:[%s3891_s26 + $0xb0] sm:$0xff]  }
 0x6b9   : > { %v3425_v32 = vpop.f32.mrf.mxu0 }
 0x6ba   : > { %v4079_v35 = vpop.f32.mrf.mxu1 }
 0x6bb   : > { %v1486_v38 = vpop.f32.mrf.mxu0 }
 0x6bc   : > { %v1498_v40 = vmul.f32 %v3681_v36, %v1486_v38  ;;  %v4081_v41 = vpop.f32.mrf.mxu1 }
 0x6be   : > { %v1502_v42 = vpack.c.bf16 %v1498_v40, %v1497_v39  ;;  %v3437_v43 = vpop.f32.mrf.mxu1  ;;  %v3185_v40 = vld [vmem:[%s3901_s21 + $0x3] ss:$0 sm:$0xff] }
 0x6c0   : > { %3428 = vmatprep.mubr.msk.bf16.mxu0 %vm960_vm2, %v1502_v42  ;;  %v4085_v46 = vpop.f32.mrf.mxu1 }
 0x6c1   : > { %3429 = vmatmul.mubr.msk.bf16.vlgmr.msra.gmra.mxu0 %vm960_vm2, %v1503_v44 }
 0x6c2   : > { %3439 = vmatpush3.bf16.msra.mxu0 %v3632_v14  ;;  %3442 = vmatprep.mubr.msk.bf16.mxu0 %vm669_vm1, %v3961_v51  ;;  %v3452_v48 = vpop.f32.mrf.mxu1 }
 0x6c3   : > { %v1759_v49 = vadd.f32 %v3452_v48, %v3158_v47  ;;  %3440 = vmatprep.subr.bf16.mxu0 %v3633_v45 }
 0x6c4   : > { %v1750_v53 = vpop.f32.mrf.mxu1 }
 0x6c5   : > { %v1843_v54 = vpack.c.bf16 %v1759_v49, %v1759_v49  ;;  %v1751_v59 = vadd.f32 %v3158_v47, %v1750_v53 }
 0x6c6   : > { %3441 = vmatpush3.bf16.msra.mxu0 %v3633_v45  ;;  %v3453_v55 = vpop.f32.mrf.mxu1 }
 0x6c7   : > { %v1854_v56 = vsel %vm960_vm2, %v1843_v54, 0  ;;  %3566 = vmatprep.subr.msk.bf16.mxu1 %vm960_vm2, %v1843_v54  ;;  %3454 = vmatprep.subr.bf16.mxu0 %v3634_v52  ;;  %v3205_v54 = vld [vmem:[%s3901_s21 + $0xb] ss:$0 sm:$0xff] }
 0x6c8   : > { %v1753_v58 = vpop.f32.mrf.mxu1  ;;  %3463 = vmatpush3.bf16.xpose.msra.mxu1 %v1854_v56 }
 0x6c9   : > { %v1754_v60 = vadd.f32 %v3158_v47, %v1753_v58  ;;  %3443 = vmatmul.mubr.msk.bf16.vlgmr.msra.gmra.mxu0 %vm669_vm1, %v3959_v50 }
 0x6ca   : > { %3455 = vmatpush3.bf16.msra.mxu0 %v3634_v52  ;;  %3458 = vmatprep.mubr.msk.bf16.mxu0 %vm669_vm1, %v3961_v51 }
 0x6cb   : > { %v1842_v61 = vpack.c.bf16 %v1754_v60, %v1751_v59  ;;  %3456 = vmatprep.subr.bf16.mxu0 %v3635_v57 }
 0x6cd   : > { %3567 = vmatprep.subr.msk.bf16.mxu1 %vm960_vm2, %v1842_v61  ;;  %v1851_v62 = vsel %vm960_vm2, %v1842_v61, 0 }
 0x6ce   : > { %3457 = vmatpush3.bf16.msra.mxu0 %v3635_v57 }
 0x6d0   : > { %3465 = vmatpush3.bf16.xpose.msra.mxu1 %v1851_v62 }
 0x6d1   : > { %3459 = vmatmul.mubr.msk.bf16.vlgmr.msra.gmra.mxu0 %vm669_vm1, %v3959_v50  ;;  %3484 = vmatprep.subr.bf16.mxu1 %v3636_v63 }
 0x781   : > { %v4104_v0 = vpop.f32.mrf.mxu0 }
 0x783   : > { %v4106_v1 = vpop.f32.mrf.mxu0 }
 0x785   : > { %v3431_v2 = vpop.f32.mrf.mxu0 }
 0x787   : > { %v4108_v3 = vpop.f32.mrf.mxu0 }
 0x789   : > { %v3444_v4 = vpop.f32.mrf.mxu0 }
 0x78a   : > { %v1686_v7 = vadd.f32 %v3444_v4, %v3148_v5 }
 0x78b   : > { %v1677_v6 = vpop.f32.mrf.mxu0 }
 0x78c   : > { %v1678_v9 = vadd.f32 %v3148_v5, %v1677_v6  ;;  %v1839_v16 = vmul.f32 0.35355338, %v1686_v7 }
 0x78d   : > { %v3445_v8 = vpop.f32.mrf.mxu0 }
 0x78e   : > { %v1837_v18 = vmul.f32 0.35355338, %v1678_v9  ;;  %v1841_v24 = vpack.c.bf16 %v1839_v16, %v1839_v16 }
 0x78f   : > { %v1680_v10 = vpop.f32.mrf.mxu0 }
 0x790   : > { %v1681_v15 = vadd.f32 %v3148_v5, %v1680_v10 }
 0x791   : > { %v3460_v17 = vpop.f32.mrf.mxu0 }
 0x792   : > { %v1838_v19 = vmul.f32 0.35355338, %v1681_v15  ;;  %v1832_v20 = vadd.f32 %v3460_v17, %v3168_v13 }
 0x793   : > { %v1823_v21 = vpop.f32.mrf.mxu0 }
 0x794   : > { %v1840_v22 = vpack.c.bf16 %v1838_v19, %v1837_v18  ;;  %v1937_v23 = vpack.c.bf16 %v1832_v20, %v1832_v20  ;;  %v1824_v26 = vadd.f32 %v3168_v13, %v1823_v21 }
 0x795   : > { %v3461_v25 = vpop.f32.mrf.mxu0 }
 0x796   : > { %v1945_v11 = vsel %vm1062_vm3, %v1937_v23, 0  ;;  %3466 = vmatprep.mubr.msk.bf16.mxu1 %vm960_vm2, %v1840_v22  ;;  %3568 = vmatprep.subr.msk.bf16.mxu0 %vm1062_vm3, %v1937_v23 }
 0x797   : > { %v1826_v14 = vpop.f32.mrf.mxu0  ;;  %3467 = vmatmul.mubr.msk.bf16.vlgmr.msra.gmra.mxu1 %vm960_vm2, %v1841_v24  ;;  %3471 = vmatpush3.bf16.msra.mxu0 %v1945_v11 }
 0x798   : > { %v1827_v27 = vadd.f32 %v3168_v13, %v1826_v14  ;;  %3485 = vmatpush3.bf16.msra.mxu1 %v3636_v63  ;;  %3488 = vmatprep.mubr.msk.bf16.mxu1 %vm669_vm1, %v3961_v51  ;;  %v3177_v14 = vld [vmem:[%s3896_s18 + $0x8] sm:$0xf] }
 0x799   : > { %3486 = vmatprep.subr.bf16.mxu1 %v3637_v12 }
 0x79a   : > { %v1936_v29 = vpack.c.bf16 %v1827_v27, %v1824_v26  ;;  %v2009_v26 = vsel %vm1062_vm3, %v3177_v14, 0  ;;  %v3640_v27 = vld [vmem:[%s3891_s26 + $0x78] sm:$0xff]  }
 0x79c   : > { %3472 = vmatprep.subr.bf16.mxu0 %v1936_v29  ;;  %3487 = vmatpush3.bf16.msra.mxu1 %v3637_v12 }
 0x79d   : > { %3473 = vmatpush3.bf16.msra.mxu0 %v1936_v29  ;;  %3500 = vmatprep.subr.bf16.mxu1 %v3638_v28 }
 0x79e   : > { %3569 = vmatprep.subr.msk.bf16.mxu0 %vm1062_vm3, %v3177_v14 }
 0x79f   : > { %3489 = vmatmul.mubr.msk.bf16.vlgmr.msra.gmra.mxu1 %vm669_vm1, %v3959_v50 }
 0x7a0   : > { %3501 = vmatpush3.bf16.msra.mxu1 %v3638_v28  ;;  %3504 = vmatprep.mubr.msk.bf16.mxu1 %vm669_vm1, %v3961_v51 }
 0x7a1   : > { %3502 = vmatprep.subr.bf16.mxu1 %v3639_v30 }
 0x7a4   : > { %3503 = vmatpush3.bf16.msra.mxu1 %v3639_v30 }
 0x7a7   : > { %3505 = vmatmul.mubr.msk.bf16.vlgmr.msra.gmra.mxu1 %vm669_vm1, %v3959_v50 }
 0x857   : > { %v3468_v31 = vpop.f32.mrf.mxu1 }
 0x858   : > { %v1899_v37 = vadd.f32 %v3468_v31, %v3995_v33 }
 0x859   : > { %v1890_v32 = vpop.f32.mrf.mxu1 }
 0x85a   : > { %v1891_v34 = vadd.f32 %v1890_v32, %v3995_v33  ;;  %v1910_v47 = vsel %vm1021_vm5, %v1899_v37, -inf }
 0x85b   : > { %v3469_v36 = vpop.f32.mrf.mxu1 }
 0x85c   : > { %v1904_v38 = vsel %vm1021_vm5, %v1891_v34, -inf }
 0x85d   : > { %v1893_v39 = vpop.f32.mrf.mxu1  ;;  %1905 = vmax.xlane.f32.xlu0 %v1904_v38 }
 0x85e   : > { %v1894_v42 = vadd.f32 %v1893_v39, %v3995_v33 }
 0x85f   : > { %v3490_v43 = vpop.f32.mrf.mxu1 }
 0x860   : > { %v4132_v44 = vadd.f32 %v3490_v43, %v3185_v40  ;;  %v1907_v45 = vsel %vm1021_vm5, %v1894_v42, -inf }
 0x861   : > { %v2121_v48 = vpop.f32.mrf.mxu1  ;;  %1908 = vmax.xlane.f32.xlu1 %v1907_v45  ;;  %1911 = vmax.xlane.f32.xlu0 %v1910_v47 }
 0x862   : > { %v2122_v52 = vadd.f32 %v3185_v40, %v2121_v48  ;;  %v3641_v48 = vld [vmem:[%s3891_s26 + $0x70] sm:$0xff]  }
 0x863   : > { %v3491_v49 = vpop.f32.mrf.mxu1 }
 0x864   : > { %v4137_v57 = vmul.f32 0.35355338, %v2122_v52  ;;  %v1613_v49 = vadd.f32 %v4079_v35, %v4104_v0 }
 0x865   : > { %v2124_v53 = vpop.f32.mrf.mxu1 }
 0x866   : > { %v2125_v55 = vadd.f32 %v3185_v40, %v2124_v53  ;;  %v1605_v53 = vadd.f32 %v4081_v41, %v4106_v1 }
 0x867   : > { %v3506_v56 = vpop.f32.mrf.mxu1 }
 0x868   : > { %v4139_v58 = vmul.f32 0.35355338, %v2125_v55  ;;  %v2276_v59 = vadd.f32 %v3506_v56, %v3205_v54 }
 0x869   : > { %v2267_v60 = vpop.f32.mrf.mxu1 }
 0x86a   : > { %v2284_v61 = vpack.c.bf16 %v4139_v58, %v4137_v57  ;;  %v2381_v62 = vpack.c.bf16 %v2276_v59, %v2276_v59  ;;  %v2268_v5 = vadd.f32 %v3205_v54, %v2267_v60  ;;  %v3195_v57 = vld [vmem:[%s3901_s21 + $0x7] ss:$0 sm:$0xff]  ;;  %s4350_s21 = scalar_lea.vmem %s4316_s6, %s3872_s15  ;;  %s4353_s15 = sld [smem:[#allocation3_spill]] }
 0x86b   : > { %v3507_v63 = vpop.f32.mrf.mxu1 }
 0x86c   : > { %v2389_v2 = vsel %vm1062_vm3, %v2381_v62, 0  ;;  %3572 = vmatprep.subr.msk.bf16.mxu1 %vm1062_vm3, %v2381_v62 }
 0x86d   : > { %v2270_v4 = vpop.f32.mrf.mxu1  ;;  %3517 = vmatpush3.bf16.msra.mxu1 %v2389_v2 }
 0x86e   : > { %v2271_v6 = vadd.f32 %v3205_v54, %v2270_v4 }
 0x870   : > { %v2380_v7 = vpack.c.bf16 %v2271_v6, %v2268_v5  ;;  %p3234_p8 = scmp.ne.s32.totalorder %s4353_s15, 1 }
 0x872   : > { %3518 = vmatprep.subr.bf16.mxu1 %v2380_v7 }
 0x873   : > { %3519 = vmatpush3.bf16.msra.mxu1 %v2380_v7 }
 0x8e6   : > { %v1906_v8 = vpop.xlane.xlu0 %1905 }
 0x8e7   : > { %v1913_v9 = vsub.f32 %v1891_v34, %v1906_v8 }
 0x8e9   : > { %v1916_v10 = vmul.f32 1.442695, %v1913_v9 }
 0x8ea   : > { %v1909_v13 = vpop.xlane.xlu1 %1908  ;;  %v1912_v15 = vpop.xlane.xlu0 %1911 }
 0x8eb   : > { %3682 = vpow2.f32 %v1916_v10  ;;  %v1914_v16 = vsub.f32 %v1894_v42, %v1909_v13  ;;  %v1915_v17 = vsub.f32 %v1899_v37, %v1912_v15 }
 0x8ed   : > { %v1918_v18 = vmul.f32 1.442695, %v1914_v16  ;;  %v1920_v19 = vmul.f32 1.442695, %v1915_v17 }
 0x8ef   : > { %3684 = vpow2.f32 %v1918_v18 }
 0x8f0   : > { %3686 = vpow2.f32 %v1920_v19 }
 0x8f8   : > { %v3683_v20 = vpop.eup %3682 }
 0x8f9   : > { %v1922_v21 = vsel %vm1021_vm5, %v3683_v20, 0.0 }
 0x8fa   : > { %1923 = vadd.xlane.f32.xlu1 %v1922_v21 }
 0x8fc   : > { %v3685_v22 = vpop.eup %3684 }
 0x8fd   : > { %v3687_v23 = vpop.eup %3686  ;;  %v1925_v24 = vsel %vm1021_vm5, %v3685_v22, 0.0  ;;  %v1934_v25 = vpack.c.bf16 %v3685_v22, %v3683_v20 }
 0x8fe   : > { %1926 = vadd.xlane.f32.xlu0 %v1925_v24  ;;  %v1928_v12 = vsel %vm1021_vm5, %v3687_v23, 0.0  ;;  %v1935_v11 = vpack.c.bf16 %v3687_v23, %v3687_v23 }
 0x8ff   : > { %1929 = vadd.xlane.f32.xlu1 %v1928_v12  ;;  %3474 = vmatprep.mubr.msk.bf16.mxu0 %vm1021_vm5, %v1934_v25 }
 0x900   : > { %3475 = vmatmul.mubr.msk.bf16.vlgmr.msra.gmra.mxu0 %vm1021_vm5, %v1935_v11 }
 0x901   : > { %3479 = vmatpush3.bf16.msra.mxu0 %v2009_v26 }
 0x902   : > { %3492 = vmatprep.subr.bf16.mxu0 %v3640_v27 }
 0x983   : > { %v1924_v28 = vpop.xlane.xlu1 %1923 }
 0x984   : > { %3688 = vrcp.f32 %v1924_v28 }
 0x987   : > { %v1927_v30 = vpop.xlane.xlu0 %1926 }
 0x988   : > { %v1930_v29 = vpop.xlane.xlu1 %1929 }
 0x989   : > { %3690 = vrcp.f32 %v1930_v29 }
 0x98a   : > { %3692 = vrcp.f32 %v1927_v30 }
 0x991   : > { %v3689_v34 = vpop.eup %3688 }
 0x996   : > { %v3691_v37 = vpop.eup %3690 }
 0x997   : > { %v3693_v38 = vpop.eup %3692 }
 0x9c0   : > { %v3476_v31 = vpop.f32.mrf.mxu0 }
 0x9c1   : > { %v1997_v39 = vmul.f32 %v3691_v37, %v3476_v31  ;;  %v3214_v31 = vld [vmem:[%s3896_s18 + $0xc] sm:$0xf] }
 0x9c2   : > { %v1981_v32 = vpop.f32.mrf.mxu0  ;;  %3573 = vmatprep.subr.msk.bf16.mxu1 %vm1062_vm3, %v3214_v31 }
 0x9c3   : > { %v1995_v42 = vmul.f32 %v3689_v34, %v1981_v32  ;;  %v2001_v47 = vpack.c.bf16 %v1997_v39, %v1997_v39  ;;  %v2453_v32 = vsel %vm1062_vm3, %v3214_v31, 0 }
 0x9c4   : > { %v3477_v36 = vpop.f32.mrf.mxu0 }
 0x9c6   : > { %v1984_v40 = vpop.f32.mrf.mxu0 }
 0x9c7   : > { %v1996_v43 = vmul.f32 %v3693_v38, %v1984_v40 }
 0x9c9   : > { %v2000_v45 = vpack.c.bf16 %v1996_v43, %v1995_v42 }
 0x9cb   : > { %3480 = vmatprep.mubr.msk.bf16.mxu0 %vm960_vm2, %v2000_v45 }
 0x9cc   : > { %3481 = vmatmul.mubr.msk.bf16.vlgmr.msra.gmra.mxu0 %vm960_vm2, %v2001_v47 }
 0x9cd   : > { %3493 = vmatpush3.bf16.msra.mxu0 %v3640_v27  ;;  %3496 = vmatprep.mubr.msk.bf16.mxu0 %vm669_vm1, %v3961_v51 }
 0x9ce   : > { %3494 = vmatprep.subr.bf16.mxu0 %v3641_v48 }
 0x9d1   : > { %3495 = vmatpush3.bf16.msra.mxu0 %v3641_v48 }
 0x9d4   : > { %3497 = vmatmul.mubr.msk.bf16.vlgmr.msra.gmra.mxu0 %vm669_vm1, %v3959_v50  ;;  %v1608_v50 = vadd.f32 %v4085_v46, %v4108_v3  ;;  %v2283_v3 = vmul.f32 0.35355338, %v4132_v44 }
 0x9d5   : > { %3512 = vmatprep.mubr.msk.bf16.mxu0 %vm960_vm2, %v2284_v61 }
 0x9d6   : > { %v2285_v5 = vpack.c.bf16 %v2283_v3, %v2283_v3 }
 0xa8c   : > { %v3482_v52 = vpop.f32.mrf.mxu0 }
 0xa8d   : > { %v4169_v54 = vadd.f32 %v3482_v52, %v1613_v49 }
 0xa8e   : > { %v2045_v51 = vpop.f32.mrf.mxu0 }
 0xa8f   : > { %v4171_v55 = vadd.f32 %v2045_v51, %v1605_v53 }
 0xa90   : > { %v3483_v56 = vpop.f32.mrf.mxu0 }
 0xa92   : > { %v2048_v59 = vpop.f32.mrf.mxu0 }
 0xa93   : > { %v4176_v58 = vadd.f32 %v2048_v59, %v1608_v50 }
 0xa94   : > { %v3498_v60 = vpop.f32.mrf.mxu0 }
 0xa95   : > { %v2203_v61 = vadd.f32 %v3498_v60, %v3195_v57 }
 0xa96   : > { %v2194_v35 = vpop.f32.mrf.mxu0 }
 0xa97   : > { %v2287_v0 = vpack.c.bf16 %v2203_v61, %v2203_v61  ;;  %v2195_v63 = vadd.f32 %v3195_v57, %v2194_v35  ;;  %v3724_v61 = vld [vmem:[#allocation2 + $0x10] sm:$0xff] }
 0xa98   : > { %v3499_v62 = vpop.f32.mrf.mxu0 }
 0xa99   : > { %v2298_v41 = vsel %vm960_vm2, %v2287_v0, 0  ;;  %3570 = vmatprep.subr.msk.bf16.mxu0 %vm960_vm2, %v2287_v0  ;;  %v3725_v0 = vld [vmem:[#allocation2] sm:$0xff] }
 0xa9a   : > { %v2197_v1 = vpop.f32.mrf.mxu0  ;;  %3509 = vmatpush3.bf16.xpose.msra.mxu0 %v2298_v41  ;;  %v3217_v41 = vld [vmem:[%s4350_s21] ss:$0 sm:$0xff] }
 0xa9b   : > { %v2198_v2 = vadd.f32 %v3195_v57, %v2197_v1 }
 0xa9d   : > { %v2286_v4 = vpack.c.bf16 %v2198_v2, %v2195_v63 }
 0xa9f   : > { %3571 = vmatprep.subr.msk.bf16.mxu0 %vm960_vm2, %v2286_v4  ;;  %v2295_v46 = vsel %vm960_vm2, %v2286_v4, 0 }
 0xaa2   : > { %3511 = vmatpush3.bf16.xpose.msra.mxu0 %v2295_v46 }
 0xaa9   : > { %3513 = vmatmul.mubr.msk.bf16.vlgmr.msra.gmra.mxu0 %vm960_vm2, %v2285_v5 }
 0xb69   : > { %v3514_v6 = vpop.f32.mrf.mxu0 }
 0xb6a   : > { %v2343_v10 = vadd.f32 %v3514_v6, %v3995_v33 }
 0xb6b   : > { %v2334_v7 = vpop.f32.mrf.mxu0 }
 0xb6c   : > { %v2335_v8 = vadd.f32 %v2334_v7, %v3995_v33  ;;  %v2354_v44 = vsel %vm1021_vm5, %v2343_v10, -inf }
 0xb6d   : > { %v3515_v9 = vpop.f32.mrf.mxu0 }
 0xb6e   : > { %v2348_v13 = vsel %vm1021_vm5, %v2335_v8, -inf }
 0xb6f   : > { %v2337_v15 = vpop.f32.mrf.mxu0  ;;  %2349 = vmax.xlane.f32.xlu0 %v2348_v13 }
 0xb70   : > { %v2338_v16 = vadd.f32 %v2337_v15, %v3995_v33 }
 0xb72   : > { %v2351_v17 = vsel %vm1021_vm5, %v2338_v16, -inf }
 0xb73   : > { %2352 = vmax.xlane.f32.xlu1 %v2351_v17  ;;  %2355 = vmax.xlane.f32.xlu0 %v2354_v44 }
 0xbf8   : > { %v2350_v18 = vpop.xlane.xlu0 %2349 }
 0xbf9   : > { %v2357_v19 = vsub.f32 %v2335_v8, %v2350_v18 }
 0xbfb   : > { %v2360_v20 = vmul.f32 1.442695, %v2357_v19 }
 0xbfc   : > { %v2353_v21 = vpop.xlane.xlu1 %2352  ;;  %v2356_v22 = vpop.xlane.xlu0 %2355 }
 0xbfd   : > { %3694 = vpow2.f32 %v2360_v20  ;;  %v2358_v23 = vsub.f32 %v2338_v16, %v2353_v21  ;;  %v2359_v24 = vsub.f32 %v2343_v10, %v2356_v22 }
 0xbff   : > { %v2362_v25 = vmul.f32 1.442695, %v2358_v23  ;;  %v2364_v12 = vmul.f32 1.442695, %v2359_v24  ;;  %v3642_v23 = vld [vmem:[%s3918_s5 + $0x8] sm:$0xff]   ;;  %v3643_v24 = vld [vmem:[%s3918_s5] sm:$0xff]  }
 0xc00   : > { %3530 = vmatprep.subr.bf16.mxu0 %v3642_v23 }
 0xc01   : > { %3696 = vpow2.f32 %v2362_v25  ;;  %3531 = vmatpush3.bf16.msra.mxu0 %v3642_v23 }
 0xc02   : > { %3698 = vpow2.f32 %v2364_v12  ;;  %3532 = vmatprep.subr.bf16.mxu0 %v3643_v24 }
 0xc05   : > { %3533 = vmatpush3.bf16.msra.mxu0 %v3643_v24 }
 0xc0a   : > { %v3695_v33 = vpop.eup %3694 }
 0xc0b   : > { %v2366_v11 = vsel %vm1021_vm5, %v3695_v33, 0.0 }
 0xc0c   : > { %2367 = vadd.xlane.f32.xlu1 %v2366_v11 }
 0xc0e   : > { %v3697_v14 = vpop.eup %3696 }
 0xc0f   : > { %v3699_v26 = vpop.eup %3698  ;;  %v2369_v27 = vsel %vm1021_vm5, %v3697_v14, 0.0  ;;  %v2378_v28 = vpack.c.bf16 %v3697_v14, %v3695_v33 }
 0xc10   : > { %2370 = vadd.xlane.f32.xlu0 %v2369_v27  ;;  %v2372_v29 = vsel %vm1021_vm5, %v3699_v26, 0.0  ;;  %v2379_v30 = vpack.c.bf16 %v3699_v26, %v3699_v26 }
 0xc11   : > { %2373 = vadd.xlane.f32.xlu1 %v2372_v29  ;;  %3520 = vmatprep.mubr.msk.bf16.mxu1 %vm1021_vm5, %v2378_v28 }
 0xc12   : > { %3521 = vmatmul.mubr.msk.bf16.vlgmr.msra.gmra.mxu1 %vm1021_vm5, %v2379_v30 }
 0xc13   : > { %3525 = vmatpush3.bf16.msra.mxu1 %v2453_v32  ;;  %v3218_v32 = vld [vmem:[%s4351_s24] ss:$0 sm:$0xff] }
 0xc95   : > { %v2368_v34 = vpop.xlane.xlu1 %2367 }
 0xc96   : > { %3700 = vrcp.f32 %v2368_v34 }
 0xc99   : > { %v2371_v37 = vpop.xlane.xlu0 %2370 }
 0xc9a   : > { %v2374_v36 = vpop.xlane.xlu1 %2373 }
 0xc9b   : > { %3702 = vrcp.f32 %v2374_v36 }
 0xc9c   : > { %3704 = vrcp.f32 %v2371_v37 }
 0xca3   : > { %v3701_v40 = vpop.eup %3700 }
 0xca8   : > { %v3703_v43 = vpop.eup %3702 }
 0xca9   : > { %v3705_v45 = vpop.eup %3704 }
 0xcd2   : > { %v3522_v38 = vpop.f32.mrf.mxu1 }
 0xcd3   : > { %v2441_v47 = vmul.f32 %v3703_v43, %v3522_v38 }
 0xcd4   : > { %v2425_v39 = vpop.f32.mrf.mxu1 }
 0xcd5   : > { %v2439_v49 = vmul.f32 %v3701_v40, %v2425_v39  ;;  %v2445_v51 = vpack.c.bf16 %v2441_v47, %v2441_v47  ;;  %v3219_v40 = vld [vmem:[%s4352_s29] ss:$0 sm:$0xff] }
 0xcd6   : > { %v3523_v42 = vpop.f32.mrf.mxu1 }
 0xcd8   : > { %v2428_v48 = vpop.f32.mrf.mxu1 }
 0xcd9   : > { %v2440_v52 = vmul.f32 %v3705_v45, %v2428_v48 }
 0xcdb   : > { %v2444_v53 = vpack.c.bf16 %v2440_v52, %v2439_v49 }
 0xcdd   : > { %3526 = vmatprep.mubr.msk.bf16.mxu1 %vm960_vm2, %v2444_v53  ;;  %v3644_v53 = vld [vmem:[%s3932_s25 + $0x38] sm:$0xff]  }
 0xcde   : > { %3527 = vmatmul.mubr.msk.bf16.vlgmr.msra.gmra.mxu1 %vm960_vm2, %v2445_v51  ;;  %3538 = vmatprep.subr.bf16.mxu1 %v3644_v53  ;;  %v3645_v51 = vld [vmem:[%s3932_s25 + $0x30] sm:$0xff]  }
 0xcdf   : > { %3539 = vmatpush3.bf16.msra.mxu1 %v3644_v53 }
 0xce0   : > { %3540 = vmatprep.subr.bf16.mxu1 %v3645_v51 }
 0xce3   : > { %3541 = vmatpush3.bf16.msra.mxu1 %v3645_v51 }
 0xd9e   : > { %v3528_v56 = vpop.f32.mrf.mxu1 }
 0xd9f   : > { %v2505_v50 = vadd.f32 %v3528_v56, %v4169_v54  ;;  %v3726_v54 = vld [vmem:[#allocation2 + $0x8] sm:$0xff] }
 0xda0   : > { %v2489_v59 = vpop.f32.mrf.mxu1  ;;  %v3646_v56 = vld [vmem:[%s3932_s25 + $0x28] sm:$0xff]  }
 0xda1   : > { %v2503_v57 = vadd.f32 %v2489_v59, %v4171_v55  ;;  %v2508_v35 = vadd.f32 %v3724_v61, %v2505_v50  ;;  %3542 = vmatprep.subr.bf16.mxu1 %v3646_v56  ;;  %v3647_v50 = vld [vmem:[%s3932_s25 + $0x20] sm:$0xff]   ;;  %v3648_v59 = vld [vmem:[%s3932_s25 + $0x18] sm:$0xff]  }
 0xda2   : > { %v3529_v60 = vpop.f32.mrf.mxu1  ;;  %3543 = vmatpush3.bf16.msra.mxu1 %v3646_v56  ;;  %v3651_v61 = vld [vmem:[%s3932_s25] sm:$0xff]  }
 0xda3   : > { %v2506_v62 = vadd.f32 %v3725_v0, %v2503_v57  ;;  %v4210_v4 = vadd.f32 %v3217_v41, %v2508_v35  ;;  %3544 = vmatprep.subr.bf16.mxu1 %v3647_v50  ;;  %v3649_v57 = vld [vmem:[%s3932_s25 + $0x10] sm:$0xff]   ;;  %v3650_v60 = vld [vmem:[%s3932_s25 + $0x8] sm:$0xff]   ;;  %v3220_v35 = vld [vmem:[%s634_s20] ss:$0 sm:$0xff] }
 0xda4   : > { %v2492_v1 = vpop.f32.mrf.mxu1 }
 0xda5   : > { %v4207_v63 = vadd.f32 %v3217_v41, %v2506_v62  ;;  %v2504_v2 = vadd.f32 %v2492_v1, %v4176_v58  ;;  %v2527_v5 = vsel %vm669_vm1, %v4210_v4, 0.0 }
 0xda6   : > { %3545 = vmatpush3.bf16.msra.mxu1 %v3647_v50 }
 0xda7   : > { %v2507_v46 = vadd.f32 %v3726_v54, %v2504_v2  ;;  %v2521_v55 = vsel %vm669_vm1, %v4207_v63, 0.0  ;;  %3546 = vmatprep.subr.bf16.mxu1 %v3648_v59 }
 0xda8   : > { %2522 = vadd.xlane.f32.xlu0 %v2521_v55 }
 0xda9   : > { %v4214_v3 = vadd.f32 %v3217_v41, %v2507_v46 }
 0xdaa   : > { %3547 = vmatpush3.bf16.msra.mxu1 %v3648_v59 }
 0xdab   : > { %v2524_v6 = vsel %vm669_vm1, %v4214_v3, 0.0  ;;  %3548 = vmatprep.subr.bf16.mxu1 %v3649_v57 }
 0xdac   : > { %2528 = vadd.xlane.f32.xlu0 %v2527_v5  ;;  %2525 = vadd.xlane.f32.xlu1 %v2524_v6 }
 0xdae   : > { %3549 = vmatpush3.bf16.msra.mxu1 %v3649_v57 }
 0xdaf   : > { %3550 = vmatprep.subr.bf16.mxu1 %v3650_v60 }
 0xdb2   : > { %3551 = vmatpush3.bf16.msra.mxu1 %v3650_v60 }
 0xdb3   : > { %3552 = vmatprep.subr.bf16.mxu1 %v3651_v61 }
 0xdb6   : > { %3553 = vmatpush3.bf16.msra.mxu1 %v3651_v61 }
 0xe31   : > { %v2523_v7 = vpop.xlane.xlu0 %2522 }
 0xe32   : > { %v2530_v58 = vmul.f32 0.03125, %v2523_v7 }
 0xe34   : > { %v2533_v8 = vsub.f32 %v4207_v63, %v2530_v58 }
 0xe35   : > { %v2529_v9 = vpop.xlane.xlu0 %2528  ;;  %v2526_v10 = vpop.xlane.xlu1 %2525 }
 0xe36   : > { %v2532_v13 = vmul.f32 0.03125, %v2529_v9  ;;  %v2531_v15 = vmul.f32 0.03125, %v2526_v10  ;;  %v2536_v16 = vmul.f32 %v2533_v8, %v2533_v8 }
 0xe38   : > { %v2535_v17 = vsub.f32 %v4210_v4, %v2532_v13  ;;  %v2534_v44 = vsub.f32 %v4214_v3, %v2531_v15  ;;  %v2539_v18 = vsel %vm669_vm1, %v2536_v16, 0.0 }
 0xe39   : > { %2540 = vadd.xlane.f32.xlu1 %v2539_v18 }
 0xe3a   : > { %v2538_v19 = vmul.f32 %v2535_v17, %v2535_v17  ;;  %v2537_v20 = vmul.f32 %v2534_v44, %v2534_v44 }
 0xe3c   : > { %v2545_v21 = vsel %vm669_vm1, %v2538_v19, 0.0  ;;  %v2542_v22 = vsel %vm669_vm1, %v2537_v20, 0.0 }
 0xe3d   : > { %2546 = vadd.xlane.f32.xlu1 %v2545_v21  ;;  %2543 = vadd.xlane.f32.xlu0 %v2542_v22 }
 0xec2   : > { %v2541_v25 = vpop.xlane.xlu1 %2540 }
 0xec3   : > { %v2548_v12 = vmul.f32 0.03125, %v2541_v25 }
 0xec5   : > { %v2551_v33 = vadd.f32 1e-05, %v2548_v12 }
 0xec6   : > { %v2544_v11 = vpop.xlane.xlu0 %2543  ;;  %v2547_v14 = vpop.xlane.xlu1 %2546 }
 0xec7   : > { %3706 = vrsqrt.f32 %v2551_v33  ;;  %v2549_v26 = vmul.f32 0.03125, %v2544_v11  ;;  %v2550_v27 = vmul.f32 0.03125, %v2547_v14 }
 0xec9   : > { %v2552_v28 = vadd.f32 1e-05, %v2549_v26  ;;  %v2553_v29 = vadd.f32 1e-05, %v2550_v27 }
 0xecb   : > { %3708 = vrsqrt.f32 %v2552_v28 }
 0xecc   : > { %3710 = vrsqrt.f32 %v2553_v29 }
 0xed4   : > { %v3707_v30 = vpop.eup %3706 }
 0xed5   : > { %v2557_v31 = vmul.f32 %v3707_v30, %v2533_v8 }
 0xed7   : > { %v2566_v38 = vmul.f32 %v3218_v32, %v2557_v31 }
 0xed8   : > { %v3709_v34 = vpop.eup %3708 }
 0xed9   : > { %v3711_v36 = vpop.eup %3710  ;;  %v2558_v37 = vmul.f32 %v3709_v34, %v2534_v44  ;;  %v2575_v45 = vadd.f32 %v3219_v40, %v2566_v38 }
 0xeda   : > { %v2559_v39 = vmul.f32 %v3711_v36, %v2535_v17 }
 0xedb   : > { %v2567_v42 = vmul.f32 %v3218_v32, %v2558_v37 }
 0xedc   : > { %v2568_v43 = vmul.f32 %v3218_v32, %v2559_v39 }
 0xedd   : > { %v2576_v47 = vadd.f32 %v3219_v40, %v2567_v42 }
 0xede   : > { %v2577_v48 = vadd.f32 %v3219_v40, %v2568_v43 }
 0xedf   : > { %v2582_v49 = vpack.c.bf16 %v2576_v47, %v2575_v45 }
 0xee0   : > { %v2583_v52 = vpack.c.bf16 %v2577_v48, %v2577_v48 }
 0xee1   : > { %3534 = vmatprep.mubr.msk.bf16.mxu0 %vm669_vm1, %v2582_v49 }
 0xee2   : > { %3535 = vmatmul.mubr.msk.bf16.vlgmr.msra.gmra.mxu0 %vm669_vm1, %v2583_v52 }
 0xfa2   : > { %v3536_v0 = vpop.f32.mrf.mxu0 }
 0xfa3   : > { %v4253_v62 = vadd.f32 %v3536_v0, %v3220_v35 }
 0xfa4   : > { %v2643_v41 = vpop.f32.mrf.mxu0 }
 0xfa5   : > { %v4256_v1 = vmul.f32 0.70710677, %v4253_v62  ;;  %v4258_v2 = vadd.f32 %v3220_v35, %v2643_v41 }
 0xfa6   : > { %v3537_v54 = vpop.f32.mrf.mxu0 }
 0xfa7   : > { %v2665_v46 = vand.u32 2147483647, %v4256_v1  ;;  %v4262_v55 = vmul.f32 0.70710677, %v4258_v2  ;;  %vm2722_vm6 = vcmp.ge.f32.partialorder %v4256_v1, 0.0 }
 0xfa8   : > { %v2646_v5 = vpop.f32.mrf.mxu0 }
 0xfa9   : > { %v2668_v6 = vmul.f32 0.3275911, %v2665_v46  ;;  %v2663_v7 = vand.u32 2147483647, %v4262_v55  ;;  %v4265_v58 = vadd.f32 %v3220_v35, %v2646_v5  ;;  %v2704_v44 = vmul.f32 %v2665_v46, %v2665_v46 }
 0xfaa   : > { %vm2720_vm7 = vcmp.ge.f32.partialorder %v4262_v55, 0.0 }
 0xfab   : > { %v2671_v8 = vadd.f32 1.0, %v2668_v6  ;;  %v2666_v9 = vmul.f32 0.3275911, %v2663_v7  ;;  %v4268_v10 = vmul.f32 0.70710677, %v4265_v58  ;;  %v2702_v18 = vmul.f32 %v2663_v7, %v2663_v7 }
 0xfac   : > { %v2707_v19 = vsub.f32 0.0, %v2704_v44  ;;  %v2659_v44 = vmul.f32 0.5, %v4253_v62  ;;  %v2658_v1 = vmul.f32 0.5, %v4265_v58 }
 0xfad   : > { %3712 = vrcp.f32 %v2671_v8  ;;  %v2669_v13 = vadd.f32 1.0, %v2666_v9  ;;  %v2664_v15 = vand.u32 2147483647, %v4268_v10  ;;  %v2705_v21 = vsub.f32 0.0, %v2702_v18 }
 0xfae   : > { %v2712_v24 = vmul.f32 1.442695, %v2707_v19  ;;  %vm2721_vm8 = vcmp.ge.f32.partialorder %v4268_v10, 0.0  ;;  %v2657_v19 = vmul.f32 0.5, %v4258_v2  ;;  %v3225_v10 = vld [vmem:[%s642_s22] ss:$0 sm:$0xff] }
 0xfaf   : > { %3714 = vrcp.f32 %v2669_v13  ;;  %v2667_v16 = vmul.f32 0.3275911, %v2664_v15  ;;  %v2703_v22 = vmul.f32 %v2664_v15, %v2664_v15  ;;  %v2708_v11 = vmul.f32 1.442695, %v2705_v21 }
 0xfb1   : > { %v2670_v17 = vadd.f32 1.0, %v2667_v16  ;;  %v2706_v14 = vsub.f32 0.0, %v2703_v22 }
 0xfb3   : > { %3716 = vrcp.f32 %v2670_v17  ;;  %v2710_v32 = vmul.f32 1.442695, %v2706_v14 }
 0xfb4   : > { %3718 = vpow2.f32 %v2712_v24 }
 0xfb5   : > { %3720 = vpow2.f32 %v2708_v11 }
 0xfb6   : > { %3722 = vpow2.f32 %v2710_v32 }
 0xfba   : > { %v3713_v20 = vpop.eup %3712 }
 0xfbb   : > { %v2677_v23 = vmul.f32 1.0614054, %v3713_v20 }
 0xfbc   : > { %v3715_v25 = vpop.eup %3714 }
 0xfbd   : > { %v2680_v12 = vadd.f32 -1.4531521, %v2677_v23  ;;  %v2675_v33 = vmul.f32 1.0614054, %v3715_v25 }
 0xfbf   : > { %v2683_v26 = vmul.f32 %v3713_v20, %v2680_v12  ;;  %v2678_v27 = vadd.f32 -1.4531521, %v2675_v33 }
 0xfc0   : > { %v3717_v28 = vpop.eup %3716 }
 0xfc1   : > { %v2686_v29 = vadd.f32 1.4214138, %v2683_v26  ;;  %v2681_v30 = vmul.f32 %v3715_v25, %v2678_v27  ;;  %v2676_v31 = vmul.f32 1.0614054, %v3717_v28  ;;  %v3719_v53 = vpop.eup %3718 }
 0xfc2   : > { %v3721_v60 = vpop.eup %3720 }
 0xfc3   : > { %v2689_v34 = vmul.f32 %v3713_v20, %v2686_v29  ;;  %v2684_v36 = vadd.f32 1.4214138, %v2681_v30  ;;  %v2679_v37 = vadd.f32 -1.4531521, %v2676_v31  ;;  %v3723_v5 = vpop.eup %3722 }
 0xfc5   : > { %v2692_v38 = vadd.f32 -0.28449672, %v2689_v34  ;;  %v2687_v39 = vmul.f32 %v3715_v25, %v2684_v36  ;;  %v2682_v40 = vmul.f32 %v3717_v28, %v2679_v37 }
 0xfc7   : > { %v2695_v42 = vmul.f32 %v3713_v20, %v2692_v38  ;;  %v2690_v43 = vadd.f32 -0.28449672, %v2687_v39  ;;  %v2685_v45 = vadd.f32 1.4214138, %v2682_v40 }
 0xfc9   : > { %v2698_v47 = vadd.f32 0.2548296, %v2695_v42  ;;  %v2693_v48 = vmul.f32 %v3715_v25, %v2690_v43  ;;  %v2688_v49 = vmul.f32 %v3717_v28, %v2685_v45 }
 0xfcb   : > { %v2701_v52 = vmul.f32 %v3713_v20, %v2698_v47  ;;  %v2696_v51 = vadd.f32 0.2548296, %v2693_v48  ;;  %v2691_v56 = vadd.f32 -0.28449672, %v2688_v49 }
 0xfcd   : > { %v2716_v50 = vmul.f32 %v3719_v53, %v2701_v52  ;;  %v2699_v59 = vmul.f32 %v3715_v25, %v2696_v51  ;;  %v2694_v57 = vmul.f32 %v3717_v28, %v2691_v56 }
 0xfcf   : > { %v2719_v61 = vsub.f32 1.0, %v2716_v50  ;;  %v2714_v35 = vmul.f32 %v3721_v60, %v2699_v59  ;;  %v2697_v0 = vadd.f32 0.2548296, %v2694_v57 }
 0xfd1   : > { %v2725_v41 = vsub.f32 0.0, %v2719_v61  ;;  %v2717_v54 = vsub.f32 1.0, %v2714_v35  ;;  %v2700_v46 = vmul.f32 %v3717_v28, %v2697_v0 }
 0xfd3   : > { %v2723_v6 = vsub.f32 0.0, %v2717_v54  ;;  %v2715_v7 = vmul.f32 %v3723_v5, %v2700_v46  ;;  %v2728_v8 = vsel %vm2722_vm6, %v2719_v61, %v2725_v41 }
 0xfd4   : > { %v2731_v15 = vadd.f32 1.0, %v2728_v8 }
 0xfd5   : > { %v2726_v9 = vsel %vm2720_vm7, %v2717_v54, %v2723_v6  ;;  %v2718_v13 = vsub.f32 1.0, %v2715_v7 }
 0xfd6   : > { %v2729_v17 = vadd.f32 1.0, %v2726_v9  ;;  %v2734_v21 = vmul.f32 %v2731_v15, %v2659_v44 }
 0xfd7   : > { %v2724_v16 = vsub.f32 0.0, %v2718_v13 }
 0xfd8   : > { %v2732_v22 = vmul.f32 %v2729_v17, %v2657_v19  ;;  %v2752_v24 = vpack.c.bf16 %v2734_v21, %v2734_v21 }
 0xfd9   : > { %v2727_v18 = vsel %vm2721_vm8, %v2718_v13, %v2724_v16 }
 0xfda   : > { %v2730_v20 = vadd.f32 1.0, %v2727_v18 }
 0xfdc   : > { %v2733_v23 = vmul.f32 %v2730_v20, %v2658_v1 }
 0xfde   : > { %v2751_v55 = vpack.c.bf16 %v2733_v23, %v2732_v22 }
 0xfe0   : > { %3554 = vmatprep.mubr.bf16.mxu1 %v2751_v55 }
 0xfe1   : > { %3555 = vmatmul.mubr.bf16.vlgmr.msra.gmra.mxu1 %v2752_v24 }
0x10a1   : > { %v3556_v25 = vpop.f32.mrf.mxu1 }
0x10a2   : > { %v2851_v62 = vadd.f32 %v3556_v25, %v3225_v10 }
0x10a3   : > { %v2842_v12 = vpop.f32.mrf.mxu1 }
0x10a4   : > { %v2858_v2 = vadd.f32 %v2851_v62, %v4210_v4  ;;  %v2843_v33 = vadd.f32 %v3225_v10, %v2842_v12 }
0x10a5   : > { %v3557_v58 = vpop.f32.mrf.mxu1 }
0x10a6   : > { %2861 = vst.msk [vmem:[#allocation2 + $0x10] sm:$0xff] %vm669_vm1, %v2858_v2  ;;  %v2856_v11 = vadd.f32 %v2843_v33, %v4207_v63 }
0x10a7   : > { %v2845_v14 = vpop.f32.mrf.mxu1 }
0x10a8   : > { %2859 = vst.msk [vmem:[#allocation2] sm:$0xff] %vm669_vm1, %v2856_v11  ;;  %v2846_v26 = vadd.f32 %v3225_v10, %v2845_v14  ;;  %2865 = sbr.rel (%p3234_p8) target bundleno = 4271 (0x10af), region = 80 }
0x10aa   : > { %v2857_v27 = vadd.f32 %v2846_v26, %v4214_v3 }
0x10ac   : > { %2860 = vst.msk [vmem:[#allocation2 + $0x8] sm:$0xff] %vm669_vm1, %v2857_v27 }
0x10ad   : > { %2866 = vst.msk [vmem:[%s3937_s13] sm:$0xff] %vm669_vm1, %v2856_v11  ;;  %2867 = vst.msk [vmem:[%s3937_s13 + $0x8] sm:$0xff] %vm669_vm1, %v2857_v27 }
0x10ae   : > { %2868 = vst.msk [vmem:[%s3937_s13 + $0x10] sm:$0xff] %vm669_vm1, %v2858_v2 }
0x10af PF: > { %s4354_s22 = sld [smem:[#allocation6_spill]] }
0x10b0   : > { %s4355_s25 = sld [smem:[#allocation4_spill]] }
0x10b1   : > { %s4356_s26 = sld [smem:[#allocation5_spill]] }
0x10b2   : > { %s4357_s27 = sld [smem:[#allocation7_spill]] }
0x10b3   : > { %s4358_s28 = sld [smem:[#allocation8_spill]] }
0x10b5   : > { %s23_s29 = sadd.s32 1, %s4354_s22  }
0x10b6   : > { %p20_p9 = scmp.ge.s32.totalorder %s23_s29, 6  }
0x10b8   :  { %22 = sbr.rel (!%p20_p9) target bundleno = 7 (0x7), region = 171 }

// kernel: forward.8
= control target key start
LH: loop header
LB: loop body
LE: loop exit
PB: predicated region body
PF: predicated region fallthrough
CT: control target
= control target key end

     0   :  { %s5934_s25 = smov 0   ;;  %s5936_s26 = smov 0   ;;  %s7517_s0 = inlined_call_operand.vmem [shape: f32[2,72,16], index: 0, kind: input, shape index: {}]   ;;  %s7518_s1 = inlined_call_operand.vmem [shape: f32[1,1,16], index: 1, kind: input, shape index: {}]   ;;  %s7519_s2 = inlined_call_operand.vmem [shape: f32[1,1,16], index: 2, kind: input, shape index: {}]   ;;  %s7520_s3 = inlined_call_operand.vmem [shape: bf16[1,3,4,16,4], index: 3, kind: input, shape index: {}]   ;;  %s7521_s4 = inlined_call_operand.vmem [shape: f32[1,3,4,1,4], index: 4, kind: input, shape index: {}]   ;;  %s7522_s5 = inlined_call_operand.vmem [shape: bf16[1,4,4,16], index: 5, kind: input, shape index: {}]   ;;  %s7523_s6 = inlined_call_operand.vmem [shape: f32[1,1,16], index: 6, kind: input, shape index: {}]   ;;  %s7524_s7 = inlined_call_operand.vmem [shape: f32[1,1,16], index: 7, kind: input, shape index: {}]   ;;  %s7525_s8 = inlined_call_operand.vmem [shape: f32[1,1,16], index: 8, kind: input, shape index: {}]   ;;  %s7526_s9 = inlined_call_operand.vmem [shape: bf16[1,16,64], index: 9, kind: input, shape index: {}]   ;;  %s7527_s10 = inlined_call_operand.vmem [shape: f32[1,1,64], index: 10, kind: input, shape index: {}]   ;;  %s7528_s11 = inlined_call_operand.vmem [shape: bf16[1,64,16], index: 11, kind: input, shape index: {}]   ;;  %s7529_s12 = inlined_call_operand.vmem [shape: f32[1,1,16], index: 12, kind: input, shape index: {}]   ;;  %s7530_s13 = inlined_call_operand.vmem [shape: f32[2,72,16], index: 13, kind: output, shape index: {}]  }
   0x1   :  { %s5938_s27 = smov 0  }
   0x2 LB: > { %s35_s28 = sadd.s32 1, %s5855_s26  ;;  %p4527_p0 = scmp.ge.s32.totalorder %s5859_s27, 1  ;;  %s5859_s27 = sphi %s5938_s27, %s23_s27   ;;  %s5855_s26 = sphi %s5936_s26, %s7532_s26   ;;  %s5851_s25 = sphi %s5934_s25, %s7531_s25  }
   0x3   : > { %p37_p1 = scmp.ge.s32.totalorder %s35_s28, 2  ;;  %p504_p2 = scmp.lt.s32.totalorder %s5859_s27, 3 }
   0x5   : > { %s7534_s28 = smov (%p37_p1, %s35_s28), 0  ;;  %p505_p3 = pnand %p4527_p0, %p504_p2 }
   0x6   : > { %p593_p4 = scmp.lt.s32.totalorder (!%p505_p3), %s5851_s25, 1 }
   0x7   : > { %508 = sbr.rel (%p505_p3) target bundleno = 4502 (0x1196), region = 72 }
   0xc   : > { %s7536_s25 = smov (!%p593_p4, %s5851_s25), 1  ;;  %vm662_vm0 = vcmask 130048   ;;  %vm5862_vm1 = vmmov 0   ;;  %vm1140_vm2 = vcmask 31744   ;;  %vm1359_vm3 = vcmask 1043456  }
   0xd   : > { %s5567_s29 = smul.u32 72, %s7536_s25  ;;  %vm1243_vm5 = vcmask 588800   ;;  %vm2059_vm6 = vcmask 1041408   ;;  %vm4170_vm10 = vcmask 523264  }
   0xf   : > { %s597_s15 = scalar_lea.vmem %s7517_s0, %s5567_s29  ;;  %s7470_s14 = scalar_lea.vmem %s7530_s13, %s5567_s29 }
  0x10   : > { %v653_v0 = vld [vmem:[%s597_s15] sm:$0xff]  ;;  %v655_v1 = vld [vmem:[%s597_s15 + $0x10] sm:$0xff]  ;;  %v654_v2 = vld [vmem:[%s597_s15 + $0x8] sm:$0xff] }
  0x11   : > { %663 = vst.msk [vmem:[#allocation2] sm:$0xff] %vm662_vm0, %v653_v0  ;;  %665 = vst.msk [vmem:[#allocation2 + $0x10] sm:$0xff] %vm662_vm0, %v655_v1  ;;  %v656_v3 = vld [vmem:[%s597_s15 + $0x18] sm:$0xff]  ;;  %v657_v4 = vld [vmem:[%s597_s15 + $0x20] sm:$0xff] }
  0x12   : > { %664 = vst.msk [vmem:[#allocation2 + $0x8] sm:$0xff] %vm662_vm0, %v654_v2  ;;  %v658_v5 = vld [vmem:[%s597_s15 + $0x28] sm:$0xff]  ;;  %666 = vst.msk [vmem:[#allocation2 + $0x18] sm:$0xff] %vm662_vm0, %v656_v3  ;;  %v659_v6 = vld [vmem:[%s597_s15 + $0x30] sm:$0xff] }
  0x13   : > { %667 = vst.msk [vmem:[#allocation2 + $0x20] sm:$0xff] %vm662_vm0, %v657_v4  ;;  %668 = vst.msk [vmem:[#allocation2 + $0x28] sm:$0xff] %vm662_vm0, %v658_v5  ;;  %v660_v7 = vld [vmem:[%s597_s15 + $0x38] sm:$0xff]  ;;  %v661_v8 = vld [vmem:[%s597_s15 + $0x40] sm:$0xff] }
  0x14   : > { %669 = vst.msk [vmem:[#allocation2 + $0x30] sm:$0xff] %vm662_vm0, %v659_v6  ;;  %670 = vst.msk [vmem:[#allocation2 + $0x38] sm:$0xff] %vm662_vm0, %v660_v7 }
  0x15   : > { %671 = vst.msk [vmem:[#allocation2 + $0x40] sm:$0xff] %vm662_vm0, %v661_v8  ;;  %v5595_v8 = vld [vmem:[%s7520_s3] sm:$0xff]  }
  0x18   : > { %v672_v9 = vld [vmem:[#allocation2] sm:$0xff]  ;;  %v674_v10 = vld [vmem:[#allocation2 + $0x10] sm:$0xff] }
  0x19   : > { %v673_v11 = vld [vmem:[#allocation2 + $0x8] sm:$0xff]  ;;  %v688_v12 = vsel %vm662_vm0, %v672_v9, 0.0  ;;  %v694_v13 = vsel %vm662_vm0, %v674_v10, 0.0  ;;  %v675_v14 = vld [vmem:[#allocation2 + $0x18] sm:$0xff] }
  0x1a   : > { %689 = vadd.xlane.f32.xlu0 %v688_v12  ;;  %695 = vadd.xlane.f32.xlu1 %v694_v13  ;;  %v691_v15 = vsel %vm662_vm0, %v673_v11, 0.0  ;;  %v697_v16 = vsel %vm662_vm0, %v675_v14, 0.0  ;;  %v676_v17 = vld [vmem:[#allocation2 + $0x20] sm:$0xff]  ;;  %v677_v18 = vld [vmem:[#allocation2 + $0x28] sm:$0xff] }
  0x1b   : > { %v700_v19 = vsel %vm662_vm0, %v676_v17, 0.0  ;;  %v703_v20 = vsel %vm662_vm0, %v677_v18, 0.0  ;;  %v678_v21 = vld [vmem:[#allocation2 + $0x30] sm:$0xff]  ;;  %v679_v22 = vld [vmem:[#allocation2 + $0x38] sm:$0xff] }
  0x1c   : > { %v706_v23 = vsel %vm662_vm0, %v678_v21, 0.0  ;;  %v709_v24 = vsel %vm662_vm0, %v679_v22, 0.0  ;;  %v680_v25 = vld [vmem:[#allocation2 + $0x40] sm:$0xff] }
  0x1d   : > { %v712_v26 = vsel %vm662_vm0, %v680_v25, 0.0 }
  0x1e   : > { %692 = vadd.xlane.f32.xlu0 %v691_v15  ;;  %698 = vadd.xlane.f32.xlu1 %v697_v16 }
  0x22   : > { %701 = vadd.xlane.f32.xlu0 %v700_v19  ;;  %704 = vadd.xlane.f32.xlu1 %v703_v20 }
  0x26   : > { %707 = vadd.xlane.f32.xlu0 %v706_v23  ;;  %710 = vadd.xlane.f32.xlu1 %v709_v24 }
  0x2a   : > { %713 = vadd.xlane.f32.xlu0 %v712_v26 }
  0xa3   : > { %v690_v27 = vpop.xlane.xlu0 %689  ;;  %v696_v28 = vpop.xlane.xlu1 %695 }
  0xa4   : > { %v716_v29 = vmul.f32 0.0625, %v690_v27  ;;  %v718_v30 = vmul.f32 0.0625, %v696_v28 }
  0xa6   : > { %v5978_v31 = vsub.f32 %v672_v9, %v716_v29  ;;  %v5980_v32 = vsub.f32 %v674_v10, %v718_v30  ;;  %v5596_v9 = vld [vmem:[%s7520_s3 + $0x20] sm:$0xff]   ;;  %v5861_v10 = vmov 0.0  }
  0xa7   : > { %v693_v33 = vpop.xlane.xlu0 %692  ;;  %v699_v34 = vpop.xlane.xlu1 %698  ;;  %4925 = vmatprep.subr.bf16.mxu0 %v5861_v10  ;;  %4947 = vmatprep.subr.bf16.mxu1 %v5861_v10 }
  0xa8   : > { %v717_v35 = vmul.f32 0.0625, %v693_v33  ;;  %v719_v36 = vmul.f32 0.0625, %v699_v34  ;;  %v734_v37 = vmul.f32 %v5978_v31, %v5978_v31  ;;  %v736_v38 = vmul.f32 %v5980_v32, %v5980_v32  ;;  %4926 = vmatpush3.bf16.msra.mxu0 %v5595_v8  ;;  %4948 = vmatpush3.bf16.msra.mxu1 %v5596_v9 }
  0xa9   : > { %4969 = vmatprep.subr.bf16.mxu0 %v5861_v10  ;;  %4991 = vmatprep.subr.bf16.mxu1 %v5861_v10 }
  0xaa   : > { %v5986_v39 = vsub.f32 %v673_v11, %v717_v35  ;;  %v5988_v40 = vsub.f32 %v675_v14, %v719_v36  ;;  %v743_v41 = vsel %vm662_vm0, %v734_v37, 0.0  ;;  %v749_v44 = vsel %vm662_vm0, %v736_v38, 0.0  ;;  %4927 = vmatprep.mubr.msk.bf16.mxu0 %vm5862_vm1, %v5861_v10  ;;  %4949 = vmatprep.mubr.msk.bf16.mxu1 %vm5862_vm1, %v5861_v10  ;;  %v4530_v37 = vld [vmem:[%s7518_s1] ss:$0 sm:$0xff] }
  0xab   : > { %744 = vadd.xlane.f32.xlu1 %v743_v41  ;;  %v702_v42 = vpop.xlane.xlu0 %701  ;;  %v705_v43 = vpop.xlane.xlu1 %704 }
  0xac   : > { %v720_v45 = vmul.f32 0.0625, %v702_v42  ;;  %v721_v46 = vmul.f32 0.0625, %v705_v43  ;;  %v735_v47 = vmul.f32 %v5986_v39, %v5986_v39  ;;  %v737_v48 = vmul.f32 %v5988_v40, %v5988_v40 }
  0xae   : > { %v5996_v49 = vsub.f32 %v676_v17, %v720_v45  ;;  %v5998_v50 = vsub.f32 %v677_v18, %v721_v46  ;;  %v746_v51 = vsel %vm662_vm0, %v735_v47, 0.0  ;;  %v752_v54 = vsel %vm662_vm0, %v737_v48, 0.0  ;;  %v4531_v47 = vld [vmem:[%s7519_s2] ss:$0 sm:$0xff] }
  0xaf   : > { %750 = vadd.xlane.f32.xlu1 %v749_v44  ;;  %747 = vadd.xlane.f32.xlu0 %v746_v51  ;;  %v708_v52 = vpop.xlane.xlu0 %707  ;;  %v711_v53 = vpop.xlane.xlu1 %710 }
  0xb0   : > { %v722_v55 = vmul.f32 0.0625, %v708_v52  ;;  %v723_v56 = vmul.f32 0.0625, %v711_v53  ;;  %v738_v57 = vmul.f32 %v5996_v49, %v5996_v49  ;;  %v739_v58 = vmul.f32 %v5998_v50, %v5998_v50 }
  0xb2   : > { %v6006_v59 = vsub.f32 %v678_v21, %v722_v55  ;;  %v6008_v60 = vsub.f32 %v679_v22, %v723_v56  ;;  %v755_v61 = vsel %vm662_vm0, %v738_v57, 0.0  ;;  %v758_v0 = vsel %vm662_vm0, %v739_v58, 0.0  ;;  %v5597_v58 = vld [vmem:[%s7520_s3 + $0x40] sm:$0xff]  }
  0xb3   : > { %753 = vadd.xlane.f32.xlu0 %v752_v54  ;;  %756 = vadd.xlane.f32.xlu1 %v755_v61  ;;  %v714_v62 = vpop.xlane.xlu0 %713 }
  0xb4   : > { %v724_v63 = vmul.f32 0.0625, %v714_v62  ;;  %v740_v1 = vmul.f32 %v6006_v59, %v6006_v59  ;;  %v741_v2 = vmul.f32 %v6008_v60, %v6008_v60 }
  0xb6   : > { %v6016_v3 = vsub.f32 %v680_v25, %v724_v63  ;;  %v761_v4 = vsel %vm662_vm0, %v740_v1, 0.0  ;;  %v764_v5 = vsel %vm662_vm0, %v741_v2, 0.0 }
  0xb7   : > { %759 = vadd.xlane.f32.xlu0 %v758_v0  ;;  %762 = vadd.xlane.f32.xlu1 %v761_v4 }
  0xb8   : > { %v742_v6 = vmul.f32 %v6016_v3, %v6016_v3 }
  0xba   : > { %v767_v7 = vsel %vm662_vm0, %v742_v6, 0.0 }
  0xbb   : > { %765 = vadd.xlane.f32.xlu0 %v764_v5  ;;  %768 = vadd.xlane.f32.xlu1 %v767_v7 }
 0x134   : > { %v745_v11 = vpop.xlane.xlu1 %744 }
 0x135   : > { %v770_v12 = vmul.f32 0.0625, %v745_v11 }
 0x137   : > { %v779_v13 = vadd.f32 1e-05, %v770_v12 }
 0x138   : > { %v751_v14 = vpop.xlane.xlu1 %750  ;;  %v748_v15 = vpop.xlane.xlu0 %747 }
 0x139   : > { %5612 = vrsqrt.f32 %v779_v13  ;;  %v772_v16 = vmul.f32 0.0625, %v751_v14  ;;  %v771_v17 = vmul.f32 0.0625, %v748_v15 }
 0x13b   : > { %v780_v18 = vadd.f32 1e-05, %v771_v17  ;;  %v781_v19 = vadd.f32 1e-05, %v772_v16 }
 0x13c   : > { %v754_v20 = vpop.xlane.xlu0 %753  ;;  %v757_v21 = vpop.xlane.xlu1 %756 }
 0x13d   : > { %v773_v22 = vmul.f32 0.0625, %v754_v20  ;;  %5614 = vrsqrt.f32 %v780_v18  ;;  %v774_v24 = vmul.f32 0.0625, %v757_v21 }
 0x13e   : > { %5616 = vrsqrt.f32 %v781_v19 }
 0x13f   : > { %v782_v23 = vadd.f32 1e-05, %v773_v22  ;;  %v783_v28 = vadd.f32 1e-05, %v774_v24 }
 0x140   : > { %v760_v25 = vpop.xlane.xlu0 %759  ;;  %v763_v29 = vpop.xlane.xlu1 %762 }
 0x141   : > { %v775_v26 = vmul.f32 0.0625, %v760_v25  ;;  %5618 = vrsqrt.f32 %v782_v23  ;;  %v776_v35 = vmul.f32 0.0625, %v763_v29 }
 0x143   : > { %v784_v27 = vadd.f32 1e-05, %v775_v26  ;;  %v785_v42 = vadd.f32 1e-05, %v776_v35 }
 0x144   : > { %v766_v30 = vpop.xlane.xlu0 %765  ;;  %v769_v43 = vpop.xlane.xlu1 %768 }
 0x145   : > { %5620 = vrsqrt.f32 %v784_v27  ;;  %v777_v34 = vmul.f32 0.0625, %v766_v30  ;;  %v778_v51 = vmul.f32 0.0625, %v769_v43 }
 0x146   : > { %v5613_v33 = vpop.eup %5612  ;;  %5622 = vrsqrt.f32 %v783_v28 }
 0x147   : > { %v797_v36 = vmul.f32 %v5613_v33, %v5978_v31  ;;  %v786_v38 = vadd.f32 1e-05, %v777_v34 }
 0x149   : > { %v812_v44 = vmul.f32 %v4530_v37, %v797_v36  ;;  %5624 = vrsqrt.f32 %v786_v38 }
 0x14a   : > { %v5615_v41 = vpop.eup %5614  ;;  %5626 = vrsqrt.f32 %v785_v42 }
 0x14b   : > { %v798_v45 = vmul.f32 %v5615_v41, %v5986_v39  ;;  %v5617_v46 = vpop.eup %5616  ;;  %v827_v52 = vadd.f32 %v4531_v47, %v812_v44  ;;  %v787_v39 = vadd.f32 1e-05, %v778_v51 }
 0x14c   : > { %v799_v53 = vmul.f32 %v5617_v46, %v5980_v32 }
 0x14d   : > { %v813_v48 = vmul.f32 %v4530_v37, %v798_v45  ;;  %5628 = vrsqrt.f32 %v787_v39 }
 0x14e   : > { %v5619_v31 = vpop.eup %5618  ;;  %v814_v62 = vmul.f32 %v4530_v37, %v799_v53 }
 0x14f   : > { %v828_v54 = vadd.f32 %v4531_v47, %v813_v48  ;;  %v800_v55 = vmul.f32 %v5619_v31, %v5988_v40 }
 0x150   : > { %v829_v0 = vadd.f32 %v4531_v47, %v814_v62 }
 0x151   : > { %v6047_v56 = vpack.c.bf16 %v828_v54, %v827_v52  ;;  %v815_v57 = vmul.f32 %v4530_v37, %v800_v55 }
 0x152   : > { %v5621_v61 = vpop.eup %5620 }
 0x153   : > { %4928 = vmatmul.mubr.msk.bf16.vlgmr.msra.gmra.mxu0 %vm662_vm0, %v6047_v56  ;;  %4950 = vmatmul.mubr.msk.bf16.vlgmr.msra.gmra.mxu1 %vm662_vm0, %v6047_v56  ;;  %v5623_v32 = vpop.eup %5622  ;;  %v830_v40 = vadd.f32 %v4531_v47, %v815_v57  ;;  %v802_v63 = vmul.f32 %v5621_v61, %v5998_v50 }
 0x154   : > { %4931 = vmatprep.mubr.msk.bf16.mxu0 %vm5862_vm1, %v5861_v10  ;;  %4953 = vmatprep.mubr.msk.bf16.mxu1 %vm5862_vm1, %v5861_v10  ;;  %v801_v1 = vmul.f32 %v5623_v32, %v5996_v49 }
 0x155   : > { %4970 = vmatpush3.bf16.msra.mxu0 %v5597_v58  ;;  %v6063_v2 = vpack.c.bf16 %v830_v40, %v829_v0  ;;  %v817_v4 = vmul.f32 %v4530_v37, %v802_v63 }
 0x156   : > { %5021 = vmatprep.subr.bf16.mxu0 %v5861_v10  ;;  %v5625_v5 = vpop.eup %5624  ;;  %v816_v7 = vmul.f32 %v4530_v37, %v801_v1 }
 0x157   : > { %v5627_v6 = vpop.eup %5626  ;;  %v832_v50 = vadd.f32 %v4531_v47, %v817_v4  ;;  %v804_v49 = vmul.f32 %v5625_v5, %v6008_v60 }
 0x158   : > { %v831_v8 = vadd.f32 %v4531_v47, %v816_v7  ;;  %v803_v9 = vmul.f32 %v5627_v6, %v6006_v59 }
 0x159   : > { %v819_v12 = vmul.f32 %v4530_v37, %v804_v49 }
 0x15a   : > { %v6075_v11 = vpack.c.bf16 %v832_v50, %v831_v8  ;;  %v5629_v13 = vpop.eup %5628  ;;  %v818_v14 = vmul.f32 %v4530_v37, %v803_v9 }
 0x15b   : > { %4932 = vmatmul.mubr.msk.bf16.gmra.mxu0 %vm662_vm0, %v6063_v2  ;;  %4954 = vmatmul.mubr.msk.bf16.gmra.mxu1 %vm662_vm0, %v6063_v2  ;;  %v805_v60 = vmul.f32 %v5629_v13, %v6016_v3  ;;  %v834_v59 = vadd.f32 %v4531_v47, %v819_v12  ;;  %v6129_v3 = vld [vmem:[%s7521_s4] ss:$0 sm:$0xff] }
 0x15c   : > { %4935 = vmatprep.mubr.msk.bf16.mxu0 %vm5862_vm1, %v5861_v10  ;;  %4957 = vmatprep.mubr.msk.bf16.mxu1 %vm5862_vm1, %v5861_v10  ;;  %v833_v15 = vadd.f32 %v4531_v47, %v818_v14  ;;  %v4542_v14 = vld [vmem:[%s7521_s4 + $0x4] ss:$0 sm:$0xff] }
 0x15d   : > { %v820_v16 = vmul.f32 %v4530_v37, %v805_v60 }
 0x15e   : > { %v6086_v17 = vpack.c.bf16 %v834_v59, %v833_v15 }
 0x15f   : > { %v835_v18 = vadd.f32 %v4531_v47, %v820_v16 }
 0x161   : > { %v6096_v19 = vpack.c.bf16 %v835_v18, %v835_v18 }
 0x163   : > { %4936 = vmatmul.mubr.msk.bf16.gmra.mxu0 %vm662_vm0, %v6075_v11  ;;  %4958 = vmatmul.mubr.msk.bf16.gmra.mxu1 %vm662_vm0, %v6075_v11 }
 0x164   : > { %4939 = vmatprep.mubr.msk.bf16.mxu0 %vm5862_vm1, %v5861_v10  ;;  %4961 = vmatprep.mubr.msk.bf16.mxu1 %vm5862_vm1, %v5861_v10 }
 0x16b   : > { %4940 = vmatmul.mubr.msk.bf16.gmra.mxu0 %vm662_vm0, %v6086_v17  ;;  %4962 = vmatmul.mubr.msk.bf16.gmra.mxu1 %vm662_vm0, %v6086_v17 }
 0x16c   : > { %4943 = vmatprep.mubr.msk.bf16.mxu0 %vm5862_vm1, %v5861_v10  ;;  %4965 = vmatprep.mubr.msk.bf16.mxu1 %vm5862_vm1, %v5861_v10 }
 0x173   : > { %4944 = vmatmul.mubr.msk.bf16.gmra.mxu0 %vm662_vm0, %v6096_v19  ;;  %4966 = vmatmul.mubr.msk.bf16.gmra.mxu1 %vm662_vm0, %v6096_v19 }
 0x174   : > { %4971 = vmatprep.mubr.msk.bf16.mxu0 %vm5862_vm1, %v5861_v10  ;;  %5001 = vmatprep.mubr.msk.bf16.mxu1 %vm5862_vm1, %v5861_v10 }
 0x17b   : > { %4972 = vmatmul.mubr.msk.bf16.vlgmr.msra.gmra.mxu0 %vm662_vm0, %v6047_v56 }
 0x17c   : > { %4975 = vmatprep.mubr.msk.bf16.mxu0 %vm5862_vm1, %v5861_v10 }
 0x183   : > { %4976 = vmatmul.mubr.msk.bf16.gmra.mxu0 %vm662_vm0, %v6063_v2 }
 0x184   : > { %4979 = vmatprep.mubr.msk.bf16.mxu0 %vm5862_vm1, %v5861_v10 }
 0x18b   : > { %4980 = vmatmul.mubr.msk.bf16.gmra.mxu0 %vm662_vm0, %v6075_v11 }
 0x18c   : > { %4983 = vmatprep.mubr.msk.bf16.mxu0 %vm5862_vm1, %v5861_v10 }
 0x193   : > { %4984 = vmatmul.mubr.msk.bf16.gmra.mxu0 %vm662_vm0, %v6086_v17 }
 0x194   : > { %4987 = vmatprep.mubr.msk.bf16.mxu0 %vm5862_vm1, %v5861_v10 }
 0x19b   : > { %4988 = vmatmul.mubr.msk.bf16.gmra.mxu0 %vm662_vm0, %v6096_v19 }
 0x19c   : > { %5031 = vmatprep.mubr.msk.bf16.mxu0 %vm5862_vm1, %v5861_v10 }
 0x213   : > { %v905_v20 = vpop.f32.mrf.mxu0  ;;  %v6131_v21 = vpop.f32.mrf.mxu1 }
 0x214   : > { %v906_v24 = vadd.f32 %v6129_v3, %v905_v20 }
 0x215   : > { %v4929_v22 = vpop.f32.mrf.mxu0  ;;  %v4951_v23 = vpop.f32.mrf.mxu1 }
 0x216   : > { %v6137_v30 = vmul.f32 0.5, %v906_v24 }
 0x217   : > { %v908_v25 = vpop.f32.mrf.mxu0  ;;  %v6134_v26 = vpop.f32.mrf.mxu1 }
 0x218   : > { %v909_v27 = vadd.f32 %v6129_v3, %v908_v25 }
 0x219   : > { %v4930_v28 = vpop.f32.mrf.mxu0  ;;  %v4952_v29 = vpop.f32.mrf.mxu1 }
 0x21a   : > { %v6139_v33 = vmul.f32 0.5, %v909_v27 }
 0x21b   : > { %v913_v34 = vpop.f32.mrf.mxu0  ;;  %v6141_v35 = vpop.f32.mrf.mxu1 }
 0x21c   : > { %v1130_v36 = vpack.c.bf16 %v6139_v33, %v6137_v30  ;;  %v914_v41 = vadd.f32 %v6129_v3, %v913_v34 }
 0x21d   : > { %v4933_v37 = vpop.f32.mrf.mxu0  ;;  %v4955_v38 = vpop.f32.mrf.mxu1 }
 0x21e   : > { %v6149_v47 = vmul.f32 0.5, %v914_v41 }
 0x21f   : > { %v916_v42 = vpop.f32.mrf.mxu0  ;;  %v6146_v43 = vpop.f32.mrf.mxu1 }
 0x220   : > { %v917_v44 = vadd.f32 %v6129_v3, %v916_v42 }
 0x221   : > { %v4934_v45 = vpop.f32.mrf.mxu0  ;;  %v4956_v46 = vpop.f32.mrf.mxu1 }
 0x222   : > { %v6151_v48 = vmul.f32 0.5, %v917_v44 }
 0x223   : > { %v921_v51 = vpop.f32.mrf.mxu0  ;;  %v1010_v31 = vpop.f32.mrf.mxu1 }
 0x224   : > { %v1131_v52 = vpack.c.bf16 %v6151_v48, %v6149_v47  ;;  %v922_v55 = vadd.f32 %v6129_v3, %v921_v51  ;;  %v1011_v51 = vadd.f32 %v4542_v14, %v1010_v31 }
 0x225   : > { %v4937_v53 = vpop.f32.mrf.mxu0  ;;  %v4959_v54 = vpop.f32.mrf.mxu1 }
 0x226   : > { %v6157_v32 = vmul.f32 0.5, %v922_v55 }
 0x227   : > { %v924_v57 = vpop.f32.mrf.mxu0  ;;  %v1013_v39 = vpop.f32.mrf.mxu1 }
 0x228   : > { %v925_v58 = vadd.f32 %v6129_v3, %v924_v57  ;;  %v1014_v44 = vadd.f32 %v4542_v14, %v1013_v39 }
 0x229   : > { %v4938_v61 = vpop.f32.mrf.mxu0  ;;  %v4960_v62 = vpop.f32.mrf.mxu1 }
 0x22a   : > { %v6159_v40 = vmul.f32 0.5, %v925_v58  ;;  %v1137_v54 = vpack.c.bf16 %v1014_v44, %v1011_v51  ;;  %v1006_v58 = vadd.f32 %v4542_v14, %v6146_v43  ;;  %v995_v43 = vadd.f32 %v4542_v14, %v6131_v21 }
 0x22b   : > { %v929_v63 = vpop.f32.mrf.mxu0  ;;  %v1018_v0 = vpop.f32.mrf.mxu1 }
 0x22c   : > { %v1132_v1 = vpack.c.bf16 %v6159_v40, %v6157_v32  ;;  %v930_v6 = vadd.f32 %v6129_v3, %v929_v63  ;;  %v1019_v34 = vadd.f32 %v4542_v14, %v1018_v0  ;;  %v1163_v61 = vsel %vm1140_vm2, %v1137_v54, 0  ;;  %v5599_v32 = vld [vmem:[%s7520_s3 + $0x48] sm:$0xff]  }
 0x22d   : > { %v4941_v4 = vpop.f32.mrf.mxu0  ;;  %v4963_v5 = vpop.f32.mrf.mxu1  ;;  %v1003_v63 = vadd.f32 %v4542_v14, %v6141_v35 }
 0x22e   : > { %v6165_v12 = vmul.f32 0.5, %v930_v6  ;;  %v998_v5 = vadd.f32 %v4542_v14, %v6134_v26  ;;  %v4552_v26 = vld [vmem:[%s7521_s4 + $0x8] ss:$0 sm:$0xff] }
 0x22f   : > { %v932_v7 = vpop.f32.mrf.mxu0  ;;  %v1021_v50 = vpop.f32.mrf.mxu1  ;;  %v1136_v0 = vpack.c.bf16 %v1006_v58, %v1003_v63 }
 0x230   : > { %v933_v49 = vadd.f32 %v6129_v3, %v932_v7  ;;  %v1022_v25 = vadd.f32 %v4542_v14, %v1021_v50 }
 0x231   : > { %v4942_v8 = vpop.f32.mrf.mxu0  ;;  %v4964_v9 = vpop.f32.mrf.mxu1  ;;  %v1160_v6 = vsel %vm1140_vm2, %v1136_v0, 0 }
 0x232   : > { %v6167_v13 = vmul.f32 0.5, %v933_v49  ;;  %v1138_v38 = vpack.c.bf16 %v1022_v25, %v1019_v34  ;;  %v1135_v49 = vpack.c.bf16 %v998_v5, %v995_v43 }
 0x233   : > { %v6172_v60 = vpop.f32.mrf.mxu0  ;;  %v1026_v59 = vpop.f32.mrf.mxu1 }
 0x234   : > { %v1133_v15 = vpack.c.bf16 %v6167_v13, %v6165_v12  ;;  %v1027_v16 = vadd.f32 %v4542_v14, %v1026_v59  ;;  %v1166_v45 = vsel %vm1140_vm2, %v1138_v38, 0  ;;  %v1157_v9 = vsel %vm1140_vm2, %v1135_v49, 0 }
 0x235   : > { %v4945_v18 = vpop.f32.mrf.mxu0  ;;  %v4967_v20 = vpop.f32.mrf.mxu1  ;;  %v938_v47 = vadd.f32 %v6129_v3, %v6172_v60  ;;  %v681_v3 = vlaneseq }
 0x236   : > { %v1139_v22 = vpack.c.bf16 %v1027_v16, %v1027_v16  ;;  %v5598_v20 = vld [vmem:[%s7520_s3 + $0x8] sm:$0xff]  }
 0x237   : > { %v940_v23 = vpop.f32.mrf.mxu0  ;;  %v1029_v24 = vpop.f32.mrf.mxu1  ;;  %v1129_v48 = vmul.f32 0.5, %v938_v47  ;;  %v682_v40 = vand.u32 127, %v681_v3 }
 0x238   : > { %v1169_v27 = vsel %vm1140_vm2, %v1139_v22, 0 }
 0x239   : > { %v4946_v28 = vpop.f32.mrf.mxu0  ;;  %v4968_v29 = vpop.f32.mrf.mxu1  ;;  %4992 = vmatpush3.bf16.xpose.msra.mxu1 %v1169_v27  ;;  %vm683_vm4 = vcmp.lt.s32.totalorder %v682_v40, 65 }
 0x23a   : > { %4993 = vmatprep.subr.bf16.mxu1 %v5861_v10 }
 0x23b   : > { %v6178_v37 = vpop.f32.mrf.mxu0 }
 0x23c   : > { %v1084_v44 = vadd.f32 %v4552_v26, %v6178_v37 }
 0x23d   : > { %v4973_v41 = vpop.f32.mrf.mxu0 }
 0x23f   : > { %v6180_v42 = vpop.f32.mrf.mxu0 }
 0x240   : > { %v1087_v38 = vadd.f32 %v4552_v26, %v6180_v42 }
 0x241   : > { %v4974_v46 = vpop.f32.mrf.mxu0  ;;  %4994 = vmatpush3.bf16.xpose.msra.mxu1 %v1166_v45 }
 0x242   : > { %4995 = vmatprep.subr.bf16.mxu1 %v5861_v10  ;;  %v1339_v45 = vpack.c.bf16 %v1087_v38, %v1084_v44 }
 0x243   : > { %v1091_v53 = vpop.f32.mrf.mxu0 }
 0x245   : > { %v4977_v55 = vpop.f32.mrf.mxu0 }
 0x247   : > { %v1094_v57 = vpop.f32.mrf.mxu0 }
 0x248   : > { %v1095_v30 = vadd.f32 %v4552_v26, %v1094_v57 }
 0x249   : > { %v4978_v62 = vpop.f32.mrf.mxu0  ;;  %4996 = vmatpush3.bf16.xpose.msra.mxu1 %v1163_v61 }
 0x24a   : > { %4997 = vmatprep.subr.bf16.mxu1 %v5861_v10 }
 0x24b   : > { %v1099_v39 = vpop.f32.mrf.mxu0 }
 0x24c   : > { %v1100_v34 = vadd.f32 %v4552_v26, %v1099_v39 }
 0x24d   : > { %v4981_v4 = vpop.f32.mrf.mxu0 }
 0x24f   : > { %v1102_v31 = vpop.f32.mrf.mxu0 }
 0x250   : > { %v1103_v28 = vadd.f32 %v4552_v26, %v1102_v31 }
 0x251   : > { %v4982_v7 = vpop.f32.mrf.mxu0  ;;  %4998 = vmatpush3.bf16.xpose.msra.mxu1 %v1160_v6 }
 0x252   : > { %4999 = vmatprep.subr.bf16.mxu1 %v5861_v10  ;;  %v1341_v33 = vpack.c.bf16 %v1103_v28, %v1100_v34 }
 0x253   : > { %v1107_v50 = vpop.f32.mrf.mxu0 }
 0x254   : > { %v1108_v25 = vadd.f32 %v4552_v26, %v1107_v50 }
 0x255   : > { %v4985_v8 = vpop.f32.mrf.mxu0 }
 0x257   : > { %v1110_v35 = vpop.f32.mrf.mxu0 }
 0x258   : > { %v1111_v22 = vadd.f32 %v4552_v26, %v1110_v35 }
 0x259   : > { %v4986_v59 = vpop.f32.mrf.mxu0  ;;  %5000 = vmatpush3.bf16.xpose.msra.mxu1 %v1157_v9 }
 0x25a   : > { %5051 = vmatprep.subr.bf16.mxu1 %v5861_v10  ;;  %v1342_v29 = vpack.c.bf16 %v1111_v22, %v1108_v25  ;;  %v6332_v25 = vld [vmem:[%s7521_s4 + $0x1] ss:$0 sm:$0xff] }
 0x25b   : > { %v1115_v16 = vpop.f32.mrf.mxu0 }
 0x25c   : > { %v1116_v18 = vadd.f32 %v4552_v26, %v1115_v16 }
 0x25d   : > { %v4989_v21 = vpop.f32.mrf.mxu0 }
 0x25e   : > { %v1343_v14 = vpack.c.bf16 %v1116_v18, %v1116_v18 }
 0x25f   : > { %v1118_v23 = vpop.f32.mrf.mxu0 }
 0x260   : > { %v1361_v24 = vsel %vm1359_vm3, %v1343_v14, 0  ;;  %5002 = vmatmul.mubr.msk.bf16.vlgmr.msra.gmra.mxu1 %vm1140_vm2, %v1130_v36  ;;  %v1092_v36 = vadd.f32 %v4552_v26, %v1091_v53 }
 0x261   : > { %v4990_v27 = vpop.f32.mrf.mxu0  ;;  %5022 = vmatpush3.bf16.msra.mxu0 %v1361_v24  ;;  %5005 = vmatprep.mubr.msk.bf16.mxu1 %vm5862_vm1, %v5861_v10 }
 0x262   : > { %5023 = vmatprep.subr.bf16.mxu0 %v5861_v10  ;;  %5052 = vmatpush3.bf16.msra.mxu1 %v5598_v20  ;;  %v1340_v41 = vpack.c.bf16 %v1095_v30, %v1092_v36 }
 0x263   : > { %5095 = vmatprep.subr.bf16.mxu1 %v5861_v10 }
 0x265   : > { %5024 = vmatpush3.bf16.msra.mxu0 %v1342_v29 }
 0x266   : > { %5025 = vmatprep.subr.bf16.mxu0 %v5861_v10 }
 0x268   : > { %5006 = vmatmul.mubr.msk.bf16.gmra.mxu1 %vm1140_vm2, %v1131_v52  ;;  %v1134_v52 = vpack.c.bf16 %v1129_v48, %v1129_v48 }
 0x269   : > { %5026 = vmatpush3.bf16.msra.mxu0 %v1341_v33  ;;  %5009 = vmatprep.mubr.msk.bf16.mxu1 %vm5862_vm1, %v5861_v10 }
 0x26a   : > { %5027 = vmatprep.subr.bf16.mxu0 %v5861_v10 }
 0x26d   : > { %5028 = vmatpush3.bf16.msra.mxu0 %v1340_v41 }
 0x26e   : > { %5029 = vmatprep.subr.bf16.mxu0 %v5861_v10 }
 0x270   : > { %5010 = vmatmul.mubr.msk.bf16.gmra.mxu1 %vm1140_vm2, %v1132_v1  ;;  %v5863_v1 = vmov -1e+30  }
 0x271   : > { %5030 = vmatpush3.bf16.msra.mxu0 %v1339_v45  ;;  %5013 = vmatprep.mubr.msk.bf16.mxu1 %vm5862_vm1, %v5861_v10  ;;  %v6282_v12 = vsel %vm683_vm4, 0.0, %v5863_v1 }
 0x272   : > { %5073 = vmatprep.subr.bf16.mxu0 %v5861_v10 }
 0x278   : > { %5014 = vmatmul.mubr.msk.bf16.gmra.mxu1 %vm1140_vm2, %v1133_v15 }
 0x279   : > { %5017 = vmatprep.mubr.msk.bf16.mxu1 %vm5862_vm1, %v5861_v10 }
 0x280   : > { %5018 = vmatmul.mubr.msk.bf16.gmra.mxu1 %vm1140_vm2, %v1134_v52 }
 0x281   : > { %5053 = vmatprep.mubr.msk.bf16.mxu1 %vm5862_vm1, %v5861_v10 }
 0x288   : > { %5054 = vmatmul.mubr.msk.bf16.vlgmr.msra.gmra.mxu1 %vm662_vm0, %v6047_v56 }
 0x289   : > { %5057 = vmatprep.mubr.msk.bf16.mxu1 %vm5862_vm1, %v5861_v10  ;;  %5096 = vmatpush3.bf16.msra.mxu1 %v5599_v32 }
 0x28a   : > { %5147 = vmatprep.subr.bf16.mxu1 %v5861_v10 }
 0x290   : > { %5058 = vmatmul.mubr.msk.bf16.gmra.mxu1 %vm662_vm0, %v6063_v2 }
 0x291   : > { %5061 = vmatprep.mubr.msk.bf16.mxu1 %vm5862_vm1, %v5861_v10 }
 0x298   : > { %5062 = vmatmul.mubr.msk.bf16.gmra.mxu1 %vm662_vm0, %v6075_v11 }
 0x299   : > { %5065 = vmatprep.mubr.msk.bf16.mxu1 %vm5862_vm1, %v5861_v10 }
 0x2a0   : > { %5066 = vmatmul.mubr.msk.bf16.gmra.mxu1 %vm662_vm0, %v6086_v17 }
 0x2a1   : > { %5069 = vmatprep.mubr.msk.bf16.mxu1 %vm5862_vm1, %v5861_v10 }
 0x2a8   : > { %5070 = vmatmul.mubr.msk.bf16.gmra.mxu1 %vm662_vm0, %v6096_v19 }
 0x2a9   : > { %5097 = vmatprep.mubr.msk.bf16.mxu1 %vm5862_vm1, %v5861_v10 }
 0x2b0   : > { %5098 = vmatmul.mubr.msk.bf16.vlgmr.msra.gmra.mxu1 %vm662_vm0, %v6047_v56 }
 0x2b1   : > { %5101 = vmatprep.mubr.msk.bf16.mxu1 %vm5862_vm1, %v5861_v10 }
 0x2b8   : > { %5102 = vmatmul.mubr.msk.bf16.gmra.mxu1 %vm662_vm0, %v6063_v2 }
 0x2b9   : > { %5105 = vmatprep.mubr.msk.bf16.mxu1 %vm5862_vm1, %v5861_v10 }
 0x2c0   : > { %5106 = vmatmul.mubr.msk.bf16.gmra.mxu1 %vm662_vm0, %v6075_v11 }
 0x2c1   : > { %5109 = vmatprep.mubr.msk.bf16.mxu1 %vm5862_vm1, %v5861_v10 }
 0x2c8   : > { %5110 = vmatmul.mubr.msk.bf16.gmra.mxu1 %vm662_vm0, %v6086_v17 }
 0x2c9   : > { %5113 = vmatprep.mubr.msk.bf16.mxu1 %vm5862_vm1, %v5861_v10 }
 0x2d0   : > { %5114 = vmatmul.mubr.msk.bf16.gmra.mxu1 %vm662_vm0, %v6096_v19 }
 0x2d1   : > { %5157 = vmatprep.mubr.msk.bf16.mxu1 %vm5862_vm1, %v5861_v10 }
 0x320   : > { %v1205_v13 = vpop.f32.mrf.mxu1 }
 0x321   : > { %v6285_v60 = vadd.f32 %v1205_v13, %v6282_v12 }
 0x322   : > { %v5003_v15 = vpop.f32.mrf.mxu1 }
 0x323   : > { %v1244_v37 = vsel %vm1243_vm5, %v6285_v60, -inf }
 0x324   : > { %1245 = vmax.xlane.f32.xlu0 %v1244_v37  ;;  %v1208_v42 = vpop.f32.mrf.mxu1 }
 0x325   : > { %v6290_v46 = vadd.f32 %v1208_v42, %v6282_v12 }
 0x326   : > { %v5004_v51 = vpop.f32.mrf.mxu1 }
 0x327   : > { %v1247_v53 = vsel %vm1243_vm5, %v6290_v46, -inf }
 0x328   : > { %1248 = vmax.xlane.f32.xlu1 %v1247_v53  ;;  %v1213_v54 = vpop.f32.mrf.mxu1 }
 0x329   : > { %v6295_v55 = vadd.f32 %v1213_v54, %v6282_v12 }
 0x32a   : > { %v5007_v57 = vpop.f32.mrf.mxu1 }
 0x32b   : > { %v1250_v58 = vsel %vm1243_vm5, %v6295_v55, -inf }
 0x32c   : > { %1251 = vmax.xlane.f32.xlu0 %v1250_v58  ;;  %v1216_v61 = vpop.f32.mrf.mxu1 }
 0x32d   : > { %v6300_v62 = vadd.f32 %v1216_v61, %v6282_v12 }
 0x32e   : > { %v5008_v63 = vpop.f32.mrf.mxu1 }
 0x32f   : > { %v1253_v39 = vsel %vm1243_vm5, %v6300_v62, -inf }
 0x330   : > { %1254 = vmax.xlane.f32.xlu1 %v1253_v39  ;;  %v1221_v0 = vpop.f32.mrf.mxu1 }
 0x331   : > { %v6305_v4 = vadd.f32 %v1221_v0, %v6282_v12 }
 0x332   : > { %v5011_v31 = vpop.f32.mrf.mxu1 }
 0x333   : > { %v1256_v5 = vsel %vm1243_vm5, %v6305_v4, -inf }
 0x334   : > { %1257 = vmax.xlane.f32.xlu0 %v1256_v5  ;;  %v1224_v6 = vpop.f32.mrf.mxu1 }
 0x335   : > { %v6310_v7 = vadd.f32 %v1224_v6, %v6282_v12 }
 0x336   : > { %v5012_v43 = vpop.f32.mrf.mxu1 }
 0x337   : > { %v1259_v50 = vsel %vm1243_vm5, %v6310_v7, -inf }
 0x338   : > { %1260 = vmax.xlane.f32.xlu1 %v1259_v50  ;;  %v1229_v49 = vpop.f32.mrf.mxu1 }
 0x339   : > { %v6315_v8 = vadd.f32 %v1229_v49, %v6282_v12 }
 0x33a   : > { %v5015_v35 = vpop.f32.mrf.mxu1 }
 0x33b   : > { %v1262_v9 = vsel %vm1243_vm5, %v6315_v8, -inf }
 0x33c   : > { %1263 = vmax.xlane.f32.xlu0 %v1262_v9  ;;  %v1232_v59 = vpop.f32.mrf.mxu1 }
 0x33d   : > { %v6320_v26 = vadd.f32 %v1232_v59, %v6282_v12 }
 0x33e   : > { %v5016_v16 = vpop.f32.mrf.mxu1 }
 0x33f   : > { %v1265_v18 = vsel %vm1243_vm5, %v6320_v26, -inf }
 0x340   : > { %1266 = vmax.xlane.f32.xlu1 %v1265_v18  ;;  %v1237_v21 = vpop.f32.mrf.mxu1 }
 0x341   : > { %v6325_v14 = vadd.f32 %v1237_v21, %v6282_v12 }
 0x342   : > { %v5019_v20 = vpop.f32.mrf.mxu1 }
 0x343   : > { %v1268_v22 = vsel %vm1243_vm5, %v6325_v14, -inf }
 0x344   : > { %1269 = vmax.xlane.f32.xlu0 %v1268_v22  ;;  %v1240_v23 = vpop.f32.mrf.mxu1 }
 0x346   : > { %v5020_v24 = vpop.f32.mrf.mxu1 }
 0x348   : > { %v1501_v27 = vpop.f32.mrf.mxu1 }
 0x349   : > { %v1502_v29 = vadd.f32 %v6332_v25, %v1501_v27 }
 0x34a   : > { %v5055_v28 = vpop.f32.mrf.mxu1 }
 0x34b   : > { %v6336_v36 = vmul.f32 0.5, %v1502_v29 }
 0x34c   : > { %v1504_v34 = vpop.f32.mrf.mxu1 }
 0x34d   : > { %v1505_v30 = vadd.f32 %v6332_v25, %v1504_v34 }
 0x34e   : > { %v5056_v33 = vpop.f32.mrf.mxu1 }
 0x34f   : > { %v6338_v38 = vmul.f32 0.5, %v1505_v30 }
 0x350   : > { %v1509_v41 = vpop.f32.mrf.mxu1 }
 0x351   : > { %v1726_v44 = vpack.c.bf16 %v6338_v38, %v6336_v36  ;;  %v1510_v47 = vadd.f32 %v6332_v25, %v1509_v41 }
 0x352   : > { %v5059_v45 = vpop.f32.mrf.mxu1 }
 0x353   : > { %v6344_v3 = vmul.f32 0.5, %v1510_v47 }
 0x354   : > { %v1512_v48 = vpop.f32.mrf.mxu1 }
 0x355   : > { %v1513_v52 = vadd.f32 %v6332_v25, %v1512_v48  ;;  %v4592_v48 = vld [vmem:[%s7521_s4 + $0x9] ss:$0 sm:$0xff] }
 0x356   : > { %v5060_v32 = vpop.f32.mrf.mxu1 }
 0x357   : > { %v6346_v40 = vmul.f32 0.5, %v1513_v52 }
 0x358   : > { %v1517_v1 = vpop.f32.mrf.mxu1 }
 0x359   : > { %v1727_v13 = vpack.c.bf16 %v6346_v40, %v6344_v3  ;;  %v1518_v37 = vadd.f32 %v6332_v25, %v1517_v1 }
 0x35a   : > { %v5063_v15 = vpop.f32.mrf.mxu1 }
 0x35b   : > { %v6352_v54 = vmul.f32 0.5, %v1518_v37 }
 0x35c   : > { %v1520_v42 = vpop.f32.mrf.mxu1 }
 0x35d   : > { %v1521_v51 = vadd.f32 %v6332_v25, %v1520_v42 }
 0x35e   : > { %v5064_v53 = vpop.f32.mrf.mxu1 }
 0x35f   : > { %v6354_v57 = vmul.f32 0.5, %v1521_v51 }
 0x360   : > { %v1525_v58 = vpop.f32.mrf.mxu1 }
 0x361   : > { %v1728_v61 = vpack.c.bf16 %v6354_v57, %v6352_v54  ;;  %v1526_v39 = vadd.f32 %v6332_v25, %v1525_v58 }
 0x362   : > { %v5067_v63 = vpop.f32.mrf.mxu1 }
 0x363   : > { %v6360_v6 = vmul.f32 0.5, %v1526_v39 }
 0x364   : > { %v1528_v0 = vpop.f32.mrf.mxu1 }
 0x365   : > { %v1529_v31 = vadd.f32 %v6332_v25, %v1528_v0 }
 0x366   : > { %v5068_v5 = vpop.f32.mrf.mxu1 }
 0x367   : > { %v6362_v43 = vmul.f32 0.5, %v1529_v31 }
 0x368   : > { %v6364_v50 = vpop.f32.mrf.mxu1 }
 0x369   : > { %v1729_v49 = vpack.c.bf16 %v6362_v43, %v6360_v6  ;;  %v1534_v36 = vadd.f32 %v6332_v25, %v6364_v50 }
 0x36a   : > { %v5071_v35 = vpop.f32.mrf.mxu1 }
 0x36b   : > { %v1725_v38 = vmul.f32 0.5, %v1534_v36 }
 0x36c   : > { %v1536_v9 = vpop.f32.mrf.mxu1 }
 0x36e   : > { %v5072_v59 = vpop.f32.mrf.mxu1 }
 0x370   : > { %v1679_v16 = vpop.f32.mrf.mxu1 }
 0x372   : > { %v5099_v18 = vpop.f32.mrf.mxu1 }
 0x373   : > { %v1680_v18 = vadd.f32 %v4592_v48, %v1679_v16 }
 0x374   : > { %v1682_v21 = vpop.f32.mrf.mxu1 }
 0x375   : > { %v1683_v9 = vadd.f32 %v4592_v48, %v1682_v21 }
 0x376   : > { %v5100_v20 = vpop.f32.mrf.mxu1 }
 0x377   : > { %v1933_v20 = vpack.c.bf16 %v1683_v9, %v1680_v18 }
 0x378   : > { %v1687_v22 = vpop.f32.mrf.mxu1 }
 0x379   : > { %v1688_v35 = vadd.f32 %v4592_v48, %v1687_v22 }
 0x37a   : > { %v5103_v23 = vpop.f32.mrf.mxu1 }
 0x37c   : > { %v1690_v24 = vpop.f32.mrf.mxu1 }
 0x37d   : > { %v1691_v31 = vadd.f32 %v4592_v48, %v1690_v24 }
 0x37e   : > { %v5104_v27 = vpop.f32.mrf.mxu1 }
 0x37f   : > { %v1934_v59 = vpack.c.bf16 %v1691_v31, %v1688_v35 }
 0x380   : > { %v1695_v28 = vpop.f32.mrf.mxu1 }
 0x381   : > { %v1696_v0 = vadd.f32 %v4592_v48, %v1695_v28 }
 0x382   : > { %v5107_v29 = vpop.f32.mrf.mxu1 }
 0x384   : > { %v1698_v34 = vpop.f32.mrf.mxu1 }
 0x385   : > { %v1699_v63 = vadd.f32 %v4592_v48, %v1698_v34 }
 0x386   : > { %v5108_v30 = vpop.f32.mrf.mxu1 }
 0x387   : > { %v1935_v5 = vpack.c.bf16 %v1699_v63, %v1696_v0 }
 0x388   : > { %v1703_v33 = vpop.f32.mrf.mxu1 }
 0x389   : > { %v1704_v53 = vadd.f32 %v4592_v48, %v1703_v33 }
 0x38a   : > { %v5111_v41 = vpop.f32.mrf.mxu1 }
 0x38c   : > { %v1706_v45 = vpop.f32.mrf.mxu1 }
 0x38d   : > { %v1707_v37 = vadd.f32 %v4592_v48, %v1706_v45 }
 0x38e   : > { %v5112_v47 = vpop.f32.mrf.mxu1 }
 0x38f   : > { %v1936_v39 = vpack.c.bf16 %v1707_v37, %v1704_v53 }
 0x390   : > { %v1711_v52 = vpop.f32.mrf.mxu1 }
 0x391   : > { %v1712_v32 = vadd.f32 %v4592_v48, %v1711_v52 }
 0x392   : > { %v5115_v1 = vpop.f32.mrf.mxu1 }
 0x393   : > { %v1937_v15 = vpack.c.bf16 %v1712_v32, %v1712_v32 }
 0x394   : > { %v1714_v42 = vpop.f32.mrf.mxu1 }
 0x395   : > { %v1954_v51 = vsel %vm1359_vm3, %v1937_v15, 0 }
 0x396   : > { %v5116_v58 = vpop.f32.mrf.mxu1  ;;  %5148 = vmatpush3.bf16.msra.mxu1 %v1954_v51 }
 0x397   : > { %5149 = vmatprep.subr.bf16.mxu1 %v5861_v10 }
 0x39a   : > { %5150 = vmatpush3.bf16.msra.mxu1 %v1936_v39 }
 0x39b   : > { %5151 = vmatprep.subr.bf16.mxu1 %v5861_v10 }
 0x39e   : > { %5152 = vmatpush3.bf16.msra.mxu1 %v1935_v5 }
 0x39f   : > { %5153 = vmatprep.subr.bf16.mxu1 %v5861_v10 }
 0x3a2   : > { %5154 = vmatpush3.bf16.msra.mxu1 %v1934_v59 }
 0x3a3   : > { %5155 = vmatprep.subr.bf16.mxu1 %v5861_v10 }
 0x3a6   : > { %5156 = vmatpush3.bf16.msra.mxu1 %v1933_v20 }
 0x3a7   : > { %5199 = vmatprep.subr.bf16.mxu1 %v5861_v10 }
 0x3ad   : > { %v1246_v23 = vpop.xlane.xlu0 %1245 }
 0x3ae   : > { %v1271_v27 = vsub.f32 %v6285_v60, %v1246_v23 }
 0x3b0   : > { %v1280_v28 = vmul.f32 1.442695, %v1271_v27 }
 0x3b1   : > { %v1249_v24 = vpop.xlane.xlu1 %1248 }
 0x3b2   : > { %v1272_v22 = vsub.f32 %v6290_v46, %v1249_v24  ;;  %5630 = vpow2.f32 %v1280_v28 }
 0x3b4   : > { %v1282_v29 = vmul.f32 1.442695, %v1272_v22 }
 0x3b5   : > { %v1252_v34 = vpop.xlane.xlu0 %1251 }
 0x3b6   : > { %5632 = vpow2.f32 %v1282_v29  ;;  %v1273_v16 = vsub.f32 %v6295_v55, %v1252_v34  ;;  %v5600_v55 = vld [vmem:[%s7520_s3 + $0x28] sm:$0xff]  }
 0x3b8   : > { %v1284_v21 = vmul.f32 1.442695, %v1273_v16 }
 0x3b9   : > { %v1255_v30 = vpop.xlane.xlu1 %1254 }
 0x3ba   : > { %v1274_v33 = vsub.f32 %v6300_v62, %v1255_v30  ;;  %5634 = vpow2.f32 %v1284_v21 }
 0x3bc   : > { %v1286_v41 = vmul.f32 1.442695, %v1274_v33 }
 0x3bd   : > { %v1258_v45 = vpop.xlane.xlu0 %1257 }
 0x3be   : > { %5636 = vpow2.f32 %v1286_v41  ;;  %v1275_v60 = vsub.f32 %v6305_v4, %v1258_v45 }
 0x3bf   : > { %v6382_v52 = vpop.eup %5630 }
 0x3c0   : > { %v1288_v47 = vmul.f32 1.442695, %v1275_v60 }
 0x3c1   : > { %v1261_v48 = vpop.xlane.xlu1 %1260 }
 0x3c2   : > { %v1276_v46 = vsub.f32 %v6310_v7, %v1261_v48  ;;  %5638 = vpow2.f32 %v1288_v47 }
 0x3c3   : > { %v6385_v32 = vpop.eup %5632 }
 0x3c4   : > { %v1334_v62 = vpack.c.bf16 %v6385_v32, %v6382_v52  ;;  %v1290_v1 = vmul.f32 1.442695, %v1276_v46 }
 0x3c5   : > { %v1264_v15 = vpop.xlane.xlu0 %1263 }
 0x3c6   : > { %5640 = vpow2.f32 %v1290_v1  ;;  %v1277_v4 = vsub.f32 %v6315_v8, %v1264_v15  ;;  %5032 = vmatmul.mubr.msk.bf16.vlgmr.msra.gmra.mxu0 %vm1243_vm5, %v1334_v62 }
 0x3c7   : > { %5074 = vmatpush3.bf16.msra.mxu0 %v5600_v55  ;;  %5035 = vmatprep.mubr.msk.bf16.mxu0 %vm5862_vm1, %v5861_v10  ;;  %v6397_v42 = vpop.eup %5634 }
 0x3c8   : > { %5117 = vmatprep.subr.bf16.mxu0 %v5861_v10  ;;  %v1292_v7 = vmul.f32 1.442695, %v1277_v4 }
 0x3c9   : > { %v1267_v37 = vpop.xlane.xlu1 %1266 }
 0x3ca   : > { %v1278_v51 = vsub.f32 %v6320_v26, %v1267_v37  ;;  %5642 = vpow2.f32 %v1292_v7 }
 0x3cb   : > { %v6400_v53 = vpop.eup %5636 }
 0x3cc   : > { %v1294_v58 = vmul.f32 1.442695, %v1278_v51  ;;  %v1335_v8 = vpack.c.bf16 %v6400_v53, %v6397_v42 }
 0x3cd   : > { %v1270_v63 = vpop.xlane.xlu0 %1269 }
 0x3ce   : > { %5644 = vpow2.f32 %v1294_v58  ;;  %v1279_v39 = vsub.f32 %v6325_v14, %v1270_v63  ;;  %5036 = vmatmul.mubr.msk.bf16.gmra.mxu0 %vm1243_vm5, %v1335_v8 }
 0x3cf   : > { %5039 = vmatprep.mubr.msk.bf16.mxu0 %vm5862_vm1, %v5861_v10  ;;  %v6408_v31 = vpop.eup %5638 }
 0x3d0   : > { %v1296_v0 = vmul.f32 1.442695, %v1279_v39 }
 0x3d2   : > { %5646 = vpow2.f32 %v1296_v0 }
 0x3d3   : > { %v6410_v26 = vpop.eup %5640 }
 0x3d4   : > { %v1336_v5 = vpack.c.bf16 %v6410_v26, %v6408_v31 }
 0x3d6   : > { %5040 = vmatmul.mubr.msk.bf16.gmra.mxu0 %vm1243_vm5, %v1336_v5 }
 0x3d7   : > { %5043 = vmatprep.mubr.msk.bf16.mxu0 %vm5862_vm1, %v5861_v10  ;;  %v6417_v14 = vpop.eup %5642 }
 0x3db   : > { %v6419_v35 = vpop.eup %5644 }
 0x3dc   : > { %v1337_v9 = vpack.c.bf16 %v6419_v35, %v6417_v14 }
 0x3de   : > { %5044 = vmatmul.mubr.msk.bf16.gmra.mxu0 %vm1243_vm5, %v1337_v9 }
 0x3df   : > { %5047 = vmatprep.mubr.msk.bf16.mxu0 %vm5862_vm1, %v5861_v10  ;;  %v6426_v59 = vpop.eup %5646 }
 0x3e0   : > { %v1338_v18 = vpack.c.bf16 %v6426_v59, %v6426_v59 }
 0x3e6   : > { %5048 = vmatmul.mubr.msk.bf16.gmra.mxu0 %vm1243_vm5, %v1338_v18 }
 0x3e7   : > { %5075 = vmatprep.mubr.msk.bf16.mxu0 %vm5862_vm1, %v5861_v10 }
 0x3ee   : > { %5076 = vmatmul.mubr.msk.bf16.vlgmr.msra.gmra.mxu0 %vm662_vm0, %v6047_v56 }
 0x3ef   : > { %5079 = vmatprep.mubr.msk.bf16.mxu0 %vm5862_vm1, %v5861_v10 }
 0x3f6   : > { %5080 = vmatmul.mubr.msk.bf16.gmra.mxu0 %vm662_vm0, %v6063_v2 }
 0x3f7   : > { %5083 = vmatprep.mubr.msk.bf16.mxu0 %vm5862_vm1, %v5861_v10 }
 0x3fe   : > { %5084 = vmatmul.mubr.msk.bf16.gmra.mxu0 %vm662_vm0, %v6075_v11 }
 0x3ff   : > { %5087 = vmatprep.mubr.msk.bf16.mxu0 %vm5862_vm1, %v5861_v10 }
 0x406   : > { %5088 = vmatmul.mubr.msk.bf16.gmra.mxu0 %vm662_vm0, %v6086_v17 }
 0x407   : > { %5091 = vmatprep.mubr.msk.bf16.mxu0 %vm5862_vm1, %v5861_v10 }
 0x40e   : > { %5092 = vmatmul.mubr.msk.bf16.gmra.mxu0 %vm662_vm0, %v6096_v19 }
 0x40f   : > { %5127 = vmatprep.mubr.msk.bf16.mxu0 %vm5862_vm1, %v5861_v10 }
 0x486   : > { %v6453_v20 = vpop.f32.mrf.mxu0 }
 0x488   : > { %v5033_v23 = vpop.f32.mrf.mxu0 }
 0x48a   : > { %v6455_v27 = vpop.f32.mrf.mxu0 }
 0x48c   : > { %v5034_v28 = vpop.f32.mrf.mxu0 }
 0x48e   : > { %v6457_v24 = vpop.f32.mrf.mxu0 }
 0x490   : > { %v5037_v22 = vpop.f32.mrf.mxu0 }
 0x491   : > { %v4582_v22 = vld [vmem:[%s7521_s4 + $0x5] ss:$0 sm:$0xff] }
 0x492   : > { %v6459_v29 = vpop.f32.mrf.mxu0 }
 0x494   : > { %v5038_v34 = vpop.f32.mrf.mxu0 }
 0x496   : > { %v6461_v16 = vpop.f32.mrf.mxu0 }
 0x498   : > { %v5041_v21 = vpop.f32.mrf.mxu0 }
 0x49a   : > { %v6463_v30 = vpop.f32.mrf.mxu0 }
 0x49c   : > { %v5042_v33 = vpop.f32.mrf.mxu0 }
 0x49e   : > { %v6465_v41 = vpop.f32.mrf.mxu0 }
 0x4a0   : > { %v5045_v45 = vpop.f32.mrf.mxu0 }
 0x4a2   : > { %v6467_v60 = vpop.f32.mrf.mxu0 }
 0x4a4   : > { %v5046_v47 = vpop.f32.mrf.mxu0 }
 0x4a6   : > { %v6469_v48 = vpop.f32.mrf.mxu0 }
 0x4a8   : > { %v5049_v46 = vpop.f32.mrf.mxu0 }
 0x4aa   : > { %v1432_v55 = vpop.f32.mrf.mxu0 }
 0x4ac   : > { %v5050_v62 = vpop.f32.mrf.mxu0 }
 0x4ae   : > { %v1590_v1 = vpop.f32.mrf.mxu0 }
 0x4b0   : > { %v5077_v15 = vpop.f32.mrf.mxu0 }
 0x4b2   : > { %v1593_v4 = vpop.f32.mrf.mxu0 }
 0x4b4   : > { %v5078_v7 = vpop.f32.mrf.mxu0 }
 0x4b6   : > { %v1598_v37 = vpop.f32.mrf.mxu0 }
 0x4b8   : > { %v5081_v51 = vpop.f32.mrf.mxu0 }
 0x4ba   : > { %v1601_v58 = vpop.f32.mrf.mxu0 }
 0x4bc   : > { %v5082_v8 = vpop.f32.mrf.mxu0 }
 0x4be   : > { %v1606_v63 = vpop.f32.mrf.mxu0 }
 0x4c0   : > { %v5085_v39 = vpop.f32.mrf.mxu0 }
 0x4c1   : > { %v1607_v39 = vadd.f32 %v4582_v22, %v1606_v63 }
 0x4c2   : > { %v1609_v0 = vpop.f32.mrf.mxu0 }
 0x4c3   : > { %v1610_v51 = vadd.f32 %v4582_v22, %v1609_v0  ;;  %v1591_v0 = vadd.f32 %v4582_v22, %v1590_v1 }
 0x4c4   : > { %v5086_v5 = vpop.f32.mrf.mxu0 }
 0x4c5   : > { %v1733_v5 = vpack.c.bf16 %v1610_v51, %v1607_v39 }
 0x4c6   : > { %v1614_v9 = vpop.f32.mrf.mxu0 }
 0x4c7   : > { %v1615_v15 = vadd.f32 %v4582_v22, %v1614_v9  ;;  %v1594_v9 = vadd.f32 %v4582_v22, %v1593_v4 }
 0x4c8   : > { %v5089_v18 = vpop.f32.mrf.mxu0 }
 0x4c9   : > { %v1602_v18 = vadd.f32 %v4582_v22, %v1601_v58 }
 0x4ca   : > { %v1617_v23 = vpop.f32.mrf.mxu0 }
 0x4cb   : > { %v1618_v46 = vadd.f32 %v4582_v22, %v1617_v23  ;;  %v1599_v23 = vadd.f32 %v4582_v22, %v1598_v37 }
 0x4cc   : > { %v5090_v28 = vpop.f32.mrf.mxu0 }
 0x4cd   : > { %v1734_v7 = vpack.c.bf16 %v1618_v46, %v1615_v15  ;;  %v1758_v28 = vsel %vm1140_vm2, %v1733_v5, 0 }
 0x4ce   : > { %v1622_v34 = vpop.f32.mrf.mxu0 }
 0x4cf   : > { %v1623_v21 = vadd.f32 %v4582_v22, %v1622_v34  ;;  %v1761_v8 = vsel %vm1140_vm2, %v1734_v7, 0  ;;  %v1732_v34 = vpack.c.bf16 %v1602_v18, %v1599_v23 }
 0x4d0   : > { %v5093_v33 = vpop.f32.mrf.mxu0 }
 0x4d1   : > { %v1735_v45 = vpack.c.bf16 %v1623_v21, %v1623_v21  ;;  %v1755_v21 = vsel %vm1140_vm2, %v1732_v34, 0  ;;  %v1731_v33 = vpack.c.bf16 %v1594_v9, %v1591_v0 }
 0x4d2   : > { %v1625_v47 = vpop.f32.mrf.mxu0 }
 0x4d3   : > { %v1764_v55 = vsel %vm1140_vm2, %v1735_v45, 0  ;;  %v1752_v63 = vsel %vm1140_vm2, %v1731_v33, 0 }
 0x4d4   : > { %v5094_v62 = vpop.f32.mrf.mxu0  ;;  %5118 = vmatpush3.bf16.xpose.msra.mxu0 %v1764_v55 }
 0x4d5   : > { %5119 = vmatprep.subr.bf16.mxu0 %v5861_v10 }
 0x4dc   : > { %5120 = vmatpush3.bf16.xpose.msra.mxu0 %v1761_v8 }
 0x4dd   : > { %5121 = vmatprep.subr.bf16.mxu0 %v5861_v10 }
 0x4e4   : > { %5122 = vmatpush3.bf16.xpose.msra.mxu0 %v1758_v28 }
 0x4e5   : > { %5123 = vmatprep.subr.bf16.mxu0 %v5861_v10 }
 0x4ec   : > { %5124 = vmatpush3.bf16.xpose.msra.mxu0 %v1755_v21 }
 0x4ed   : > { %5125 = vmatprep.subr.bf16.mxu0 %v5861_v10 }
 0x4f4   : > { %5126 = vmatpush3.bf16.xpose.msra.mxu0 %v1752_v63  ;;  %v1298_v63 = vsel %vm1243_vm5, %v6382_v52, 0.0  ;;  %v1307_v52 = vsel %vm1243_vm5, %v6400_v53, 0.0 }
 0x4f5   : > { %5177 = vmatprep.subr.bf16.mxu0 %v5861_v10 }
 0x4fb   : > { %5128 = vmatmul.mubr.msk.bf16.vlgmr.msra.gmra.mxu0 %vm1140_vm2, %v1726_v44  ;;  %v1730_v44 = vpack.c.bf16 %v1725_v38, %v1725_v38 }
 0x4fc   : > { %5131 = vmatprep.mubr.msk.bf16.mxu0 %vm5862_vm1, %v5861_v10 }
 0x503   : > { %5132 = vmatmul.mubr.msk.bf16.gmra.mxu0 %vm1140_vm2, %v1727_v13 }
 0x504   : > { %5135 = vmatprep.mubr.msk.bf16.mxu0 %vm5862_vm1, %v5861_v10 }
 0x50b   : > { %5136 = vmatmul.mubr.msk.bf16.gmra.mxu0 %vm1140_vm2, %v1728_v61 }
 0x50c   : > { %5139 = vmatprep.mubr.msk.bf16.mxu0 %vm5862_vm1, %v5861_v10 }
 0x513   : > { %5140 = vmatmul.mubr.msk.bf16.gmra.mxu0 %vm1140_vm2, %v1729_v49 }
 0x514   : > { %5143 = vmatprep.mubr.msk.bf16.mxu0 %vm5862_vm1, %v5861_v10 }
 0x51b   : > { %5144 = vmatmul.mubr.msk.bf16.gmra.mxu0 %vm1140_vm2, %v1730_v44 }
 0x51c   : > { %5179 = vmatprep.mubr.msk.bf16.mxu0 %vm5862_vm1, %v5861_v10 }
 0x5bb   : > { %v1800_v3 = vpop.f32.mrf.mxu0 }
 0x5bc   : > { %v6514_v40 = vadd.f32 %v1800_v3, %v6282_v12  ;;  %v1304_v3 = vsel %vm1243_vm5, %v6397_v42, 0.0  ;;  %v1319_v42 = vsel %vm1243_vm5, %v6419_v35, 0.0 }
 0x5bd   : > { %v5129_v25 = vpop.f32.mrf.mxu0 }
 0x5be   : > { %v1838_v13 = vsel %vm1243_vm5, %v6514_v40, -inf  ;;  %v1301_v25 = vsel %vm1243_vm5, %v6385_v32, 0.0  ;;  %v1322_v32 = vsel %vm1243_vm5, %v6426_v59, 0.0 }
 0x5bf   : > { %1839 = vmax.xlane.f32.xlu1 %v1838_v13  ;;  %v1803_v54 = vpop.f32.mrf.mxu0  ;;  %v1310_v13 = vsel %vm1243_vm5, %v6408_v31, 0.0 }
 0x5c0   : > { %v6519_v57 = vadd.f32 %v1803_v54, %v6282_v12  ;;  %v1316_v54 = vsel %vm1243_vm5, %v6417_v14, 0.0 }
 0x5c1   : > { %v5130_v61 = vpop.f32.mrf.mxu0 }
 0x5c2   : > { %v1841_v6 = vsel %vm1243_vm5, %v6519_v57, -inf  ;;  %v1313_v61 = vsel %vm1243_vm5, %v6410_v26, 0.0 }
 0x5c3   : > { %1842 = vmax.xlane.f32.xlu0 %v1841_v6  ;;  %v1808_v43 = vpop.f32.mrf.mxu0 }
 0x5c4   : > { %v6524_v50 = vadd.f32 %v1808_v43, %v6282_v12 }
 0x5c5   : > { %v5133_v49 = vpop.f32.mrf.mxu0 }
 0x5c6   : > { %v1844_v1 = vsel %vm1243_vm5, %v6524_v50, -inf }
 0x5c7   : > { %1845 = vmax.xlane.f32.xlu1 %v1844_v1  ;;  %v1811_v4 = vpop.f32.mrf.mxu0 }
 0x5c8   : > { %v6529_v37 = vadd.f32 %v1811_v4, %v6282_v12 }
 0x5c9   : > { %v5134_v58 = vpop.f32.mrf.mxu0 }
 0x5ca   : > { %v1847_v22 = vsel %vm1243_vm5, %v6529_v37, -inf }
 0x5cb   : > { %1848 = vmax.xlane.f32.xlu0 %v1847_v22  ;;  %v1816_v45 = vpop.f32.mrf.mxu0 }
 0x5cc   : > { %v6534_v47 = vadd.f32 %v1816_v45, %v6282_v12 }
 0x5cd   : > { %v5137_v46 = vpop.f32.mrf.mxu0 }
 0x5ce   : > { %v1850_v55 = vsel %vm1243_vm5, %v6534_v47, -inf }
 0x5cf   : > { %1851 = vmax.xlane.f32.xlu1 %v1850_v55  ;;  %v1819_v62 = vpop.f32.mrf.mxu0 }
 0x5d0   : > { %v6539_v15 = vadd.f32 %v1819_v62, %v6282_v12 }
 0x5d1   : > { %v5138_v7 = vpop.f32.mrf.mxu0 }
 0x5d2   : > { %v1853_v51 = vsel %vm1243_vm5, %v6539_v15, -inf }
 0x5d3   : > { %1854 = vmax.xlane.f32.xlu0 %v1853_v51  ;;  %v1824_v8 = vpop.f32.mrf.mxu0 }
 0x5d4   : > { %v6544_v39 = vadd.f32 %v1824_v8, %v6282_v12 }
 0x5d5   : > { %v5141_v5 = vpop.f32.mrf.mxu0 }
 0x5d6   : > { %v1856_v18 = vsel %vm1243_vm5, %v6544_v39, -inf }
 0x5d7   : > { %1857 = vmax.xlane.f32.xlu1 %v1856_v18  ;;  %v1827_v28 = vpop.f32.mrf.mxu0 }
 0x5d8   : > { %v6549_v23 = vadd.f32 %v1827_v28, %v6282_v12 }
 0x5d9   : > { %v5142_v34 = vpop.f32.mrf.mxu0 }
 0x5da   : > { %v1859_v9 = vsel %vm1243_vm5, %v6549_v23, -inf }
 0x5db   : > { %1860 = vmax.xlane.f32.xlu0 %v1859_v9  ;;  %v1832_v21 = vpop.f32.mrf.mxu0 }
 0x5dc   : > { %v6554_v0 = vadd.f32 %v1832_v21, %v6282_v12 }
 0x5dd   : > { %v5145_v33 = vpop.f32.mrf.mxu0 }
 0x5de   : > { %v1862_v36 = vsel %vm1243_vm5, %v6554_v0, -inf }
 0x5df   : > { %1299 = vadd.xlane.f32.xlu0 %v1298_v63  ;;  %1863 = vmax.xlane.f32.xlu1 %v1862_v36  ;;  %v1835_v38 = vpop.f32.mrf.mxu0 }
 0x5e1   : > { %v5146_v44 = vpop.f32.mrf.mxu0 }
 0x5e3   : > { %1305 = vadd.xlane.f32.xlu0 %v1304_v3  ;;  %1302 = vadd.xlane.f32.xlu1 %v1301_v25 }
 0x5e7   : > { %1311 = vadd.xlane.f32.xlu0 %v1310_v13  ;;  %1308 = vadd.xlane.f32.xlu1 %v1307_v52 }
 0x5eb   : > { %1317 = vadd.xlane.f32.xlu0 %v1316_v54  ;;  %1314 = vadd.xlane.f32.xlu1 %v1313_v61 }
 0x5ef   : > { %1323 = vadd.xlane.f32.xlu0 %v1322_v32  ;;  %1320 = vadd.xlane.f32.xlu1 %v1319_v42 }
 0x648   : > { %v1840_v31 = vpop.xlane.xlu1 %1839 }
 0x649   : > { %v1865_v53 = vsub.f32 %v6514_v40, %v1840_v31 }
 0x64b   : > { %v1874_v6 = vmul.f32 1.442695, %v1865_v53 }
 0x64c   : > { %v1843_v43 = vpop.xlane.xlu0 %1842 }
 0x64d   : > { %5648 = vpow2.f32 %v1874_v6  ;;  %v1866_v14 = vsub.f32 %v6519_v57, %v1843_v43 }
 0x64f   : > { %v1876_v49 = vmul.f32 1.442695, %v1866_v14 }
 0x650   : > { %v1846_v26 = vpop.xlane.xlu1 %1845 }
 0x651   : > { %5650 = vpow2.f32 %v1876_v49  ;;  %v1867_v1 = vsub.f32 %v6524_v50, %v1846_v26  ;;  %v1444_v50 = vld [vmem:[%s7522_s5] sm:$0x3] }
 0x653   : > { %v1878_v4 = vmul.f32 1.442695, %v1867_v1 }
 0x654   : > { %v1849_v59 = vpop.xlane.xlu0 %1848 }
 0x655   : > { %5652 = vpow2.f32 %v1878_v4  ;;  %v1868_v35 = vsub.f32 %v6529_v37, %v1849_v59 }
 0x657   : > { %v1880_v58 = vmul.f32 1.442695, %v1868_v35 }
 0x658   : > { %v1852_v22 = vpop.xlane.xlu1 %1851 }
 0x659   : > { %5654 = vpow2.f32 %v1880_v58  ;;  %v1869_v40 = vsub.f32 %v6534_v47, %v1852_v22  ;;  %v2151_v47 = vsel %vm2059_vm6, %v1444_v50, 0  ;;  %v4609_v22 = vld [vmem:[%s7522_s5 + $0x2] sm:$0x3] }
 0x65a   : > { %v5649_v45 = vpop.eup %5648 }
 0x65b   : > { %v1882_v46 = vmul.f32 1.442695, %v1869_v40  ;;  %v1892_v55 = vsel %vm1243_vm5, %v5649_v45, 0.0 }
 0x65c   : > { %v1855_v57 = vpop.xlane.xlu0 %1854  ;;  %1893 = vadd.xlane.f32.xlu1 %v1892_v55  ;;  %v5601_v55 = vld [vmem:[%s7520_s3 + $0x30] sm:$0xff]  }
 0x65d   : > { %5656 = vpow2.f32 %v1882_v46  ;;  %v1870_v62 = vsub.f32 %v6539_v15, %v1855_v57 }
 0x65e   : > { %v5651_v37 = vpop.eup %5650 }
 0x65f   : > { %v1928_v7 = vpack.c.bf16 %v5651_v37, %v5649_v45  ;;  %v1884_v51 = vmul.f32 1.442695, %v1870_v62  ;;  %v1895_v8 = vsel %vm1243_vm5, %v5651_v37, 0.0  ;;  %v2061_v45 = vsel %vm2059_vm6, %v4609_v22, 0 }
 0x660   : > { %v1858_v5 = vpop.xlane.xlu1 %1857  ;;  %1896 = vadd.xlane.f32.xlu0 %v1895_v8  ;;  %5178 = vmatpush3.bf16.msra.mxu0 %v2061_v45 }
 0x661   : > { %5658 = vpow2.f32 %v1884_v51  ;;  %v1871_v18 = vsub.f32 %v6544_v39, %v1858_v5  ;;  %5158 = vmatmul.mubr.msk.bf16.vlgmr.msra.gmra.mxu1 %vm1243_vm5, %v1928_v7  ;;  %5221 = vmatprep.subr.bf16.mxu0 %v5861_v10 }
 0x662   : > { %v5653_v28 = vpop.eup %5652  ;;  %5161 = vmatprep.mubr.msk.bf16.mxu1 %vm5862_vm1, %v5861_v10  ;;  %5200 = vmatpush3.bf16.msra.mxu1 %v2151_v47 }
 0x663   : > { %v1886_v15 = vmul.f32 1.442695, %v1871_v18  ;;  %v1898_v34 = vsel %vm1243_vm5, %v5653_v28, 0.0  ;;  %5243 = vmatprep.subr.bf16.mxu1 %v5861_v10 }
 0x664   : > { %v1861_v9 = vpop.xlane.xlu0 %1860  ;;  %1899 = vadd.xlane.f32.xlu1 %v1898_v34 }
 0x665   : > { %5660 = vpow2.f32 %v1886_v15  ;;  %v1872_v21 = vsub.f32 %v6549_v23, %v1861_v9 }
 0x666   : > { %v5655_v33 = vpop.eup %5654 }
 0x667   : > { %v1888_v63 = vmul.f32 1.442695, %v1872_v21  ;;  %v1901_v39 = vsel %vm1243_vm5, %v5655_v33, 0.0  ;;  %v1929_v36 = vpack.c.bf16 %v5655_v33, %v5653_v28 }
 0x668   : > { %1902 = vadd.xlane.f32.xlu0 %v1901_v39  ;;  %v1864_v38 = vpop.xlane.xlu1 %1863  ;;  %v1300_v32 = vpop.xlane.xlu0 %1299 }
 0x669   : > { %5662 = vpow2.f32 %v1888_v63  ;;  %v1873_v44 = vsub.f32 %v6554_v0, %v1864_v38  ;;  %5162 = vmatmul.mubr.msk.bf16.gmra.mxu1 %vm1243_vm5, %v1929_v36 }
 0x66a   : > { %v5657_v3 = vpop.eup %5656  ;;  %5165 = vmatprep.mubr.msk.bf16.mxu1 %vm5862_vm1, %v5861_v10 }
 0x66b   : > { %v1890_v25 = vmul.f32 1.442695, %v1873_v44  ;;  %v1904_v13 = vsel %vm1243_vm5, %v5657_v3, 0.0 }
 0x66c   : > { %1905 = vadd.xlane.f32.xlu1 %v1904_v13  ;;  %v1303_v61 = vpop.xlane.xlu1 %1302  ;;  %v1306_v49 = vpop.xlane.xlu0 %1305 }
 0x66d   : > { %5664 = vpow2.f32 %v1890_v25 }
 0x66e   : > { %v5659_v23 = vpop.eup %5658  ;;  %5666 = vrcp.f32 %v1303_v61  ;;  %v5602_v61 = vld [vmem:[%s7520_s3 + $0x10] sm:$0xff]  }
 0x66f   : > { %v1907_v52 = vsel %vm1243_vm5, %v5659_v23, 0.0  ;;  %v1930_v54 = vpack.c.bf16 %v5659_v23, %v5657_v3  ;;  %5668 = vrcp.f32 %v1300_v32 }
 0x670   : > { %1908 = vadd.xlane.f32.xlu0 %v1907_v52  ;;  %v1309_v43 = vpop.xlane.xlu1 %1308  ;;  %v1312_v58 = vpop.xlane.xlu0 %1311 }
 0x671   : > { %5166 = vmatmul.mubr.msk.bf16.gmra.mxu1 %vm1243_vm5, %v1930_v54  ;;  %5670 = vrcp.f32 %v1309_v43 }
 0x672   : > { %v5661_v0 = vpop.eup %5660  ;;  %5169 = vmatprep.mubr.msk.bf16.mxu1 %vm5862_vm1, %v5861_v10  ;;  %5672 = vrcp.f32 %v1306_v49 }
 0x673   : > { %v1910_v42 = vsel %vm1243_vm5, %v5661_v0, 0.0 }
 0x674   : > { %1911 = vadd.xlane.f32.xlu1 %v1910_v42  ;;  %v1315_v59 = vpop.xlane.xlu1 %1314 }
 0x675   : > { %5674 = vrcp.f32 %v1315_v59 }
 0x676   : > { %v5663_v31 = vpop.eup %5662  ;;  %5676 = vrcp.f32 %v1312_v58 }
 0x677   : > { %v1913_v53 = vsel %vm1243_vm5, %v5663_v31, 0.0  ;;  %v1931_v6 = vpack.c.bf16 %v5663_v31, %v5661_v0 }
 0x678   : > { %1914 = vadd.xlane.f32.xlu0 %v1913_v53  ;;  %v1321_v62 = vpop.xlane.xlu1 %1320 }
 0x679   : > { %5170 = vmatmul.mubr.msk.bf16.gmra.mxu1 %vm1243_vm5, %v1931_v6  ;;  %5678 = vrcp.f32 %v1321_v62 }
 0x67a   : > { %v5665_v14 = vpop.eup %5664  ;;  %5173 = vmatprep.mubr.msk.bf16.mxu1 %vm5862_vm1, %v5861_v10 }
 0x67b   : > { %v1916_v26 = vsel %vm1243_vm5, %v5665_v14, 0.0  ;;  %v1932_v1 = vpack.c.bf16 %v5665_v14, %v5665_v14  ;;  %v5667_v4 = vpop.eup %5666 }
 0x67c   : > { %1917 = vadd.xlane.f32.xlu1 %v1916_v26  ;;  %v5669_v35 = vpop.eup %5668  ;;  %v1436_v40 = vmul.f32 %v5667_v4, %v6455_v27  ;;  %v1318_v27 = vpop.xlane.xlu0 %1317 }
 0x67d   : > { %v1435_v46 = vmul.f32 %v5669_v35, %v6453_v20  ;;  %5680 = vrcp.f32 %v1318_v27 }
 0x67e   : > { %v5671_v50 = vpop.eup %5670 }
 0x67f   : > { %v1445_v57 = vpack.c.bf16 %v1436_v40, %v1435_v46  ;;  %v5673_v37 = vpop.eup %5672  ;;  %v1438_v20 = vmul.f32 %v5671_v50, %v6459_v29 }
 0x680   : > { %v1437_v7 = vmul.f32 %v5673_v37, %v6457_v24  ;;  %v1324_v47 = vpop.xlane.xlu0 %1323 }
 0x681   : > { %5174 = vmatmul.mubr.msk.bf16.gmra.mxu1 %vm1243_vm5, %v1932_v1  ;;  %5682 = vrcp.f32 %v1324_v47 }
 0x682   : > { %5201 = vmatprep.mubr.msk.bf16.mxu1 %vm5862_vm1, %v5861_v10  ;;  %v1446_v51 = vpack.c.bf16 %v1438_v20, %v1437_v7  ;;  %v5675_v8 = vpop.eup %5674 }
 0x683   : > { %v5677_v5 = vpop.eup %5676  ;;  %v1440_v18 = vmul.f32 %v5675_v8, %v6463_v30 }
 0x684   : > { %v1439_v28 = vmul.f32 %v5677_v5, %v6461_v16 }
 0x686   : > { %v1447_v29 = vpack.c.bf16 %v1440_v18, %v1439_v28  ;;  %v5679_v15 = vpop.eup %5678 }
 0x687   : > { %v1442_v24 = vmul.f32 %v5679_v15, %v6467_v60 }
 0x689   : > { %5202 = vmatmul.mubr.msk.bf16.vlgmr.msra.gmra.mxu1 %vm1140_vm2, %v1445_v57 }
 0x68a   : > { %5205 = vmatprep.mubr.msk.bf16.mxu1 %vm5862_vm1, %v5861_v10  ;;  %5244 = vmatpush3.bf16.msra.mxu1 %v5601_v55  ;;  %v5681_v34 = vpop.eup %5680 }
 0x68b   : > { %5287 = vmatprep.subr.bf16.mxu1 %v5861_v10  ;;  %v1441_v9 = vmul.f32 %v5681_v34, %v6465_v41 }
 0x68d   : > { %v1448_v21 = vpack.c.bf16 %v1442_v24, %v1441_v9 }
 0x68e   : > { %v5683_v33 = vpop.eup %5682 }
 0x68f   : > { %v1443_v16 = vmul.f32 %v5683_v33, %v6469_v48 }
 0x691   : > { %5206 = vmatmul.mubr.msk.bf16.gmra.mxu1 %vm1140_vm2, %v1446_v51  ;;  %v1449_v30 = vpack.c.bf16 %v1443_v16, %v1443_v16 }
 0x692   : > { %5209 = vmatprep.mubr.msk.bf16.mxu1 %vm5862_vm1, %v5861_v10 }
 0x699   : > { %5210 = vmatmul.mubr.msk.bf16.gmra.mxu1 %vm1140_vm2, %v1447_v29 }
 0x69a   : > { %5213 = vmatprep.mubr.msk.bf16.mxu1 %vm5862_vm1, %v5861_v10 }
 0x6a1   : > { %5214 = vmatmul.mubr.msk.bf16.gmra.mxu1 %vm1140_vm2, %v1448_v21 }
 0x6a2   : > { %5217 = vmatprep.mubr.msk.bf16.mxu1 %vm5862_vm1, %v5861_v10 }
 0x6a9   : > { %5218 = vmatmul.mubr.msk.bf16.gmra.mxu1 %vm1140_vm2, %v1449_v30 }
 0x6aa   : > { %5245 = vmatprep.mubr.msk.bf16.mxu1 %vm5862_vm1, %v5861_v10 }
 0x6b1   : > { %5246 = vmatmul.mubr.msk.bf16.vlgmr.msra.gmra.mxu1 %vm662_vm0, %v6047_v56 }
 0x6b2   : > { %5249 = vmatprep.mubr.msk.bf16.mxu1 %vm5862_vm1, %v5861_v10 }
 0x6b9   : > { %5250 = vmatmul.mubr.msk.bf16.gmra.mxu1 %vm662_vm0, %v6063_v2 }
 0x6ba   : > { %5253 = vmatprep.mubr.msk.bf16.mxu1 %vm5862_vm1, %v5861_v10 }
 0x6c1   : > { %5254 = vmatmul.mubr.msk.bf16.gmra.mxu1 %vm662_vm0, %v6075_v11 }
 0x6c2   : > { %5257 = vmatprep.mubr.msk.bf16.mxu1 %vm5862_vm1, %v5861_v10 }
 0x6c9   : > { %5258 = vmatmul.mubr.msk.bf16.gmra.mxu1 %vm662_vm0, %v6086_v17 }
 0x6ca   : > { %5261 = vmatprep.mubr.msk.bf16.mxu1 %vm5862_vm1, %v5861_v10 }
 0x6d1   : > { %5262 = vmatmul.mubr.msk.bf16.gmra.mxu1 %vm662_vm0, %v6096_v19 }
 0x6d2   : > { %5297 = vmatprep.mubr.msk.bf16.mxu1 %vm5862_vm1, %v5861_v10 }
 0x6e5   : > { %v1894_v41 = vpop.xlane.xlu1 %1893 }
 0x6e6   : > { %5684 = vrcp.f32 %v1894_v41  ;;  %v5603_v41 = vld [vmem:[%s7520_s3 + $0x50] sm:$0xff]  }
 0x6e9   : > { %v1897_v60 = vpop.xlane.xlu0 %1896 }
 0x6ea   : > { %5686 = vrcp.f32 %v1897_v60 }
 0x6ed   : > { %v1900_v48 = vpop.xlane.xlu1 %1899 }
 0x6ee   : > { %5688 = vrcp.f32 %v1900_v48 }
 0x6f1   : > { %v1903_v63 = vpop.xlane.xlu0 %1902 }
 0x6f2   : > { %5690 = vrcp.f32 %v1903_v63 }
 0x6f3   : > { %v5685_v38 = vpop.eup %5684 }
 0x6f5   : > { %v1906_v44 = vpop.xlane.xlu1 %1905 }
 0x6f6   : > { %5692 = vrcp.f32 %v1906_v44 }
 0x6f7   : > { %v5687_v3 = vpop.eup %5686 }
 0x6f9   : > { %v1909_v25 = vpop.xlane.xlu0 %1908 }
 0x6fa   : > { %5694 = vrcp.f32 %v1909_v25 }
 0x6fb   : > { %v5689_v31 = vpop.eup %5688 }
 0x6fd   : > { %v1912_v53 = vpop.xlane.xlu1 %1911 }
 0x6fe   : > { %5696 = vrcp.f32 %v1912_v53 }
 0x6ff   : > { %v5691_v6 = vpop.eup %5690 }
 0x701   : > { %v1915_v43 = vpop.xlane.xlu0 %1914 }
 0x702   : > { %5698 = vrcp.f32 %v1915_v43 }
 0x703   : > { %v5693_v22 = vpop.eup %5692 }
 0x705   : > { %v1918_v35 = vpop.xlane.xlu1 %1917 }
 0x706   : > { %5700 = vrcp.f32 %v1918_v35 }
 0x707   : > { %v5695_v40 = vpop.eup %5694 }
 0x70b   : > { %v5697_v27 = vpop.eup %5696 }
 0x70f   : > { %v5699_v20 = vpop.eup %5698 }
 0x713   : > { %v5701_v28 = vpop.eup %5700 }
 0x721   : > { %v1990_v39 = vpop.f32.mrf.mxu1 }
 0x722   : > { %v2028_v23 = vmul.f32 %v5685_v38, %v1990_v39 }
 0x723   : > { %v5159_v36 = vpop.f32.mrf.mxu1 }
 0x725   : > { %v1993_v13 = vpop.f32.mrf.mxu1 }
 0x726   : > { %v2029_v52 = vmul.f32 %v5687_v3, %v1993_v13 }
 0x727   : > { %v5160_v54 = vpop.f32.mrf.mxu1 }
 0x728   : > { %v2039_v0 = vpack.c.bf16 %v2029_v52, %v2028_v23 }
 0x729   : > { %v1998_v32 = vpop.f32.mrf.mxu1 }
 0x72a   : > { %5180 = vmatmul.mubr.msk.bf16.vlgmr.msra.gmra.mxu0 %vm1140_vm2, %v2039_v0  ;;  %v2030_v49 = vmul.f32 %v5689_v31, %v1998_v32 }
 0x72b   : > { %v5163_v42 = vpop.f32.mrf.mxu1  ;;  %5222 = vmatpush3.bf16.msra.mxu0 %v5602_v61  ;;  %5183 = vmatprep.mubr.msk.bf16.mxu0 %vm5862_vm1, %v5861_v10 }
 0x72c   : > { %5265 = vmatprep.subr.bf16.mxu0 %v5861_v10 }
 0x72d   : > { %v2001_v14 = vpop.f32.mrf.mxu1 }
 0x72e   : > { %v2031_v26 = vmul.f32 %v5691_v6, %v2001_v14 }
 0x72f   : > { %v5164_v1 = vpop.f32.mrf.mxu1 }
 0x730   : > { %v2040_v4 = vpack.c.bf16 %v2031_v26, %v2030_v49 }
 0x731   : > { %v2006_v59 = vpop.f32.mrf.mxu1 }
 0x732   : > { %5184 = vmatmul.mubr.msk.bf16.gmra.mxu0 %vm1140_vm2, %v2040_v4  ;;  %v2032_v46 = vmul.f32 %v5693_v22, %v2006_v59 }
 0x733   : > { %v5167_v58 = vpop.f32.mrf.mxu1  ;;  %5187 = vmatprep.mubr.msk.bf16.mxu0 %vm5862_vm1, %v5861_v10 }
 0x735   : > { %v2009_v45 = vpop.f32.mrf.mxu1 }
 0x736   : > { %v2033_v55 = vmul.f32 %v5695_v40, %v2009_v45 }
 0x737   : > { %v5168_v57 = vpop.f32.mrf.mxu1 }
 0x738   : > { %v2041_v50 = vpack.c.bf16 %v2033_v55, %v2032_v46  ;;  %v4633_v46 = vld [vmem:[%s7521_s4 + $0x6] ss:$0 sm:$0xff] }
 0x739   : > { %v2014_v62 = vpop.f32.mrf.mxu1 }
 0x73a   : > { %5188 = vmatmul.mubr.msk.bf16.gmra.mxu0 %vm1140_vm2, %v2041_v50  ;;  %v2034_v51 = vmul.f32 %v5697_v27, %v2014_v62 }
 0x73b   : > { %v5171_v37 = vpop.f32.mrf.mxu1  ;;  %5191 = vmatprep.mubr.msk.bf16.mxu0 %vm5862_vm1, %v5861_v10 }
 0x73d   : > { %v2017_v7 = vpop.f32.mrf.mxu1 }
 0x73e   : > { %v2035_v8 = vmul.f32 %v5699_v20, %v2017_v7 }
 0x73f   : > { %v5172_v47 = vpop.f32.mrf.mxu1 }
 0x740   : > { %v2042_v5 = vpack.c.bf16 %v2035_v8, %v2034_v51 }
 0x741   : > { %v2022_v18 = vpop.f32.mrf.mxu1 }
 0x742   : > { %5192 = vmatmul.mubr.msk.bf16.gmra.mxu0 %vm1140_vm2, %v2042_v5  ;;  %v2036_v15 = vmul.f32 %v5701_v28, %v2022_v18 }
 0x743   : > { %v5175_v29 = vpop.f32.mrf.mxu1  ;;  %5195 = vmatprep.mubr.msk.bf16.mxu0 %vm5862_vm1, %v5861_v10 }
 0x744   : > { %v2043_v9 = vpack.c.bf16 %v2036_v15, %v2036_v15 }
 0x745   : > { %v2025_v34 = vpop.f32.mrf.mxu1 }
 0x747   : > { %v5176_v24 = vpop.f32.mrf.mxu1 }
 0x749   : > { %v6683_v21 = vpop.f32.mrf.mxu1 }
 0x74a   : > { %5196 = vmatmul.mubr.msk.bf16.gmra.mxu0 %vm1140_vm2, %v2043_v9 }
 0x74b   : > { %v5203_v33 = vpop.f32.mrf.mxu1  ;;  %5223 = vmatprep.mubr.msk.bf16.mxu0 %vm5862_vm1, %v5861_v10 }
 0x74d   : > { %v6688_v16 = vpop.f32.mrf.mxu1 }
 0x74f   : > { %v5204_v30 = vpop.f32.mrf.mxu1 }
 0x751   : > { %v6693_v60 = vpop.f32.mrf.mxu1 }
 0x752   : > { %5224 = vmatmul.mubr.msk.bf16.vlgmr.msra.gmra.mxu0 %vm662_vm0, %v6047_v56 }
 0x753   : > { %v5207_v48 = vpop.f32.mrf.mxu1  ;;  %5227 = vmatprep.mubr.msk.bf16.mxu0 %vm5862_vm1, %v5861_v10  ;;  %5266 = vmatpush3.bf16.msra.mxu0 %v5603_v41 }
 0x754   : > { %5317 = vmatprep.subr.bf16.mxu0 %v5861_v10 }
 0x755   : > { %v6700_v63 = vpop.f32.mrf.mxu1 }
 0x757   : > { %v5208_v39 = vpop.f32.mrf.mxu1 }
 0x759   : > { %v6702_v36 = vpop.f32.mrf.mxu1 }
 0x75a   : > { %5228 = vmatmul.mubr.msk.bf16.gmra.mxu0 %vm662_vm0, %v6063_v2 }
 0x75b   : > { %v5211_v38 = vpop.f32.mrf.mxu1  ;;  %5231 = vmatprep.mubr.msk.bf16.mxu0 %vm5862_vm1, %v5861_v10 }
 0x75d   : > { %v6708_v44 = vpop.f32.mrf.mxu1 }
 0x75f   : > { %v5212_v3 = vpop.f32.mrf.mxu1 }
 0x761   : > { %v6710_v25 = vpop.f32.mrf.mxu1 }
 0x762   : > { %5232 = vmatmul.mubr.msk.bf16.gmra.mxu0 %vm662_vm0, %v6075_v11 }
 0x763   : > { %v5215_v13 = vpop.f32.mrf.mxu1  ;;  %5235 = vmatprep.mubr.msk.bf16.mxu0 %vm5862_vm1, %v5861_v10 }
 0x765   : > { %v6716_v23 = vpop.f32.mrf.mxu1 }
 0x767   : > { %v5216_v52 = vpop.f32.mrf.mxu1 }
 0x769   : > { %v6718_v54 = vpop.f32.mrf.mxu1 }
 0x76a   : > { %5236 = vmatmul.mubr.msk.bf16.gmra.mxu0 %vm662_vm0, %v6086_v17 }
 0x76b   : > { %v5219_v61 = vpop.f32.mrf.mxu1  ;;  %5239 = vmatprep.mubr.msk.bf16.mxu0 %vm5862_vm1, %v5861_v10 }
 0x76d   : > { %v2222_v0 = vpop.f32.mrf.mxu1 }
 0x76f   : > { %v5220_v32 = vpop.f32.mrf.mxu1 }
 0x771   : > { %v2365_v42 = vpop.f32.mrf.mxu1 }
 0x772   : > { %5240 = vmatmul.mubr.msk.bf16.gmra.mxu0 %vm662_vm0, %v6096_v19  ;;  %v2366_v30 = vadd.f32 %v4633_v46, %v2365_v42 }
 0x773   : > { %v5247_v31 = vpop.f32.mrf.mxu1  ;;  %5267 = vmatprep.mubr.msk.bf16.mxu0 %vm5862_vm1, %v5861_v10 }
 0x775   : > { %v2368_v53 = vpop.f32.mrf.mxu1 }
 0x776   : > { %v2369_v9 = vadd.f32 %v4633_v46, %v2368_v53 }
 0x777   : > { %v5248_v6 = vpop.f32.mrf.mxu1 }
 0x778   : > { %v2506_v41 = vpack.c.bf16 %v2369_v9, %v2366_v30 }
 0x779   : > { %v2373_v43 = vpop.f32.mrf.mxu1 }
 0x77a   : > { %5268 = vmatmul.mubr.msk.bf16.vlgmr.msra.gmra.mxu0 %vm662_vm0, %v6047_v56  ;;  %v2374_v34 = vadd.f32 %v4633_v46, %v2373_v43  ;;  %v2527_v48 = vsel %vm1140_vm2, %v2506_v41, 0 }
 0x77b   : > { %v5251_v14 = vpop.f32.mrf.mxu1  ;;  %5271 = vmatprep.mubr.msk.bf16.mxu0 %vm5862_vm1, %v5861_v10 }
 0x77d   : > { %v2376_v49 = vpop.f32.mrf.mxu1 }
 0x77e   : > { %v2377_v29 = vadd.f32 %v4633_v46, %v2376_v49 }
 0x77f   : > { %v5252_v26 = vpop.f32.mrf.mxu1 }
 0x780   : > { %v2507_v24 = vpack.c.bf16 %v2377_v29, %v2374_v34 }
 0x781   : > { %v2381_v1 = vpop.f32.mrf.mxu1 }
 0x782   : > { %5272 = vmatmul.mubr.msk.bf16.gmra.mxu0 %vm662_vm0, %v6063_v2  ;;  %v2382_v18 = vadd.f32 %v4633_v46, %v2381_v1  ;;  %v2530_v33 = vsel %vm1140_vm2, %v2507_v24, 0 }
 0x783   : > { %v5255_v4 = vpop.f32.mrf.mxu1  ;;  %5275 = vmatprep.mubr.msk.bf16.mxu0 %vm5862_vm1, %v5861_v10 }
 0x785   : > { %v2384_v59 = vpop.f32.mrf.mxu1 }
 0x786   : > { %v2385_v47 = vadd.f32 %v4633_v46, %v2384_v59 }
 0x787   : > { %v5256_v35 = vpop.f32.mrf.mxu1 }
 0x788   : > { %v2508_v28 = vpack.c.bf16 %v2385_v47, %v2382_v18 }
 0x789   : > { %v2389_v58 = vpop.f32.mrf.mxu1 }
 0x78a   : > { %5276 = vmatmul.mubr.msk.bf16.gmra.mxu0 %vm662_vm0, %v6075_v11  ;;  %v2390_v51 = vadd.f32 %v4633_v46, %v2389_v58  ;;  %v2533_v15 = vsel %vm1140_vm2, %v2508_v28, 0  ;;  %v4623_v58 = vld [vmem:[%s7521_s4 + $0x2] ss:$0 sm:$0xff] }
 0x78b   : > { %v5259_v22 = vpop.f32.mrf.mxu1  ;;  %5279 = vmatprep.mubr.msk.bf16.mxu0 %vm5862_vm1, %v5861_v10 }
 0x78d   : > { %v2392_v40 = vpop.f32.mrf.mxu1 }
 0x78e   : > { %v2393_v27 = vadd.f32 %v4633_v46, %v2392_v40 }
 0x78f   : > { %v5260_v45 = vpop.f32.mrf.mxu1 }
 0x790   : > { %v2509_v8 = vpack.c.bf16 %v2393_v27, %v2390_v51 }
 0x791   : > { %v2397_v55 = vpop.f32.mrf.mxu1 }
 0x792   : > { %v2398_v57 = vadd.f32 %v4633_v46, %v2397_v55  ;;  %5280 = vmatmul.mubr.msk.bf16.gmra.mxu0 %vm662_vm0, %v6086_v17  ;;  %v2536_v5 = vsel %vm1140_vm2, %v2509_v8, 0 }
 0x793   : > { %v5263_v50 = vpop.f32.mrf.mxu1  ;;  %5283 = vmatprep.mubr.msk.bf16.mxu0 %vm5862_vm1, %v5861_v10 }
 0x794   : > { %v2510_v62 = vpack.c.bf16 %v2398_v57, %v2398_v57 }
 0x795   : > { %v2400_v37 = vpop.f32.mrf.mxu1 }
 0x796   : > { %v2539_v20 = vsel %vm1140_vm2, %v2510_v62, 0 }
 0x797   : > { %v5264_v7 = vpop.f32.mrf.mxu1  ;;  %5288 = vmatpush3.bf16.xpose.msra.mxu1 %v2539_v20 }
 0x798   : > { %5289 = vmatprep.subr.bf16.mxu1 %v5861_v10 }
 0x79a   : > { %5284 = vmatmul.mubr.msk.bf16.gmra.mxu0 %vm662_vm0, %v6096_v19 }
 0x79b   : > { %5327 = vmatprep.mubr.msk.bf16.mxu0 %vm5862_vm1, %v5861_v10 }
 0x79f   : > { %5290 = vmatpush3.bf16.xpose.msra.mxu1 %v2536_v5 }
 0x7a0   : > { %5291 = vmatprep.subr.bf16.mxu1 %v5861_v10 }
 0x7a7   : > { %5292 = vmatpush3.bf16.xpose.msra.mxu1 %v2533_v15 }
 0x7a8   : > { %5293 = vmatprep.subr.bf16.mxu1 %v5861_v10 }
 0x7af   : > { %5294 = vmatpush3.bf16.xpose.msra.mxu1 %v2530_v33 }
 0x7b0   : > { %5295 = vmatprep.subr.bf16.mxu1 %v5861_v10 }
 0x7b7   : > { %5296 = vmatpush3.bf16.xpose.msra.mxu1 %v2527_v48 }
 0x7b8   : > { %5347 = vmatprep.subr.bf16.mxu1 %v5861_v10 }
 0x7ea   : > { %v6761_v39 = vpop.f32.mrf.mxu0 }
 0x7ec   : > { %v5181_v38 = vpop.f32.mrf.mxu0 }
 0x7ee   : > { %v6763_v3 = vpop.f32.mrf.mxu0 }
 0x7f0   : > { %v5182_v13 = vpop.f32.mrf.mxu0 }
 0x7f2   : > { %v6765_v52 = vpop.f32.mrf.mxu0 }
 0x7f4   : > { %v5185_v61 = vpop.f32.mrf.mxu0 }
 0x7f6   : > { %v6767_v0 = vpop.f32.mrf.mxu0 }
 0x7f8   : > { %v5186_v32 = vpop.f32.mrf.mxu0 }
 0x7fa   : > { %v6769_v42 = vpop.f32.mrf.mxu0 }
 0x7fc   : > { %v5189_v31 = vpop.f32.mrf.mxu0 }
 0x7fe   : > { %v6771_v53 = vpop.f32.mrf.mxu0 }
 0x800   : > { %v5190_v6 = vpop.f32.mrf.mxu0 }
 0x802   : > { %v6773_v43 = vpop.f32.mrf.mxu0 }
 0x804   : > { %v5193_v14 = vpop.f32.mrf.mxu0 }
 0x806   : > { %v6775_v49 = vpop.f32.mrf.mxu0 }
 0x808   : > { %v5194_v26 = vpop.f32.mrf.mxu0 }
 0x80a   : > { %v6777_v1 = vpop.f32.mrf.mxu0 }
 0x80c   : > { %v5197_v4 = vpop.f32.mrf.mxu0 }
 0x80e   : > { %v2132_v59 = vpop.f32.mrf.mxu0 }
 0x810   : > { %v5198_v35 = vpop.f32.mrf.mxu0 }
 0x812   : > { %v2276_v22 = vpop.f32.mrf.mxu0 }
 0x813   : > { %v2277_v45 = vadd.f32 %v4623_v58, %v2276_v22 }
 0x814   : > { %v5225_v40 = vpop.f32.mrf.mxu0 }
 0x815   : > { %v2492_v50 = vmul.f32 0.5, %v2277_v45 }
 0x816   : > { %v2279_v46 = vpop.f32.mrf.mxu0 }
 0x817   : > { %v2280_v55 = vadd.f32 %v4623_v58, %v2279_v46 }
 0x818   : > { %v5226_v57 = vpop.f32.mrf.mxu0 }
 0x819   : > { %v2493_v62 = vmul.f32 0.5, %v2280_v55 }
 0x81a   : > { %v2284_v37 = vpop.f32.mrf.mxu0 }
 0x81b   : > { %v2501_v27 = vpack.c.bf16 %v2493_v62, %v2492_v50  ;;  %v2285_v7 = vadd.f32 %v4623_v58, %v2284_v37 }
 0x81c   : > { %v5229_v20 = vpop.f32.mrf.mxu0 }
 0x81d   : > { %5298 = vmatmul.mubr.msk.bf16.vlgmr.msra.gmra.mxu1 %vm1140_vm2, %v2501_v27  ;;  %v2494_v5 = vmul.f32 0.5, %v2285_v7 }
 0x81e   : > { %v2287_v51 = vpop.f32.mrf.mxu0  ;;  %5301 = vmatprep.mubr.msk.bf16.mxu1 %vm5862_vm1, %v5861_v10 }
 0x81f   : > { %v2288_v8 = vadd.f32 %v4623_v58, %v2287_v51 }
 0x820   : > { %v5230_v47 = vpop.f32.mrf.mxu0 }
 0x821   : > { %v2495_v18 = vmul.f32 0.5, %v2288_v8 }
 0x822   : > { %v2292_v28 = vpop.f32.mrf.mxu0 }
 0x823   : > { %v2502_v29 = vpack.c.bf16 %v2495_v18, %v2494_v5  ;;  %v2293_v34 = vadd.f32 %v4623_v58, %v2292_v28 }
 0x824   : > { %v5233_v15 = vpop.f32.mrf.mxu0 }
 0x825   : > { %5302 = vmatmul.mubr.msk.bf16.gmra.mxu1 %vm1140_vm2, %v2502_v29  ;;  %v2496_v30 = vmul.f32 0.5, %v2293_v34  ;;  %v4643_v34 = vld [vmem:[%s7521_s4 + $0xa] ss:$0 sm:$0xff] }
 0x826   : > { %v2295_v24 = vpop.f32.mrf.mxu0  ;;  %5305 = vmatprep.mubr.msk.bf16.mxu1 %vm5862_vm1, %v5861_v10 }
 0x827   : > { %v2296_v9 = vadd.f32 %v4623_v58, %v2295_v24 }
 0x828   : > { %v5234_v33 = vpop.f32.mrf.mxu0 }
 0x829   : > { %v2497_v41 = vmul.f32 0.5, %v2296_v9 }
 0x82a   : > { %v2300_v48 = vpop.f32.mrf.mxu0 }
 0x82b   : > { %v2503_v38 = vpack.c.bf16 %v2497_v41, %v2496_v30  ;;  %v2301_v61 = vadd.f32 %v4623_v58, %v2300_v48 }
 0x82c   : > { %v5237_v13 = vpop.f32.mrf.mxu0 }
 0x82d   : > { %5306 = vmatmul.mubr.msk.bf16.gmra.mxu1 %vm1140_vm2, %v2503_v38  ;;  %v2498_v14 = vmul.f32 0.5, %v2301_v61 }
 0x82e   : > { %v2303_v32 = vpop.f32.mrf.mxu0  ;;  %5309 = vmatprep.mubr.msk.bf16.mxu1 %vm5862_vm1, %v5861_v10 }
 0x82f   : > { %v2304_v31 = vadd.f32 %v4623_v58, %v2303_v32 }
 0x830   : > { %v5238_v6 = vpop.f32.mrf.mxu0 }
 0x831   : > { %v2499_v26 = vmul.f32 0.5, %v2304_v31 }
 0x832   : > { %v2308_v4 = vpop.f32.mrf.mxu0 }
 0x833   : > { %v2504_v59 = vpack.c.bf16 %v2499_v26, %v2498_v14  ;;  %v2309_v35 = vadd.f32 %v4623_v58, %v2308_v4 }
 0x834   : > { %v5241_v22 = vpop.f32.mrf.mxu0 }
 0x835   : > { %5310 = vmatmul.mubr.msk.bf16.gmra.mxu1 %vm1140_vm2, %v2504_v59  ;;  %v2500_v45 = vmul.f32 0.5, %v2309_v35 }
 0x836   : > { %v2311_v40 = vpop.f32.mrf.mxu0  ;;  %5313 = vmatprep.mubr.msk.bf16.mxu1 %vm5862_vm1, %v5861_v10 }
 0x837   : > { %v2505_v57 = vpack.c.bf16 %v2500_v45, %v2500_v45 }
 0x838   : > { %v5242_v46 = vpop.f32.mrf.mxu0 }
 0x83a   : > { %v2454_v55 = vpop.f32.mrf.mxu0 }
 0x83b   : > { %v2455_v22 = vadd.f32 %v4643_v34, %v2454_v55 }
 0x83c   : > { %v5269_v50 = vpop.f32.mrf.mxu0 }
 0x83d   : > { %5314 = vmatmul.mubr.msk.bf16.gmra.mxu1 %vm1140_vm2, %v2505_v57 }
 0x83e   : > { %v2457_v62 = vpop.f32.mrf.mxu0  ;;  %5349 = vmatprep.mubr.msk.bf16.mxu1 %vm5862_vm1, %v5861_v10 }
 0x83f   : > { %v2458_v59 = vadd.f32 %v4643_v34, %v2457_v62 }
 0x840   : > { %v5270_v37 = vpop.f32.mrf.mxu0 }
 0x841   : > { %v2708_v40 = vpack.c.bf16 %v2458_v59, %v2455_v22 }
 0x842   : > { %v2462_v58 = vpop.f32.mrf.mxu0 }
 0x843   : > { %v2463_v4 = vadd.f32 %v4643_v34, %v2462_v58 }
 0x844   : > { %v5273_v27 = vpop.f32.mrf.mxu0 }
 0x846   : > { %v2465_v20 = vpop.f32.mrf.mxu0 }
 0x847   : > { %v2466_v14 = vadd.f32 %v4643_v34, %v2465_v20 }
 0x848   : > { %v5274_v7 = vpop.f32.mrf.mxu0 }
 0x849   : > { %v2709_v35 = vpack.c.bf16 %v2466_v14, %v2463_v4 }
 0x84a   : > { %v2470_v51 = vpop.f32.mrf.mxu0 }
 0x84b   : > { %v2471_v6 = vadd.f32 %v4643_v34, %v2470_v51 }
 0x84c   : > { %v5277_v8 = vpop.f32.mrf.mxu0 }
 0x84e   : > { %v2473_v47 = vpop.f32.mrf.mxu0 }
 0x84f   : > { %v2474_v32 = vadd.f32 %v4643_v34, %v2473_v47 }
 0x850   : > { %v5278_v5 = vpop.f32.mrf.mxu0 }
 0x851   : > { %v2710_v26 = vpack.c.bf16 %v2474_v32, %v2471_v6 }
 0x852   : > { %v2478_v18 = vpop.f32.mrf.mxu0 }
 0x853   : > { %v2479_v13 = vadd.f32 %v4643_v34, %v2478_v18 }
 0x854   : > { %v5281_v28 = vpop.f32.mrf.mxu0 }
 0x856   : > { %v2481_v29 = vpop.f32.mrf.mxu0 }
 0x857   : > { %v2482_v41 = vadd.f32 %v4643_v34, %v2481_v29 }
 0x858   : > { %v5282_v15 = vpop.f32.mrf.mxu0 }
 0x859   : > { %v2711_v31 = vpack.c.bf16 %v2482_v41, %v2479_v13 }
 0x85a   : > { %v2486_v24 = vpop.f32.mrf.mxu0 }
 0x85b   : > { %v2487_v9 = vadd.f32 %v4643_v34, %v2486_v24 }
 0x85c   : > { %v5285_v33 = vpop.f32.mrf.mxu0 }
 0x85d   : > { %v2712_v30 = vpack.c.bf16 %v2487_v9, %v2487_v9 }
 0x85e   : > { %v2489_v48 = vpop.f32.mrf.mxu0 }
 0x85f   : > { %v2729_v38 = vsel %vm1359_vm3, %v2712_v30, 0 }
 0x860   : > { %v5286_v61 = vpop.f32.mrf.mxu0  ;;  %5318 = vmatpush3.bf16.msra.mxu0 %v2729_v38 }
 0x861   : > { %5319 = vmatprep.subr.bf16.mxu0 %v5861_v10 }
 0x864   : > { %5320 = vmatpush3.bf16.msra.mxu0 %v2711_v31 }
 0x865   : > { %5321 = vmatprep.subr.bf16.mxu0 %v5861_v10 }
 0x868   : > { %5322 = vmatpush3.bf16.msra.mxu0 %v2710_v26 }
 0x869   : > { %5323 = vmatprep.subr.bf16.mxu0 %v5861_v10 }
 0x86c   : > { %5324 = vmatpush3.bf16.msra.mxu0 %v2709_v35 }
 0x86d   : > { %5325 = vmatprep.subr.bf16.mxu0 %v5861_v10 }
 0x870   : > { %5326 = vmatpush3.bf16.msra.mxu0 %v2708_v40 }
 0x871   : > { %5369 = vmatprep.subr.bf16.mxu0 %v5861_v10 }
 0x8dd   : > { %v2575_v45 = vpop.f32.mrf.mxu1 }
 0x8de   : > { %v2576_v46 = vadd.f32 %v2575_v45, %v6282_v12 }
 0x8df   : > { %v5299_v57 = vpop.f32.mrf.mxu1 }
 0x8e0   : > { %v2613_v50 = vsel %vm1243_vm5, %v2576_v46, -inf }
 0x8e1   : > { %2614 = vmax.xlane.f32.xlu0 %v2613_v50  ;;  %v2578_v37 = vpop.f32.mrf.mxu1 }
 0x8e2   : > { %v2579_v58 = vadd.f32 %v2578_v37, %v6282_v12 }
 0x8e3   : > { %v5300_v62 = vpop.f32.mrf.mxu1 }
 0x8e4   : > { %v2616_v55 = vsel %vm1243_vm5, %v2579_v58, -inf }
 0x8e5   : > { %2617 = vmax.xlane.f32.xlu1 %v2616_v55  ;;  %v2583_v27 = vpop.f32.mrf.mxu1 }
 0x8e6   : > { %v2584_v20 = vadd.f32 %v2583_v27, %v6282_v12 }
 0x8e7   : > { %v5303_v7 = vpop.f32.mrf.mxu1 }
 0x8e8   : > { %v2619_v51 = vsel %vm1243_vm5, %v2584_v20, -inf }
 0x8e9   : > { %2620 = vmax.xlane.f32.xlu0 %v2619_v51  ;;  %v2586_v8 = vpop.f32.mrf.mxu1 }
 0x8ea   : > { %v2587_v47 = vadd.f32 %v2586_v8, %v6282_v12 }
 0x8eb   : > { %v5304_v5 = vpop.f32.mrf.mxu1 }
 0x8ec   : > { %v2622_v18 = vsel %vm1243_vm5, %v2587_v47, -inf }
 0x8ed   : > { %2623 = vmax.xlane.f32.xlu1 %v2622_v18  ;;  %v2591_v28 = vpop.f32.mrf.mxu1 }
 0x8ee   : > { %v2592_v29 = vadd.f32 %v2591_v28, %v6282_v12 }
 0x8ef   : > { %v5307_v15 = vpop.f32.mrf.mxu1 }
 0x8f0   : > { %v2625_v34 = vsel %vm1243_vm5, %v2592_v29, -inf }
 0x8f1   : > { %2626 = vmax.xlane.f32.xlu0 %v2625_v34  ;;  %v2594_v24 = vpop.f32.mrf.mxu1 }
 0x8f2   : > { %v2595_v9 = vadd.f32 %v2594_v24, %v6282_v12 }
 0x8f3   : > { %v5308_v33 = vpop.f32.mrf.mxu1 }
 0x8f4   : > { %v2628_v30 = vsel %vm1243_vm5, %v2595_v9, -inf }
 0x8f5   : > { %2629 = vmax.xlane.f32.xlu1 %v2628_v30  ;;  %v2599_v41 = vpop.f32.mrf.mxu1 }
 0x8f6   : > { %v2600_v48 = vadd.f32 %v2599_v41, %v6282_v12 }
 0x8f7   : > { %v5311_v38 = vpop.f32.mrf.mxu1 }
 0x8f8   : > { %v2631_v13 = vsel %vm1243_vm5, %v2600_v48, -inf }
 0x8f9   : > { %2632 = vmax.xlane.f32.xlu0 %v2631_v13  ;;  %v2602_v61 = vpop.f32.mrf.mxu1 }
 0x8fa   : > { %v2603_v32 = vadd.f32 %v2602_v61, %v6282_v12 }
 0x8fb   : > { %v5312_v31 = vpop.f32.mrf.mxu1 }
 0x8fc   : > { %v2634_v6 = vsel %vm1243_vm5, %v2603_v32, -inf }
 0x8fd   : > { %2635 = vmax.xlane.f32.xlu1 %v2634_v6  ;;  %v2607_v14 = vpop.f32.mrf.mxu1 }
 0x8fe   : > { %v2608_v26 = vadd.f32 %v2607_v14, %v6282_v12 }
 0x8ff   : > { %v5315_v4 = vpop.f32.mrf.mxu1 }
 0x900   : > { %v2637_v59 = vsel %vm1243_vm5, %v2608_v26, -inf }
 0x901   : > { %2638 = vmax.xlane.f32.xlu0 %v2637_v59  ;;  %v2610_v35 = vpop.f32.mrf.mxu1 }
 0x903   : > { %v5316_v22 = vpop.f32.mrf.mxu1 }
 0x96a   : > { %v2615_v40 = vpop.xlane.xlu0 %2614 }
 0x96b   : > { %v2640_v45 = vsub.f32 %v2576_v46, %v2615_v40 }
 0x96d   : > { %v2649_v57 = vmul.f32 1.442695, %v2640_v45 }
 0x96e   : > { %v2618_v50 = vpop.xlane.xlu1 %2617 }
 0x96f   : > { %5702 = vpow2.f32 %v2649_v57  ;;  %v2641_v37 = vsub.f32 %v2579_v58, %v2618_v50 }
 0x971   : > { %v2651_v62 = vmul.f32 1.442695, %v2641_v37 }
 0x972   : > { %v2621_v55 = vpop.xlane.xlu0 %2620 }
 0x973   : > { %5704 = vpow2.f32 %v2651_v62  ;;  %v2642_v27 = vsub.f32 %v2584_v20, %v2621_v55  ;;  %v5604_v20 = vld [vmem:[%s7520_s3 + $0x18] sm:$0xff]  }
 0x975   : > { %v2653_v7 = vmul.f32 1.442695, %v2642_v27 }
 0x976   : > { %v2624_v51 = vpop.xlane.xlu1 %2623 }
 0x977   : > { %5706 = vpow2.f32 %v2653_v7  ;;  %v2643_v8 = vsub.f32 %v2587_v47, %v2624_v51 }
 0x979   : > { %v2655_v5 = vmul.f32 1.442695, %v2643_v8 }
 0x97a   : > { %v2627_v18 = vpop.xlane.xlu0 %2626 }
 0x97b   : > { %5708 = vpow2.f32 %v2655_v5  ;;  %v2644_v28 = vsub.f32 %v2592_v29, %v2627_v18  ;;  %v4660_v18 = vld [vmem:[%s7522_s5 + $0x4] sm:$0x3] }
 0x97c   : > { %v5703_v15 = vpop.eup %5702 }
 0x97d   : > { %v2657_v34 = vmul.f32 1.442695, %v2644_v28  ;;  %v2667_v46 = vsel %vm1243_vm5, %v5703_v15, 0.0  ;;  %v2835_v28 = vsel %vm2059_vm6, %v4660_v18, 0 }
 0x97e   : > { %v2630_v24 = vpop.xlane.xlu1 %2629  ;;  %2668 = vadd.xlane.f32.xlu1 %v2667_v46  ;;  %5348 = vmatpush3.bf16.msra.mxu1 %v2835_v28 }
 0x97f   : > { %5710 = vpow2.f32 %v2657_v34  ;;  %v2645_v58 = vsub.f32 %v2595_v9, %v2630_v24  ;;  %5391 = vmatprep.subr.bf16.mxu1 %v5861_v10 }
 0x980   : > { %v5705_v33 = vpop.eup %5704 }
 0x981   : > { %v2703_v30 = vpack.c.bf16 %v5705_v33, %v5703_v15  ;;  %v2659_v41 = vmul.f32 1.442695, %v2645_v58  ;;  %v2670_v47 = vsel %vm1243_vm5, %v5705_v33, 0.0  ;;  %v5605_v15 = vld [vmem:[%s7520_s3 + $0x58] sm:$0xff]  }
 0x982   : > { %v2633_v38 = vpop.xlane.xlu0 %2632  ;;  %2671 = vadd.xlane.f32.xlu0 %v2670_v47 }
 0x983   : > { %5712 = vpow2.f32 %v2659_v41  ;;  %v2646_v29 = vsub.f32 %v2600_v48, %v2633_v38  ;;  %5328 = vmatmul.mubr.msk.bf16.vlgmr.msra.gmra.mxu0 %vm1243_vm5, %v2703_v30 }
 0x984   : > { %v5707_v13 = vpop.eup %5706  ;;  %5331 = vmatprep.mubr.msk.bf16.mxu0 %vm5862_vm1, %v5861_v10  ;;  %5370 = vmatpush3.bf16.msra.mxu0 %v5604_v20 }
 0x985   : > { %v2661_v9 = vmul.f32 1.442695, %v2646_v29  ;;  %v2673_v61 = vsel %vm1243_vm5, %v5707_v13, 0.0  ;;  %5413 = vmatprep.subr.bf16.mxu0 %v5861_v10 }
 0x986   : > { %2674 = vadd.xlane.f32.xlu1 %v2673_v61  ;;  %v2636_v31 = vpop.xlane.xlu1 %2635 }
 0x987   : > { %5714 = vpow2.f32 %v2661_v9  ;;  %v2647_v6 = vsub.f32 %v2603_v32, %v2636_v31  ;;  %v5606_v31 = vld [vmem:[%s7520_s3 + $0x38] sm:$0xff]  }
 0x988   : > { %v5709_v14 = vpop.eup %5708 }
 0x989   : > { %v2663_v4 = vmul.f32 1.442695, %v2647_v6  ;;  %v2676_v48 = vsel %vm1243_vm5, %v5709_v14, 0.0  ;;  %v2704_v59 = vpack.c.bf16 %v5709_v14, %v5707_v13 }
 0x98a   : > { %2677 = vadd.xlane.f32.xlu0 %v2676_v48  ;;  %v2639_v35 = vpop.xlane.xlu0 %2638 }
 0x98b   : > { %5716 = vpow2.f32 %v2663_v4  ;;  %v2648_v22 = vsub.f32 %v2608_v26, %v2639_v35  ;;  %5332 = vmatmul.mubr.msk.bf16.gmra.mxu0 %vm1243_vm5, %v2704_v59 }
 0x98c   : > { %v5711_v40 = vpop.eup %5710  ;;  %5335 = vmatprep.mubr.msk.bf16.mxu0 %vm5862_vm1, %v5861_v10 }
 0x98d   : > { %v2665_v45 = vmul.f32 1.442695, %v2648_v22  ;;  %v2679_v57 = vsel %vm1243_vm5, %v5711_v40, 0.0 }
 0x98e   : > { %2680 = vadd.xlane.f32.xlu1 %v2679_v57 }
 0x98f   : > { %5718 = vpow2.f32 %v2665_v45 }
 0x990   : > { %v5713_v32 = vpop.eup %5712 }
 0x991   : > { %v2682_v50 = vsel %vm1243_vm5, %v5713_v32, 0.0  ;;  %v2705_v37 = vpack.c.bf16 %v5713_v32, %v5711_v40 }
 0x992   : > { %2683 = vadd.xlane.f32.xlu0 %v2682_v50 }
 0x993   : > { %5336 = vmatmul.mubr.msk.bf16.gmra.mxu0 %vm1243_vm5, %v2705_v37 }
 0x994   : > { %v5715_v62 = vpop.eup %5714  ;;  %5339 = vmatprep.mubr.msk.bf16.mxu0 %vm5862_vm1, %v5861_v10 }
 0x995   : > { %v2685_v26 = vsel %vm1243_vm5, %v5715_v62, 0.0 }
 0x996   : > { %2686 = vadd.xlane.f32.xlu1 %v2685_v26 }
 0x998   : > { %v5717_v55 = vpop.eup %5716 }
 0x999   : > { %v2688_v27 = vsel %vm1243_vm5, %v5717_v55, 0.0  ;;  %v2706_v7 = vpack.c.bf16 %v5717_v55, %v5715_v62 }
 0x99a   : > { %2689 = vadd.xlane.f32.xlu0 %v2688_v27 }
 0x99b   : > { %5340 = vmatmul.mubr.msk.bf16.gmra.mxu0 %vm1243_vm5, %v2706_v7 }
 0x99c   : > { %v5719_v51 = vpop.eup %5718  ;;  %5343 = vmatprep.mubr.msk.bf16.mxu0 %vm5862_vm1, %v5861_v10 }
 0x99d   : > { %v2691_v8 = vsel %vm1243_vm5, %v5719_v51, 0.0  ;;  %v2707_v5 = vpack.c.bf16 %v5719_v51, %v5719_v51 }
 0x99e   : > { %2692 = vadd.xlane.f32.xlu1 %v2691_v8 }
 0x9a3   : > { %5344 = vmatmul.mubr.msk.bf16.gmra.mxu0 %vm1243_vm5, %v2707_v5 }
 0x9a4   : > { %5371 = vmatprep.mubr.msk.bf16.mxu0 %vm5862_vm1, %v5861_v10 }
 0x9ab   : > { %5372 = vmatmul.mubr.msk.bf16.vlgmr.msra.gmra.mxu0 %vm662_vm0, %v6047_v56 }
 0x9ac   : > { %5375 = vmatprep.mubr.msk.bf16.mxu0 %vm5862_vm1, %v5861_v10  ;;  %5414 = vmatpush3.bf16.msra.mxu0 %v5605_v15 }
 0x9ad   : > { %5465 = vmatprep.subr.bf16.mxu0 %v5861_v10 }
 0x9b3   : > { %5376 = vmatmul.mubr.msk.bf16.gmra.mxu0 %vm662_vm0, %v6063_v2 }
 0x9b4   : > { %5379 = vmatprep.mubr.msk.bf16.mxu0 %vm5862_vm1, %v5861_v10 }
 0x9bb   : > { %5380 = vmatmul.mubr.msk.bf16.gmra.mxu0 %vm662_vm0, %v6075_v11 }
 0x9bc   : > { %5383 = vmatprep.mubr.msk.bf16.mxu0 %vm5862_vm1, %v5861_v10 }
 0x9c3   : > { %5384 = vmatmul.mubr.msk.bf16.gmra.mxu0 %vm662_vm0, %v6086_v17 }
 0x9c4   : > { %5387 = vmatprep.mubr.msk.bf16.mxu0 %vm5862_vm1, %v5861_v10 }
 0x9cb   : > { %5388 = vmatmul.mubr.msk.bf16.gmra.mxu0 %vm662_vm0, %v6096_v19 }
 0x9cc   : > { %5415 = vmatprep.mubr.msk.bf16.mxu0 %vm5862_vm1, %v5861_v10 }
 0x9d3   : > { %5416 = vmatmul.mubr.msk.bf16.vlgmr.msra.gmra.mxu0 %vm662_vm0, %v6047_v56 }
 0x9d4   : > { %5419 = vmatprep.mubr.msk.bf16.mxu0 %vm5862_vm1, %v5861_v10 }
 0x9db   : > { %5420 = vmatmul.mubr.msk.bf16.gmra.mxu0 %vm662_vm0, %v6063_v2 }
 0x9dc   : > { %5423 = vmatprep.mubr.msk.bf16.mxu0 %vm5862_vm1, %v5861_v10 }
 0x9e3   : > { %5424 = vmatmul.mubr.msk.bf16.gmra.mxu0 %vm662_vm0, %v6075_v11 }
 0x9e4   : > { %5427 = vmatprep.mubr.msk.bf16.mxu0 %vm5862_vm1, %v5861_v10 }
 0x9eb   : > { %5428 = vmatmul.mubr.msk.bf16.gmra.mxu0 %vm662_vm0, %v6086_v17 }
 0x9ec   : > { %5431 = vmatprep.mubr.msk.bf16.mxu0 %vm5862_vm1, %v5861_v10 }
 0x9f3   : > { %5432 = vmatmul.mubr.msk.bf16.gmra.mxu0 %vm662_vm0, %v6096_v19 }
 0x9f4   : > { %5475 = vmatprep.mubr.msk.bf16.mxu0 %vm5862_vm1, %v5861_v10 }
 0xa07   : > { %v2669_v34 = vpop.xlane.xlu1 %2668 }
 0xa08   : > { %5720 = vrcp.f32 %v2669_v34 }
 0xa0b   : > { %v2672_v46 = vpop.xlane.xlu0 %2671 }
 0xa0c   : > { %5722 = vrcp.f32 %v2672_v46 }
 0xa0f   : > { %v2675_v24 = vpop.xlane.xlu1 %2674 }
 0xa10   : > { %5724 = vrcp.f32 %v2675_v24 }
 0xa13   : > { %v2678_v58 = vpop.xlane.xlu0 %2677 }
 0xa14   : > { %5726 = vrcp.f32 %v2678_v58 }
 0xa15   : > { %v5721_v30 = vpop.eup %5720 }
 0xa17   : > { %v2681_v41 = vpop.xlane.xlu1 %2680 }
 0xa18   : > { %5728 = vrcp.f32 %v2681_v41 }
 0xa19   : > { %v5723_v47 = vpop.eup %5722 }
 0xa1b   : > { %v2684_v38 = vpop.xlane.xlu0 %2683 }
 0xa1c   : > { %5730 = vrcp.f32 %v2684_v38 }
 0xa1d   : > { %v5725_v48 = vpop.eup %5724 }
 0xa1f   : > { %v2687_v59 = vpop.xlane.xlu1 %2686 }
 0xa20   : > { %5732 = vrcp.f32 %v2687_v59 }
 0xa21   : > { %v5727_v35 = vpop.eup %5726 }
 0xa23   : > { %v2690_v22 = vpop.xlane.xlu0 %2689 }
 0xa24   : > { %5734 = vrcp.f32 %v2690_v22 }
 0xa25   : > { %v5729_v55 = vpop.eup %5728 }
 0xa27   : > { %v2693_v62 = vpop.xlane.xlu1 %2692 }
 0xa28   : > { %5736 = vrcp.f32 %v2693_v62 }
 0xa29   : > { %v5731_v27 = vpop.eup %5730 }
 0xa2d   : > { %v5733_v34 = vpop.eup %5732 }
 0xa31   : > { %v5735_v46 = vpop.eup %5734 }
 0xa43   : > { %v2765_v33 = vpop.f32.mrf.mxu0 }
 0xa44   : > { %v2803_v13 = vmul.f32 %v5721_v30, %v2765_v33 }
 0xa45   : > { %v5329_v20 = vpop.f32.mrf.mxu0 }
 0xa47   : > { %v2768_v29 = vpop.f32.mrf.mxu0 }
 0xa48   : > { %v2804_v9 = vmul.f32 %v5723_v47, %v2768_v29  ;;  %v5737_v47 = vpop.eup %5736 }
 0xa49   : > { %v5330_v61 = vpop.f32.mrf.mxu0 }
 0xa4a   : > { %v2814_v6 = vpack.c.bf16 %v2804_v9, %v2803_v13 }
 0xa4b   : > { %v2773_v14 = vpop.f32.mrf.mxu0 }
 0xa4c   : > { %5350 = vmatmul.mubr.msk.bf16.vlgmr.msra.gmra.mxu1 %vm1140_vm2, %v2814_v6  ;;  %v2805_v45 = vmul.f32 %v5725_v48, %v2773_v14 }
 0xa4d   : > { %v5333_v4 = vpop.f32.mrf.mxu0  ;;  %5392 = vmatpush3.bf16.msra.mxu1 %v5606_v31  ;;  %5353 = vmatprep.mubr.msk.bf16.mxu1 %vm5862_vm1, %v5861_v10  ;;  %v6920_v31 = vld [vmem:[%s7521_s4 + $0x3] ss:$0 sm:$0xff] }
 0xa4e   : > { %5435 = vmatprep.subr.bf16.mxu1 %v5861_v10 }
 0xa4f   : > { %v2776_v40 = vpop.f32.mrf.mxu0 }
 0xa50   : > { %v2806_v57 = vmul.f32 %v5727_v35, %v2776_v40 }
 0xa51   : > { %v5334_v32 = vpop.f32.mrf.mxu0 }
 0xa52   : > { %v2815_v50 = vpack.c.bf16 %v2806_v57, %v2805_v45 }
 0xa53   : > { %v2781_v37 = vpop.f32.mrf.mxu0 }
 0xa54   : > { %5354 = vmatmul.mubr.msk.bf16.gmra.mxu1 %vm1140_vm2, %v2815_v50  ;;  %v2807_v51 = vmul.f32 %v5729_v55, %v2781_v37 }
 0xa55   : > { %v5337_v26 = vpop.f32.mrf.mxu0  ;;  %5357 = vmatprep.mubr.msk.bf16.mxu1 %vm5862_vm1, %v5861_v10 }
 0xa57   : > { %v2784_v7 = vpop.f32.mrf.mxu0 }
 0xa58   : > { %v2808_v8 = vmul.f32 %v5731_v27, %v2784_v7 }
 0xa59   : > { %v5338_v5 = vpop.f32.mrf.mxu0 }
 0xa5a   : > { %v2816_v18 = vpack.c.bf16 %v2808_v8, %v2807_v51 }
 0xa5b   : > { %v2789_v28 = vpop.f32.mrf.mxu0 }
 0xa5c   : > { %5358 = vmatmul.mubr.msk.bf16.gmra.mxu1 %vm1140_vm2, %v2816_v18  ;;  %v2809_v58 = vmul.f32 %v5733_v34, %v2789_v28 }
 0xa5d   : > { %v5341_v15 = vpop.f32.mrf.mxu0  ;;  %5361 = vmatprep.mubr.msk.bf16.mxu1 %vm5862_vm1, %v5861_v10 }
 0xa5f   : > { %v2792_v24 = vpop.f32.mrf.mxu0 }
 0xa60   : > { %v2810_v33 = vmul.f32 %v5735_v46, %v2792_v24 }
 0xa61   : > { %v5342_v20 = vpop.f32.mrf.mxu0 }
 0xa62   : > { %v2817_v30 = vpack.c.bf16 %v2810_v33, %v2809_v58 }
 0xa63   : > { %v2797_v41 = vpop.f32.mrf.mxu0 }
 0xa64   : > { %5362 = vmatmul.mubr.msk.bf16.gmra.mxu1 %vm1140_vm2, %v2817_v30  ;;  %v2811_v29 = vmul.f32 %v5737_v47, %v2797_v41 }
 0xa65   : > { %v5345_v38 = vpop.f32.mrf.mxu0  ;;  %5365 = vmatprep.mubr.msk.bf16.mxu1 %vm5862_vm1, %v5861_v10 }
 0xa66   : > { %v2818_v61 = vpack.c.bf16 %v2811_v29, %v2811_v29 }
 0xa67   : > { %v2800_v13 = vpop.f32.mrf.mxu0 }
 0xa69   : > { %v5346_v9 = vpop.f32.mrf.mxu0 }
 0xa6b   : > { %v2969_v6 = vpop.f32.mrf.mxu0 }
 0xa6c   : > { %5366 = vmatmul.mubr.msk.bf16.gmra.mxu1 %vm1140_vm2, %v2818_v61  ;;  %v2970_v4 = vadd.f32 %v6920_v31, %v2969_v6 }
 0xa6d   : > { %v5373_v14 = vpop.f32.mrf.mxu0  ;;  %5393 = vmatprep.mubr.msk.bf16.mxu1 %vm5862_vm1, %v5861_v10 }
 0xa6e   : > { %v6927_v22 = vmul.f32 0.5, %v2970_v4 }
 0xa6f   : > { %v2972_v48 = vpop.f32.mrf.mxu0 }
 0xa70   : > { %v2973_v59 = vadd.f32 %v6920_v31, %v2972_v48 }
 0xa71   : > { %v5374_v35 = vpop.f32.mrf.mxu0 }
 0xa72   : > { %v6929_v40 = vmul.f32 0.5, %v2973_v59 }
 0xa73   : > { %v2977_v45 = vpop.f32.mrf.mxu0 }
 0xa74   : > { %v3194_v57 = vpack.c.bf16 %v6929_v40, %v6927_v22  ;;  %5394 = vmatmul.mubr.msk.bf16.vlgmr.msra.gmra.mxu1 %vm662_vm0, %v6047_v56  ;;  %v2978_v50 = vadd.f32 %v6920_v31, %v2977_v45 }
 0xa75   : > { %v5377_v32 = vpop.f32.mrf.mxu0  ;;  %5397 = vmatprep.mubr.msk.bf16.mxu1 %vm5862_vm1, %v5861_v10 }
 0xa76   : > { %v6939_v55 = vmul.f32 0.5, %v2978_v50 }
 0xa77   : > { %v2980_v37 = vpop.f32.mrf.mxu0 }
 0xa78   : > { %v2981_v62 = vadd.f32 %v6920_v31, %v2980_v37 }
 0xa79   : > { %v5378_v26 = vpop.f32.mrf.mxu0 }
 0xa7a   : > { %v6941_v27 = vmul.f32 0.5, %v2981_v62 }
 0xa7b   : > { %v2985_v7 = vpop.f32.mrf.mxu0 }
 0xa7c   : > { %v3195_v51 = vpack.c.bf16 %v6941_v27, %v6939_v55  ;;  %5398 = vmatmul.mubr.msk.bf16.gmra.mxu1 %vm662_vm0, %v6063_v2  ;;  %v2986_v8 = vadd.f32 %v6920_v31, %v2985_v7 }
 0xa7d   : > { %v5381_v56 = vpop.f32.mrf.mxu0  ;;  %5401 = vmatprep.mubr.msk.bf16.mxu1 %vm5862_vm1, %v5861_v10 }
 0xa7e   : > { %v6951_v15 = vmul.f32 0.5, %v2986_v8 }
 0xa7f   : > { %v2988_v5 = vpop.f32.mrf.mxu0 }
 0xa80   : > { %v2989_v18 = vadd.f32 %v6920_v31, %v2988_v5 }
 0xa81   : > { %v5382_v28 = vpop.f32.mrf.mxu0 }
 0xa82   : > { %v6953_v34 = vmul.f32 0.5, %v2989_v18 }
 0xa83   : > { %v2993_v46 = vpop.f32.mrf.mxu0 }
 0xa84   : > { %v3196_v24 = vpack.c.bf16 %v6953_v34, %v6951_v15  ;;  %5402 = vmatmul.mubr.msk.bf16.gmra.mxu1 %vm662_vm0, %v6075_v11  ;;  %v2994_v58 = vadd.f32 %v6920_v31, %v2993_v46 }
 0xa85   : > { %v5385_v2 = vpop.f32.mrf.mxu0  ;;  %5405 = vmatprep.mubr.msk.bf16.mxu1 %vm5862_vm1, %v5861_v10 }
 0xa86   : > { %v6963_v41 = vmul.f32 0.5, %v2994_v58 }
 0xa87   : > { %v2996_v33 = vpop.f32.mrf.mxu0 }
 0xa88   : > { %v2997_v20 = vadd.f32 %v6920_v31, %v2996_v33 }
 0xa89   : > { %v5386_v30 = vpop.f32.mrf.mxu0 }
 0xa8a   : > { %v6965_v47 = vmul.f32 0.5, %v2997_v20 }
 0xa8b   : > { %v6967_v38 = vpop.f32.mrf.mxu0 }
 0xa8c   : > { %v3197_v29 = vpack.c.bf16 %v6965_v47, %v6963_v41  ;;  %5406 = vmatmul.mubr.msk.bf16.gmra.mxu1 %vm662_vm0, %v6086_v17  ;;  %v3002_v22 = vadd.f32 %v6920_v31, %v6967_v38 }
 0xa8d   : > { %v5389_v11 = vpop.f32.mrf.mxu0  ;;  %5409 = vmatprep.mubr.msk.bf16.mxu1 %vm5862_vm1, %v5861_v10 }
 0xa8e   : > { %v3193_v40 = vmul.f32 0.5, %v3002_v22 }
 0xa8f   : > { %v3004_v13 = vpop.f32.mrf.mxu0 }
 0xa91   : > { %v5390_v9 = vpop.f32.mrf.mxu0 }
 0xa93   : > { %v3147_v61 = vpop.f32.mrf.mxu0 }
 0xa94   : > { %5410 = vmatmul.mubr.msk.bf16.gmra.mxu1 %vm662_vm0, %v6096_v19  ;;  %v4689_v19 = vld [vmem:[%s7521_s4 + $0xb] ss:$0 sm:$0xff] }
 0xa95   : > { %v5417_v6 = vpop.f32.mrf.mxu0  ;;  %5445 = vmatprep.mubr.msk.bf16.mxu1 %vm5862_vm1, %v5861_v10 }
 0xa97   : > { %v3150_v14 = vpop.f32.mrf.mxu0 }
 0xa99   : > { %v5418_v4 = vpop.f32.mrf.mxu0 }
 0xa9b   : > { %v3155_v48 = vpop.f32.mrf.mxu0 }
 0xa9c   : > { %v3156_v4 = vadd.f32 %v4689_v19, %v3155_v48 }
 0xa9d   : > { %v5421_v59 = vpop.f32.mrf.mxu0 }
 0xa9e   : > { %v3151_v59 = vadd.f32 %v4689_v19, %v3150_v14 }
 0xa9f   : > { %v3158_v35 = vpop.f32.mrf.mxu0 }
 0xaa0   : > { %v3159_v9 = vadd.f32 %v4689_v19, %v3158_v35 }
 0xaa1   : > { %v5422_v17 = vpop.f32.mrf.mxu0 }
 0xaa2   : > { %v3402_v17 = vpack.c.bf16 %v3159_v9, %v3156_v4 }
 0xaa3   : > { %v3163_v45 = vpop.f32.mrf.mxu0 }
 0xaa4   : > { %v3164_v13 = vadd.f32 %v4689_v19, %v3163_v45  ;;  %v2188_v45 = vadd.f32 %v6683_v21, %v6761_v39  ;;  %v2199_v21 = vadd.f32 %v6700_v63, %v6767_v0  ;;  %v2212_v63 = vadd.f32 %v6710_v25, %v6773_v43 }
 0xaa5   : > { %v5425_v32 = vpop.f32.mrf.mxu0 }
 0xaa6   : > { %v3148_v32 = vadd.f32 %v4689_v19, %v3147_v61 }
 0xaa7   : > { %v3166_v50 = vpop.f32.mrf.mxu0 }
 0xaa8   : > { %v3167_v30 = vadd.f32 %v4689_v19, %v3166_v50 }
 0xaa9   : > { %v5426_v37 = vpop.f32.mrf.mxu0 }
 0xaaa   : > { %v3403_v6 = vpack.c.bf16 %v3167_v30, %v3164_v13  ;;  %v3401_v37 = vpack.c.bf16 %v3151_v59, %v3148_v32 }
 0xaab   : > { %v3171_v62 = vpop.f32.mrf.mxu0 }
 0xaac   : > { %v3172_v33 = vadd.f32 %v4689_v19, %v3171_v62  ;;  %v2191_v62 = vadd.f32 %v6688_v16, %v6763_v3  ;;  %v2204_v16 = vadd.f32 %v6702_v36, %v6769_v42  ;;  %v2215_v36 = vadd.f32 %v6716_v23, %v6775_v49 }
 0xaad   : > { %v5429_v26 = vpop.f32.mrf.mxu0 }
 0xaaf   : > { %v3174_v7 = vpop.f32.mrf.mxu0 }
 0xab0   : > { %v3175_v46 = vadd.f32 %v4689_v19, %v3174_v7  ;;  %v2196_v7 = vadd.f32 %v6693_v60, %v6765_v52  ;;  %v2207_v60 = vadd.f32 %v6708_v44, %v6771_v53  ;;  %v2220_v44 = vadd.f32 %v6718_v54, %v6777_v1 }
 0xab1   : > { %v5430_v56 = vpop.f32.mrf.mxu0 }
 0xab2   : > { %v3404_v11 = vpack.c.bf16 %v3175_v46, %v3172_v33 }
 0xab3   : > { %v3179_v8 = vpop.f32.mrf.mxu0 }
 0xab4   : > { %v3180_v5 = vadd.f32 %v4689_v19, %v3179_v8 }
 0xab5   : > { %v5433_v18 = vpop.f32.mrf.mxu0 }
 0xab6   : > { %v3405_v28 = vpack.c.bf16 %v3180_v5, %v3180_v5 }
 0xab7   : > { %v3182_v2 = vpop.f32.mrf.mxu0 }
 0xab8   : > { %v3422_v58 = vsel %vm1359_vm3, %v3405_v28, 0 }
 0xab9   : > { %v5434_v20 = vpop.f32.mrf.mxu0  ;;  %5466 = vmatpush3.bf16.msra.mxu0 %v3422_v58 }
 0xaba   : > { %5467 = vmatprep.subr.bf16.mxu0 %v5861_v10 }
 0xabd   : > { %5468 = vmatpush3.bf16.msra.mxu0 %v3404_v11 }
 0xabe   : > { %5469 = vmatprep.subr.bf16.mxu0 %v5861_v10 }
 0xac1   : > { %5470 = vmatpush3.bf16.msra.mxu0 %v3403_v6 }
 0xac2   : > { %5471 = vmatprep.subr.bf16.mxu0 %v5861_v10 }
 0xac5   : > { %5472 = vmatpush3.bf16.msra.mxu0 %v3402_v17 }
 0xac6   : > { %5473 = vmatprep.subr.bf16.mxu0 %v5861_v10 }
 0xac9   : > { %5474 = vmatpush3.bf16.msra.mxu0 %v3401_v37 }
 0xaca   : > { %5517 = vmatprep.subr.bf16.mxu0 %v5861_v10 }
 0xb0c   : > { %v2871_v50 = vpop.f32.mrf.mxu1 }
 0xb0d   : > { %v6990_v35 = vadd.f32 %v2871_v50, %v2188_v45 }
 0xb0e   : > { %v5351_v48 = vpop.f32.mrf.mxu1 }
 0xb10   : > { %v2874_v14 = vpop.f32.mrf.mxu1 }
 0xb11   : > { %v6994_v26 = vadd.f32 %v2874_v14, %v2191_v62 }
 0xb12   : > { %v5352_v61 = vpop.f32.mrf.mxu1 }
 0xb14   : > { %v2879_v56 = vpop.f32.mrf.mxu1 }
 0xb15   : > { %v6998_v19 = vadd.f32 %v2879_v56, %v2196_v7  ;;  %v4679_v7 = vld [vmem:[%s7521_s4 + $0x7] ss:$0 sm:$0xff] }
 0xb16   : > { %v5355_v8 = vpop.f32.mrf.mxu1 }
 0xb18   : > { %v2882_v39 = vpop.f32.mrf.mxu1 }
 0xb19   : > { %v7002_v5 = vadd.f32 %v2882_v39, %v2199_v21 }
 0xb1a   : > { %v5356_v18 = vpop.f32.mrf.mxu1 }
 0xb1c   : > { %v2887_v3 = vpop.f32.mrf.mxu1 }
 0xb1d   : > { %v7006_v28 = vadd.f32 %v2887_v3, %v2204_v16 }
 0xb1e   : > { %v5359_v46 = vpop.f32.mrf.mxu1 }
 0xb20   : > { %v2890_v52 = vpop.f32.mrf.mxu1 }
 0xb21   : > { %v7010_v2 = vadd.f32 %v2890_v52, %v2207_v60 }
 0xb22   : > { %v5360_v58 = vpop.f32.mrf.mxu1 }
 0xb24   : > { %v2895_v0 = vpop.f32.mrf.mxu1 }
 0xb25   : > { %v7014_v33 = vadd.f32 %v2895_v0, %v2212_v63 }
 0xb26   : > { %v5363_v20 = vpop.f32.mrf.mxu1 }
 0xb28   : > { %v2898_v42 = vpop.f32.mrf.mxu1 }
 0xb29   : > { %v7018_v30 = vadd.f32 %v2898_v42, %v2215_v36 }
 0xb2a   : > { %v5364_v11 = vpop.f32.mrf.mxu1 }
 0xb2c   : > { %v2903_v53 = vpop.f32.mrf.mxu1 }
 0xb2d   : > { %v7022_v13 = vadd.f32 %v2903_v53, %v2220_v44 }
 0xb2e   : > { %v5367_v9 = vpop.f32.mrf.mxu1 }
 0xb30   : > { %v2906_v6 = vpop.f32.mrf.mxu1 }
 0xb32   : > { %v5368_v25 = vpop.f32.mrf.mxu1 }
 0xb34   : > { %v3058_v43 = vpop.f32.mrf.mxu1 }
 0xb35   : > { %v3059_v6 = vadd.f32 %v4679_v7, %v3058_v43 }
 0xb36   : > { %v5395_v4 = vpop.f32.mrf.mxu1 }
 0xb38   : > { %v3061_v59 = vpop.f32.mrf.mxu1 }
 0xb39   : > { %v3062_v53 = vadd.f32 %v4679_v7, %v3061_v59 }
 0xb3a   : > { %v5396_v17 = vpop.f32.mrf.mxu1 }
 0xb3b   : > { %v3199_v25 = vpack.c.bf16 %v3062_v53, %v3059_v6 }
 0xb3c   : > { %v3066_v32 = vpop.f32.mrf.mxu1 }
 0xb3d   : > { %v3067_v11 = vadd.f32 %v4679_v7, %v3066_v32  ;;  %v3220_v4 = vsel %vm1140_vm2, %v3199_v25, 0 }
 0xb3e   : > { %v5399_v37 = vpop.f32.mrf.mxu1 }
 0xb40   : > { %v3069_v23 = vpop.f32.mrf.mxu1 }
 0xb41   : > { %v3070_v36 = vadd.f32 %v4679_v7, %v3069_v23 }
 0xb42   : > { %v5400_v49 = vpop.f32.mrf.mxu1 }
 0xb43   : > { %v3200_v44 = vpack.c.bf16 %v3070_v36, %v3067_v11 }
 0xb44   : > { %v3074_v45 = vpop.f32.mrf.mxu1 }
 0xb45   : > { %v3075_v0 = vadd.f32 %v4679_v7, %v3074_v45  ;;  %v3223_v9 = vsel %vm1140_vm2, %v3200_v44, 0 }
 0xb46   : > { %v5403_v50 = vpop.f32.mrf.mxu1 }
 0xb48   : > { %v3077_v48 = vpop.f32.mrf.mxu1 }
 0xb49   : > { %v3078_v58 = vadd.f32 %v4679_v7, %v3077_v48 }
 0xb4a   : > { %v5404_v62 = vpop.f32.mrf.mxu1 }
 0xb4b   : > { %v3201_v20 = vpack.c.bf16 %v3078_v58, %v3075_v0 }
 0xb4c   : > { %v3082_v14 = vpop.f32.mrf.mxu1 }
 0xb4d   : > { %v3083_v60 = vadd.f32 %v4679_v7, %v3082_v14  ;;  %v3226_v42 = vsel %vm1140_vm2, %v3201_v20, 0 }
 0xb4e   : > { %v5407_v54 = vpop.f32.mrf.mxu1 }
 0xb50   : > { %v3085_v1 = vpop.f32.mrf.mxu1 }
 0xb51   : > { %v3086_v16 = vadd.f32 %v4679_v7, %v3085_v1 }
 0xb52   : > { %v5408_v61 = vpop.f32.mrf.mxu1 }
 0xb53   : > { %v3202_v52 = vpack.c.bf16 %v3086_v16, %v3083_v60 }
 0xb54   : > { %v3090_v56 = vpop.f32.mrf.mxu1 }
 0xb55   : > { %v3091_v8 = vadd.f32 %v4679_v7, %v3090_v56  ;;  %v3229_v63 = vsel %vm1140_vm2, %v3202_v52, 0 }
 0xb56   : > { %v5411_v21 = vpop.f32.mrf.mxu1 }
 0xb57   : > { %v3203_v39 = vpack.c.bf16 %v3091_v8, %v3091_v8 }
 0xb58   : > { %v3093_v18 = vpop.f32.mrf.mxu1 }
 0xb59   : > { %v3232_v3 = vsel %vm1140_vm2, %v3203_v39, 0 }
 0xb5a   : > { %v5412_v46 = vpop.f32.mrf.mxu1  ;;  %5436 = vmatpush3.bf16.xpose.msra.mxu1 %v3232_v3 }
 0xb5b   : > { %5437 = vmatprep.subr.bf16.mxu1 %v5861_v10 }
 0xb62   : > { %5438 = vmatpush3.bf16.xpose.msra.mxu1 %v3229_v63 }
 0xb63   : > { %5439 = vmatprep.subr.bf16.mxu1 %v5861_v10 }
 0xb6a   : > { %5440 = vmatpush3.bf16.xpose.msra.mxu1 %v3226_v42 }
 0xb6b   : > { %5441 = vmatprep.subr.bf16.mxu1 %v5861_v10 }
 0xb72   : > { %5442 = vmatpush3.bf16.xpose.msra.mxu1 %v3223_v9 }
 0xb73   : > { %5443 = vmatprep.subr.bf16.mxu1 %v5861_v10 }
 0xb7a   : > { %5444 = vmatpush3.bf16.xpose.msra.mxu1 %v3220_v4 }
 0xb7b   : > { %5495 = vmatprep.subr.bf16.mxu1 %v5861_v10 }
 0xb81   : > { %5446 = vmatmul.mubr.msk.bf16.vlgmr.msra.gmra.mxu1 %vm1140_vm2, %v3194_v57  ;;  %v3198_v57 = vpack.c.bf16 %v3193_v40, %v3193_v40 }
 0xb82   : > { %5449 = vmatprep.mubr.msk.bf16.mxu1 %vm5862_vm1, %v5861_v10 }
 0xb89   : > { %5450 = vmatmul.mubr.msk.bf16.gmra.mxu1 %vm1140_vm2, %v3195_v51 }
 0xb8a   : > { %5453 = vmatprep.mubr.msk.bf16.mxu1 %vm5862_vm1, %v5861_v10 }
 0xb91   : > { %5454 = vmatmul.mubr.msk.bf16.gmra.mxu1 %vm1140_vm2, %v3196_v24 }
 0xb92   : > { %5457 = vmatprep.mubr.msk.bf16.mxu1 %vm5862_vm1, %v5861_v10 }
 0xb99   : > { %5458 = vmatmul.mubr.msk.bf16.gmra.mxu1 %vm1140_vm2, %v3197_v29 }
 0xb9a   : > { %5461 = vmatprep.mubr.msk.bf16.mxu1 %vm5862_vm1, %v5861_v10 }
 0xba1   : > { %5462 = vmatmul.mubr.msk.bf16.gmra.mxu1 %vm1140_vm2, %v3198_v57 }
 0xba2   : > { %5497 = vmatprep.mubr.msk.bf16.mxu1 %vm5862_vm1, %v5861_v10 }
 0xc41   : > { %v3268_v55 = vpop.f32.mrf.mxu1 }
 0xc42   : > { %v3269_v27 = vadd.f32 %v3268_v55, %v6282_v12 }
 0xc43   : > { %v5447_v51 = vpop.f32.mrf.mxu1 }
 0xc44   : > { %v3306_v31 = vsel %vm1243_vm5, %v3269_v27, -inf }
 0xc45   : > { %3307 = vmax.xlane.f32.xlu0 %v3306_v31  ;;  %v3271_v15 = vpop.f32.mrf.mxu1 }
 0xc46   : > { %v3272_v34 = vadd.f32 %v3271_v15, %v6282_v12 }
 0xc47   : > { %v5448_v24 = vpop.f32.mrf.mxu1 }
 0xc48   : > { %v3309_v41 = vsel %vm1243_vm5, %v3272_v34, -inf }
 0xc49   : > { %3310 = vmax.xlane.f32.xlu1 %v3309_v41  ;;  %v3276_v47 = vpop.f32.mrf.mxu1 }
 0xc4a   : > { %v3277_v38 = vadd.f32 %v3276_v47, %v6282_v12 }
 0xc4b   : > { %v5451_v29 = vpop.f32.mrf.mxu1 }
 0xc4c   : > { %v3312_v43 = vsel %vm1243_vm5, %v3277_v38, -inf }
 0xc4d   : > { %3313 = vmax.xlane.f32.xlu0 %v3312_v43  ;;  %v3279_v59 = vpop.f32.mrf.mxu1 }
 0xc4e   : > { %v3280_v17 = vadd.f32 %v3279_v59, %v6282_v12 }
 0xc4f   : > { %v5452_v32 = vpop.f32.mrf.mxu1 }
 0xc50   : > { %v3315_v37 = vsel %vm1243_vm5, %v3280_v17, -inf }
 0xc51   : > { %3316 = vmax.xlane.f32.xlu1 %v3315_v37  ;;  %v3284_v23 = vpop.f32.mrf.mxu1 }
 0xc52   : > { %v3285_v49 = vadd.f32 %v3284_v23, %v6282_v12 }
 0xc53   : > { %v5455_v45 = vpop.f32.mrf.mxu1 }
 0xc54   : > { %v3318_v50 = vsel %vm1243_vm5, %v3285_v49, -inf }
 0xc55   : > { %3319 = vmax.xlane.f32.xlu0 %v3318_v50  ;;  %v3287_v48 = vpop.f32.mrf.mxu1 }
 0xc56   : > { %v3288_v62 = vadd.f32 %v3287_v48, %v6282_v12 }
 0xc57   : > { %v5456_v14 = vpop.f32.mrf.mxu1 }
 0xc58   : > { %v3321_v54 = vsel %vm1243_vm5, %v3288_v62, -inf }
 0xc59   : > { %3322 = vmax.xlane.f32.xlu1 %v3321_v54  ;;  %v3292_v1 = vpop.f32.mrf.mxu1 }
 0xc5a   : > { %v3293_v61 = vadd.f32 %v3292_v1, %v6282_v12 }
 0xc5b   : > { %v5459_v7 = vpop.f32.mrf.mxu1 }
 0xc5c   : > { %v3324_v56 = vsel %vm1243_vm5, %v3293_v61, -inf }
 0xc5d   : > { %3325 = vmax.xlane.f32.xlu0 %v3324_v56  ;;  %v3295_v8 = vpop.f32.mrf.mxu1 }
 0xc5e   : > { %v3296_v21 = vadd.f32 %v3295_v8, %v6282_v12 }
 0xc5f   : > { %v5460_v39 = vpop.f32.mrf.mxu1 }
 0xc60   : > { %v3327_v18 = vsel %vm1243_vm5, %v3296_v21, -inf }
 0xc61   : > { %3328 = vmax.xlane.f32.xlu1 %v3327_v18  ;;  %v3300_v16 = vpop.f32.mrf.mxu1 }
 0xc62   : > { %v3301_v3 = vadd.f32 %v3300_v16, %v6282_v12 }
 0xc63   : > { %v5463_v46 = vpop.f32.mrf.mxu1 }
 0xc64   : > { %v3330_v60 = vsel %vm1243_vm5, %v3301_v3, -inf  ;;  %v4706_v46 = vld [vmem:[%s7522_s5 + $0x6] sm:$0x3] }
 0xc65   : > { %3331 = vmax.xlane.f32.xlu0 %v3330_v60  ;;  %v3303_v52 = vpop.f32.mrf.mxu1  ;;  %v3528_v60 = vsel %vm2059_vm6, %v4706_v46, 0 }
 0xc66   : > { %5496 = vmatpush3.bf16.msra.mxu1 %v3528_v60 }
 0xc67   : > { %v5464_v58 = vpop.f32.mrf.mxu1  ;;  %5539 = vmatprep.subr.bf16.mxu1 %v5861_v10 }
 0xcce   : > { %v3308_v63 = vpop.xlane.xlu0 %3307 }
 0xccf   : > { %v3333_v0 = vsub.f32 %v3269_v27, %v3308_v63 }
 0xcd1   : > { %v3342_v20 = vmul.f32 1.442695, %v3333_v0 }
 0xcd2   : > { %v3311_v36 = vpop.xlane.xlu1 %3310 }
 0xcd3   : > { %5738 = vpow2.f32 %v3342_v20  ;;  %v3334_v42 = vsub.f32 %v3272_v34, %v3311_v36 }
 0xcd5   : > { %v3344_v11 = vmul.f32 1.442695, %v3334_v42 }
 0xcd6   : > { %v3314_v44 = vpop.xlane.xlu0 %3313 }
 0xcd7   : > { %5740 = vpow2.f32 %v3344_v11  ;;  %v3335_v53 = vsub.f32 %v3277_v38, %v3314_v44 }
 0xcd9   : > { %v3346_v9 = vmul.f32 1.442695, %v3335_v53 }
 0xcda   : > { %v3317_v6 = vpop.xlane.xlu1 %3316 }
 0xcdb   : > { %5742 = vpow2.f32 %v3346_v9  ;;  %v3336_v12 = vsub.f32 %v3280_v17, %v3317_v6 }
 0xcdd   : > { %v3348_v25 = vmul.f32 1.442695, %v3336_v12 }
 0xcde   : > { %v3320_v4 = vpop.xlane.xlu0 %3319 }
 0xcdf   : > { %5744 = vpow2.f32 %v3348_v25  ;;  %v3337_v22 = vsub.f32 %v3285_v49, %v3320_v4 }
 0xce0   : > { %v5739_v40 = vpop.eup %5738 }
 0xce1   : > { %v3350_v57 = vmul.f32 1.442695, %v3337_v22  ;;  %v3360_v55 = vsel %vm1243_vm5, %v5739_v40, 0.0 }
 0xce2   : > { %v3323_v27 = vpop.xlane.xlu1 %3322  ;;  %3361 = vadd.xlane.f32.xlu1 %v3360_v55 }
 0xce3   : > { %5746 = vpow2.f32 %v3350_v57  ;;  %v3338_v51 = vsub.f32 %v3288_v62, %v3323_v27 }
 0xce4   : > { %v5741_v31 = vpop.eup %5740 }
 0xce5   : > { %v3396_v15 = vpack.c.bf16 %v5741_v31, %v5739_v40  ;;  %v3352_v34 = vmul.f32 1.442695, %v3338_v51  ;;  %v3363_v24 = vsel %vm1243_vm5, %v5741_v31, 0.0 }
 0xce6   : > { %v3326_v41 = vpop.xlane.xlu0 %3325  ;;  %3364 = vadd.xlane.f32.xlu0 %v3363_v24 }
 0xce7   : > { %5748 = vpow2.f32 %v3352_v34  ;;  %v3339_v47 = vsub.f32 %v3293_v61, %v3326_v41  ;;  %5476 = vmatmul.mubr.msk.bf16.vlgmr.msra.gmra.mxu0 %vm1243_vm5, %v3396_v15 }
 0xce8   : > { %v5743_v38 = vpop.eup %5742  ;;  %5479 = vmatprep.mubr.msk.bf16.mxu0 %vm5862_vm1, %v5861_v10 }
 0xce9   : > { %v3354_v29 = vmul.f32 1.442695, %v3339_v47  ;;  %v3366_v43 = vsel %vm1243_vm5, %v5743_v38, 0.0 }
 0xcea   : > { %3367 = vadd.xlane.f32.xlu1 %v3366_v43  ;;  %v3329_v59 = vpop.xlane.xlu1 %3328 }
 0xceb   : > { %5750 = vpow2.f32 %v3354_v29  ;;  %v3340_v17 = vsub.f32 %v3296_v21, %v3329_v59 }
 0xcec   : > { %v5745_v32 = vpop.eup %5744 }
 0xced   : > { %v3356_v37 = vmul.f32 1.442695, %v3340_v17  ;;  %v3369_v23 = vsel %vm1243_vm5, %v5745_v32, 0.0  ;;  %v3397_v49 = vpack.c.bf16 %v5745_v32, %v5743_v38 }
 0xcee   : > { %3370 = vadd.xlane.f32.xlu0 %v3369_v23  ;;  %v3332_v45 = vpop.xlane.xlu0 %3331 }
 0xcef   : > { %5752 = vpow2.f32 %v3356_v37  ;;  %v3341_v50 = vsub.f32 %v3301_v3, %v3332_v45  ;;  %5480 = vmatmul.mubr.msk.bf16.gmra.mxu0 %vm1243_vm5, %v3397_v49 }
 0xcf0   : > { %v5747_v48 = vpop.eup %5746  ;;  %5483 = vmatprep.mubr.msk.bf16.mxu0 %vm5862_vm1, %v5861_v10 }
 0xcf1   : > { %v3358_v62 = vmul.f32 1.442695, %v3341_v50  ;;  %v3372_v14 = vsel %vm1243_vm5, %v5747_v48, 0.0 }
 0xcf2   : > { %3373 = vadd.xlane.f32.xlu1 %v3372_v14 }
 0xcf3   : > { %5754 = vpow2.f32 %v3358_v62 }
 0xcf4   : > { %v5749_v54 = vpop.eup %5748 }
 0xcf5   : > { %v3375_v1 = vsel %vm1243_vm5, %v5749_v54, 0.0  ;;  %v3398_v61 = vpack.c.bf16 %v5749_v54, %v5747_v48 }
 0xcf6   : > { %3376 = vadd.xlane.f32.xlu0 %v3375_v1 }
 0xcf7   : > { %5484 = vmatmul.mubr.msk.bf16.gmra.mxu0 %vm1243_vm5, %v3398_v61 }
 0xcf8   : > { %v5751_v7 = vpop.eup %5750  ;;  %5487 = vmatprep.mubr.msk.bf16.mxu0 %vm5862_vm1, %v5861_v10 }
 0xcf9   : > { %v3378_v56 = vsel %vm1243_vm5, %v5751_v7, 0.0 }
 0xcfa   : > { %3379 = vadd.xlane.f32.xlu1 %v3378_v56 }
 0xcfc   : > { %v5753_v8 = vpop.eup %5752 }
 0xcfd   : > { %v3381_v21 = vsel %vm1243_vm5, %v5753_v8, 0.0  ;;  %v3399_v39 = vpack.c.bf16 %v5753_v8, %v5751_v7 }
 0xcfe   : > { %3382 = vadd.xlane.f32.xlu0 %v3381_v21 }
 0xcff   : > { %5488 = vmatmul.mubr.msk.bf16.gmra.mxu0 %vm1243_vm5, %v3399_v39 }
 0xd00   : > { %v5755_v18 = vpop.eup %5754  ;;  %5491 = vmatprep.mubr.msk.bf16.mxu0 %vm5862_vm1, %v5861_v10 }
 0xd01   : > { %v3384_v16 = vsel %vm1243_vm5, %v5755_v18, 0.0  ;;  %v3400_v3 = vpack.c.bf16 %v5755_v18, %v5755_v18 }
 0xd02   : > { %3385 = vadd.xlane.f32.xlu1 %v3384_v16 }
 0xd07   : > { %5492 = vmatmul.mubr.msk.bf16.gmra.mxu0 %vm1243_vm5, %v3400_v3 }
 0xd08   : > { %5519 = vmatprep.mubr.msk.bf16.mxu0 %vm5862_vm1, %v5861_v10 }
 0xd6b   : > { %v3362_v52 = vpop.xlane.xlu1 %3361 }
 0xd6c   : > { %5756 = vrcp.f32 %v3362_v52  ;;  %v7132_v52 = vld [vmem:[%s7523_s6] ss:$0 sm:$0xff] }
 0xd6f   : > { %v3365_v58 = vpop.xlane.xlu0 %3364 }
 0xd70   : > { %5758 = vrcp.f32 %v3365_v58 }
 0xd73   : > { %v3368_v63 = vpop.xlane.xlu1 %3367 }
 0xd74   : > { %5760 = vrcp.f32 %v3368_v63  ;;  %v5828_v63 = vld [vmem:[#allocation2] sm:$0xff] }
 0xd77   : > { %v3371_v0 = vpop.xlane.xlu0 %3370 }
 0xd78   : > { %5762 = vrcp.f32 %v3371_v0 }
 0xd79   : > { %v5757_v42 = vpop.eup %5756 }
 0xd7b   : > { %v3374_v11 = vpop.xlane.xlu1 %3373 }
 0xd7c   : > { %5764 = vrcp.f32 %v3374_v11 }
 0xd7d   : > { %v5759_v44 = vpop.eup %5758 }
 0xd7f   : > { %v3377_v53 = vpop.xlane.xlu0 %3376 }
 0xd80   : > { %5766 = vrcp.f32 %v3377_v53 }
 0xd81   : > { %v5761_v57 = vpop.eup %5760 }
 0xd83   : > { %v3380_v55 = vpop.xlane.xlu1 %3379 }
 0xd84   : > { %5768 = vrcp.f32 %v3380_v55 }
 0xd85   : > { %v5763_v27 = vpop.eup %5762 }
 0xd87   : > { %v3383_v51 = vpop.xlane.xlu0 %3382 }
 0xd88   : > { %5770 = vrcp.f32 %v3383_v51  ;;  %v5831_v51 = vld [vmem:[#allocation2 + $0x18] sm:$0xff] }
 0xd89   : > { %v5765_v43 = vpop.eup %5764 }
 0xd8b   : > { %v3386_v38 = vpop.xlane.xlu1 %3385 }
 0xd8c   : > { %5772 = vrcp.f32 %v3386_v38 }
 0xd8d   : > { %v5767_v59 = vpop.eup %5766 }
 0xd91   : > { %v5769_v48 = vpop.eup %5768 }
 0xd95   : > { %v5771_v62 = vpop.eup %5770 }
 0xd99   : > { %v5773_v8 = vpop.eup %5772 }
 0xda7   : > { %v3458_v20 = vpop.f32.mrf.mxu0 }
 0xda8   : > { %v3496_v6 = vmul.f32 %v5757_v42, %v3458_v20 }
 0xda9   : > { %v5477_v36 = vpop.f32.mrf.mxu0 }
 0xdab   : > { %v3461_v9 = vpop.f32.mrf.mxu0 }
 0xdac   : > { %v3497_v12 = vmul.f32 %v5759_v44, %v3461_v9  ;;  %v5829_v44 = vld [vmem:[#allocation2 + $0x8] sm:$0xff] }
 0xdad   : > { %v5478_v25 = vpop.f32.mrf.mxu0 }
 0xdae   : > { %v3507_v4 = vpack.c.bf16 %v3497_v12, %v3496_v6 }
 0xdaf   : > { %v3466_v22 = vpop.f32.mrf.mxu0 }
 0xdb0   : > { %5498 = vmatmul.mubr.msk.bf16.vlgmr.msra.gmra.mxu1 %vm1140_vm2, %v3507_v4  ;;  %v3498_v15 = vmul.f32 %v5761_v57, %v3466_v22  ;;  %v5830_v4 = vld [vmem:[#allocation2 + $0x10] sm:$0xff] }
 0xdb1   : > { %v5481_v40 = vpop.f32.mrf.mxu0  ;;  %5501 = vmatprep.mubr.msk.bf16.mxu1 %vm5862_vm1, %v5861_v10 }
 0xdb3   : > { %v3469_v31 = vpop.f32.mrf.mxu0 }
 0xdb4   : > { %v3499_v34 = vmul.f32 %v5763_v27, %v3469_v31 }
 0xdb5   : > { %v5482_v24 = vpop.f32.mrf.mxu0 }
 0xdb6   : > { %v3508_v41 = vpack.c.bf16 %v3499_v34, %v3498_v15 }
 0xdb7   : > { %v3474_v47 = vpop.f32.mrf.mxu0 }
 0xdb8   : > { %5502 = vmatmul.mubr.msk.bf16.gmra.mxu1 %vm1140_vm2, %v3508_v41  ;;  %v3500_v32 = vmul.f32 %v5765_v43, %v3474_v47  ;;  %v5832_v47 = vld [vmem:[#allocation2 + $0x20] sm:$0xff] }
 0xdb9   : > { %v5485_v29 = vpop.f32.mrf.mxu0  ;;  %5505 = vmatprep.mubr.msk.bf16.mxu1 %vm5862_vm1, %v5861_v10 }
 0xdbb   : > { %v3477_v17 = vpop.f32.mrf.mxu0 }
 0xdbc   : > { %v3501_v37 = vmul.f32 %v5767_v59, %v3477_v17 }
 0xdbd   : > { %v5486_v23 = vpop.f32.mrf.mxu0 }
 0xdbe   : > { %v3509_v49 = vpack.c.bf16 %v3501_v37, %v3500_v32  ;;  %v5833_v32 = vld [vmem:[#allocation2 + $0x28] sm:$0xff] }
 0xdbf   : > { %v3482_v45 = vpop.f32.mrf.mxu0 }
 0xdc0   : > { %5506 = vmatmul.mubr.msk.bf16.gmra.mxu1 %vm1140_vm2, %v3509_v49  ;;  %v3502_v54 = vmul.f32 %v5769_v48, %v3482_v45  ;;  %v5834_v48 = vld [vmem:[#allocation2 + $0x30] sm:$0xff] }
 0xdc1   : > { %v5489_v50 = vpop.f32.mrf.mxu0  ;;  %5509 = vmatprep.mubr.msk.bf16.mxu1 %vm5862_vm1, %v5861_v10 }
 0xdc3   : > { %v3485_v14 = vpop.f32.mrf.mxu0 }
 0xdc4   : > { %v3503_v1 = vmul.f32 %v5771_v62, %v3485_v14 }
 0xdc5   : > { %v5490_v61 = vpop.f32.mrf.mxu0 }
 0xdc6   : > { %v3510_v7 = vpack.c.bf16 %v3503_v1, %v3502_v54 }
 0xdc7   : > { %v3490_v56 = vpop.f32.mrf.mxu0 }
 0xdc8   : > { %5510 = vmatmul.mubr.msk.bf16.gmra.mxu1 %vm1140_vm2, %v3510_v7  ;;  %v3504_v39 = vmul.f32 %v5773_v8, %v3490_v56  ;;  %v5835_v7 = vld [vmem:[#allocation2 + $0x38] sm:$0xff] }
 0xdc9   : > { %v5493_v21 = vpop.f32.mrf.mxu0  ;;  %5513 = vmatprep.mubr.msk.bf16.mxu1 %vm5862_vm1, %v5861_v10 }
 0xdca   : > { %v3511_v3 = vpack.c.bf16 %v3504_v39, %v3504_v39 }
 0xdcb   : > { %v3493_v18 = vpop.f32.mrf.mxu0 }
 0xdcd   : > { %v5494_v16 = vpop.f32.mrf.mxu0 }
 0xdce   : > { %v5836_v16 = vld [vmem:[#allocation2 + $0x40] sm:$0xff] }
 0xdd0   : > { %5514 = vmatmul.mubr.msk.bf16.gmra.mxu1 %vm1140_vm2, %v3511_v3 }
 0xdd1   : > { %5547 = vmatprep.mubr.msk.bf16.mxu1 %vm5862_vm1, %v5861_v10 }
 0xe70   : > { %v3564_v46 = vpop.f32.mrf.mxu1 }
 0xe71   : > { %v3602_v60 = vadd.f32 %v3564_v46, %v6990_v35 }
 0xe72   : > { %v5499_v58 = vpop.f32.mrf.mxu1 }
 0xe73   : > { %v3611_v0 = vadd.f32 %v5828_v63, %v3602_v60 }
 0xe74   : > { %v3567_v20 = vpop.f32.mrf.mxu1 }
 0xe75   : > { %v7135_v36 = vadd.f32 %v7132_v52, %v3611_v0  ;;  %v3603_v42 = vadd.f32 %v3567_v20, %v6994_v26 }
 0xe76   : > { %v5500_v11 = vpop.f32.mrf.mxu1 }
 0xe77   : > { %v3612_v53 = vadd.f32 %v5829_v44, %v3603_v42  ;;  %v3638_v35 = vsel %vm662_vm0, %v7135_v36, 0.0 }
 0xe78   : > { %3639 = vadd.xlane.f32.xlu0 %v3638_v35  ;;  %v3572_v9 = vpop.f32.mrf.mxu1 }
 0xe79   : > { %v7141_v6 = vadd.f32 %v7132_v52, %v3612_v53  ;;  %v3604_v12 = vadd.f32 %v3572_v9, %v6998_v19 }
 0xe7a   : > { %v5503_v25 = vpop.f32.mrf.mxu1 }
 0xe7b   : > { %v3613_v22 = vadd.f32 %v5830_v4, %v3604_v12  ;;  %v3641_v40 = vsel %vm662_vm0, %v7141_v6, 0.0 }
 0xe7c   : > { %3642 = vadd.xlane.f32.xlu1 %v3641_v40  ;;  %v3575_v26 = vpop.f32.mrf.mxu1 }
 0xe7d   : > { %v7147_v57 = vadd.f32 %v7132_v52, %v3613_v22  ;;  %v3605_v55 = vadd.f32 %v3575_v26, %v7002_v5 }
 0xe7e   : > { %v5504_v27 = vpop.f32.mrf.mxu1 }
 0xe7f   : > { %v3614_v31 = vadd.f32 %v5831_v51, %v3605_v55  ;;  %v3644_v15 = vsel %vm662_vm0, %v7147_v57, 0.0 }
 0xe80   : > { %3645 = vadd.xlane.f32.xlu0 %v3644_v15  ;;  %v3580_v19 = vpop.f32.mrf.mxu1 }
 0xe81   : > { %v7153_v34 = vadd.f32 %v7132_v52, %v3614_v31  ;;  %v3606_v24 = vadd.f32 %v3580_v19, %v7006_v28 }
 0xe82   : > { %v5507_v41 = vpop.f32.mrf.mxu1 }
 0xe83   : > { %v3615_v38 = vadd.f32 %v5832_v47, %v3606_v24  ;;  %v3647_v29 = vsel %vm662_vm0, %v7153_v34, 0.0 }
 0xe84   : > { %3648 = vadd.xlane.f32.xlu1 %v3647_v29  ;;  %v3583_v5 = vpop.f32.mrf.mxu1 }
 0xe85   : > { %v7159_v43 = vadd.f32 %v7132_v52, %v3615_v38  ;;  %v3607_v59 = vadd.f32 %v3583_v5, %v7010_v2 }
 0xe86   : > { %v5508_v17 = vpop.f32.mrf.mxu1 }
 0xe87   : > { %v3616_v37 = vadd.f32 %v5833_v32, %v3607_v59  ;;  %v3650_v23 = vsel %vm662_vm0, %v7159_v43, 0.0 }
 0xe88   : > { %3651 = vadd.xlane.f32.xlu0 %v3650_v23  ;;  %v3588_v28 = vpop.f32.mrf.mxu1 }
 0xe89   : > { %v7165_v49 = vadd.f32 %v7132_v52, %v3616_v37  ;;  %v3608_v45 = vadd.f32 %v3588_v28, %v7014_v33 }
 0xe8a   : > { %v5511_v50 = vpop.f32.mrf.mxu1 }
 0xe8b   : > { %v3617_v62 = vadd.f32 %v5834_v48, %v3608_v45  ;;  %v3653_v14 = vsel %vm662_vm0, %v7165_v49, 0.0 }
 0xe8c   : > { %3654 = vadd.xlane.f32.xlu1 %v3653_v14  ;;  %v3591_v2 = vpop.f32.mrf.mxu1 }
 0xe8d   : > { %v7171_v54 = vadd.f32 %v7132_v52, %v3617_v62  ;;  %v3609_v1 = vadd.f32 %v3591_v2, %v7018_v30 }
 0xe8e   : > { %v5512_v61 = vpop.f32.mrf.mxu1 }
 0xe8f   : > { %v3618_v56 = vadd.f32 %v5835_v7, %v3609_v1  ;;  %v3656_v8 = vsel %vm662_vm0, %v7171_v54, 0.0 }
 0xe90   : > { %3657 = vadd.xlane.f32.xlu0 %v3656_v8  ;;  %v3596_v33 = vpop.f32.mrf.mxu1 }
 0xe91   : > { %v7177_v21 = vadd.f32 %v7132_v52, %v3618_v56  ;;  %v3610_v39 = vadd.f32 %v3596_v33, %v7022_v13  ;;  %v5607_v13 = vld [vmem:[%s7526_s9] sm:$0xff]  }
 0xe92   : > { %v5515_v18 = vpop.f32.mrf.mxu1  ;;  %5518 = vmatpush3.bf16.msra.mxu0 %v5607_v13 }
 0xe93   : > { %v3619_v3 = vadd.f32 %v5836_v16, %v3610_v39  ;;  %v3659_v46 = vsel %vm662_vm0, %v7177_v21, 0.0 }
 0xe94   : > { %3660 = vadd.xlane.f32.xlu1 %v3659_v46  ;;  %v3599_v30 = vpop.f32.mrf.mxu1 }
 0xe95   : > { %v7183_v60 = vadd.f32 %v7132_v52, %v3619_v3 }
 0xe96   : > { %v5516_v58 = vpop.f32.mrf.mxu1 }
 0xe97   : > { %v3662_v63 = vsel %vm662_vm0, %v7183_v60, 0.0 }
 0xe98   : > { %3663 = vadd.xlane.f32.xlu0 %v3662_v63 }
 0xf01   : > { %v3640_v0 = vpop.xlane.xlu0 %3639 }
 0xf02   : > { %v3665_v20 = vmul.f32 0.0625, %v3640_v0 }
 0xf04   : > { %v7191_v42 = vsub.f32 %v7135_v36, %v3665_v20 }
 0xf05   : > { %v3643_v11 = vpop.xlane.xlu1 %3642 }
 0xf06   : > { %v3666_v44 = vmul.f32 0.0625, %v3643_v11  ;;  %v3683_v52 = vmul.f32 %v7191_v42, %v7191_v42 }
 0xf08   : > { %v7196_v53 = vsub.f32 %v7141_v6, %v3666_v44  ;;  %v3692_v35 = vsel %vm662_vm0, %v3683_v52, 0.0 }
 0xf09   : > { %v3646_v9 = vpop.xlane.xlu0 %3645  ;;  %3693 = vadd.xlane.f32.xlu1 %v3692_v35 }
 0xf0a   : > { %v3667_v12 = vmul.f32 0.0625, %v3646_v9  ;;  %v3684_v25 = vmul.f32 %v7196_v53, %v7196_v53 }
 0xf0c   : > { %v7202_v4 = vsub.f32 %v7147_v57, %v3667_v12  ;;  %v3695_v22 = vsel %vm662_vm0, %v3684_v25, 0.0  ;;  %v4713_v25 = vld [vmem:[%s7524_s7] ss:$0 sm:$0xff] }
 0xf0d   : > { %v3649_v40 = vpop.xlane.xlu1 %3648  ;;  %3696 = vadd.xlane.f32.xlu0 %v3695_v22 }
 0xf0e   : > { %v3668_v26 = vmul.f32 0.0625, %v3649_v40  ;;  %v3685_v55 = vmul.f32 %v7202_v4, %v7202_v4 }
 0xf10   : > { %v7208_v27 = vsub.f32 %v7153_v34, %v3668_v26  ;;  %v3698_v51 = vsel %vm662_vm0, %v3685_v55, 0.0 }
 0xf11   : > { %v3652_v31 = vpop.xlane.xlu0 %3651  ;;  %3699 = vadd.xlane.f32.xlu1 %v3698_v51 }
 0xf12   : > { %v3669_v15 = vmul.f32 0.0625, %v3652_v31  ;;  %v3686_v19 = vmul.f32 %v7208_v27, %v7208_v27 }
 0xf14   : > { %v7214_v24 = vsub.f32 %v7159_v43, %v3669_v15  ;;  %v3701_v41 = vsel %vm662_vm0, %v3686_v19, 0.0  ;;  %v4714_v15 = vld [vmem:[%s7525_s8] ss:$0 sm:$0xff] }
 0xf15   : > { %v3655_v47 = vpop.xlane.xlu1 %3654  ;;  %3702 = vadd.xlane.f32.xlu0 %v3701_v41 }
 0xf16   : > { %v3670_v38 = vmul.f32 0.0625, %v3655_v47  ;;  %v3687_v29 = vmul.f32 %v7214_v24, %v7214_v24 }
 0xf18   : > { %v7220_v5 = vsub.f32 %v7165_v49, %v3670_v38  ;;  %v3704_v59 = vsel %vm662_vm0, %v3687_v29, 0.0 }
 0xf19   : > { %v3658_v17 = vpop.xlane.xlu0 %3657  ;;  %3705 = vadd.xlane.f32.xlu1 %v3704_v59 }
 0xf1a   : > { %v3671_v32 = vmul.f32 0.0625, %v3658_v17  ;;  %v3688_v37 = vmul.f32 %v7220_v5, %v7220_v5 }
 0xf1c   : > { %v7226_v23 = vsub.f32 %v7171_v54, %v3671_v32  ;;  %v3707_v28 = vsel %vm662_vm0, %v3688_v37, 0.0 }
 0xf1d   : > { %v3661_v45 = vpop.xlane.xlu1 %3660  ;;  %3708 = vadd.xlane.f32.xlu0 %v3707_v28 }
 0xf1e   : > { %v3672_v50 = vmul.f32 0.0625, %v3661_v45  ;;  %v3689_v48 = vmul.f32 %v7226_v23, %v7226_v23 }
 0xf20   : > { %v7232_v62 = vsub.f32 %v7177_v21, %v3672_v50  ;;  %v3710_v14 = vsel %vm662_vm0, %v3689_v48, 0.0 }
 0xf21   : > { %3711 = vadd.xlane.f32.xlu1 %v3710_v14  ;;  %v3664_v2 = vpop.xlane.xlu0 %3663 }
 0xf22   : > { %v3673_v1 = vmul.f32 0.0625, %v3664_v2  ;;  %v3690_v61 = vmul.f32 %v7232_v62, %v7232_v62 }
 0xf24   : > { %v7238_v7 = vsub.f32 %v7183_v60, %v3673_v1  ;;  %v3713_v56 = vsel %vm662_vm0, %v3690_v61, 0.0 }
 0xf25   : > { %3714 = vadd.xlane.f32.xlu0 %v3713_v56 }
 0xf26   : > { %v3691_v8 = vmul.f32 %v7238_v7, %v7238_v7 }
 0xf28   : > { %v3716_v33 = vsel %vm662_vm0, %v3691_v8, 0.0 }
 0xf29   : > { %3717 = vadd.xlane.f32.xlu1 %v3716_v33 }
 0xf92   : > { %v3694_v39 = vpop.xlane.xlu1 %3693 }
 0xf93   : > { %v3719_v18 = vmul.f32 0.0625, %v3694_v39 }
 0xf95   : > { %v3728_v16 = vadd.f32 1e-05, %v3719_v18 }
 0xf96   : > { %v3697_v3 = vpop.xlane.xlu0 %3696 }
 0xf97   : > { %5774 = vrsqrt.f32 %v3728_v16  ;;  %v3720_v46 = vmul.f32 0.0625, %v3697_v3 }
 0xf99   : > { %v3729_v30 = vadd.f32 1e-05, %v3720_v46 }
 0xf9a   : > { %v3700_v58 = vpop.xlane.xlu1 %3699 }
 0xf9b   : > { %5776 = vrsqrt.f32 %v3729_v30  ;;  %v3721_v63 = vmul.f32 0.0625, %v3700_v58 }
 0xf9d   : > { %v3730_v13 = vadd.f32 1e-05, %v3721_v63 }
 0xf9e   : > { %v3703_v0 = vpop.xlane.xlu0 %3702 }
 0xf9f   : > { %5778 = vrsqrt.f32 %v3730_v13  ;;  %v3722_v20 = vmul.f32 0.0625, %v3703_v0 }
 0xfa1   : > { %v3731_v11 = vadd.f32 1e-05, %v3722_v20 }
 0xfa2   : > { %v3706_v44 = vpop.xlane.xlu1 %3705 }
 0xfa3   : > { %5780 = vrsqrt.f32 %v3731_v11  ;;  %v3723_v52 = vmul.f32 0.0625, %v3706_v44 }
 0xfa4   : > { %v5775_v35 = vpop.eup %5774 }
 0xfa5   : > { %v3746_v9 = vmul.f32 %v5775_v35, %v7191_v42  ;;  %v3732_v12 = vadd.f32 1e-05, %v3723_v52 }
 0xfa6   : > { %v3709_v22 = vpop.xlane.xlu0 %3708 }
 0xfa7   : > { %5782 = vrsqrt.f32 %v3732_v12  ;;  %v3724_v40 = vmul.f32 0.0625, %v3709_v22  ;;  %v3761_v55 = vmul.f32 %v4713_v25, %v3746_v9  ;;  %v5608_v22 = vld [vmem:[%s7528_s11 + $0x18] sm:$0xff]  }
 0xfa8   : > { %v5777_v26 = vpop.eup %5776  ;;  %5540 = vmatpush3.bf16.msra.mxu1 %v5608_v22 }
 0xfa9   : > { %v3747_v51 = vmul.f32 %v5777_v26, %v7196_v53  ;;  %v3733_v31 = vadd.f32 1e-05, %v3724_v40  ;;  %v3776_v38 = vadd.f32 %v4714_v15, %v3761_v55  ;;  %5541 = vmatprep.subr.bf16.mxu1 %v5861_v10  ;;  %v5611_v40 = vld [vmem:[%s7528_s11] sm:$0xff]  }
 0xfaa   : > { %v3712_v19 = vpop.xlane.xlu1 %3711  ;;  %v7290_v26 = vld [vmem:[%s7527_s10] ss:$0 sm:$0xff] }
 0xfab   : > { %v3762_v41 = vmul.f32 %v4713_v25, %v3747_v51  ;;  %5784 = vrsqrt.f32 %v3733_v31  ;;  %v3725_v42 = vmul.f32 0.0625, %v3712_v19 }
 0xfac   : > { %v5779_v47 = vpop.eup %5778 }
 0xfad   : > { %v3777_v29 = vadd.f32 %v4714_v15, %v3762_v41  ;;  %v3748_v59 = vmul.f32 %v5779_v47, %v7202_v4  ;;  %v3734_v17 = vadd.f32 1e-05, %v3725_v42 }
 0xfae   : > { %v3715_v32 = vpop.xlane.xlu0 %3714 }
 0xfaf   : > { %v3787_v37 = vpack.c.bf16 %v3777_v29, %v3776_v38  ;;  %5786 = vrsqrt.f32 %v3734_v17  ;;  %v3726_v28 = vmul.f32 0.0625, %v3715_v32  ;;  %v3763_v48 = vmul.f32 %v4713_v25, %v3748_v59 }
 0xfb0   : > { %v5781_v53 = vpop.eup %5780 }
 0xfb1   : > { %v3749_v45 = vmul.f32 %v5781_v53, %v7208_v27  ;;  %v3735_v50 = vadd.f32 1e-05, %v3726_v28  ;;  %5520 = vmatmul.mubr.msk.bf16.vlgmr.msra.gmra.mxu0 %vm662_vm0, %v3787_v37  ;;  %v3778_v8 = vadd.f32 %v4714_v15, %v3763_v48 }
 0xfb2   : > { %v3718_v14 = vpop.xlane.xlu1 %3717  ;;  %5523 = vmatprep.mubr.msk.bf16.mxu0 %vm5862_vm1, %v5861_v10 }
 0xfb3   : > { %5788 = vrsqrt.f32 %v3735_v50  ;;  %v3727_v2 = vmul.f32 0.0625, %v3718_v14  ;;  %v3764_v1 = vmul.f32 %v4713_v25, %v3749_v45 }
 0xfb4   : > { %v5783_v4 = vpop.eup %5782 }
 0xfb5   : > { %v3750_v61 = vmul.f32 %v5783_v4, %v7214_v24  ;;  %v3736_v56 = vadd.f32 1e-05, %v3727_v2  ;;  %v3779_v33 = vadd.f32 %v4714_v15, %v3764_v1 }
 0xfb7   : > { %5790 = vrsqrt.f32 %v3736_v56  ;;  %v3788_v39 = vpack.c.bf16 %v3779_v33, %v3778_v8  ;;  %v3765_v16 = vmul.f32 %v4713_v25, %v3750_v61 }
 0xfb8   : > { %v5785_v27 = vpop.eup %5784 }
 0xfb9   : > { %v3751_v18 = vmul.f32 %v5785_v27, %v7220_v5  ;;  %5524 = vmatmul.mubr.msk.bf16.gmra.mxu0 %vm662_vm0, %v3788_v39  ;;  %v3780_v58 = vadd.f32 %v4714_v15, %v3765_v16 }
 0xfba   : > { %5527 = vmatprep.mubr.msk.bf16.mxu0 %vm5862_vm1, %v5861_v10 }
 0xfbb   : > { %v3766_v3 = vmul.f32 %v4713_v25, %v3751_v18 }
 0xfbc   : > { %v5787_v46 = vpop.eup %5786 }
 0xfbd   : > { %v3752_v30 = vmul.f32 %v5787_v46, %v7226_v23  ;;  %v3781_v24 = vadd.f32 %v4714_v15, %v3766_v3 }
 0xfbf   : > { %v3789_v63 = vpack.c.bf16 %v3781_v24, %v3780_v58  ;;  %v3767_v20 = vmul.f32 %v4713_v25, %v3752_v30 }
 0xfc0   : > { %v5789_v13 = vpop.eup %5788 }
 0xfc1   : > { %v3753_v0 = vmul.f32 %v5789_v13, %v7232_v62  ;;  %5528 = vmatmul.mubr.msk.bf16.gmra.mxu0 %vm662_vm0, %v3789_v63  ;;  %v3782_v52 = vadd.f32 %v4714_v15, %v3767_v20 }
 0xfc2   : > { %5531 = vmatprep.mubr.msk.bf16.mxu0 %vm5862_vm1, %v5861_v10 }
 0xfc3   : > { %v3768_v5 = vmul.f32 %v4713_v25, %v3753_v0 }
 0xfc4   : > { %v5791_v11 = vpop.eup %5790 }
 0xfc5   : > { %v3754_v44 = vmul.f32 %v5791_v11, %v7238_v7  ;;  %v3783_v35 = vadd.f32 %v4714_v15, %v3768_v5  ;;  %v5609_v7 = vld [vmem:[%s7528_s11 + $0x10] sm:$0xff]  }
 0xfc6   : > { %5542 = vmatpush3.bf16.msra.mxu1 %v5609_v7 }
 0xfc7   : > { %v3790_v9 = vpack.c.bf16 %v3783_v35, %v3782_v52  ;;  %v3769_v23 = vmul.f32 %v4713_v25, %v3754_v44  ;;  %5543 = vmatprep.subr.bf16.mxu1 %v5861_v10  ;;  %v5610_v25 = vld [vmem:[%s7528_s11 + $0x8] sm:$0xff]  }
 0xfc9   : > { %5532 = vmatmul.mubr.msk.bf16.gmra.mxu0 %vm662_vm0, %v3790_v9  ;;  %v3784_v62 = vadd.f32 %v4714_v15, %v3769_v23 }
 0xfca   : > { %5535 = vmatprep.mubr.msk.bf16.mxu0 %vm5862_vm1, %v5861_v10  ;;  %5544 = vmatpush3.bf16.msra.mxu1 %v5610_v25 }
 0xfcb   : > { %v3791_v12 = vpack.c.bf16 %v3784_v62, %v3784_v62  ;;  %5545 = vmatprep.subr.bf16.mxu1 %v5861_v10 }
 0xfce   : > { %5546 = vmatpush3.bf16.msra.mxu1 %v5611_v40 }
 0xfd1   : > { %5536 = vmatmul.mubr.msk.bf16.gmra.mxu0 %vm662_vm0, %v3791_v12 }
0x1071   : > { %v3854_v55 = vpop.f32.mrf.mxu0 }
0x1072   : > { %v7293_v51 = vadd.f32 %v7290_v26, %v3854_v55 }
0x1073   : > { %v5521_v31 = vpop.f32.mrf.mxu0 }
0x1074   : > { %v7296_v15 = vmul.f32 0.70710677, %v7293_v51 }
0x1075   : > { %v3857_v19 = vpop.f32.mrf.mxu0 }
0x1076   : > { %v3910_v41 = vand.u32 2147483647, %v7296_v15  ;;  %v7300_v42 = vadd.f32 %v7290_v26, %v3857_v19  ;;  %vm4081_vm7 = vcmp.ge.f32.partialorder %v7296_v15, 0.0 }
0x1077   : > { %v5522_v47 = vpop.f32.mrf.mxu0 }
0x1078   : > { %v3919_v38 = vmul.f32 0.3275911, %v3910_v41  ;;  %v7303_v29 = vmul.f32 0.70710677, %v7300_v42  ;;  %v4027_v61 = vmul.f32 %v3910_v41, %v3910_v41 }
0x1079   : > { %v3862_v59 = vpop.f32.mrf.mxu0 }
0x107a   : > { %v3928_v17 = vadd.f32 1.0, %v3919_v38  ;;  %v3911_v32 = vand.u32 2147483647, %v7303_v29  ;;  %v7307_v37 = vadd.f32 %v7290_v26, %v3862_v59  ;;  %v4036_v30 = vsub.f32 0.0, %v4027_v61 }
0x107b   : > { %v5525_v28 = vpop.f32.mrf.mxu0  ;;  %vm4082_vm8 = vcmp.ge.f32.partialorder %v7303_v29, 0.0 }
0x107c   : > { %5792 = vrcp.f32 %v3928_v17  ;;  %v3920_v53 = vmul.f32 0.3275911, %v3911_v32  ;;  %v7310_v45 = vmul.f32 0.70710677, %v7307_v37  ;;  %v4028_v16 = vmul.f32 %v3911_v32, %v3911_v32 }
0x107d   : > { %v3865_v50 = vpop.f32.mrf.mxu0  ;;  %v4045_v52 = vmul.f32 1.442695, %v4036_v30 }
0x107e   : > { %v3929_v48 = vadd.f32 1.0, %v3920_v53  ;;  %v7313_v14 = vadd.f32 %v7290_v26, %v3865_v50  ;;  %v3912_v2 = vand.u32 2147483647, %v7310_v45  ;;  %v4037_v20 = vsub.f32 0.0, %v4028_v16 }
0x107f   : > { %v5526_v1 = vpop.f32.mrf.mxu0  ;;  %vm4083_vm9 = vcmp.ge.f32.partialorder %v7310_v45, 0.0 }
0x1080   : > { %5794 = vrcp.f32 %v3929_v48  ;;  %v7317_v4 = vmul.f32 0.70710677, %v7313_v14  ;;  %v3921_v56 = vmul.f32 0.3275911, %v3912_v2  ;;  %v4029_v5 = vmul.f32 %v3912_v2, %v3912_v2 }
0x1081   : > { %v3870_v8 = vpop.f32.mrf.mxu0  ;;  %v4047_v31 = vmul.f32 1.442695, %v4037_v20 }
0x1082   : > { %v3913_v33 = vand.u32 2147483647, %v7317_v4  ;;  %v7321_v39 = vadd.f32 %v7290_v26, %v3870_v8  ;;  %v3930_v27 = vadd.f32 1.0, %v3921_v56  ;;  %v4038_v19 = vsub.f32 0.0, %v4029_v5 }
0x1083   : > { %v5529_v18 = vpop.f32.mrf.mxu0  ;;  %vm4084_vm11 = vcmp.ge.f32.partialorder %v7317_v4, 0.0 }
0x1084   : > { %v3922_v3 = vmul.f32 0.3275911, %v3913_v33  ;;  %v7324_v46 = vmul.f32 0.70710677, %v7321_v39  ;;  %5796 = vrcp.f32 %v3930_v27  ;;  %v4030_v62 = vmul.f32 %v3913_v33, %v3913_v33 }
0x1085   : > { %v3873_v58 = vpop.f32.mrf.mxu0  ;;  %v4049_v33 = vmul.f32 1.442695, %v4038_v19  ;;  %v7352_v27 = vmul.f32 0.5, %v7293_v51 }
0x1086   : > { %v3931_v24 = vadd.f32 1.0, %v3922_v3  ;;  %v3914_v63 = vand.u32 2147483647, %v7324_v46  ;;  %v7328_v13 = vadd.f32 %v7290_v26, %v3873_v58  ;;  %v4039_v28 = vsub.f32 0.0, %v4030_v62 }
0x1087   : > { %v5530_v0 = vpop.f32.mrf.mxu0  ;;  %vm4085_vm12 = vcmp.ge.f32.partialorder %v7324_v46, 0.0 }
0x1088   : > { %5798 = vrcp.f32 %v3931_v24  ;;  %v3923_v11 = vmul.f32 0.3275911, %v3914_v63  ;;  %v7333_v35 = vmul.f32 0.70710677, %v7328_v13  ;;  %v4031_v22 = vmul.f32 %v3914_v63, %v3914_v63 }
0x1089   : > { %v7330_v44 = vpop.eup %5792  ;;  %v3878_v9 = vpop.f32.mrf.mxu0  ;;  %v4051_v24 = vmul.f32 1.442695, %v4039_v28 }
0x108a   : > { %v3946_v23 = vmul.f32 1.0614054, %v7330_v44  ;;  %v3932_v12 = vadd.f32 1.0, %v3923_v11  ;;  %v3915_v7 = vand.u32 2147483647, %v7333_v35  ;;  %v7338_v25 = vadd.f32 %v7290_v26, %v3878_v9 }
0x108b   : > { %v5533_v40 = vpop.f32.mrf.mxu0  ;;  %v4040_v50 = vsub.f32 0.0, %v4031_v22  ;;  %vm4086_vm13 = vcmp.ge.f32.partialorder %v7333_v35, 0.0 }
0x108c   : > { %v3955_v55 = vadd.f32 -1.4531521, %v3946_v23  ;;  %5800 = vrcp.f32 %v3932_v12  ;;  %v3924_v47 = vmul.f32 0.3275911, %v3915_v7  ;;  %v7343_v38 = vmul.f32 0.70710677, %v7338_v25 }
0x108d   : > { %v7340_v41 = vpop.eup %5794  ;;  %5802 = vpow2.f32 %v4045_v52  ;;  %v3881_v59 = vpop.f32.mrf.mxu0  ;;  %v4032_v2 = vmul.f32 %v3915_v7, %v3915_v7  ;;  %v4053_v20 = vmul.f32 1.442695, %v4040_v50  ;;  %v7366_v12 = vmul.f32 0.5, %v7300_v42 }
0x108e   : > { %v3964_v17 = vmul.f32 %v7330_v44, %v3955_v55  ;;  %v3947_v32 = vmul.f32 1.0614054, %v7340_v41  ;;  %v7348_v53 = vadd.f32 %v7290_v26, %v3881_v59  ;;  %v3933_v48 = vadd.f32 1.0, %v3924_v47 }
0x108f   : > { %v3916_v1 = vand.u32 2147483647, %v7343_v38  ;;  %v5534_v61 = vpop.f32.mrf.mxu0  ;;  %5804 = vpow2.f32 %v4047_v31  ;;  %v4041_v5 = vsub.f32 0.0, %v4032_v2  ;;  %v7375_v59 = vmul.f32 0.5, %v7307_v37 }
0x1090   : > { %v3973_v56 = vadd.f32 1.4214138, %v3964_v17  ;;  %v3956_v8 = vadd.f32 -1.4531521, %v3947_v32  ;;  %5806 = vrcp.f32 %v3933_v48  ;;  %v7359_v63 = vmul.f32 0.70710677, %v7348_v53 }
0x1091   : > { %v3925_v18 = vmul.f32 0.3275911, %v3916_v1  ;;  %v3886_v16 = vpop.f32.mrf.mxu0  ;;  %v7354_v3 = vpop.eup %5796  ;;  %5808 = vpow2.f32 %v4049_v33  ;;  %v4055_v42 = vmul.f32 1.442695, %v4041_v5  ;;  %v4033_v61 = vmul.f32 %v3916_v1, %v3916_v1 }
0x1092   : > { %v3982_v30 = vmul.f32 %v7330_v44, %v3973_v56  ;;  %v3965_v58 = vmul.f32 %v7340_v41, %v3956_v8  ;;  %v3948_v0 = vmul.f32 1.0614054, %v7354_v3  ;;  %v3917_v23 = vand.u32 2147483647, %v7359_v63 }
0x1093   : > { %v3934_v11 = vadd.f32 1.0, %v3925_v18  ;;  %v5537_v51 = vpop.f32.mrf.mxu0  ;;  %v7369_v7 = vadd.f32 %v7290_v26, %v3886_v16  ;;  %vm4087_vm14 = vcmp.ge.f32.partialorder %v7343_v38, 0.0  ;;  %vm4088_vm15 = vcmp.ge.f32.partialorder %v7359_v63, 0.0  ;;  %v4722_v63 = vld [vmem:[%s7529_s12] ss:$0 sm:$0xff] }
0x1094   : > { %v3991_v52 = vadd.f32 -0.28449672, %v3982_v30  ;;  %v3974_v9 = vadd.f32 1.4214138, %v3965_v58  ;;  %v3957_v22 = vadd.f32 -1.4531521, %v3948_v0 }
0x1095   : > { %v7363_v62 = vpop.eup %5798  ;;  %5810 = vrcp.f32 %v3934_v11  ;;  %v3889_v40 = vpop.f32.mrf.mxu0  ;;  %v3926_v47 = vmul.f32 0.3275911, %v3917_v23  ;;  %v7382_v8 = vmul.f32 0.70710677, %v7369_v7  ;;  %v3899_v38 = vmul.f32 0.5, %v7348_v53 }
0x1096   : > { %v4000_v55 = vmul.f32 %v7330_v44, %v3991_v52  ;;  %v3983_v31 = vmul.f32 %v7340_v41, %v3974_v9  ;;  %v3949_v19 = vmul.f32 1.0614054, %v7363_v62  ;;  %v3966_v17 = vmul.f32 %v7354_v3, %v3957_v22 }
0x1097   : > { %5812 = vpow2.f32 %v4051_v24  ;;  %v5538_v32 = vpop.f32.mrf.mxu0  ;;  %v3935_v56 = vadd.f32 1.0, %v3926_v47  ;;  %v7390_v24 = vmul.f32 0.5, %v7313_v14  ;;  %v3918_v1 = vand.u32 2147483647, %v7382_v8 }
0x1098   : > { %v4009_v28 = vadd.f32 0.2548296, %v4000_v55  ;;  %v3992_v50 = vadd.f32 -0.28449672, %v3983_v31  ;;  %v3958_v26 = vadd.f32 -1.4531521, %v3949_v19  ;;  %5814 = vpow2.f32 %v4053_v20 }
0x1099   : > { %v7378_v48 = vpop.eup %5800  ;;  %v3975_v2 = vadd.f32 1.4214138, %v3966_v17  ;;  %5816 = vrcp.f32 %v3935_v56  ;;  %v4042_v52 = vsub.f32 0.0, %v4033_v61  ;;  %v3927_v9 = vmul.f32 0.3275911, %v3918_v1 }
0x109a   : > { %v5803_v37 = vpop.eup %5802  ;;  %v4018_v33 = vmul.f32 %v7330_v44, %v4009_v28  ;;  %v4001_v18 = vmul.f32 %v7340_v41, %v3992_v50  ;;  %v3967_v16 = vmul.f32 %v7363_v62, %v3958_v26  ;;  %v3950_v30 = vmul.f32 1.0614054, %v7378_v48 }
0x109b   : > { %v3984_v58 = vmul.f32 %v7354_v3, %v3975_v2  ;;  %5818 = vpow2.f32 %v4055_v42  ;;  %v4034_v17 = vmul.f32 %v3917_v23, %v3917_v23  ;;  %v3936_v32 = vadd.f32 1.0, %v3927_v9 }
0x109c   : > { %v4063_v0 = vmul.f32 %v5803_v37, %v4018_v33  ;;  %v4010_v20 = vadd.f32 0.2548296, %v4001_v18  ;;  %v3976_v5 = vadd.f32 1.4214138, %v3967_v16  ;;  %v3959_v11 = vadd.f32 -1.4531521, %v3950_v30  ;;  %v5805_v51 = vpop.eup %5804 }
0x109d   : > { %v3993_v44 = vadd.f32 -0.28449672, %v3984_v58  ;;  %v7394_v22 = vpop.eup %5806  ;;  %v4057_v37 = vmul.f32 1.442695, %v4042_v52  ;;  %5820 = vrcp.f32 %v3936_v32  ;;  %vm4089_vm2 = vcmp.ge.f32.partialorder %v7382_v8, 0.0 }
0x109e   : > { %v4072_v40 = vsub.f32 1.0, %v4063_v0  ;;  %v4019_v14 = vmul.f32 %v7340_v41, %v4010_v20  ;;  %v3985_v55 = vmul.f32 %v7363_v62, %v3976_v5  ;;  %v3968_v31 = vmul.f32 %v7378_v48, %v3959_v11  ;;  %v5809_v2 = vpop.eup %5808 }
0x109f   : > { %v4002_v19 = vmul.f32 %v7354_v3, %v3993_v44  ;;  %v3951_v47 = vmul.f32 1.0614054, %v7394_v22  ;;  %v4043_v20 = vsub.f32 0.0, %v4034_v17  ;;  %5822 = vpow2.f32 %v4057_v37 }
0x10a0   : > { %v4090_v28 = vsub.f32 0.0, %v4072_v40  ;;  %v4064_v50 = vmul.f32 %v5805_v51, %v4019_v14  ;;  %v3994_v42 = vadd.f32 -0.28449672, %v3985_v55  ;;  %v3977_v26 = vadd.f32 1.4214138, %v3968_v31 }
0x10a1   : > { %v4011_v61 = vadd.f32 0.2548296, %v4002_v19  ;;  %v3960_v56 = vadd.f32 -1.4531521, %v3951_v47  ;;  %v4035_v19 = vmul.f32 %v3918_v1, %v3918_v1 }
0x10a2   : > { %v7401_v41 = vpop.eup %5810  ;;  %v4099_v33 = vsel %vm4081_vm7, %v4072_v40, %v4090_v28  ;;  %v4073_v18 = vsub.f32 1.0, %v4064_v50  ;;  %v4003_v23 = vmul.f32 %v7363_v62, %v3994_v42  ;;  %v3986_v16 = vmul.f32 %v7378_v48, %v3977_v26 }
0x10a3   : > { %v4020_v30 = vmul.f32 %v7354_v3, %v4011_v61  ;;  %v3969_v58 = vmul.f32 %v7394_v22, %v3960_v56  ;;  %v3952_v0 = vmul.f32 1.0614054, %v7401_v41  ;;  %v4108_v11 = vadd.f32 1.0, %v4099_v33 }
0x10a4   : > { %v5813_v5 = vpop.eup %5812  ;;  %v4091_v51 = vsub.f32 0.0, %v4073_v18  ;;  %v4012_v15 = vadd.f32 0.2548296, %v4003_v23  ;;  %v3995_v44 = vadd.f32 -0.28449672, %v3986_v16  ;;  %v4044_v16 = vsub.f32 0.0, %v4035_v19 }
0x10a5   : > { %v5815_v52 = vpop.eup %5814  ;;  %v4065_v9 = vmul.f32 %v5809_v2, %v4020_v30  ;;  %v3978_v40 = vadd.f32 1.4214138, %v3969_v58  ;;  %v3961_v14 = vadd.f32 -1.4531521, %v3952_v0  ;;  %v4117_v42 = vmul.f32 %v4108_v11, %v7352_v27 }
0x10a6   : > { %v4100_v55 = vsel %vm4082_vm8, %v4073_v18, %v4091_v51  ;;  %v4021_v3 = vmul.f32 %v7363_v62, %v4012_v15  ;;  %v4004_v31 = vmul.f32 %v7378_v48, %v3995_v44  ;;  %v7417_v50 = vpop.eup %5816  ;;  %v4059_v61 = vmul.f32 1.442695, %v4043_v20 }
0x10a7   : > { %v4109_v47 = vadd.f32 1.0, %v4100_v55  ;;  %v4074_v17 = vsub.f32 1.0, %v4065_v9  ;;  %v3987_v32 = vmul.f32 %v7394_v22, %v3978_v40  ;;  %v3970_v28 = vmul.f32 %v7401_v41, %v3961_v14 }
0x10a8   : > { %v4066_v26 = vmul.f32 %v5813_v5, %v4021_v3  ;;  %v4013_v2 = vadd.f32 0.2548296, %v4004_v31  ;;  %v5819_v33 = vpop.eup %5818  ;;  %v3953_v23 = vmul.f32 1.0614054, %v7417_v50  ;;  %5824 = vpow2.f32 %v4059_v61 }
0x10a9   : > { %v4118_v29 = vmul.f32 %v4109_v47, %v7366_v12  ;;  %v4092_v56 = vsub.f32 0.0, %v4074_v17  ;;  %v3996_v62 = vadd.f32 -0.28449672, %v3987_v32  ;;  %v3979_v37 = vadd.f32 1.4214138, %v3970_v28 }
0x10aa   : > { %v4075_v1 = vsub.f32 1.0, %v4066_v26  ;;  %v4022_v18 = vmul.f32 %v7378_v48, %v4013_v2  ;;  %v3962_v11 = vadd.f32 -1.4531521, %v3953_v23  ;;  %v5821_v15 = vpop.eup %5820  ;;  %v4061_v19 = vmul.f32 1.442695, %v4044_v16 }
0x10ab   : > { %v4134_v30 = vpack.c.bf16 %v4118_v29, %v4117_v42  ;;  %v4101_v58 = vsel %vm4083_vm9, %v4074_v17, %v4092_v56  ;;  %v4005_v27 = vmul.f32 %v7394_v22, %v3996_v62  ;;  %v3988_v0 = vmul.f32 %v7401_v41, %v3979_v37 }
0x10ac   : > { %v4110_v20 = vadd.f32 1.0, %v4101_v58  ;;  %v4093_v12 = vsub.f32 0.0, %v4075_v1  ;;  %v4067_v5 = vmul.f32 %v5815_v52, %v4022_v18  ;;  %v3971_v9 = vmul.f32 %v7417_v50, %v3962_v11  ;;  %v5823_v42 = vpop.eup %5822 }
0x10ad   : > { %v4014_v48 = vadd.f32 0.2548296, %v4005_v27  ;;  %v3997_v51 = vadd.f32 -0.28449672, %v3988_v0  ;;  %5548 = vmatmul.mubr.msk.bf16.vlgmr.msra.gmra.mxu1 %vm4170_vm10, %v4134_v30  ;;  %v3954_v14 = vmul.f32 1.0614054, %v5821_v15  ;;  %5826 = vpow2.f32 %v4061_v19 }
0x10ae   : > { %v4102_v44 = vsel %vm4084_vm11, %v4075_v1, %v4093_v12  ;;  %v4076_v45 = vsub.f32 1.0, %v4067_v5  ;;  %5551 = vmatprep.mubr.msk.bf16.mxu1 %vm5862_vm1, %v5861_v10  ;;  %v4119_v55 = vmul.f32 %v4110_v20, %v7375_v59  ;;  %v3980_v31 = vadd.f32 1.4214138, %v3971_v9 }
0x10af   : > { %v4111_v40 = vadd.f32 1.0, %v4102_v44  ;;  %v4023_v52 = vmul.f32 %v7394_v22, %v4014_v48  ;;  %v4006_v4 = vmul.f32 %v7401_v41, %v3997_v51  ;;  %v3963_v28 = vadd.f32 -1.4531521, %v3954_v14 }
0x10b0   : > { %v4094_v3 = vsub.f32 0.0, %v4076_v45  ;;  %v3989_v2 = vmul.f32 %v7417_v50, %v3980_v31  ;;  %v3897_v23 = vmul.f32 0.5, %v7328_v13  ;;  %v3898_v14 = vmul.f32 0.5, %v7338_v25 }
0x10b1   : > { %v4120_v47 = vmul.f32 %v4111_v40, %v7390_v24  ;;  %v4068_v17 = vmul.f32 %v5819_v33, %v4023_v52  ;;  %v4015_v32 = vadd.f32 0.2548296, %v4006_v4  ;;  %v3972_v59 = vmul.f32 %v5821_v15, %v3963_v28 }
0x10b2   : > { %v4103_v26 = vsel %vm4085_vm12, %v4076_v45, %v4094_v3  ;;  %v3998_v56 = vadd.f32 -0.28449672, %v3989_v2  ;;  %v3896_v33 = vmul.f32 0.5, %v7321_v39 }
0x10b3   : > { %v4135_v22 = vpack.c.bf16 %v4120_v47, %v4119_v55  ;;  %v4077_v61 = vsub.f32 1.0, %v4068_v17  ;;  %v4024_v29 = vmul.f32 %v7401_v41, %v4015_v32  ;;  %v4112_v62 = vadd.f32 1.0, %v4103_v26 }
0x10b4   : > { %v4007_v24 = vmul.f32 %v7417_v50, %v3998_v56  ;;  %v3981_v46 = vadd.f32 1.4214138, %v3972_v59  ;;  %v3900_v32 = vmul.f32 0.5, %v7369_v7 }
0x10b5   : > { %v4095_v37 = vsub.f32 0.0, %v4077_v61  ;;  %v4069_v1 = vmul.f32 %v5823_v42, %v4024_v29  ;;  %5552 = vmatmul.mubr.msk.bf16.gmra.mxu1 %vm4170_vm10, %v4135_v22  ;;  %v4121_v27 = vmul.f32 %v4112_v62, %v3896_v33  ;;  %v5825_v5 = vpop.eup %5824 }
0x10b6   : > { %5555 = vmatprep.mubr.msk.bf16.mxu1 %vm5862_vm1, %v5861_v10  ;;  %v4016_v30 = vadd.f32 0.2548296, %v4007_v24  ;;  %v3990_v58 = vmul.f32 %v5821_v15, %v3981_v46 }
0x10b7   : > { %v4104_v18 = vsel %vm4086_vm13, %v4077_v61, %v4095_v37  ;;  %v4078_v41 = vsub.f32 1.0, %v4069_v1 }
0x10b8   : > { %v4113_v16 = vadd.f32 1.0, %v4104_v18  ;;  %v4025_v35 = vmul.f32 %v7417_v50, %v4016_v30  ;;  %v3999_v12 = vadd.f32 -0.28449672, %v3990_v58 }
0x10b9   : > { %v4096_v20 = vsub.f32 0.0, %v4078_v41 }
0x10ba   : > { %v4122_v0 = vmul.f32 %v4113_v16, %v3897_v23  ;;  %v4070_v48 = vmul.f32 %v5825_v5, %v4025_v35  ;;  %v4008_v51 = vmul.f32 %v5821_v15, %v3999_v12  ;;  %v5827_v40 = vpop.eup %5826 }
0x10bb   : > { %v4105_v39 = vsel %vm4087_vm14, %v4078_v41, %v4096_v20 }
0x10bc   : > { %v4136_v11 = vpack.c.bf16 %v4122_v0, %v4121_v27  ;;  %v4079_v44 = vsub.f32 1.0, %v4070_v48  ;;  %v4017_v45 = vadd.f32 0.2548296, %v4008_v51  ;;  %v4114_v52 = vadd.f32 1.0, %v4105_v39 }
0x10be   : > { %5556 = vmatmul.mubr.msk.bf16.gmra.mxu1 %vm4170_vm10, %v4136_v11  ;;  %v4097_v13 = vsub.f32 0.0, %v4079_v44  ;;  %v4026_v9 = vmul.f32 %v5821_v15, %v4017_v45  ;;  %v4123_v31 = vmul.f32 %v4114_v52, %v3898_v14 }
0x10bf   : > { %5559 = vmatprep.mubr.msk.bf16.mxu1 %vm5862_vm1, %v5861_v10 }
0x10c0   : > { %v4106_v50 = vsel %vm4088_vm15, %v4079_v44, %v4097_v13  ;;  %v4071_v4 = vmul.f32 %v5827_v40, %v4026_v9 }
0x10c1   : > { %v4115_v55 = vadd.f32 1.0, %v4106_v50 }
0x10c2   : > { %v4080_v3 = vsub.f32 1.0, %v4071_v4 }
0x10c3   : > { %v4124_v19 = vmul.f32 %v4115_v55, %v3899_v38 }
0x10c4   : > { %v4098_v47 = vsub.f32 0.0, %v4080_v3 }
0x10c5   : > { %v4137_v17 = vpack.c.bf16 %v4124_v19, %v4123_v31 }
0x10c6   : > { %v4107_v15 = vsel %vm4089_vm2, %v4080_v3, %v4098_v47 }
0x10c7   : > { %v4116_v28 = vadd.f32 1.0, %v4107_v15  ;;  %5560 = vmatmul.mubr.msk.bf16.gmra.mxu1 %vm4170_vm10, %v4137_v17 }
0x10c8   : > { %5563 = vmatprep.mubr.msk.bf16.mxu1 %vm5862_vm1, %v5861_v10 }
0x10c9   : > { %v4125_v25 = vmul.f32 %v4116_v28, %v3900_v32 }
0x10cb   : > { %v4138_v53 = vpack.c.bf16 %v4125_v25, %v4125_v25 }
0x10cf   : > { %5564 = vmatmul.mubr.msk.bf16.gmra.mxu1 %vm4170_vm10, %v4138_v53 }
0x116d   : > { %v4220_v42 = vpop.f32.mrf.mxu1 }
0x116e   : > { %v4221_v26 = vadd.f32 %v4722_v63, %v4220_v42 }
0x116f   : > { %v5549_v7 = vpop.f32.mrf.mxu1 }
0x1170   : > { %v4258_v10 = vadd.f32 %v4221_v26, %v7135_v36 }
0x1171   : > { %v4223_v8 = vpop.f32.mrf.mxu1 }
0x1172   : > { %4267 = vst.msk [vmem:[#allocation2] sm:$0xff] %vm662_vm0, %v4258_v10  ;;  %4279 = vst.msk [vmem:[%s7470_s14] sm:$0xff] %vm662_vm0, %v4258_v10  ;;  %v4224_v2 = vadd.f32 %v4722_v63, %v4223_v8 }
0x1173   : > { %v5550_v22 = vpop.f32.mrf.mxu1 }
0x1174   : > { %v4259_v61 = vadd.f32 %v4224_v2, %v7141_v6 }
0x1175   : > { %v4228_v29 = vpop.f32.mrf.mxu1 }
0x1176   : > { %4268 = vst.msk [vmem:[#allocation2 + $0x8] sm:$0xff] %vm662_vm0, %v4259_v61  ;;  %4280 = vst.msk [vmem:[%s7470_s14 + $0x8] sm:$0xff] %vm662_vm0, %v4259_v61  ;;  %v4229_v56 = vadd.f32 %v4722_v63, %v4228_v29 }
0x1177   : > { %v5553_v59 = vpop.f32.mrf.mxu1 }
0x1178   : > { %v4260_v36 = vadd.f32 %v4229_v56, %v7147_v57 }
0x1179   : > { %v4231_v62 = vpop.f32.mrf.mxu1 }
0x117a   : > { %4269 = vst.msk [vmem:[#allocation2 + $0x10] sm:$0xff] %vm662_vm0, %v4260_v36  ;;  %4281 = vst.msk [vmem:[%s7470_s14 + $0x10] sm:$0xff] %vm662_vm0, %v4260_v36  ;;  %v4232_v37 = vadd.f32 %v4722_v63, %v4231_v62 }
0x117b   : > { %v5554_v1 = vpop.f32.mrf.mxu1 }
0x117c   : > { %v4261_v6 = vadd.f32 %v4232_v37, %v7153_v34 }
0x117e   : > { %4270 = vst.msk [vmem:[#allocation2 + $0x18] sm:$0xff] %vm662_vm0, %v4261_v6  ;;  %4282 = vst.msk [vmem:[%s7470_s14 + $0x18] sm:$0xff] %vm662_vm0, %v4261_v6  ;;  %v4236_v24 = vpop.f32.mrf.mxu1 }
0x117f   : > { %v4237_v46 = vadd.f32 %v4722_v63, %v4236_v24 }
0x1180   : > { %v5557_v33 = vpop.f32.mrf.mxu1 }
0x1181   : > { %v4262_v57 = vadd.f32 %v4237_v46, %v7159_v43 }
0x1182   : > { %v4239_v18 = vpop.f32.mrf.mxu1 }
0x1183   : > { %4271 = vst.msk [vmem:[#allocation2 + $0x20] sm:$0xff] %vm662_vm0, %v4262_v57  ;;  %4283 = vst.msk [vmem:[%s7470_s14 + $0x20] sm:$0xff] %vm662_vm0, %v4262_v57  ;;  %v4240_v41 = vadd.f32 %v4722_v63, %v4239_v18 }
0x1184   : > { %v5558_v23 = vpop.f32.mrf.mxu1 }
0x1185   : > { %v4263_v34 = vadd.f32 %v4240_v41, %v7165_v49 }
0x1187   : > { %4272 = vst.msk [vmem:[#allocation2 + $0x28] sm:$0xff] %vm662_vm0, %v4263_v34  ;;  %4284 = vst.msk [vmem:[%s7470_s14 + $0x28] sm:$0xff] %vm662_vm0, %v4263_v34  ;;  %v4244_v16 = vpop.f32.mrf.mxu1 }
0x1188   : > { %v4245_v30 = vadd.f32 %v4722_v63, %v4244_v16 }
0x1189   : > { %v5561_v58 = vpop.f32.mrf.mxu1 }
0x118a   : > { %v4264_v43 = vadd.f32 %v4245_v30, %v7171_v54 }
0x118b   : > { %v4247_v27 = vpop.f32.mrf.mxu1 }
0x118c   : > { %4273 = vst.msk [vmem:[#allocation2 + $0x30] sm:$0xff] %vm662_vm0, %v4264_v43  ;;  %4285 = vst.msk [vmem:[%s7470_s14 + $0x30] sm:$0xff] %vm662_vm0, %v4264_v43  ;;  %v4248_v0 = vadd.f32 %v4722_v63, %v4247_v27 }
0x118d   : > { %v5562_v20 = vpop.f32.mrf.mxu1 }
0x118e   : > { %v4265_v35 = vadd.f32 %v4248_v0, %v7177_v21 }
0x118f   : > { %v4252_v49 = vpop.f32.mrf.mxu1 }
0x1190   : > { %4274 = vst.msk [vmem:[#allocation2 + $0x38] sm:$0xff] %vm662_vm0, %v4265_v35  ;;  %4286 = vst.msk [vmem:[%s7470_s14 + $0x38] sm:$0xff] %vm662_vm0, %v4265_v35  ;;  %v4253_v12 = vadd.f32 %v4722_v63, %v4252_v49 }
0x1191   : > { %v5565_v5 = vpop.f32.mrf.mxu1 }
0x1192   : > { %v4266_v11 = vadd.f32 %v4253_v12, %v7183_v60 }
0x1193   : > { %v4255_v48 = vpop.f32.mrf.mxu1 }
0x1194   : > { %4275 = vst.msk [vmem:[#allocation2 + $0x40] sm:$0xff] %vm662_vm0, %v4266_v11  ;;  %4287 = vst.msk [vmem:[%s7470_s14 + $0x40] sm:$0xff] %vm662_vm0, %v4266_v11 }
0x1195   : > { %v5566_v54 = vpop.f32.mrf.mxu1 }
0x1196 PF: > { %s23_s27 = sadd.s32 1, %s5859_s27   ;;  %s7531_s25 = smov %s5855_s26 }
0x1197   : > { %p20_p5 = scmp.ge.s32.totalorder %s23_s27, 4   ;;  %s7532_s26 = smov %s7534_s28 }
0x1199   :  { %22 = sbr.rel (!%p20_p5) target bundleno = 2 (0x2), region = 171 }

// kernel: forward.9
= control target key start
LH: loop header
LB: loop body
LE: loop exit
PB: predicated region body
PF: predicated region fallthrough
CT: control target
= control target key end

     0   :  { %vm50_vm0 = vcmask 130048   ;;  %s1636_s0 = inlined_call_operand.vmem [shape: f32[144,16], index: 0, kind: input, shape index: {}]   ;;  %s1637_s1 = inlined_call_operand.vmem [shape: f32[1,16], index: 1, kind: input, shape index: {}]   ;;  %s1638_s2 = inlined_call_operand.vmem [shape: f32[1,16], index: 2, kind: input, shape index: {}]   ;;  %s1639_s3 = inlined_call_operand.vmem [shape: bf16[16,256], index: 3, kind: input, shape index: {}]   ;;  %s1640_s4 = inlined_call_operand.vmem [shape: f32[1,256], index: 4, kind: input, shape index: {}]   ;;  %s1641_s5 = inlined_call_operand.vmem [shape: f32[144,256], index: 5, kind: input, shape index: {}]   ;;  %s1642_s6 = inlined_call_operand.vmem [shape: f32[144,1], index: 6, kind: input, shape index: {}]   ;;  %s1643_s7 = inlined_call_operand.vmem [shape: f32[144,256], index: 7, kind: output, shape index: {0}]   ;;  %s1644_s8 = inlined_call_operand.hbm [shape: f32[1,1], index: 8, kind: output, shape index: {1}]  }
   0x1   :  { %v30_v0 = vld [vmem:[%s1636_s0] sm:$0xff]  ;;  %v32_v1 = vld [vmem:[%s1636_s0 + $0x10] sm:$0xff]  ;;  %v957_v2 = vld [vmem:[%s1636_s0 + $0x8] sm:$0xff] }
   0x2   :  { %v51_v3 = vsel %vm50_vm0, %v30_v0, 0.0  ;;  %v57_v4 = vsel %vm50_vm0, %v32_v1, 0.0  ;;  %v964_v5 = vld [vmem:[%s1636_s0 + $0x18] sm:$0xff]  ;;  %v54_v6 = vsel %vm50_vm0, %v957_v2, 0.0  ;;  %v973_v8 = vld [vmem:[%s1636_s0 + $0x20] sm:$0xff]  ;;  %v978_v9 = vld [vmem:[%s1636_s0 + $0x28] sm:$0xff] }
   0x3   :  { %52 = vadd.xlane.f32.xlu0 %v51_v3  ;;  %58 = vadd.xlane.f32.xlu1 %v57_v4  ;;  %v60_v7 = vsel %vm50_vm0, %v964_v5, 0.0  ;;  %v63_v10 = vsel %vm50_vm0, %v973_v8, 0.0  ;;  %v66_v11 = vsel %vm50_vm0, %v978_v9, 0.0 }
   0x7   :  { %55 = vadd.xlane.f32.xlu0 %v54_v6  ;;  %61 = vadd.xlane.f32.xlu1 %v60_v7 }
   0x8   :  { %14 = vsyncpa [#allocation3], 0  ;;  %v987_v12 = vld [vmem:[%s1636_s0 + $0x30] sm:$0xff]  ;;  %v992_v13 = vld [vmem:[%s1636_s0 + $0x38] sm:$0xff]  ;;  %vm769_vm1 = vcmask 7168   ;;  %s902_s16 = smov [#allocation2]  }
   0x9   :  { %v69_v14 = vsel %vm50_vm0, %v987_v12, 0.0  ;;  %v72_v15 = vsel %vm50_vm0, %v992_v13, 0.0  ;;  %v1001_v16 = vld [vmem:[%s1636_s0 + $0x50] sm:$0xff]  ;;  %v1006_v17 = vld [vmem:[%s1636_s0 + $0x58] sm:$0xff]  ;;  %v1015_v20 = vld [vmem:[%s1636_s0 + $0x40] sm:$0xff] }
   0xa   :  { %v81_v18 = vsel %vm50_vm0, %v1001_v16, 0.0  ;;  %v84_v19 = vsel %vm50_vm0, %v1006_v17, 0.0  ;;  %v1020_v21 = vld [vmem:[%s1636_s0 + $0x48] sm:$0xff]  ;;  %v75_v22 = vsel %vm50_vm0, %v1015_v20, 0.0  ;;  %v1029_v24 = vld [vmem:[%s1636_s0 + $0x60] sm:$0xff]  ;;  %v1043_v28 = vld [vmem:[%s1636_s0 + $0x70] sm:$0xff] }
   0xb   :  { %64 = vadd.xlane.f32.xlu0 %v63_v10  ;;  %67 = vadd.xlane.f32.xlu1 %v66_v11  ;;  %v78_v23 = vsel %vm50_vm0, %v1020_v21, 0.0  ;;  %v1034_v25 = vld [vmem:[%s1636_s0 + $0x68] sm:$0xff]  ;;  %v87_v26 = vsel %vm50_vm0, %v1029_v24, 0.0  ;;  %v1048_v29 = vld [vmem:[%s1636_s0 + $0x78] sm:$0xff]  ;;  %v93_v30 = vsel %vm50_vm0, %v1043_v28, 0.0  ;;  %v1057_v32 = vld [vmem:[%s1636_s0 + $0x80] sm:$0xff] }
   0xc   :  { %v90_v27 = vsel %vm50_vm0, %v1034_v25, 0.0  ;;  %v96_v31 = vsel %vm50_vm0, %v1048_v29, 0.0  ;;  %v1062_v33 = vld [vmem:[%s1636_s0 + $0x88] sm:$0xff]  ;;  %v99_v34 = vsel %vm50_vm0, %v1057_v32, 0.0 }
   0xd   :  { %v102_v35 = vsel %vm50_vm0, %v1062_v33, 0.0 }
   0xf   :  { %70 = vadd.xlane.f32.xlu0 %v69_v14  ;;  %73 = vadd.xlane.f32.xlu1 %v72_v15 }
  0x13   :  { %82 = vadd.xlane.f32.xlu0 %v81_v18  ;;  %85 = vadd.xlane.f32.xlu1 %v84_v19 }
  0x17   :  { %76 = vadd.xlane.f32.xlu0 %v75_v22  ;;  %79 = vadd.xlane.f32.xlu1 %v78_v23 }
  0x1b   :  { %88 = vadd.xlane.f32.xlu0 %v87_v26  ;;  %91 = vadd.xlane.f32.xlu1 %v90_v27 }
  0x1f   :  { %94 = vadd.xlane.f32.xlu0 %v93_v30  ;;  %97 = vadd.xlane.f32.xlu1 %v96_v31 }
  0x23   :  { %100 = vadd.xlane.f32.xlu0 %v99_v34  ;;  %103 = vadd.xlane.f32.xlu1 %v102_v35 }
  0x8c   :  { %v53_v36 = vpop.xlane.xlu0 %52  ;;  %v59_v37 = vpop.xlane.xlu1 %58 }
  0x8d   :  { %v106_v38 = vmul.f32 0.0625, %v53_v36  ;;  %v108_v39 = vmul.f32 0.0625, %v59_v37 }
  0x8f   :  { %v1068_v40 = vsub.f32 %v30_v0, %v106_v38  ;;  %v1070_v41 = vsub.f32 %v32_v1, %v108_v39 }
  0x90   :  { %v56_v42 = vpop.xlane.xlu0 %55  ;;  %v62_v43 = vpop.xlane.xlu1 %61 }
  0x91   :  { %v107_v44 = vmul.f32 0.0625, %v56_v42  ;;  %v109_v45 = vmul.f32 0.0625, %v62_v43  ;;  %v142_v46 = vmul.f32 %v1068_v40, %v1068_v40  ;;  %v144_v47 = vmul.f32 %v1070_v41, %v1070_v41 }
  0x93   :  { %v1077_v48 = vsub.f32 %v957_v2, %v107_v44  ;;  %v1080_v49 = vsub.f32 %v964_v5, %v109_v45  ;;  %v160_v50 = vsel %vm50_vm0, %v142_v46, 0.0  ;;  %v166_v53 = vsel %vm50_vm0, %v144_v47, 0.0 }
  0x94   :  { %161 = vadd.xlane.f32.xlu0 %v160_v50  ;;  %v65_v51 = vpop.xlane.xlu0 %64  ;;  %v68_v52 = vpop.xlane.xlu1 %67 }
  0x95   :  { %v110_v54 = vmul.f32 0.0625, %v65_v51  ;;  %v111_v55 = vmul.f32 0.0625, %v68_v52  ;;  %v143_v56 = vmul.f32 %v1077_v48, %v1077_v48  ;;  %v145_v57 = vmul.f32 %v1080_v49, %v1080_v49 }
  0x97   :  { %v1089_v58 = vsub.f32 %v973_v8, %v110_v54  ;;  %v1092_v59 = vsub.f32 %v978_v9, %v111_v55  ;;  %v163_v60 = vsel %vm50_vm0, %v143_v56, 0.0  ;;  %v169_v63 = vsel %vm50_vm0, %v145_v57, 0.0 }
  0x98   :  { %167 = vadd.xlane.f32.xlu0 %v166_v53  ;;  %164 = vadd.xlane.f32.xlu1 %v163_v60  ;;  %v71_v61 = vpop.xlane.xlu0 %70  ;;  %v74_v62 = vpop.xlane.xlu1 %73 }
  0x99   :  { %v112_v0 = vmul.f32 0.0625, %v71_v61  ;;  %v113_v1 = vmul.f32 0.0625, %v74_v62  ;;  %v146_v2 = vmul.f32 %v1089_v58, %v1089_v58  ;;  %v147_v3 = vmul.f32 %v1092_v59, %v1092_v59 }
  0x9b   :  { %v1101_v4 = vsub.f32 %v987_v12, %v112_v0  ;;  %v1104_v5 = vsub.f32 %v992_v13, %v113_v1  ;;  %v172_v6 = vsel %vm50_vm0, %v146_v2, 0.0  ;;  %v175_v9 = vsel %vm50_vm0, %v147_v3, 0.0 }
  0x9c   :  { %170 = vadd.xlane.f32.xlu1 %v169_v63  ;;  %173 = vadd.xlane.f32.xlu0 %v172_v6  ;;  %v83_v7 = vpop.xlane.xlu0 %82  ;;  %v86_v8 = vpop.xlane.xlu1 %85 }
  0x9d   :  { %v116_v10 = vmul.f32 0.0625, %v83_v7  ;;  %v117_v11 = vmul.f32 0.0625, %v86_v8  ;;  %v148_v14 = vmul.f32 %v1101_v4, %v1101_v4  ;;  %v149_v12 = vmul.f32 %v1104_v5, %v1104_v5  ;;  %v854_v7 = vld [vmem:[%s1639_s3] ss:$8 sps:$4 sm:$0xff]  }
  0x9e   :  { %v901_v8 = vmov 0  }
  0x9f   :  { %v1113_v15 = vsub.f32 %v1001_v16, %v116_v10  ;;  %v1116_v13 = vsub.f32 %v1006_v17, %v117_v11  ;;  %v178_v18 = vsel %vm50_vm0, %v148_v14, 0.0  ;;  %v181_v23 = vsel %vm50_vm0, %v149_v12, 0.0  ;;  %426 = vmatprep.mubr.bf16.mxu0 %v901_v8  ;;  %476 = vmatprep.mubr.bf16.mxu1 %v901_v8 }
  0xa0   :  { %176 = vadd.xlane.f32.xlu1 %v175_v9  ;;  %179 = vadd.xlane.f32.xlu0 %v178_v18  ;;  %v77_v19 = vpop.xlane.xlu0 %76  ;;  %v80_v22 = vpop.xlane.xlu1 %79 }
  0xa1   :  { %v114_v26 = vmul.f32 0.0625, %v77_v19  ;;  %v115_v27 = vmul.f32 0.0625, %v80_v22  ;;  %v152_v30 = vmul.f32 %v1113_v15, %v1113_v15  ;;  %v153_v16 = vmul.f32 %v1116_v13, %v1116_v13 }
  0xa3   :  { %v1125_v31 = vsub.f32 %v1015_v20, %v114_v26  ;;  %v1128_v17 = vsub.f32 %v1020_v21, %v115_v27  ;;  %v190_v34 = vsel %vm50_vm0, %v152_v30, 0.0  ;;  %v193_v37 = vsel %vm50_vm0, %v153_v16, 0.0 }
  0xa4   :  { %182 = vadd.xlane.f32.xlu1 %v181_v23  ;;  %191 = vadd.xlane.f32.xlu0 %v190_v34  ;;  %v89_v35 = vpop.xlane.xlu0 %88  ;;  %v92_v36 = vpop.xlane.xlu1 %91 }
  0xa5   :  { %v118_v38 = vmul.f32 0.0625, %v89_v35  ;;  %v119_v39 = vmul.f32 0.0625, %v92_v36  ;;  %v150_v42 = vmul.f32 %v1125_v31, %v1125_v31  ;;  %v151_v20 = vmul.f32 %v1128_v17, %v1128_v17 }
  0xa7   :  { %v1137_v43 = vsub.f32 %v1029_v24, %v118_v38  ;;  %v1140_v21 = vsub.f32 %v1034_v25, %v119_v39  ;;  %v184_v44 = vsel %vm50_vm0, %v150_v42, 0.0  ;;  %v187_v47 = vsel %vm50_vm0, %v151_v20, 0.0 }
  0xa8   :  { %194 = vadd.xlane.f32.xlu1 %v193_v37  ;;  %185 = vadd.xlane.f32.xlu0 %v184_v44  ;;  %v95_v45 = vpop.xlane.xlu0 %94  ;;  %v98_v46 = vpop.xlane.xlu1 %97 }
  0xa9   :  { %v120_v50 = vmul.f32 0.0625, %v95_v45  ;;  %v121_v51 = vmul.f32 0.0625, %v98_v46  ;;  %v154_v52 = vmul.f32 %v1137_v43, %v1137_v43  ;;  %v155_v24 = vmul.f32 %v1140_v21, %v1140_v21 }
  0xab   :  { %v1149_v53 = vsub.f32 %v1043_v28, %v120_v50  ;;  %v1152_v25 = vsub.f32 %v1048_v29, %v121_v51  ;;  %v196_v54 = vsel %vm50_vm0, %v154_v52, 0.0  ;;  %v199_v57 = vsel %vm50_vm0, %v155_v24, 0.0  ;;  %v1185_v51 = vld [vmem:[%s1637_s1] ss:$0 sm:$0xff] }
  0xac   :  { %188 = vadd.xlane.f32.xlu1 %v187_v47  ;;  %197 = vadd.xlane.f32.xlu0 %v196_v54  ;;  %v101_v55 = vpop.xlane.xlu0 %100  ;;  %v104_v56 = vpop.xlane.xlu1 %103 }
  0xad   :  { %v122_v60 = vmul.f32 0.0625, %v101_v55  ;;  %v123_v61 = vmul.f32 0.0625, %v104_v56  ;;  %v156_v62 = vmul.f32 %v1149_v53, %v1149_v53  ;;  %v157_v28 = vmul.f32 %v1152_v25, %v1152_v25 }
  0xaf   :  { %v1161_v63 = vsub.f32 %v1057_v32, %v122_v60  ;;  %v1164_v29 = vsub.f32 %v1062_v33, %v123_v61  ;;  %v202_v0 = vsel %vm50_vm0, %v156_v62, 0.0  ;;  %v205_v1 = vsel %vm50_vm0, %v157_v28, 0.0  ;;  %v852_v33 = vld [vmem:[%s1639_s3 + $0x4] ss:$8 sps:$4 sm:$0xff]   ;;  %v1192_v28 = vld [vmem:[%s1638_s2] ss:$0 sm:$0xff] }
  0xb0   :  { %200 = vadd.xlane.f32.xlu1 %v199_v57  ;;  %203 = vadd.xlane.f32.xlu0 %v202_v0 }
  0xb1   :  { %v158_v2 = vmul.f32 %v1161_v63, %v1161_v63  ;;  %v159_v3 = vmul.f32 %v1164_v29, %v1164_v29  ;;  %408 = vmatprep.subr.bf16.mxu0 %v852_v33  ;;  %846 = vmatprep.subr.bf16.mxu1 %v852_v33 }
  0xb2   :  { %409 = vmatpush1.bf16.msra.mxu0 %v854_v7  ;;  %847 = vmatpush1.bf16.msra.mxu1 %v854_v7 }
  0xb3   :  { %v208_v6 = vsel %vm50_vm0, %v158_v2, 0.0  ;;  %v211_v32 = vsel %vm50_vm0, %v159_v3, 0.0 }
  0xb4   :  { %206 = vadd.xlane.f32.xlu1 %v205_v1  ;;  %209 = vadd.xlane.f32.xlu0 %v208_v6 }
  0xb8   :  { %212 = vadd.xlane.f32.xlu1 %v211_v32 }
 0x11d   :  { %v162_v9 = vpop.xlane.xlu0 %161 }
 0x11e   :  { %v214_v10 = vmul.f32 0.0625, %v162_v9 }
 0x120   :  { %v232_v11 = vadd.f32 1e-05, %v214_v10 }
 0x121   :  { %v165_v14 = vpop.xlane.xlu1 %164  ;;  %v168_v12 = vpop.xlane.xlu0 %167 }
 0x122   :  { %855 = vrsqrt.f32 %v232_v11  ;;  %v215_v18 = vmul.f32 0.0625, %v165_v14  ;;  %v216_v19 = vmul.f32 0.0625, %v168_v12 }
 0x124   :  { %v233_v22 = vadd.f32 1e-05, %v215_v18  ;;  %v234_v23 = vadd.f32 1e-05, %v216_v19 }
 0x125   :  { %v171_v26 = vpop.xlane.xlu1 %170  ;;  %v174_v27 = vpop.xlane.xlu0 %173 }
 0x126   :  { %857 = vrsqrt.f32 %v233_v22  ;;  %v217_v30 = vmul.f32 0.0625, %v171_v26  ;;  %v218_v16 = vmul.f32 0.0625, %v174_v27 }
 0x127   :  { %859 = vrsqrt.f32 %v234_v23 }
 0x128   :  { %v235_v34 = vadd.f32 1e-05, %v217_v30  ;;  %v236_v38 = vadd.f32 1e-05, %v218_v16 }
 0x129   :  { %v177_v35 = vpop.xlane.xlu1 %176  ;;  %v180_v36 = vpop.xlane.xlu0 %179 }
 0x12a   :  { %861 = vrsqrt.f32 %v235_v34  ;;  %v219_v37 = vmul.f32 0.0625, %v177_v35  ;;  %v220_v47 = vmul.f32 0.0625, %v180_v36 }
 0x12c   :  { %v237_v39 = vadd.f32 1e-05, %v219_v37  ;;  %v238_v60 = vadd.f32 1e-05, %v220_v47 }
 0x12d   :  { %v183_v42 = vpop.xlane.xlu1 %182  ;;  %v192_v20 = vpop.xlane.xlu0 %191 }
 0x12e   :  { %863 = vrsqrt.f32 %v237_v39  ;;  %v221_v44 = vmul.f32 0.0625, %v183_v42  ;;  %v224_v45 = vmul.f32 0.0625, %v192_v20 }
 0x12f   :  { %v856_v46 = vpop.eup %855  ;;  %865 = vrsqrt.f32 %v236_v38 }
 0x130   :  { %v242_v50 = vadd.f32 1e-05, %v224_v45  ;;  %v268_v52 = vmul.f32 %v856_v46, %v1068_v40  ;;  %v239_v24 = vadd.f32 1e-05, %v221_v44 }
 0x131   :  { %v195_v54 = vpop.xlane.xlu1 %194  ;;  %v186_v55 = vpop.xlane.xlu0 %185 }
 0x132   :  { %v225_v56 = vmul.f32 0.0625, %v195_v54  ;;  %867 = vrsqrt.f32 %v242_v50  ;;  %v292_v61 = vmul.f32 %v1185_v51, %v268_v52  ;;  %v222_v7 = vmul.f32 0.0625, %v186_v55 }
 0x133   :  { %v858_v57 = vpop.eup %857  ;;  %869 = vrsqrt.f32 %v239_v24 }
 0x134   :  { %v243_v62 = vadd.f32 1e-05, %v225_v56  ;;  %v269_v0 = vmul.f32 %v858_v57, %v1077_v48  ;;  %v860_v1 = vpop.eup %859  ;;  %v316_v9 = vadd.f32 %v1192_v28, %v292_v61  ;;  %v240_v30 = vadd.f32 1e-05, %v222_v7 }
 0x135   :  { %v189_v40 = vpop.xlane.xlu1 %188  ;;  %v198_v2 = vpop.xlane.xlu0 %197  ;;  %v270_v14 = vmul.f32 %v860_v1, %v1070_v41 }
 0x136   :  { %871 = vrsqrt.f32 %v243_v62  ;;  %v223_v3 = vmul.f32 0.0625, %v189_v40  ;;  %v226_v6 = vmul.f32 0.0625, %v198_v2  ;;  %v293_v32 = vmul.f32 %v1185_v51, %v269_v0 }
 0x137   :  { %v862_v33 = vpop.eup %861  ;;  %873 = vrsqrt.f32 %v238_v60  ;;  %v294_v41 = vmul.f32 %v1185_v51, %v270_v14 }
 0x138   :  { %v244_v10 = vadd.f32 1e-05, %v226_v6  ;;  %v317_v11 = vadd.f32 %v1192_v28, %v293_v32  ;;  %v271_v48 = vmul.f32 %v862_v33, %v1080_v49  ;;  %v241_v12 = vadd.f32 1e-05, %v223_v3 }
 0x139   :  { %v201_v18 = vpop.xlane.xlu1 %200  ;;  %v204_v19 = vpop.xlane.xlu0 %203  ;;  %v318_v47 = vadd.f32 %v1192_v28, %v294_v41 }
 0x13a   :  { %v227_v22 = vmul.f32 0.0625, %v201_v18  ;;  %v228_v23 = vmul.f32 0.0625, %v204_v19  ;;  %v336_v26 = vpack.c.bf16 %v317_v11, %v316_v9  ;;  %875 = vrsqrt.f32 %v244_v10 }
 0x13b   :  { %v864_v27 = vpop.eup %863  ;;  %v295_v16 = vmul.f32 %v1185_v51, %v271_v48  ;;  %877 = vrsqrt.f32 %v241_v12 }
 0x13c   :  { %v866_v34 = vpop.eup %865  ;;  %v245_v35 = vadd.f32 1e-05, %v227_v22  ;;  %v246_v36 = vadd.f32 1e-05, %v228_v23  ;;  %837 = vmatmul.mubr.msk.bf16.vlgmr.msra.gmra.mxu0 %vm50_vm0, %v336_v26  ;;  %v273_v42 = vmul.f32 %v864_v27, %v1092_v59 }
 0x13d   :  { %v207_v49 = vpop.xlane.xlu1 %206  ;;  %v210_v37 = vpop.xlane.xlu0 %209  ;;  %436 = vmatprep.mubr.bf16.mxu0 %v901_v8  ;;  %v319_v39 = vadd.f32 %v1192_v28, %v295_v16  ;;  %v272_v20 = vmul.f32 %v866_v34, %v1089_v58 }
 0x13e   :  { %879 = vrsqrt.f32 %v245_v35  ;;  %v229_v38 = vmul.f32 0.0625, %v207_v49  ;;  %v230_v46 = vmul.f32 0.0625, %v210_v37  ;;  %v297_v56 = vmul.f32 %v1185_v51, %v273_v42 }
 0x13f   :  { %881 = vrsqrt.f32 %v240_v30  ;;  %v868_v44 = vpop.eup %867  ;;  %v337_v55 = vpack.c.bf16 %v319_v39, %v318_v47  ;;  %v296_v59 = vmul.f32 %v1185_v51, %v272_v20 }
 0x140   :  { %883 = vrsqrt.f32 %v246_v36  ;;  %v247_v45 = vadd.f32 1e-05, %v229_v38  ;;  %v278_v52 = vmul.f32 %v868_v44, %v1113_v15  ;;  %v870_v24 = vpop.eup %869  ;;  %v248_v58 = vadd.f32 1e-05, %v230_v46 }
 0x141   :  { %v213_v50 = vpop.xlane.xlu1 %212  ;;  %v321_v15 = vadd.f32 %v1192_v28, %v297_v56  ;;  %v275_v40 = vmul.f32 %v870_v24, %v1104_v5  ;;  %v320_v6 = vadd.f32 %v1192_v28, %v296_v59  ;;  %v345_v56 = vld [vmem:[%s1640_s4] sm:$0x3] }
 0x142   :  { %885 = vrsqrt.f32 %v247_v45  ;;  %v231_v54 = vmul.f32 0.0625, %v213_v50  ;;  %v302_v0 = vmul.f32 %v1185_v51, %v278_v52 }
 0x143   :  { %v872_v57 = vpop.eup %871  ;;  %v338_v9 = vpack.c.bf16 %v321_v15, %v320_v6  ;;  %v299_v11 = vmul.f32 %v1185_v51, %v275_v40  ;;  %v556_v6 = vld [vmem:[%s1641_s5 + $0x18] sm:$0xff] }
 0x144   :  { %v874_v60 = vpop.eup %873  ;;  %v249_v61 = vadd.f32 1e-05, %v231_v54  ;;  %838 = vmatmul.mubr.msk.bf16.gmra.mxu0 %vm50_vm0, %v337_v55  ;;  %v279_v62 = vmul.f32 %v872_v57, %v1116_v13  ;;  %v326_v32 = vadd.f32 %v1192_v28, %v302_v0 }
 0x145   :  { %446 = vmatprep.mubr.bf16.mxu0 %v901_v8  ;;  %v274_v2 = vmul.f32 %v874_v60, %v1101_v4 }
 0x146   :  { %887 = vrsqrt.f32 %v249_v61  ;;  %v303_v1 = vmul.f32 %v1185_v51, %v279_v62  ;;  %v554_v61 = vld [vmem:[%s1641_s5 + $0x8] sm:$0xff] }
 0x147   :  { %v876_v3 = vpop.eup %875  ;;  %889 = vrsqrt.f32 %v248_v58  ;;  %v298_v5 = vmul.f32 %v1185_v51, %v274_v2 }
 0x148   :  { %v327_v13 = vadd.f32 %v1192_v28, %v303_v1  ;;  %v280_v33 = vmul.f32 %v876_v3, %v1137_v43  ;;  %v878_v7 = vpop.eup %877  ;;  %v323_v43 = vadd.f32 %v1192_v28, %v299_v11  ;;  %v555_v1 = vld [vmem:[%s1641_s5 + $0x10] sm:$0xff] }
 0x149   :  { %v277_v22 = vmul.f32 %v878_v7, %v1128_v17  ;;  %v322_v26 = vadd.f32 %v1192_v28, %v298_v5 }
 0x14a   :  { %v341_v10 = vpack.c.bf16 %v327_v13, %v326_v32  ;;  %v304_v12 = vmul.f32 %v1185_v51, %v280_v33 }
 0x14b   :  { %v880_v14 = vpop.eup %879  ;;  %v339_v35 = vpack.c.bf16 %v323_v43, %v322_v26  ;;  %v301_v41 = vmul.f32 %v1185_v51, %v277_v22 }
 0x14c   :  { %v882_v48 = vpop.eup %881  ;;  %839 = vmatmul.mubr.msk.bf16.gmra.mxu0 %vm50_vm0, %v338_v9  ;;  %842 = vmatmul.mubr.msk.bf16.vlgmr.msra.gmra.mxu1 %vm50_vm0, %v341_v10  ;;  %v281_v4 = vmul.f32 %v880_v14, %v1140_v21  ;;  %v328_v21 = vadd.f32 %v1192_v28, %v304_v12  ;;  %v557_v14 = vld [vmem:[%s1641_s5 + $0x20] sm:$0xff] }
 0x14d   :  { %v884_v18 = vpop.eup %883  ;;  %456 = vmatprep.mubr.bf16.mxu0 %v901_v8  ;;  %486 = vmatprep.mubr.bf16.mxu1 %v901_v8  ;;  %v276_v27 = vmul.f32 %v882_v48, %v1125_v31 }
 0x14e   :  { %v305_v19 = vmul.f32 %v1185_v51, %v281_v4  ;;  %v282_v16 = vmul.f32 %v884_v18, %v1149_v53  ;;  %v325_v53 = vadd.f32 %v1192_v28, %v301_v41  ;;  %v558_v4 = vld [vmem:[%s1641_s5 + $0x28] sm:$0xff] }
 0x14f   :  { %v886_v23 = vpop.eup %885  ;;  %v300_v31 = vmul.f32 %v1185_v51, %v276_v27  ;;  %v559_v27 = vld [vmem:[%s1641_s5 + $0x30] sm:$0xff] }
 0x150   :  { %v329_v30 = vadd.f32 %v1192_v28, %v305_v19  ;;  %v283_v34 = vmul.f32 %v886_v23, %v1152_v25  ;;  %v306_v37 = vmul.f32 %v1185_v51, %v282_v16  ;;  %v560_v16 = vld [vmem:[%s1641_s5 + $0x38] sm:$0xff] }
 0x151   :  { %v324_v42 = vadd.f32 %v1192_v28, %v300_v31 }
 0x152   :  { %v342_v36 = vpack.c.bf16 %v329_v30, %v328_v21  ;;  %v307_v49 = vmul.f32 %v1185_v51, %v283_v34  ;;  %v330_v20 = vadd.f32 %v1192_v28, %v306_v37 }
 0x153   :  { %v888_v17 = vpop.eup %887  ;;  %v340_v45 = vpack.c.bf16 %v325_v53, %v324_v42 }
 0x154   :  { %840 = vmatmul.mubr.msk.bf16.gmra.mxu0 %vm50_vm0, %v339_v35  ;;  %843 = vmatmul.mubr.msk.bf16.gmra.mxu1 %vm50_vm0, %v342_v36  ;;  %v890_v38 = vpop.eup %889  ;;  %v331_v25 = vadd.f32 %v1192_v28, %v307_v49  ;;  %v285_v39 = vmul.f32 %v888_v17, %v1164_v29 }
 0x155   :  { %466 = vmatprep.mubr.bf16.mxu0 %v901_v8  ;;  %496 = vmatprep.mubr.bf16.mxu1 %v901_v8  ;;  %v284_v44 = vmul.f32 %v890_v38, %v1161_v63  ;;  %v347_v63 = vlaneseq  ;;  %v561_v38 = vld [vmem:[%s1641_s5 + $0x40] sm:$0xff] }
 0x156   :  { %v343_v46 = vpack.c.bf16 %v331_v25, %v330_v20  ;;  %v309_v47 = vmul.f32 %v1185_v51, %v285_v39  ;;  %v562_v39 = vld [vmem:[%s1641_s5 + $0x48] sm:$0xff] }
 0x157   :  { %v308_v50 = vmul.f32 %v1185_v51, %v284_v44  ;;  %v348_v54 = vshrl.u32 %v347_v63, 7 }
 0x158   :  { %v333_v29 = vadd.f32 %v1192_v28, %v309_v47 }
 0x159   :  { %v332_v52 = vadd.f32 %v1192_v28, %v308_v50  ;;  %v349_v55 = vsub.s32 0, %v348_v54  ;;  %v353_v57 = vsub.s32 1, %v348_v54  ;;  %v553_v28 = vld [vmem:[%s1641_s5] sm:$0xff]  ;;  %v563_v54 = vld [vmem:[%s1641_s5 + $0x50] sm:$0xff] }
 0x15b   :  { %v344_v24 = vpack.c.bf16 %v333_v29, %v332_v52  ;;  %v1265_v59 = vrot.slane %v345_v56, %v349_v55  ;;  %v1267_v51 = vrot.slane %v345_v56, %v353_v57  ;;  %v564_v57 = vld [vmem:[%s1641_s5 + $0x58] sm:$0xff] }
 0x15c   :  { %841 = vmatmul.mubr.msk.bf16.gmra.mxu0 %vm50_vm0, %v340_v45  ;;  %844 = vmatmul.mubr.msk.bf16.gmra.mxu1 %vm50_vm0, %v343_v46 }
 0x15d   :  { %506 = vmatprep.mubr.bf16.mxu1 %v901_v8 }
 0x164   :  { %845 = vmatmul.mubr.msk.bf16.gmra.mxu1 %vm50_vm0, %v344_v24 }
 0x1fc   :  { %v428_v8 = vpop.f32.mrf.mxu0 }
 0x1fd   :  { %v429_v60 = vadd.f32 %v428_v8, %v1265_v59 }
 0x1fe   :  { %v430_v58 = vpop.f32.mrf.mxu0 }
 0x1ff   :  { %517 = vst [vmem:[%s1643_s7] sm:$0xff] %v429_v60  ;;  %v589_v62 = vsub.f32 %v429_v60, %v553_v28  ;;  %v431_v0 = vadd.f32 %v430_v58, %v1267_v51 }
 0x200   :  { %v432_v15 = vpop.f32.mrf.mxu0 }
 0x201   :  { %518 = vst [vmem:[%s1643_s7 + $0x8] sm:$0xff] %v431_v0  ;;  %v590_v40 = vsub.f32 %v431_v0, %v554_v61  ;;  %v433_v2 = vadd.f32 %v432_v15, %v1265_v59  ;;  %v625_v32 = vmul.f32 %v589_v62, %v589_v62 }
 0x202   :  { %v434_v3 = vpop.f32.mrf.mxu0 }
 0x203   :  { %v626_v13 = vmul.f32 %v590_v40, %v590_v40  ;;  %519 = vst [vmem:[%s1643_s7 + $0x10] sm:$0xff] %v433_v2  ;;  %v591_v33 = vsub.f32 %v433_v2, %v555_v1  ;;  %v435_v7 = vadd.f32 %v434_v3, %v1267_v51  ;;  %v565_v3 = vld [vmem:[%s1641_s5 + $0x60] sm:$0xff] }
 0x204   :  { %v438_v9 = vpop.f32.mrf.mxu0 }
 0x205   :  { %520 = vst [vmem:[%s1643_s7 + $0x18] sm:$0xff] %v435_v7  ;;  %v592_v10 = vsub.f32 %v435_v7, %v556_v6  ;;  %v439_v11 = vadd.f32 %v438_v9, %v1265_v59  ;;  %v661_v5 = vadd.f32 %v626_v13, %v625_v32  ;;  %v627_v12 = vmul.f32 %v591_v33, %v591_v33  ;;  %v566_v13 = vld [vmem:[%s1641_s5 + $0x68] sm:$0xff] }
 0x206   :  { %v440_v48 = vpop.f32.mrf.mxu0 }
 0x207   :  { %v628_v18 = vmul.f32 %v592_v10, %v592_v10  ;;  %521 = vst [vmem:[%s1643_s7 + $0x20] sm:$0xff] %v439_v11  ;;  %v441_v43 = vadd.f32 %v440_v48, %v1267_v51  ;;  %662 = vadd.xlane.f32.xlu0 %v661_v5  ;;  %v593_v19 = vsub.f32 %v439_v11, %v557_v14 }
 0x208   :  { %v442_v22 = vpop.f32.mrf.mxu0 }
 0x209   :  { %522 = vst [vmem:[%s1643_s7 + $0x28] sm:$0xff] %v441_v43  ;;  %v594_v23 = vsub.f32 %v441_v43, %v558_v4  ;;  %v443_v26 = vadd.f32 %v442_v22, %v1265_v59  ;;  %v664_v21 = vadd.f32 %v628_v18, %v627_v12  ;;  %v629_v36 = vmul.f32 %v593_v19, %v593_v19  ;;  %v567_v43 = vld [vmem:[%s1641_s5 + $0x70] sm:$0xff] }
 0x20a   :  { %v444_v30 = vpop.f32.mrf.mxu0 }
 0x20b   :  { %v630_v34 = vmul.f32 %v594_v23, %v594_v23  ;;  %523 = vst [vmem:[%s1643_s7 + $0x30] sm:$0xff] %v443_v26  ;;  %v445_v35 = vadd.f32 %v444_v30, %v1267_v51  ;;  %665 = vadd.xlane.f32.xlu1 %v664_v21  ;;  %v595_v41 = vsub.f32 %v443_v26, %v559_v27  ;;  %v568_v23 = vld [vmem:[%s1641_s5 + $0x78] sm:$0xff] }
 0x20c   :  { %v448_v49 = vpop.f32.mrf.mxu0  ;;  %v478_v17 = vpop.f32.mrf.mxu1 }
 0x20d   :  { %524 = vst [vmem:[%s1643_s7 + $0x38] sm:$0xff] %v445_v35  ;;  %v596_v31 = vsub.f32 %v445_v35, %v560_v16  ;;  %v449_v37 = vadd.f32 %v448_v49, %v1265_v59  ;;  %v1330_v53 = vadd.f32 %v478_v17, %v1265_v59  ;;  %v667_v20 = vadd.f32 %v630_v34, %v629_v36  ;;  %v574_v17 = vld [vmem:[%s1641_s5 + $0xa8] sm:$0xff] }
 0x20e   :  { %v450_v25 = vpop.f32.mrf.mxu0  ;;  %v480_v42 = vpop.f32.mrf.mxu1  ;;  %v631_v46 = vmul.f32 %v595_v41, %v595_v41  ;;  %v569_v41 = vld [vmem:[%s1641_s5 + $0x80] sm:$0xff] }
 0x20f   :  { %v632_v44 = vmul.f32 %v596_v31, %v596_v31  ;;  %525 = vst [vmem:[%s1643_s7 + $0x40] sm:$0xff] %v449_v37  ;;  %537 = vst [vmem:[%s1643_s7 + $0xa0] sm:$0xff] %v1330_v53  ;;  %v451_v45 = vadd.f32 %v450_v25, %v1267_v51  ;;  %v597_v47 = vsub.f32 %v449_v37, %v561_v38  ;;  %668 = vadd.xlane.f32.xlu0 %v667_v20 }
 0x210   :  { %v1344_v50 = vadd.f32 %v480_v42, %v1267_v51  ;;  %v452_v29 = vpop.f32.mrf.mxu0  ;;  %v482_v52 = vpop.f32.mrf.mxu1 }
 0x211   :  { %526 = vst [vmem:[%s1643_s7 + $0x48] sm:$0xff] %v451_v45  ;;  %v598_v24 = vsub.f32 %v451_v45, %v562_v39  ;;  %v453_v63 = vadd.f32 %v452_v29, %v1265_v59  ;;  %v1358_v55 = vadd.f32 %v482_v52, %v1265_v59  ;;  %v670_v28 = vadd.f32 %v632_v44, %v631_v46  ;;  %v570_v39 = vld [vmem:[%s1641_s5 + $0x88] sm:$0xff]  ;;  %v573_v44 = vld [vmem:[%s1641_s5 + $0xa0] sm:$0xff] }
 0x212   :  { %538 = vst [vmem:[%s1643_s7 + $0xa8] sm:$0xff] %v1344_v50  ;;  %v454_v56 = vpop.f32.mrf.mxu0  ;;  %v484_v8 = vpop.f32.mrf.mxu1  ;;  %v633_v62 = vmul.f32 %v597_v47, %v597_v47  ;;  %v610_v52 = vsub.f32 %v1344_v50, %v574_v17 }
 0x213   :  { %v634_v60 = vmul.f32 %v598_v24, %v598_v24  ;;  %527 = vst [vmem:[%s1643_s7 + $0x50] sm:$0xff] %v453_v63  ;;  %v455_v58 = vadd.f32 %v454_v56, %v1267_v51  ;;  %v1368_v61 = vadd.f32 %v484_v8, %v1267_v51  ;;  %v599_v0 = vsub.f32 %v453_v63, %v563_v54  ;;  %v571_v54 = vld [vmem:[%s1641_s5 + $0x90] sm:$0xff] }
 0x214   :  { %539 = vst [vmem:[%s1643_s7 + $0xb0] sm:$0xff] %v1358_v55  ;;  %671 = vadd.xlane.f32.xlu1 %v670_v28  ;;  %v458_v15 = vpop.f32.mrf.mxu0  ;;  %v488_v1 = vpop.f32.mrf.mxu1  ;;  %v609_v28 = vsub.f32 %v1330_v53, %v573_v44  ;;  %v583_v44 = vld [vmem:[%s1641_s5 + $0xf0] sm:$0xff] }
 0x215   :  { %528 = vst [vmem:[%s1643_s7 + $0x58] sm:$0xff] %v455_v58  ;;  %v600_v40 = vsub.f32 %v455_v58, %v564_v57  ;;  %540 = vst [vmem:[%s1643_s7 + $0xb8] sm:$0xff] %v1368_v61  ;;  %v459_v2 = vadd.f32 %v458_v15, %v1265_v59  ;;  %v1386_v6 = vadd.f32 %v488_v1, %v1265_v59  ;;  %v576_v57 = vld [vmem:[%s1641_s5 + $0xb8] sm:$0xff] }
 0x216   :  { %v460_v32 = vpop.f32.mrf.mxu0  ;;  %v490_v33 = vpop.f32.mrf.mxu1  ;;  %v673_v7 = vadd.f32 %v634_v60, %v633_v62  ;;  %v635_v11 = vmul.f32 %v599_v0, %v599_v0  ;;  %v578_v60 = vld [vmem:[%s1641_s5 + $0xc8] sm:$0xff]  ;;  %v572_v0 = vld [vmem:[%s1641_s5 + $0x98] sm:$0xff] }
 0x217   :  { %v636_v9 = vmul.f32 %v600_v40, %v600_v40  ;;  %529 = vst [vmem:[%s1643_s7 + $0x60] sm:$0xff] %v459_v2  ;;  %v461_v10 = vadd.f32 %v460_v32, %v1267_v51  ;;  %v601_v14 = vsub.f32 %v459_v2, %v565_v3  ;;  %541 = vst [vmem:[%s1643_s7 + $0xc0] sm:$0xff] %v1386_v6  ;;  %v575_v40 = vld [vmem:[%s1641_s5 + $0xb0] sm:$0xff] }
 0x218   :  { %v1400_v5 = vadd.f32 %v490_v33, %v1267_v51  ;;  %674 = vadd.xlane.f32.xlu0 %v673_v7  ;;  %v462_v48 = vpop.f32.mrf.mxu0  ;;  %v492_v4 = vpop.f32.mrf.mxu1  ;;  %v612_v33 = vsub.f32 %v1368_v61, %v576_v57  ;;  %v577_v7 = vld [vmem:[%s1641_s5 + $0xc0] sm:$0xff]  ;;  %v587_v57 = vld [vmem:[%s1641_s5 + $0x110] sm:$0xff] }
 0x219   :  { %530 = vst [vmem:[%s1643_s7 + $0x68] sm:$0xff] %v461_v10  ;;  %v602_v12 = vsub.f32 %v461_v10, %v566_v13  ;;  %v463_v18 = vadd.f32 %v462_v48, %v1265_v59  ;;  %v1410_v19 = vadd.f32 %v492_v4, %v1265_v59  ;;  %v676_v27 = vadd.f32 %v636_v9, %v635_v11 }
 0x21a   :  { %542 = vst [vmem:[%s1643_s7 + $0xc8] sm:$0xff] %v1400_v5  ;;  %v464_v22 = vpop.f32.mrf.mxu0  ;;  %v494_v26 = vpop.f32.mrf.mxu1  ;;  %v637_v16 = vmul.f32 %v601_v14, %v601_v14  ;;  %v646_v13 = vmul.f32 %v610_v52, %v610_v52  ;;  %v614_v11 = vsub.f32 %v1400_v5, %v578_v60  ;;  %v580_v14 = vld [vmem:[%s1641_s5 + $0xd8] sm:$0xff] }
 0x21b   :  { %v638_v21 = vmul.f32 %v602_v12, %v602_v12  ;;  %531 = vst [vmem:[%s1643_s7 + $0x70] sm:$0xff] %v463_v18  ;;  %543 = vst [vmem:[%s1643_s7 + $0xd0] sm:$0xff] %v1410_v19  ;;  %v465_v30 = vadd.f32 %v464_v22, %v1267_v51  ;;  %v603_v34 = vsub.f32 %v463_v18, %v567_v43  ;;  %677 = vadd.xlane.f32.xlu1 %v676_v27  ;;  %v582_v43 = vld [vmem:[%s1641_s5 + $0xe8] sm:$0xff] }
 0x21c   :  { %v1428_v35 = vadd.f32 %v494_v26, %v1267_v51  ;;  %v468_v36 = vpop.f32.mrf.mxu0  ;;  %v498_v49 = vpop.f32.mrf.mxu1  ;;  %v645_v12 = vmul.f32 %v609_v28, %v609_v28  ;;  %v611_v18 = vsub.f32 %v1358_v55, %v575_v40  ;;  %v613_v22 = vsub.f32 %v1386_v6, %v577_v7  ;;  %v581_v6 = vld [vmem:[%s1641_s5 + $0xe0] sm:$0xff] }
 0x21d   :  { %532 = vst [vmem:[%s1643_s7 + $0x78] sm:$0xff] %v465_v30  ;;  %v604_v31 = vsub.f32 %v465_v30, %v568_v23  ;;  %v469_v37 = vadd.f32 %v468_v36, %v1265_v59  ;;  %v1445_v38 = vadd.f32 %v498_v49, %v1265_v59  ;;  %v679_v20 = vadd.f32 %v638_v21, %v637_v16  ;;  %v579_v23 = vld [vmem:[%s1641_s5 + $0xd0] sm:$0xff] }
 0x21e   :  { %544 = vst [vmem:[%s1643_s7 + $0xd8] sm:$0xff] %v1428_v35  ;;  %v470_v25 = vpop.f32.mrf.mxu0  ;;  %v500_v42 = vpop.f32.mrf.mxu1  ;;  %v639_v24 = vmul.f32 %v603_v34, %v603_v34  ;;  %v648_v21 = vmul.f32 %v612_v33, %v612_v33  ;;  %v616_v30 = vsub.f32 %v1428_v35, %v580_v14  ;;  %v691_v34 = vadd.f32 %v646_v13, %v645_v12  ;;  %v584_v35 = vld [vmem:[%s1641_s5 + $0xf8] sm:$0xff] }
 0x21f   :  { %v640_v45 = vmul.f32 %v604_v31, %v604_v31  ;;  %533 = vst [vmem:[%s1643_s7 + $0x80] sm:$0xff] %v469_v37  ;;  %v605_v46 = vsub.f32 %v469_v37, %v569_v41  ;;  %v471_v47 = vadd.f32 %v470_v25, %v1267_v51  ;;  %v501_v29 = vadd.f32 %v500_v42, %v1267_v51  ;;  %v586_v25 = vld [vmem:[%s1641_s5 + $0x108] sm:$0xff] }
 0x220   :  { %545 = vst [vmem:[%s1643_s7 + $0xe0] sm:$0xff] %v1445_v38  ;;  %680 = vadd.xlane.f32.xlu0 %v679_v20  ;;  %v472_v63 = vpop.f32.mrf.mxu0  ;;  %v502_v56 = vpop.f32.mrf.mxu1  ;;  %v650_v36 = vmul.f32 %v614_v11, %v614_v11  ;;  %v647_v31 = vmul.f32 %v611_v18, %v611_v18  ;;  %v615_v37 = vsub.f32 %v1410_v19, %v579_v23 }
 0x221   :  { %534 = vst [vmem:[%s1643_s7 + $0x88] sm:$0xff] %v471_v47  ;;  %v606_v50 = vsub.f32 %v471_v47, %v570_v39  ;;  %546 = vst [vmem:[%s1643_s7 + $0xe8] sm:$0xff] %v501_v29  ;;  %v473_v8 = vadd.f32 %v472_v63, %v1265_v59  ;;  %v1481_v58 = vadd.f32 %v502_v56, %v1265_v59 }
 0x222   :  { %v474_v62 = vpop.f32.mrf.mxu0  ;;  %v504_v15 = vpop.f32.mrf.mxu1  ;;  %v682_v1 = vadd.f32 %v640_v45, %v639_v24  ;;  %v641_v2 = vmul.f32 %v605_v46, %v605_v46  ;;  %v618_v41 = vsub.f32 %v501_v29, %v582_v43  ;;  %v649_v42 = vmul.f32 %v613_v22, %v613_v22  ;;  %v585_v45 = vld [vmem:[%s1641_s5 + $0x100] sm:$0xff]  ;;  %v588_v24 = vld [vmem:[%s1641_s5 + $0x118] sm:$0xff] }
 0x223   :  { %v642_v53 = vmul.f32 %v606_v50, %v606_v50  ;;  %535 = vst [vmem:[%s1643_s7 + $0x90] sm:$0xff] %v473_v8  ;;  %v607_v3 = vsub.f32 %v473_v8, %v571_v54  ;;  %v475_v32 = vadd.f32 %v474_v62, %v1267_v51  ;;  %547 = vst [vmem:[%s1643_s7 + $0xf0] sm:$0xff] %v1481_v58  ;;  %v736_v43 = vld [vmem:[%s1642_s6 + $0x18] sm:$0xff] }
 0x224   :  { %v505_v9 = vadd.f32 %v504_v15, %v1267_v51  ;;  %683 = vadd.xlane.f32.xlu1 %v682_v1  ;;  %v508_v10 = vpop.f32.mrf.mxu1  ;;  %v617_v20 = vsub.f32 %v1445_v38, %v581_v6  ;;  %v652_v19 = vmul.f32 %v616_v30, %v616_v30  ;;  %v694_v46 = vadd.f32 %v648_v21, %v647_v31  ;;  %v738_v6 = vld [vmem:[%s1642_s6 + $0x28] sm:$0xff] }
 0x225   :  { %536 = vst [vmem:[%s1643_s7 + $0x98] sm:$0xff] %v475_v32  ;;  %v608_v61 = vsub.f32 %v475_v32, %v572_v0  ;;  %v509_v48 = vadd.f32 %v508_v10, %v1265_v59  ;;  %v685_v4 = vadd.f32 %v642_v53, %v641_v2  ;;  %v643_v26 = vmul.f32 %v607_v3, %v607_v3 }
 0x226   :  { %548 = vst [vmem:[%s1643_s7 + $0xf8] sm:$0xff] %v505_v9  ;;  %v510_v5 = vpop.f32.mrf.mxu1  ;;  %v654_v47 = vmul.f32 %v618_v41, %v618_v41  ;;  %v620_v38 = vsub.f32 %v505_v9, %v584_v35  ;;  %v651_v52 = vmul.f32 %v615_v37, %v615_v37  ;;  %v653_v63 = vmul.f32 %v617_v20, %v617_v20  ;;  %v734_v9 = vld [vmem:[%s1642_s6 + $0x8] sm:$0xff]  ;;  %v740_v20 = vld [vmem:[%s1642_s6 + $0x38] sm:$0xff] }
 0x227   :  { %v644_v27 = vmul.f32 %v608_v61, %v608_v61  ;;  %549 = vst [vmem:[%s1643_s7 + $0x100] sm:$0xff] %v509_v48  ;;  %v511_v55 = vadd.f32 %v510_v5, %v1267_v51  ;;  %686 = vadd.xlane.f32.xlu0 %v685_v4  ;;  %v619_v54 = vsub.f32 %v1481_v58, %v583_v44  ;;  %v733_v61 = vld [vmem:[%s1642_s6] sm:$0xff] }
 0x228   :  { %v512_v16 = vpop.f32.mrf.mxu1  ;;  %v621_v56 = vsub.f32 %v509_v48, %v585_v45  ;;  %v700_v50 = vadd.f32 %v652_v19, %v651_v52  ;;  %v656_v8 = vmul.f32 %v620_v38, %v620_v38  ;;  %v703_v62 = vadd.f32 %v654_v47, %v653_v63  ;;  %v735_v48 = vld [vmem:[%s1642_s6 + $0x10] sm:$0xff]  ;;  %v741_v38 = vld [vmem:[%s1642_s6 + $0x40] sm:$0xff] }
 0x229   :  { %550 = vst [vmem:[%s1643_s7 + $0x108] sm:$0xff] %v511_v55  ;;  %v513_v49 = vadd.f32 %v512_v16, %v1265_v59  ;;  %v688_v17 = vadd.f32 %v644_v27, %v643_v26  ;;  %v622_v29 = vsub.f32 %v511_v55, %v586_v25  ;;  %v655_v0 = vmul.f32 %v619_v54, %v619_v54  ;;  %v737_v27 = vld [vmem:[%s1642_s6 + $0x20] sm:$0xff] }
 0x22a   :  { %v514_v39 = vpop.f32.mrf.mxu1  ;;  %v657_v15 = vmul.f32 %v621_v56, %v621_v56 }
 0x22b   :  { %551 = vst [vmem:[%s1643_s7 + $0x110] sm:$0xff] %v513_v49  ;;  %v515_v59 = vadd.f32 %v514_v39, %v1267_v51  ;;  %689 = vadd.xlane.f32.xlu1 %v688_v17  ;;  %692 = vadd.xlane.f32.xlu0 %v691_v34  ;;  %v697_v51 = vadd.f32 %v650_v36, %v649_v42  ;;  %v739_v17 = vld [vmem:[%s1642_s6 + $0x30] sm:$0xff] }
 0x22c   :  { %v658_v28 = vmul.f32 %v622_v29, %v622_v29  ;;  %v623_v1 = vsub.f32 %v513_v49, %v587_v57  ;;  %v706_v2 = vadd.f32 %v656_v8, %v655_v0  ;;  %v742_v57 = vld [vmem:[%s1642_s6 + $0x48] sm:$0xff]  ;;  %v743_v8 = vld [vmem:[%s1642_s6 + $0x50] sm:$0xff] }
 0x22d   :  { %552 = vst [vmem:[%s1643_s7 + $0x118] sm:$0xff] %v515_v59  ;;  %v624_v60 = vsub.f32 %v515_v59, %v588_v24 }
 0x22e   :  { %v709_v58 = vadd.f32 %v658_v28, %v657_v15  ;;  %v659_v53 = vmul.f32 %v623_v1, %v623_v1 }
 0x22f   :  { %695 = vadd.xlane.f32.xlu1 %v694_v46  ;;  %698 = vadd.xlane.f32.xlu0 %v697_v51  ;;  %v660_v40 = vmul.f32 %v624_v60, %v624_v60 }
 0x231   :  { %v712_v3 = vadd.f32 %v660_v40, %v659_v53 }
 0x233   :  { %701 = vadd.xlane.f32.xlu1 %v700_v50  ;;  %704 = vadd.xlane.f32.xlu0 %v703_v62 }
 0x237   :  { %707 = vadd.xlane.f32.xlu1 %v706_v2  ;;  %710 = vadd.xlane.f32.xlu0 %v709_v58  ;;  %v744_v58 = vld [vmem:[%s1642_s6 + $0x58] sm:$0xff] }
 0x23b   :  { %713 = vadd.xlane.f32.xlu1 %v712_v3  ;;  %v745_v3 = vld [vmem:[%s1642_s6 + $0x60] sm:$0xff] }
 0x290   :  { %v663_v32 = vpop.xlane.xlu0 %662 }
 0x291   :  { %v715_v11 = vmul.f32 0.0052083335, %v663_v32 }
 0x293   :  { %v751_v5 = vmul.f32 %v733_v61, %v715_v11 }
 0x294   :  { %v666_v13 = vpop.xlane.xlu1 %665 }
 0x295   :  { %v716_v7 = vmul.f32 0.0052083335, %v666_v13  ;;  %v770_v16 = vsel %vm769_vm1, %v751_v5, 0.0 }
 0x297   :  { %v752_v12 = vmul.f32 %v734_v9, %v716_v7 }
 0x298   :  { %v669_v33 = vpop.xlane.xlu0 %668 }
 0x299   :  { %v717_v14 = vmul.f32 0.0052083335, %v669_v33  ;;  %v771_v55 = vsel %vm769_vm1, %v752_v12, 0.0  ;;  %v747_v12 = vld [vmem:[%s1642_s6 + $0x70] sm:$0xff] }
 0x29a   :  { %v772_v49 = vadd.f32 %v771_v55, %v770_v16  ;;  %v749_v16 = vld [vmem:[%s1642_s6 + $0x80] sm:$0xff] }
 0x29b   :  { %v753_v22 = vmul.f32 %v735_v48, %v717_v14  ;;  %v746_v48 = vld [vmem:[%s1642_s6 + $0x68] sm:$0xff] }
 0x29d   :  { %v672_v10 = vpop.xlane.xlu1 %671  ;;  %v773_v34 = vsel %vm769_vm1, %v753_v22, 0.0 }
 0x29e   :  { %v718_v18 = vmul.f32 0.0052083335, %v672_v10  ;;  %v774_v25 = vadd.f32 %v773_v34, %v772_v49 }
 0x2a0   :  { %v754_v21 = vmul.f32 %v736_v43, %v718_v18 }
 0x2a1   :  { %v675_v4 = vpop.xlane.xlu0 %674 }
 0x2a2   :  { %v719_v23 = vmul.f32 0.0052083335, %v675_v4  ;;  %v775_v37 = vsel %vm769_vm1, %v754_v21, 0.0 }
 0x2a3   :  { %v776_v19 = vadd.f32 %v775_v37, %v774_v25 }
 0x2a4   :  { %v678_v26 = vpop.xlane.xlu1 %677  ;;  %v755_v36 = vmul.f32 %v737_v27, %v719_v23 }
 0x2a5   :  { %v720_v30 = vmul.f32 0.0052083335, %v678_v26 }
 0x2a6   :  { %v777_v39 = vsel %vm769_vm1, %v755_v36, 0.0 }
 0x2a7   :  { %v756_v35 = vmul.f32 %v738_v6, %v720_v30  ;;  %v778_v46 = vadd.f32 %v777_v39, %v776_v19  ;;  %v748_v30 = vld [vmem:[%s1642_s6 + $0x78] sm:$0xff]  ;;  %v750_v39 = vld [vmem:[%s1642_s6 + $0x88] sm:$0xff] }
 0x2a9   :  { %v681_v41 = vpop.xlane.xlu0 %680  ;;  %v779_v45 = vsel %vm769_vm1, %v756_v35, 0.0 }
 0x2aa   :  { %v721_v31 = vmul.f32 0.0052083335, %v681_v41  ;;  %v780_v24 = vadd.f32 %v779_v45, %v778_v46 }
 0x2ac   :  { %v757_v42 = vmul.f32 %v739_v17, %v721_v31 }
 0x2ad   :  { %v684_v59 = vpop.xlane.xlu1 %683 }
 0x2ae   :  { %v722_v44 = vmul.f32 0.0052083335, %v684_v59  ;;  %v781_v51 = vsel %vm769_vm1, %v757_v42, 0.0 }
 0x2af   :  { %v782_v56 = vadd.f32 %v781_v51, %v780_v24 }
 0x2b0   :  { %v758_v47 = vmul.f32 %v740_v20, %v722_v44  ;;  %v687_v29 = vpop.xlane.xlu0 %686 }
 0x2b1   :  { %v723_v52 = vmul.f32 0.0052083335, %v687_v29 }
 0x2b2   :  { %v783_v63 = vsel %vm769_vm1, %v758_v47, 0.0 }
 0x2b3   :  { %v759_v54 = vmul.f32 %v741_v38, %v723_v52  ;;  %v784_v15 = vadd.f32 %v783_v63, %v782_v56 }
 0x2b4   :  { %v690_v50 = vpop.xlane.xlu1 %689  ;;  %v693_v28 = vpop.xlane.xlu0 %692 }
 0x2b5   :  { %v785_v60 = vsel %vm769_vm1, %v759_v54, 0.0  ;;  %v724_v62 = vmul.f32 0.0052083335, %v690_v50  ;;  %v725_v0 = vmul.f32 0.0052083335, %v693_v28 }
 0x2b6   :  { %v786_v2 = vadd.f32 %v785_v60, %v784_v15 }
 0x2b7   :  { %v760_v1 = vmul.f32 %v742_v57, %v724_v62  ;;  %v761_v40 = vmul.f32 %v743_v8, %v725_v0 }
 0x2b8   :  { %v696_v53 = vpop.xlane.xlu1 %695  ;;  %v699_v32 = vpop.xlane.xlu0 %698 }
 0x2b9   :  { %v787_v13 = vsel %vm769_vm1, %v760_v1, 0.0  ;;  %v726_v33 = vmul.f32 0.0052083335, %v696_v53  ;;  %v727_v7 = vmul.f32 0.0052083335, %v699_v32  ;;  %v789_v10 = vsel %vm769_vm1, %v761_v40, 0.0 }
 0x2ba   :  { %v788_v9 = vadd.f32 %v787_v13, %v786_v2 }
 0x2bb   :  { %v762_v11 = vmul.f32 %v744_v58, %v726_v33  ;;  %v763_v14 = vmul.f32 %v745_v3, %v727_v7 }
 0x2bc   :  { %v790_v61 = vadd.f32 %v789_v10, %v788_v9  ;;  %v702_v4 = vpop.xlane.xlu1 %701  ;;  %v705_v18 = vpop.xlane.xlu0 %704 }
 0x2bd   :  { %v791_v43 = vsel %vm769_vm1, %v762_v11, 0.0  ;;  %v728_v5 = vmul.f32 0.0052083335, %v702_v4  ;;  %v729_v22 = vmul.f32 0.0052083335, %v705_v18  ;;  %v793_v26 = vsel %vm769_vm1, %v763_v14, 0.0 }
 0x2be   :  { %v792_v23 = vadd.f32 %v791_v43, %v790_v61 }
 0x2bf   :  { %v764_v27 = vmul.f32 %v746_v48, %v728_v5  ;;  %v765_v55 = vmul.f32 %v747_v12, %v729_v22 }
 0x2c0   :  { %v794_v21 = vadd.f32 %v793_v26, %v792_v23  ;;  %v708_v6 = vpop.xlane.xlu1 %707  ;;  %v711_v34 = vpop.xlane.xlu0 %710 }
 0x2c1   :  { %v795_v36 = vsel %vm769_vm1, %v764_v27, 0.0  ;;  %v730_v41 = vmul.f32 0.0052083335, %v708_v6  ;;  %v731_v49 = vmul.f32 0.0052083335, %v711_v34  ;;  %v797_v31 = vsel %vm769_vm1, %v765_v55, 0.0 }
 0x2c2   :  { %v796_v17 = vadd.f32 %v795_v36, %v794_v21 }
 0x2c3   :  { %v766_v37 = vmul.f32 %v748_v30, %v730_v41  ;;  %v767_v35 = vmul.f32 %v749_v16, %v731_v49 }
 0x2c4   :  { %v798_v25 = vadd.f32 %v797_v31, %v796_v17  ;;  %v714_v42 = vpop.xlane.xlu1 %713 }
 0x2c5   :  { %v799_v20 = vsel %vm769_vm1, %v766_v37, 0.0  ;;  %v732_v59 = vmul.f32 0.0052083335, %v714_v42  ;;  %v801_v45 = vsel %vm769_vm1, %v767_v35, 0.0 }
 0x2c6   :  { %v800_v19 = vadd.f32 %v799_v20, %v798_v25 }
 0x2c7   :  { %v768_v44 = vmul.f32 %v750_v39, %v732_v59 }
 0x2c8   :  { %v802_v46 = vadd.f32 %v801_v45, %v800_v19 }
 0x2c9   :  { %v803_v47 = vsel %vm769_vm1, %v768_v44, 0.0 }
 0x2ca   :  { %v804_v38 = vadd.f32 %v803_v47, %v802_v46 }
 0x2cc   :  { %805 = vadd.xlane.f32.xlu0 %v804_v38 }
 0x355   :  { %v806_v29 = vpop.xlane.xlu0 %805 }
 0x356   :  { %v807_v51 = vrot.slane %v806_v29, 4 }
 0x358   :  { %v808_v52 = vadd.f32 %v807_v51, %v806_v29 }
 0x35a   :  { %v809_v24 = vrot.slane %v808_v52, 2 }
 0x35c   :  { %v810_v63 = vadd.f32 %v809_v24, %v808_v52 }
 0x35e   :  { %v811_v54 = vrot.slane %v810_v63, 1 }
 0x360   :  { %v812_v56 = vadd.f32 %v811_v54, %v810_v63 }
 0x362   :  { %848 = vpush %v812_v56 }
 0x393   :  { %s849_s6 = spop %848 }
 0x394   :  { %815 = sst [smem:[#allocation2]] %s849_s6 }
 0x395   :  { %825 = dma.smem_to_hbm %s902_s16, 16, %s1644_s8, [#allocation3]  }
 0x396   :  { %899 = dma.done.wait [#allocation3], 16  }
 0x397   :  { %900 = vsyncadd [#allocation3], 4294967280 }
 0x398   :  { %831 = sfence }
 0x399   :  { %832 = vsyncpa [#allocation3], 1 }

</bundles_post_ra>
